<compile_context>
chip_gen: v6e
topology: v6e:2x2x1
jax: 0.10.0
libtpu: 0.0.40
codegen_flags: <defaults>
</compile_context>

<pallas_src>
import math

import jax
import jax.numpy as jnp
from jax.experimental import pallas as pl
from jax.experimental.pallas import tpu as pltpu


# ---------------------------------------------------------------------------
# Fused SDMC kernel
# ---------------------------------------------------------------------------
def _sdmc_kernel(sp_ref, stf_ref, stt_ref, r1_ref, r2_ref, r3_ref,
                 wcs_ref, wct_ref, bc_ref,
                 wcc_ref, bcc_ref,
                 wr_ref, br_ref,
                 wa_ref, ba_ref,
                 sp_out_ref, st_out_ref):
    # sp_ref : (Csp_in, Ft)      spatial features, this face tile
    # stf_ref: (Cst,    F )      structural features, ALL faces (gather source)
    # stt_ref: (Cst,    Ft)      structural features, this face tile
    # r*_ref : (1, Kp*Ft) int32  flattened ring indices for this tile (k-major)
    # wcs/wct: (Csp_out, Csp_in) / (Csp_out, Cst)   combination weight column blocks
    # wcc    : (Cst, Cst)        concat MLP weight
    # wr     : (3, Cst, Cst)     ring MLP weights,  br: (3, Cst, 1)
    # wa     : (4, Cst_out, Cst) aggregation weight column blocks, ba: (Cst_out, 1)
    F = stf_ref.shape[1]
    Ft = st_out_ref.shape[1]

    # ---- combination_mlp (spatial path); channel concat folded into 2 matmuls ----
    y = jnp.dot(wcs_ref[...], sp_ref[...], preferred_element_type=jnp.float32)
    y = y + jnp.dot(wct_ref[...], stt_ref[...], preferred_element_type=jnp.float32)
    sp_out_ref[...] = jnp.maximum(y + bc_ref[...], 0.0)

    # ---- concat_mlp (st2): over all faces (gather source) and over this tile ----
    st2_full = jnp.maximum(
        jnp.dot(wcc_ref[...], stf_ref[...], preferred_element_type=jnp.float32)
        + bcc_ref[...], 0.0)                                        # (Cst, F)
    st2_tile = jnp.maximum(
        jnp.dot(wcc_ref[...], stt_ref[...], preferred_element_type=jnp.float32)
        + bcc_ref[...], 0.0)                                        # (Cst, Ft)

    # ---- aggregation accumulator (agg weight split into 4 column blocks) ----
    acc = jnp.dot(wa_ref[0], st2_tile, preferred_element_type=jnp.float32)

    # ---- DMC at 3 dilation rates ----
    for r, r_ref in enumerate((r1_ref, r2_ref, r3_ref)):
        # 1x1 MLP is pointwise over faces: apply it to all faces, then gather.
        yr = jnp.maximum(
            jnp.dot(wr_ref[r], st2_full, preferred_element_type=jnp.float32)
            + br_ref[r], 0.0)                                       # (Cst, F)

        idx = r_ref[...]                                            # (1, Kp*Ft)
        kp_ft = idx.shape[1]
        src = jax.lax.broadcasted_iota(jnp.int32, (F, kp_ft), 0)    # source-face ids
        sel = (src == idx).astype(jnp.float32)                      # stacked one-hot cols
        g = jnp.dot(yr, sel, preferred_element_type=jnp.float32)    # (Cst, Kp*Ft) gather (MXU)

        # max-pool over the ring: static 128-aligned lane slices on the VPU
        m = g[:, 0:Ft]
        for k in range(1, kp_ft // Ft):
            m = jnp.maximum(m, g[:, k * Ft:(k + 1) * Ft])

        acc = acc + jnp.dot(wa_ref[r + 1], m, preferred_element_type=jnp.float32)

    st_out_ref[...] = jnp.maximum(acc + ba_ref[...], 0.0)


# ---------------------------------------------------------------------------
# Helpers
# ---------------------------------------------------------------------------
def _choose_face_tile(F, kp_max):
    """Largest lane-dense face tile whose stacked one-hot selector (+ iota) fits a
    modest VMEM budget (safe for v7x's 64 MiB and v5e's default limits)."""
    if F % 128 != 0:
        return F  # single full-face tile; full-dim blocks are always legal
    budget = 12 * 1024 * 1024
    for t in (1024, 512, 256, 128):
        if F % t == 0 and F * kp_max * t * 8 <= budget:
            return t
    return 128


def _subsample_ring(ring, i, sample_key):
    # torch.randperm(K)[:ceil(K * 2/3)] replaced by deterministic jax.random.permutation.
    K = ring.shape[2]
    kp = math.ceil(K * (1.0 - 1.0 / 3.0))
    perm = jax.random.permutation(jax.random.fold_in(sample_key, i), K)[:kp]
    return jnp.take(ring, perm, axis=2).astype(jnp.int32)


# ---------------------------------------------------------------------------
# Parameters (deterministic init, eval-mode BatchNorm folded)
# ---------------------------------------------------------------------------
def init_params(key, csp_in, cst_in, csp_out, cst_out):
    def conv_bn(k, cin, cout):
        kw, kb = jax.random.split(k)
        w = jax.random.normal(kw, (cout, cin), jnp.float32) * (1.0 / math.sqrt(cin))
        b = jax.random.normal(kb, (cout, 1), jnp.float32) * 0.01
        # Fold eval-mode BatchNorm (gamma=1, beta=0, running_mean=0, running_var=1, eps=1e-5).
        scale = 1.0 / math.sqrt(1.0 + 1e-5)
        return w * scale, b * scale

    keys = jax.random.split(key, 6)
    p = {}
    p["comb_w"], p["comb_b"] = conv_bn(keys[0], csp_in + cst_in, csp_out)
    p["concat_w"], p["concat_b"] = conv_bn(keys[1], cst_in, cst_in)
    p["ring1_w"], p["ring1_b"] = conv_bn(keys[2], cst_in, cst_in)
    p["ring2_w"], p["ring2_b"] = conv_bn(keys[3], cst_in, cst_in)
    p["ring3_w"], p["ring3_b"] = conv_bn(keys[4], cst_in, cst_in)
    p["agg_w"], p["agg_b"] = conv_bn(keys[5], 4 * cst_in, cst_out)
    return p


# ---------------------------------------------------------------------------
# SDMC forward (single fused pallas_call; all glue is tiny int/weight reshapes)
# ---------------------------------------------------------------------------
def sdmc_forward(spatial_fea, structural_fea, rings, params, sample_key):
    # spatial_fea: (N, Csp_in, F), structural_fea: (N, Cst_in, F)   (PyTorch NCW, kept!)
    sp = spatial_fea.astype(jnp.float32)
    st = structural_fea.astype(jnp.float32)
    N, csp_in, F = sp.shape
    cst_in = st.shape[1]
    csp_out = params["comb_w"].shape[0]
    cst_out = params["agg_w"].shape[0]

    # Ring subsampling (host-side, tiny int arrays).
    ring_subs = [_subsample_ring(rings[i], i, sample_key) for i in range(3)]
    kps = [r.shape[2] for r in ring_subs]

    Ft = _choose_face_tile(F, max(kps))
    n_tiles = F // Ft

    # Flatten ring indices per face tile so the kernel needs no in-kernel relayout:
    #   flat[n, j, 0, k*Ft + f] = ring[n, j*Ft + f, k]
    ring_flats = []
    for rs, kp in zip(ring_subs, kps):
        flat = (rs.transpose(0, 2, 1)                    # (N, Kp, F)
                  .reshape(N, kp, n_tiles, Ft)
                  .transpose(0, 2, 1, 3)                 # (N, n_tiles, Kp, Ft)
                  .reshape(N, n_tiles, 1, kp * Ft))
        ring_flats.append(flat)

    # Split concatenation weights into column blocks (kills the activation concats).
    w_cs = params["comb_w"][:, :csp_in]                  # (Csp_out, Csp_in)
    w_ct = params["comb_w"][:, csp_in:]                  # (Csp_out, Cst_in)
    w_agg = (params["agg_w"].reshape(cst_out, 4, cst_in)
             .transpose(1, 0, 2))                        # (4, Cst_out, Cst_in): [st2, r1, r2, r3]
    w_r = jnp.stack([params["ring1_w"], params["ring2_w"], params["ring3_w"]])  # (3, C, C)
    b_r = jnp.stack([params["ring1_b"], params["ring2_b"], params["ring3_b"]])  # (3, C, 1)

    tile_map = lambda n, j: (n, 0, j)
    full_map = lambda n, j: (n, 0, 0)
    ring_map = lambda n, j: (n, j, 0, 0)
    w2_map = lambda n, j: (0, 0)
    w3_map = lambda n, j: (0, 0, 0)

    in_specs = [
        pl.BlockSpec((None, csp_in, Ft), tile_map),              # spatial tile
        pl.BlockSpec((None, cst_in, F), full_map),               # structural, all faces
        pl.BlockSpec((None, cst_in, Ft), tile_map),              # structural tile
        pl.BlockSpec((None, None, 1, kps[0] * Ft), ring_map),    # ring1 flat indices
        pl.BlockSpec((None, None, 1, kps[1] * Ft), ring_map),    # ring2 flat indices
        pl.BlockSpec((None, None, 1, kps[2] * Ft), ring_map),    # ring3 flat indices
        pl.BlockSpec((csp_out, csp_in), w2_map),                 # comb W (spatial cols)
        pl.BlockSpec((csp_out, cst_in), w2_map),                 # comb W (structural cols)
        pl.BlockSpec((csp_out, 1), w2_map),                      # comb b
        pl.BlockSpec((cst_in, cst_in), w2_map),                  # concat W
        pl.BlockSpec((cst_in, 1), w2_map),                       # concat b
        pl.BlockSpec((3, cst_in, cst_in), w3_map),               # ring Ws
        pl.BlockSpec((3, cst_in, 1), w3_map),                    # ring bs
        pl.BlockSpec((4, cst_out, cst_in), w3_map),              # agg W column blocks
        pl.BlockSpec((cst_out, 1), w2_map),                      # agg b
    ]
    out_specs = [
        pl.BlockSpec((None, csp_out, Ft), tile_map),
        pl.BlockSpec((None, cst_out, Ft), tile_map),
    ]
    out_shape = (
        jax.ShapeDtypeStruct((N, csp_out, F), jnp.float32),
        jax.ShapeDtypeStruct((N, cst_out, F), jnp.float32),
    )

    sp_out, st_out = pl.pallas_call(
        _sdmc_kernel,
        out_shape=out_shape,
        grid=(N, n_tiles),
        in_specs=in_specs,
        out_specs=out_specs,
        compiler_params=pltpu.CompilerParams(
            dimension_semantics=("parallel", "parallel"),
            vmem_limit_bytes=48 * 1024 * 1024,
        ),
    )(sp, st, st, ring_flats[0], ring_flats[1], ring_flats[2],
      w_cs, w_ct, params["comb_b"],
      params["concat_w"], params["concat_b"],
      w_r, b_r, w_agg, params["agg_b"])

    return sp_out, st_out                                # (N, Csp_out, F), (N, Cst_out, F)


# ---------------------------------------------------------------------------
# Pure-JAX reference (mirrors the torch op order: gather -> MLP -> max)
# ---------------------------------------------------------------------------
def ref_forward(spatial_fea, structural_fea, rings, params, sample_key):
    def mlp(x, w, b):
        y = jnp.einsum("oc,nc...->no...", w, x)
        y = y + b.reshape((1, w.shape[0]) + (1,) * (x.ndim - 2))
        return jnp.maximum(y, 0.0)

    sp = spatial_fea.astype(jnp.float32)
    st = structural_fea.astype(jnp.float32)

    spatial_out = mlp(jnp.concatenate([sp, st], axis=1), params["comb_w"], params["comb_b"])
    st2 = mlp(st, params["concat_w"], params["concat_b"])

    feats = [st2]
    for i, name in enumerate(["ring1", "ring2", "ring3"]):
        ring_sub = _subsample_ring(rings[i], i, sample_key)            # (N, F, Kp)
        gathered = jax.vmap(lambda x2, r: x2[:, r])(st2, ring_sub)     # (N, C, F, Kp)
        y = mlp(gathered, params[name + "_w"], params[name + "_b"])
        feats.append(jnp.max(y, axis=3))

    struct_out = mlp(jnp.concatenate(feats, axis=1), params["agg_w"], params["agg_b"])
    return spatial_out, struct_out


# ---------------------------------------------------------------------------
if __name__ == "__main__":
    N, F = 2, 512
    CSP_IN, CST_IN, CSP_OUT, CST_OUT = 16, 8, 32, 16

    key = jax.random.PRNGKey(0)
    k_sp, k_st, k_r1, k_r2, k_r3, k_par, k_samp = jax.random.split(key, 7)

    spatial = jax.random.normal(k_sp, (N, CSP_IN, F), jnp.float32)
    structural = jax.random.normal(k_st, (N, CST_IN, F), jnp.float32)
    rings = [
        jax.random.randint(k_r1, (N, F, 3), 0, F, jnp.int32),
        jax.random.randint(k_r2, (N, F, 6), 0, F, jnp.int32),
        jax.random.randint(k_r3, (N, F, 12), 0, F, jnp.int32),
    ]
    params = init_params(k_par, CSP_IN, CST_IN, CSP_OUT, CST_OUT)

    sp_out, st_out = sdmc_forward(spatial, structural, rings, params, k_samp)
    jax.block_until_ready((sp_out, st_out))

    sp_ref, st_ref = ref_forward(spatial, structural, rings, params, k_samp)

    assert sp_out.shape == (N, CSP_OUT, F) and st_out.shape == (N, CST_OUT, F)
    assert jnp.allclose(sp_out, sp_ref, atol=1e-4, rtol=1e-4)
    assert jnp.allclose(st_out, st_ref, atol=1e-4, rtol=1e-4)
    print("KERNEL_OK")
</pallas_src>

<mosaic_0001>
module attributes {stable_mosaic.version = 11 : i64} {
  func.func @_sdmc_kernel(%arg0: i32, %arg1: i32, %arg2: memref<1x16x256xf32, #tpu.memory_space<vmem>>, %arg3: memref<1x8x512xf32, #tpu.memory_space<vmem>>, %arg4: memref<1x8x256xf32, #tpu.memory_space<vmem>>, %arg5: memref<1x1x1x512xi32, #tpu.memory_space<vmem>>, %arg6: memref<1x1x1x1024xi32, #tpu.memory_space<vmem>>, %arg7: memref<1x1x1x2048xi32, #tpu.memory_space<vmem>>, %arg8: memref<32x16xf32, #tpu.memory_space<vmem>>, %arg9: memref<32x8xf32, #tpu.memory_space<vmem>>, %arg10: memref<32x1xf32, #tpu.memory_space<vmem>>, %arg11: memref<8x8xf32, #tpu.memory_space<vmem>>, %arg12: memref<8x1xf32, #tpu.memory_space<vmem>>, %arg13: memref<3x8x8xf32, #tpu.memory_space<vmem>>, %arg14: memref<3x8x1xf32, #tpu.memory_space<vmem>>, %arg15: memref<4x16x8xf32, #tpu.memory_space<vmem>>, %arg16: memref<16x1xf32, #tpu.memory_space<vmem>>, %arg17: memref<1x32x256xf32, #tpu.memory_space<vmem>>, %arg18: memref<1x16x256xf32, #tpu.memory_space<vmem>>) attributes {dimension_semantics = [#tpu.dimension_semantics<parallel>, #tpu.dimension_semantics<parallel>], iteration_bounds = array<i64: 2, 2>, scalar_prefetch = 0 : i64, scratch_operands = 0 : i64, tpu.core_type = #tpu.core_type<tc>, window_params = [{transform_indices = @transform_0, window_bounds = array<i64: 1, 16, 256>}, {transform_indices = @transform_1, window_bounds = array<i64: 1, 8, 512>}, {transform_indices = @transform_2, window_bounds = array<i64: 1, 8, 256>}, {transform_indices = @transform_3, window_bounds = array<i64: 1, 1, 1, 512>}, {transform_indices = @transform_4, window_bounds = array<i64: 1, 1, 1, 1024>}, {transform_indices = @transform_5, window_bounds = array<i64: 1, 1, 1, 2048>}, {pipeline_mode = #tpu.pipeline_mode<synchronous>, transform_indices = @transform_6, window_bounds = array<i64: 32, 16>}, {pipeline_mode = #tpu.pipeline_mode<synchronous>, transform_indices = @transform_7, window_bounds = array<i64: 32, 8>}, {pipeline_mode = #tpu.pipeline_mode<synchronous>, transform_indices = @transform_8, window_bounds = array<i64: 32, 1>}, {pipeline_mode = #tpu.pipeline_mode<synchronous>, transform_indices = @transform_9, window_bounds = array<i64: 8, 8>}, {pipeline_mode = #tpu.pipeline_mode<synchronous>, transform_indices = @transform_10, window_bounds = array<i64: 8, 1>}, {pipeline_mode = #tpu.pipeline_mode<synchronous>, transform_indices = @transform_11, window_bounds = array<i64: 3, 8, 8>}, {pipeline_mode = #tpu.pipeline_mode<synchronous>, transform_indices = @transform_12, window_bounds = array<i64: 3, 8, 1>}, {pipeline_mode = #tpu.pipeline_mode<synchronous>, transform_indices = @transform_13, window_bounds = array<i64: 4, 16, 8>}, {pipeline_mode = #tpu.pipeline_mode<synchronous>, transform_indices = @transform_14, window_bounds = array<i64: 16, 1>}, {transform_indices = @transform_15, window_bounds = array<i64: 1, 32, 256>}, {transform_indices = @transform_16, window_bounds = array<i64: 1, 16, 256>}]} {
    %c0 = arith.constant 0 : index
    %c0_0 = arith.constant 0 : index
    %0 = vector.load %arg8[%c0, %c0_0] : memref<32x16xf32, #tpu.memory_space<vmem>>, vector<32x16xf32>
    %c0_1 = arith.constant 0 : index
    %c0_2 = arith.constant 0 : index
    %c0_3 = arith.constant 0 : index
    %1 = vector.load %arg2[%c0_1, %c0_2, %c0_3] : memref<1x16x256xf32, #tpu.memory_space<vmem>>, vector<1x16x256xf32>
    %2 = vector.shape_cast %1 : vector<1x16x256xf32> to vector<16x256xf32>
    %cst = arith.constant dense<0.000000e+00> : vector<32x256xf32>
    %3 = tpu.matmul %0, %2, %cst {dimension_numbers = #tpu.dot_dimension_numbers<[1], [0], [0], [1], [0, 0, 1, 1], [], []>} : vector<32x16xf32>, vector<16x256xf32>, vector<32x256xf32> -> vector<32x256xf32>
    %c0_4 = arith.constant 0 : index
    %c0_5 = arith.constant 0 : index
    %4 = vector.load %arg9[%c0_4, %c0_5] : memref<32x8xf32, #tpu.memory_space<vmem>>, vector<32x8xf32>
    %c0_6 = arith.constant 0 : index
    %c0_7 = arith.constant 0 : index
    %c0_8 = arith.constant 0 : index
    %5 = vector.load %arg4[%c0_6, %c0_7, %c0_8] : memref<1x8x256xf32, #tpu.memory_space<vmem>>, vector<1x8x256xf32>
    %6 = vector.shape_cast %5 : vector<1x8x256xf32> to vector<8x256xf32>
    %cst_9 = arith.constant dense<0.000000e+00> : vector<32x256xf32>
    %7 = tpu.matmul %4, %6, %cst_9 {dimension_numbers = #tpu.dot_dimension_numbers<[1], [0], [0], [1], [0, 0, 1, 1], [], []>} : vector<32x8xf32>, vector<8x256xf32>, vector<32x256xf32> -> vector<32x256xf32>
    %8 = arith.addf %3, %7 : vector<32x256xf32>
    %c0_10 = arith.constant 0 : index
    %c0_11 = arith.constant 0 : index
    %9 = vector.load %arg10[%c0_10, %c0_11] : memref<32x1xf32, #tpu.memory_space<vmem>>, vector<32x1xf32>
    %10 = vector.broadcast %9 : vector<32x1xf32> to vector<32x256xf32>
    %11 = arith.addf %8, %10 : vector<32x256xf32>
    %cst_12 = arith.constant 0.000000e+00 : f32
    %12 = vector.broadcast %cst_12 : f32 to vector<32x256xf32>
    %13 = arith.maximumf %11, %12 : vector<32x256xf32>
    %c0_13 = arith.constant 0 : index
    %c0_14 = arith.constant 0 : index
    %c0_15 = arith.constant 0 : index
    %14 = vector.load %arg17[%c0_13, %c0_14, %c0_15] : memref<1x32x256xf32, #tpu.memory_space<vmem>>, vector<1x32x256xf32>
    %15 = vector.shape_cast %14 : vector<1x32x256xf32> to vector<32x256xf32>
    %16 = vector.shape_cast %13 : vector<32x256xf32> to vector<1x32x256xf32>
    tpu.vector_store %arg17[%c0_13, %c0_14, %c0_15], %16 {strides = array<i32>} : memref<1x32x256xf32, #tpu.memory_space<vmem>>, vector<1x32x256xf32>,
    %c0_16 = arith.constant 0 : index
    %c0_17 = arith.constant 0 : index
    %17 = vector.load %arg11[%c0_16, %c0_17] : memref<8x8xf32, #tpu.memory_space<vmem>>, vector<8x8xf32>
    %c0_18 = arith.constant 0 : index
    %c0_19 = arith.constant 0 : index
    %c0_20 = arith.constant 0 : index
    %18 = vector.load %arg3[%c0_18, %c0_19, %c0_20] : memref<1x8x512xf32, #tpu.memory_space<vmem>>, vector<1x8x512xf32>
    %19 = vector.shape_cast %18 : vector<1x8x512xf32> to vector<8x512xf32>
    %cst_21 = arith.constant dense<0.000000e+00> : vector<8x512xf32>
    %20 = tpu.matmul %17, %19, %cst_21 {dimension_numbers = #tpu.dot_dimension_numbers<[1], [0], [0], [1], [0, 0, 1, 1], [], []>} : vector<8x8xf32>, vector<8x512xf32>, vector<8x512xf32> -> vector<8x512xf32>
    %c0_22 = arith.constant 0 : index
    %c0_23 = arith.constant 0 : index
    %21 = vector.load %arg12[%c0_22, %c0_23] : memref<8x1xf32, #tpu.memory_space<vmem>>, vector<8x1xf32>
    %22 = vector.broadcast %21 : vector<8x1xf32> to vector<8x512xf32>
    %23 = arith.addf %20, %22 : vector<8x512xf32>
    %cst_24 = arith.constant 0.000000e+00 : f32
    %24 = vector.broadcast %cst_24 : f32 to vector<8x512xf32>
    %25 = arith.maximumf %23, %24 : vector<8x512xf32>
    %c0_25 = arith.constant 0 : index
    %c0_26 = arith.constant 0 : index
    %26 = vector.load %arg11[%c0_25, %c0_26] : memref<8x8xf32, #tpu.memory_space<vmem>>, vector<8x8xf32>
    %c0_27 = arith.constant 0 : index
    %c0_28 = arith.constant 0 : index
    %c0_29 = arith.constant 0 : index
    %27 = vector.load %arg4[%c0_27, %c0_28, %c0_29] : memref<1x8x256xf32, #tpu.memory_space<vmem>>, vector<1x8x256xf32>
    %28 = vector.shape_cast %27 : vector<1x8x256xf32> to vector<8x256xf32>
    %cst_30 = arith.constant dense<0.000000e+00> : vector<8x256xf32>
    %29 = tpu.matmul %26, %28, %cst_30 {dimension_numbers = #tpu.dot_dimension_numbers<[1], [0], [0], [1], [0, 0, 1, 1], [], []>} : vector<8x8xf32>, vector<8x256xf32>, vector<8x256xf32> -> vector<8x256xf32>
    %c0_31 = arith.constant 0 : index
    %c0_32 = arith.constant 0 : index
    %30 = vector.load %arg12[%c0_31, %c0_32] : memref<8x1xf32, #tpu.memory_space<vmem>>, vector<8x1xf32>
    %31 = vector.broadcast %30 : vector<8x1xf32> to vector<8x256xf32>
    %32 = arith.addf %29, %31 : vector<8x256xf32>
    %cst_33 = arith.constant 0.000000e+00 : f32
    %33 = vector.broadcast %cst_33 : f32 to vector<8x256xf32>
    %34 = arith.maximumf %32, %33 : vector<8x256xf32>
    %c0_34 = arith.constant 0 : index
    %c0_35 = arith.constant 0 : index
    %c0_36 = arith.constant 0 : index
    %35 = vector.load %arg15[%c0_34, %c0_35, %c0_36] : memref<4x16x8xf32, #tpu.memory_space<vmem>>, vector<1x16x8xf32>
    %36 = vector.shape_cast %35 : vector<1x16x8xf32> to vector<16x8xf32>
    %cst_37 = arith.constant dense<0.000000e+00> : vector<16x256xf32>
    %37 = tpu.matmul %36, %34, %cst_37 {dimension_numbers = #tpu.dot_dimension_numbers<[1], [0], [0], [1], [0, 0, 1, 1], [], []>} : vector<16x8xf32>, vector<8x256xf32>, vector<16x256xf32> -> vector<16x256xf32>
    %c0_38 = arith.constant 0 : index
    %c0_39 = arith.constant 0 : index
    %c0_40 = arith.constant 0 : index
    %38 = vector.load %arg13[%c0_38, %c0_39, %c0_40] : memref<3x8x8xf32, #tpu.memory_space<vmem>>, vector<1x8x8xf32>
    %39 = vector.shape_cast %38 : vector<1x8x8xf32> to vector<8x8xf32>
    %cst_41 = arith.constant dense<0.000000e+00> : vector<8x512xf32>
    %40 = tpu.matmul %39, %25, %cst_41 {dimension_numbers = #tpu.dot_dimension_numbers<[1], [0], [0], [1], [0, 0, 1, 1], [], []>} : vector<8x8xf32>, vector<8x512xf32>, vector<8x512xf32> -> vector<8x512xf32>
    %c0_42 = arith.constant 0 : index
    %c0_43 = arith.constant 0 : index
    %c0_44 = arith.constant 0 : index
    %41 = vector.load %arg14[%c0_42, %c0_43, %c0_44] : memref<3x8x1xf32, #tpu.memory_space<vmem>>, vector<1x8x1xf32>
    %42 = vector.shape_cast %41 : vector<1x8x1xf32> to vector<8x1xf32>
    %43 = vector.broadcast %42 : vector<8x1xf32> to vector<8x512xf32>
    %44 = arith.addf %40, %43 : vector<8x512xf32>
    %cst_45 = arith.constant 0.000000e+00 : f32
    %45 = vector.broadcast %cst_45 : f32 to vector<8x512xf32>
    %46 = arith.maximumf %44, %45 : vector<8x512xf32>
    %c0_46 = arith.constant 0 : index
    %c0_47 = arith.constant 0 : index
    %c0_48 = arith.constant 0 : index
    %c0_49 = arith.constant 0 : index
    %47 = vector.load %arg5[%c0_46, %c0_47, %c0_48, %c0_49] : memref<1x1x1x512xi32, #tpu.memory_space<vmem>>, vector<1x1x1x512xi32>
    %48 = vector.shape_cast %47 : vector<1x1x1x512xi32> to vector<1x512xi32>
    %49 = tpu.iota {dimensions = array<i32: 0>} : vector<512x512xi32>
    %50 = vector.broadcast %48 : vector<1x512xi32> to vector<512x512xi32>
    %51 = arith.cmpi eq, %49, %50 : vector<512x512xi32>
    %52 = arith.extui %51 : vector<512x512xi1> to vector<512x512xi32>
    %53 = arith.sitofp %52 : vector<512x512xi32> to vector<512x512xf32>
    %cst_50 = arith.constant dense<0.000000e+00> : vector<8x512xf32>
    %54 = tpu.matmul %46, %53, %cst_50 {dimension_numbers = #tpu.dot_dimension_numbers<[1], [0], [0], [1], [0, 0, 1, 1], [], []>} : vector<8x512xf32>, vector<512x512xf32>, vector<8x512xf32> -> vector<8x512xf32>
    %55 = vector.extract_strided_slice %54 {offsets = [0, 0], sizes = [8, 256], strides = [1, 1]} : vector<8x512xf32> to vector<8x256xf32>
    %56 = vector.extract_strided_slice %54 {offsets = [0, 256], sizes = [8, 256], strides = [1, 1]} : vector<8x512xf32> to vector<8x256xf32>
    %57 = arith.maximumf %55, %56 : vector<8x256xf32>
    %c1 = arith.constant 1 : index
    %c0_51 = arith.constant 0 : index
    %c0_52 = arith.constant 0 : index
    %58 = vector.load %arg15[%c1, %c0_51, %c0_52] : memref<4x16x8xf32, #tpu.memory_space<vmem>>, vector<1x16x8xf32>
    %59 = vector.shape_cast %58 : vector<1x16x8xf32> to vector<16x8xf32>
    %cst_53 = arith.constant dense<0.000000e+00> : vector<16x256xf32>
    %60 = tpu.matmul %59, %57, %cst_53 {dimension_numbers = #tpu.dot_dimension_numbers<[1], [0], [0], [1], [0, 0, 1, 1], [], []>} : vector<16x8xf32>, vector<8x256xf32>, vector<16x256xf32> -> vector<16x256xf32>
    %61 = arith.addf %37, %60 : vector<16x256xf32>
    %c1_54 = arith.constant 1 : index
    %c0_55 = arith.constant 0 : index
    %c0_56 = arith.constant 0 : index
    %62 = vector.load %arg13[%c1_54, %c0_55, %c0_56] : memref<3x8x8xf32, #tpu.memory_space<vmem>>, vector<1x8x8xf32>
    %63 = vector.shape_cast %62 : vector<1x8x8xf32> to vector<8x8xf32>
    %cst_57 = arith.constant dense<0.000000e+00> : vector<8x512xf32>
    %64 = tpu.matmul %63, %25, %cst_57 {dimension_numbers = #tpu.dot_dimension_numbers<[1], [0], [0], [1], [0, 0, 1, 1], [], []>} : vector<8x8xf32>, vector<8x512xf32>, vector<8x512xf32> -> vector<8x512xf32>
    %c1_58 = arith.constant 1 : index
    %c0_59 = arith.constant 0 : index
    %c0_60 = arith.constant 0 : index
    %65 = vector.load %arg14[%c1_58, %c0_59, %c0_60] : memref<3x8x1xf32, #tpu.memory_space<vmem>>, vector<1x8x1xf32>
    %66 = vector.shape_cast %65 : vector<1x8x1xf32> to vector<8x1xf32>
    %67 = vector.broadcast %66 : vector<8x1xf32> to vector<8x512xf32>
    %68 = arith.addf %64, %67 : vector<8x512xf32>
    %cst_61 = arith.constant 0.000000e+00 : f32
    %69 = vector.broadcast %cst_61 : f32 to vector<8x512xf32>
    %70 = arith.maximumf %68, %69 : vector<8x512xf32>
    %c0_62 = arith.constant 0 : index
    %c0_63 = arith.constant 0 : index
    %c0_64 = arith.constant 0 : index
    %c0_65 = arith.constant 0 : index
    %71 = vector.load %arg6[%c0_62, %c0_63, %c0_64, %c0_65] : memref<1x1x1x1024xi32, #tpu.memory_space<vmem>>, vector<1x1x1x1024xi32>
    %72 = vector.shape_cast %71 : vector<1x1x1x1024xi32> to vector<1x1024xi32>
    %73 = tpu.iota {dimensions = array<i32: 0>} : vector<512x1024xi32>
    %74 = vector.broadcast %72 : vector<1x1024xi32> to vector<512x1024xi32>
    %75 = arith.cmpi eq, %73, %74 : vector<512x1024xi32>
    %76 = arith.extui %75 : vector<512x1024xi1> to vector<512x1024xi32>
    %77 = arith.sitofp %76 : vector<512x1024xi32> to vector<512x1024xf32>
    %cst_66 = arith.constant dense<0.000000e+00> : vector<8x1024xf32>
    %78 = tpu.matmul %70, %77, %cst_66 {dimension_numbers = #tpu.dot_dimension_numbers<[1], [0], [0], [1], [0, 0, 1, 1], [], []>} : vector<8x512xf32>, vector<512x1024xf32>, vector<8x1024xf32> -> vector<8x1024xf32>
    %79 = vector.extract_strided_slice %78 {offsets = [0, 0], sizes = [8, 256], strides = [1, 1]} : vector<8x1024xf32> to vector<8x256xf32>
    %80 = vector.extract_strided_slice %78 {offsets = [0, 256], sizes = [8, 256], strides = [1, 1]} : vector<8x1024xf32> to vector<8x256xf32>
    %81 = arith.maximumf %79, %80 : vector<8x256xf32>
    %82 = vector.extract_strided_slice %78 {offsets = [0, 512], sizes = [8, 256], strides = [1, 1]} : vector<8x1024xf32> to vector<8x256xf32>
    %83 = arith.maximumf %81, %82 : vector<8x256xf32>
    %84 = vector.extract_strided_slice %78 {offsets = [0, 768], sizes = [8, 256], strides = [1, 1]} : vector<8x1024xf32> to vector<8x256xf32>
    %85 = arith.maximumf %83, %84 : vector<8x256xf32>
    %c2 = arith.constant 2 : index
    %c0_67 = arith.constant 0 : index
    %c0_68 = arith.constant 0 : index
    %86 = vector.load %arg15[%c2, %c0_67, %c0_68] : memref<4x16x8xf32, #tpu.memory_space<vmem>>, vector<1x16x8xf32>
    %87 = vector.shape_cast %86 : vector<1x16x8xf32> to vector<16x8xf32>
    %cst_69 = arith.constant dense<0.000000e+00> : vector<16x256xf32>
    %88 = tpu.matmul %87, %85, %cst_69 {dimension_numbers = #tpu.dot_dimension_numbers<[1], [0], [0], [1], [0, 0, 1, 1], [], []>} : vector<16x8xf32>, vector<8x256xf32>, vector<16x256xf32> -> vector<16x256xf32>
    %89 = arith.addf %61, %88 : vector<16x256xf32>
    %c2_70 = arith.constant 2 : index
    %c0_71 = arith.constant 0 : index
    %c0_72 = arith.constant 0 : index
    %90 = vector.load %arg13[%c2_70, %c0_71, %c0_72] : memref<3x8x8xf32, #tpu.memory_space<vmem>>, vector<1x8x8xf32>
    %91 = vector.shape_cast %90 : vector<1x8x8xf32> to vector<8x8xf32>
    %cst_73 = arith.constant dense<0.000000e+00> : vector<8x512xf32>
    %92 = tpu.matmul %91, %25, %cst_73 {dimension_numbers = #tpu.dot_dimension_numbers<[1], [0], [0], [1], [0, 0, 1, 1], [], []>} : vector<8x8xf32>, vector<8x512xf32>, vector<8x512xf32> -> vector<8x512xf32>
    %c2_74 = arith.constant 2 : index
    %c0_75 = arith.constant 0 : index
    %c0_76 = arith.constant 0 : index
    %93 = vector.load %arg14[%c2_74, %c0_75, %c0_76] : memref<3x8x1xf32, #tpu.memory_space<vmem>>, vector<1x8x1xf32>
    %94 = vector.shape_cast %93 : vector<1x8x1xf32> to vector<8x1xf32>
    %95 = vector.broadcast %94 : vector<8x1xf32> to vector<8x512xf32>
    %96 = arith.addf %92, %95 : vector<8x512xf32>
    %cst_77 = arith.constant 0.000000e+00 : f32
    %97 = vector.broadcast %cst_77 : f32 to vector<8x512xf32>
    %98 = arith.maximumf %96, %97 : vector<8x512xf32>
    %c0_78 = arith.constant 0 : index
    %c0_79 = arith.constant 0 : index
    %c0_80 = arith.constant 0 : index
    %c0_81 = arith.constant 0 : index
    %99 = vector.load %arg7[%c0_78, %c0_79, %c0_80, %c0_81] : memref<1x1x1x2048xi32, #tpu.memory_space<vmem>>, vector<1x1x1x2048xi32>
    %100 = vector.shape_cast %99 : vector<1x1x1x2048xi32> to vector<1x2048xi32>
    %101 = tpu.iota {dimensions = array<i32: 0>} : vector<512x2048xi32>
    %102 = vector.broadcast %100 : vector<1x2048xi32> to vector<512x2048xi32>
    %103 = arith.cmpi eq, %101, %102 : vector<512x2048xi32>
    %104 = arith.extui %103 : vector<512x2048xi1> to vector<512x2048xi32>
    %105 = arith.sitofp %104 : vector<512x2048xi32> to vector<512x2048xf32>
    %cst_82 = arith.constant dense<0.000000e+00> : vector<8x2048xf32>
    %106 = tpu.matmul %98, %105, %cst_82 {dimension_numbers = #tpu.dot_dimension_numbers<[1], [0], [0], [1], [0, 0, 1, 1], [], []>} : vector<8x512xf32>, vector<512x2048xf32>, vector<8x2048xf32> -> vector<8x2048xf32>
    %107 = vector.extract_strided_slice %106 {offsets = [0, 0], sizes = [8, 256], strides = [1, 1]} : vector<8x2048xf32> to vector<8x256xf32>
    %108 = vector.extract_strided_slice %106 {offsets = [0, 256], sizes = [8, 256], strides = [1, 1]} : vector<8x2048xf32> to vector<8x256xf32>
    %109 = arith.maximumf %107, %108 : vector<8x256xf32>
    %110 = vector.extract_strided_slice %106 {offsets = [0, 512], sizes = [8, 256], strides = [1, 1]} : vector<8x2048xf32> to vector<8x256xf32>
    %111 = arith.maximumf %109, %110 : vector<8x256xf32>
    %112 = vector.extract_strided_slice %106 {offsets = [0, 768], sizes = [8, 256], strides = [1, 1]} : vector<8x2048xf32> to vector<8x256xf32>
    %113 = arith.maximumf %111, %112 : vector<8x256xf32>
    %114 = vector.extract_strided_slice %106 {offsets = [0, 1024], sizes = [8, 256], strides = [1, 1]} : vector<8x2048xf32> to vector<8x256xf32>
    %115 = arith.maximumf %113, %114 : vector<8x256xf32>
    %116 = vector.extract_strided_slice %106 {offsets = [0, 1280], sizes = [8, 256], strides = [1, 1]} : vector<8x2048xf32> to vector<8x256xf32>
    %117 = arith.maximumf %115, %116 : vector<8x256xf32>
    %118 = vector.extract_strided_slice %106 {offsets = [0, 1536], sizes = [8, 256], strides = [1, 1]} : vector<8x2048xf32> to vector<8x256xf32>
    %119 = arith.maximumf %117, %118 : vector<8x256xf32>
    %120 = vector.extract_strided_slice %106 {offsets = [0, 1792], sizes = [8, 256], strides = [1, 1]} : vector<8x2048xf32> to vector<8x256xf32>
    %121 = arith.maximumf %119, %120 : vector<8x256xf32>
    %c3 = arith.constant 3 : index
    %c0_83 = arith.constant 0 : index
    %c0_84 = arith.constant 0 : index
    %122 = vector.load %arg15[%c3, %c0_83, %c0_84] : memref<4x16x8xf32, #tpu.memory_space<vmem>>, vector<1x16x8xf32>
    %123 = vector.shape_cast %122 : vector<1x16x8xf32> to vector<16x8xf32>
    %cst_85 = arith.constant dense<0.000000e+00> : vector<16x256xf32>
    %124 = tpu.matmul %123, %121, %cst_85 {dimension_numbers = #tpu.dot_dimension_numbers<[1], [0], [0], [1], [0, 0, 1, 1], [], []>} : vector<16x8xf32>, vector<8x256xf32>, vector<16x256xf32> -> vector<16x256xf32>
    %125 = arith.addf %89, %124 : vector<16x256xf32>
    %c0_86 = arith.constant 0 : index
    %c0_87 = arith.constant 0 : index
    %126 = vector.load %arg16[%c0_86, %c0_87] : memref<16x1xf32, #tpu.memory_space<vmem>>, vector<16x1xf32>
    %127 = vector.broadcast %126 : vector<16x1xf32> to vector<16x256xf32>
    %128 = arith.addf %125, %127 : vector<16x256xf32>
    %cst_88 = arith.constant 0.000000e+00 : f32
    %129 = vector.broadcast %cst_88 : f32 to vector<16x256xf32>
    %130 = arith.maximumf %128, %129 : vector<16x256xf32>
    %c0_89 = arith.constant 0 : index
    %c0_90 = arith.constant 0 : index
    %c0_91 = arith.constant 0 : index
    %131 = vector.load %arg18[%c0_89, %c0_90, %c0_91] : memref<1x16x256xf32, #tpu.memory_space<vmem>>, vector<1x16x256xf32>
    %132 = vector.shape_cast %131 : vector<1x16x256xf32> to vector<16x256xf32>
    %133 = vector.shape_cast %130 : vector<16x256xf32> to vector<1x16x256xf32>
    tpu.vector_store %arg18[%c0_89, %c0_90, %c0_91], %133 {strides = array<i32>} : memref<1x16x256xf32, #tpu.memory_space<vmem>>, vector<1x16x256xf32>,
    return
  }
  func.func @transform_0(%arg0: i32, %arg1: i32) -> (i32, i32, i32) {
    %c0_i32 = arith.constant 0 : i32
    %c0_i32_0 = arith.constant 0 : i32
    return %arg0, %c0_i32, %arg1 : i32, i32, i32
  }
  func.func @transform_1(%arg0: i32, %arg1: i32) -> (i32, i32, i32) {
    %c0_i32 = arith.constant 0 : i32
    %c0_i32_0 = arith.constant 0 : i32
    %c0_i32_1 = arith.constant 0 : i32
    return %arg0, %c0_i32, %c0_i32_0 : i32, i32, i32
  }
  func.func @transform_2(%arg0: i32, %arg1: i32) -> (i32, i32, i32) {
    %c0_i32 = arith.constant 0 : i32
    %c0_i32_0 = arith.constant 0 : i32
    return %arg0, %c0_i32, %arg1 : i32, i32, i32
  }
  func.func @transform_3(%arg0: i32, %arg1: i32) -> (i32, i32, i32, i32) {
    %c0_i32 = arith.constant 0 : i32
    %c0_i32_0 = arith.constant 0 : i32
    %c0_i32_1 = arith.constant 0 : i32
    return %arg0, %arg1, %c0_i32, %c0_i32_0 : i32, i32, i32, i32
  }
  func.func @transform_4(%arg0: i32, %arg1: i32) -> (i32, i32, i32, i32) {
    %c0_i32 = arith.constant 0 : i32
    %c0_i32_0 = arith.constant 0 : i32
    %c0_i32_1 = arith.constant 0 : i32
    return %arg0, %arg1, %c0_i32, %c0_i32_0 : i32, i32, i32, i32
  }
  func.func @transform_5(%arg0: i32, %arg1: i32) -> (i32, i32, i32, i32) {
    %c0_i32 = arith.constant 0 : i32
    %c0_i32_0 = arith.constant 0 : i32
    %c0_i32_1 = arith.constant 0 : i32
    return %arg0, %arg1, %c0_i32, %c0_i32_0 : i32, i32, i32, i32
  }
  func.func @transform_6(%arg0: i32, %arg1: i32) -> (i32, i32) {
    %c0_i32 = arith.constant 0 : i32
    %c0_i32_0 = arith.constant 0 : i32
    %c0_i32_1 = arith.constant 0 : i32
    return %c0_i32, %c0_i32_0 : i32, i32
  }
  func.func @transform_7(%arg0: i32, %arg1: i32) -> (i32, i32) {
    %c0_i32 = arith.constant 0 : i32
    %c0_i32_0 = arith.constant 0 : i32
    %c0_i32_1 = arith.constant 0 : i32
    return %c0_i32, %c0_i32_0 : i32, i32
  }
  func.func @transform_8(%arg0: i32, %arg1: i32) -> (i32, i32) {
    %c0_i32 = arith.constant 0 : i32
    %c0_i32_0 = arith.constant 0 : i32
    %c0_i32_1 = arith.constant 0 : i32
    return %c0_i32, %c0_i32_0 : i32, i32
  }
  func.func @transform_9(%arg0: i32, %arg1: i32) -> (i32, i32) {
    %c0_i32 = arith.constant 0 : i32
    %c0_i32_0 = arith.constant 0 : i32
    %c0_i32_1 = arith.constant 0 : i32
    return %c0_i32, %c0_i32_0 : i32, i32
  }
  func.func @transform_10(%arg0: i32, %arg1: i32) -> (i32, i32) {
    %c0_i32 = arith.constant 0 : i32
    %c0_i32_0 = arith.constant 0 : i32
    %c0_i32_1 = arith.constant 0 : i32
    return %c0_i32, %c0_i32_0 : i32, i32
  }
  func.func @transform_11(%arg0: i32, %arg1: i32) -> (i32, i32, i32) {
    %c0_i32 = arith.constant 0 : i32
    %c0_i32_0 = arith.constant 0 : i32
    %c0_i32_1 = arith.constant 0 : i32
    %c0_i32_2 = arith.constant 0 : i32
    return %c0_i32, %c0_i32_0, %c0_i32_1 : i32, i32, i32
  }
  func.func @transform_12(%arg0: i32, %arg1: i32) -> (i32, i32, i32) {
    %c0_i32 = arith.constant 0 : i32
    %c0_i32_0 = arith.constant 0 : i32
    %c0_i32_1 = arith.constant 0 : i32
    %c0_i32_2 = arith.constant 0 : i32
    return %c0_i32, %c0_i32_0, %c0_i32_1 : i32, i32, i32
  }
  func.func @transform_13(%arg0: i32, %arg1: i32) -> (i32, i32, i32) {
    %c0_i32 = arith.constant 0 : i32
    %c0_i32_0 = arith.constant 0 : i32
    %c0_i32_1 = arith.constant 0 : i32
    %c0_i32_2 = arith.constant 0 : i32
    return %c0_i32, %c0_i32_0, %c0_i32_1 : i32, i32, i32
  }
  func.func @transform_14(%arg0: i32, %arg1: i32) -> (i32, i32) {
    %c0_i32 = arith.constant 0 : i32
    %c0_i32_0 = arith.constant 0 : i32
    %c0_i32_1 = arith.constant 0 : i32
    return %c0_i32, %c0_i32_0 : i32, i32
  }
  func.func @transform_15(%arg0: i32, %arg1: i32) -> (i32, i32, i32) {
    %c0_i32 = arith.constant 0 : i32
    %c0_i32_0 = arith.constant 0 : i32
    return %arg0, %c0_i32, %arg1 : i32, i32, i32
  }
  func.func @transform_16(%arg0: i32, %arg1: i32) -> (i32, i32, i32) {
    %c0_i32 = arith.constant 0 : i32
    %c0_i32_0 = arith.constant 0 : i32
    return %arg0, %c0_i32, %arg1 : i32, i32, i32
  }
}

</mosaic_0001>

<bundles_post_ra>
// kernel: tpu_custom_call.1
= control target key start
LH: loop header
LB: loop body
LE: loop exit
PB: predicated region body
PF: predicated region fallthrough
CT: control target
= control target key end

     0   :  { %s20505_s0 = inlined_call_operand.vmem [shape: f32[2,16,512], index: 0, kind: input, shape index: {}]   ;;  %s20506_s1 = inlined_call_operand.vmem [shape: f32[2,8,512], index: 1, kind: input, shape index: {}]   ;;  %s20507_s2 = inlined_call_operand.vmem [shape: f32[2,8,512], index: 2, kind: input, shape index: {}]   ;;  %s20508_s3 = inlined_call_operand.hbm [shape: s32[2,2,1,512], index: 3, kind: input, shape index: {}]   ;;  %s20509_s4 = inlined_call_operand.hbm [shape: s32[2,2,1,1024], index: 4, kind: input, shape index: {}]   ;;  %s20510_s5 = inlined_call_operand.hbm [shape: s32[2,2,1,2048], index: 5, kind: input, shape index: {}]   ;;  %s20511_s6 = inlined_call_operand.vmem [shape: f32[32,16], index: 6, kind: input, shape index: {}]   ;;  %s20512_s7 = inlined_call_operand.vmem [shape: f32[32,8], index: 7, kind: input, shape index: {}]   ;;  %s20513_s8 = inlined_call_operand.vmem [shape: f32[32,1], index: 8, kind: input, shape index: {}]   ;;  %s20514_s9 = inlined_call_operand.hbm [shape: f32[8,8], index: 9, kind: input, shape index: {}]   ;;  %s20515_s10 = inlined_call_operand.vmem [shape: f32[8,1], index: 10, kind: input, shape index: {}]   ;;  %s20516_s11 = inlined_call_operand.hbm [shape: f32[3,8,8], index: 11, kind: input, shape index: {}]   ;;  %s20517_s12 = inlined_call_operand.vmem [shape: f32[3,8,1], index: 12, kind: input, shape index: {}]   ;;  %s20518_s13 = inlined_call_operand.vmem [shape: f32[4,16,8], index: 13, kind: input, shape index: {}]   ;;  %s20519_s14 = inlined_call_operand.vmem [shape: f32[16,1], index: 14, kind: input, shape index: {}]   ;;  %s20520_s15 = inlined_call_operand.hbm [shape: f32[2,32,512], index: 15, kind: output, shape index: {0}]   ;;  %s20521_s16 = inlined_call_operand.hbm [shape: f32[2,16,512], index: 16, kind: output, shape index: {1}]  }
   0x1   :  { %20787 = sst [smem:[#allocation90_spill]] %s20505_s0 }
   0x2   :  { %20788 = sst [smem:[#allocation91_spill]] %s20506_s1 }
   0x3   :  { %20789 = sst [smem:[#allocation92_spill]] %s20509_s4 }
   0x4   :  { %20790 = sst [smem:[#allocation93_spill]] %s20511_s6 }
   0x5   :  { %20791 = sst [smem:[#allocation94_spill]] %s20513_s8 }
   0x6   :  { %20792 = sst [smem:[#allocation95_spill]] %s20514_s9 }
   0x7   :  { %20793 = sst [smem:[#allocation96_spill]] %s20515_s10 }
   0x8   :  { %20794 = sst [smem:[#allocation97_spill]] %s20516_s11 }
   0x9   :  { %20795 = sst [smem:[#allocation98_spill]] %s20517_s12 }
   0xa   :  { %20796 = sst [smem:[#allocation99_spill]] %s20518_s13 }
   0xb   :  { %20797 = sst [smem:[#allocation100_spill]] %s20519_s14 }
   0xc   :  { %20798 = sst [smem:[#allocation101_spill]] %s20520_s15 }
   0xd   :  { %20799 = sst [smem:[#allocation102_spill]] %s20521_s16 }
   0xe   :  { %22 = vsyncpa [#allocation4], 0 }
   0xf   :  { %24 = vsyncpa [#allocation4 + $0x1], 0 }
  0x10   :  { %25 = vsyncpa [#allocation7], 0 }
  0x11   :  { %27 = vsyncpa [#allocation7 + $0x1], 0 }
  0x12   :  { %28 = vsyncpa [#allocation10], 0 }
  0x13   :  { %29 = vsyncpa [#allocation5], 0 }
  0x14   :  { %31 = vsyncpa [#allocation5 + $0x1], 0 }
  0x15   :  { %32 = vsyncpa [#allocation14], 0 }
  0x16   :  { %34 = vsyncpa [#allocation14 + $0x1], 0  ;;  %s14130_s21 = smov 0   ;;  %s14132_s22 = smov 0  }
  0x17   :  { %s14134_s23 = smov 0   ;;  %s14136_s24 = smov 0  }
  0x18   :  { %s14138_s25 = smov 0   ;;  %s14140_s26 = smov 0  }
  0x19   :  { %s14142_s27 = smov 0   ;;  %s14144_s28 = smov 0  }
  0x1a LB: > { %20800 = sst [smem:[#allocation20_spill]] %s14000_s21  ;;  %s14171_s29 = sadd.s32 4294967295, %s14028_s28   ;;  %s14028_s28 = sphi %s14144_s28, %s40_s28   ;;  %s14024_s27 = sphi %s14142_s27, %s21131_s27   ;;  %s14020_s26 = sphi %s14140_s26, %s21130_s26   ;;  %s14016_s25 = sphi %s14138_s25, %s21129_s25   ;;  %s14012_s24 = sphi %s14136_s24, %s21128_s24   ;;  %s14008_s23 = sphi %s14134_s23, %s21127_s23   ;;  %s14004_s22 = sphi %s14132_s22, %s21126_s22   ;;  %s14000_s21 = sphi %s14130_s21, %s21125_s21  }
  0x1b   : > { %20801 = sst [smem:[#allocation21_spill]] %s14008_s23  ;;  %s9985_s30 = sadd.s32 4294967294, %s14028_s28  }
  0x1c   : > { %20802 = sst [smem:[#allocation22_spill]] %s14028_s28  ;;  %s49_s0 = sadd.s32 1, %s14020_s26 }
  0x1d   : > { %s52_s17 = sadd.s32 1, %s14024_s27  ;;  %p50_p0 = scmp.ge.s32.totalorder %s49_s0, 2 }
  0x1e   : > { %s61_s18 = sadd.s32 1, %s14008_s23  ;;  %p68_p1 = scmp.ne.s32.totalorder %s14008_s23, %s14004_s22 }
  0x1f   : > { %p69_p2 = scmp.eq.s32.totalorder %s14028_s28, 0  ;;  %s21133_s0 = smov (%p50_p0, %s49_s0), 0 }
  0x20   : > { %20803 = sst [smem:[#allocation23_spill]] %s21133_s0  ;;  %s21135_s17 = smov (!%p50_p0, %s52_s17), %s14024_s27 }
  0x21   : > { %s57_s19 = ssub.s32 %s14020_s26, %s21133_s0  ;;  %p14185_p3 = por %p69_p2, %p68_p1 }
  0x22   : > { %p54_p4 = scmp.ge.s32.totalorder %s21135_s17, 2  ;;  %p156_p5 = scmp.ne.s32.totalorder %s14004_s22, %s14000_s21 }
  0x23   : > { %s20804_s20 = scalar_select %p14185_p3, 1, 0 }
  0x24   : > { %p20533_p6 = scmp.eq.s32.totalorder %s14171_s29, 0  ;;  %p427_p7 = scmp.eq.s32.totalorder %s14171_s29, 3 }
  0x25   : > { %s21137_s17 = smov (%p54_p4, %s21135_s17), 0  ;;  %p433_p10 = scmp.eq.s32.totalorder %s9985_s30, 3 }
  0x26   : > { %20805 = sst [smem:[#allocation24_spill]] %s21137_s17  ;;  %p14197_p8 = por %p20533_p6, %p156_p5 }
  0x27   : > { %p14201_p9 = por %p427_p7, %p68_p1  ;;  %s56_s0 = ssub.s32 %s14024_s27, %s21137_s17 }
  0x28   : > { %s20806_s16 = scalar_select %p14197_p8, 1, 0 }
  0x29   : > { %s20807_s15 = scalar_select %p14201_p9, 1, 0 }
  0x2a   : > { %s58_s13 = sor.u32 %s57_s19, %s56_s0  ;;  %p9986_p11 = scmp.ge.s32.totalorder %s14028_s28, 1 }
  0x2b   : > { %20808 = sst [smem:[#allocation25_spill]] %s20807_s15  ;;  %p59_p12 = scmp.eq.s32.totalorder %s58_s13, 0 }
  0x2c   : > { %p14208_p13 = por %p433_p10, %p156_p5  ;;  %p468_p0 = scmp.lt.s32.totalorder %s14028_s28, 5 }
  0x2d   : > { %s14214_s14 = scalar_select %p59_p12, %s14008_s23, %s61_s18  }
  0x2e   : > { %s20809_s21 = scalar_select %p14208_p13, 1, 0 }
  0x2f   : > { %20811 = sst [smem:[#allocation27_spill]] %s14214_s14  ;;  %p14216_p2 = pnand %p9986_p11, %p468_p0 }
  0x30   : > { %20810 = sst [smem:[#allocation26_spill]] %s20809_s21  ;;  %s14030_s12 = smov [#allocation9]  }
  0x31   : > { %s20812_s8 = scalar_select %p14216_p2, 1, 0 }
  0x32   : > { %s490_s15 = sshll.u32 %s14030_s12, 4  ;;  %p13666_p1 = pneg %p14216_p2  ;;  %s491_s15 = int_to_ptr.vmem [resolvable:$true] %s490_s15 }
  0x33   : > { %s14031_s30 = smov [#allocation11]   ;;  %s13775_s18 = scalar_lea.vmem %s491_s15, 128 }
  0x34   : > { %s503_s0 = sshll.u32 %s14031_s30, 4  ;;  %p14224_p4 = pnand %p13666_p1, %p20533_p6  ;;  %s504_s0 = int_to_ptr.vmem [resolvable:$true] %s503_s0 }
  0x35   : > { %p13776_p7 = scmp.ne.s32.totalorder %s491_s15, %s13775_s18  ;;  %p13783_p12 = scmp.lt.s32.totalorder %s491_s15, %s491_s15 }
  0x36   : > { %p13766_p5 = pneg %p14224_p4  ;;  %p13784_p0 = scmp.lt.s32.totalorder %s13775_s18, %s13775_s18 }
  0x38   : > { %p13778_p10 = pnand %p13776_p7, %p13766_p5  ;;  %p13785_p13 = por %p13784_p0, %p13783_p12 }
  0x3a   : > { %p13779_p11 = pneg %p13778_p10 }
  0x3c   : > { %p13786_p9 = pnand %p13785_p13, %p13779_p11 }
  0x3e   : > { %13789 = shalt.err (!%p13786_p9)
}
  0x3f   : > { %s20814_s9 = sld [smem:[#allocation95_spill]]  ;;  %s13801_s30 = scalar_lea.vmem %s504_s0, 384 }
  0x40   : > { %p13802_p1 = scmp.ne.s32.totalorder %s504_s0, %s13801_s30  ;;  %p13809_p7 = scmp.lt.s32.totalorder %s504_s0, %s504_s0 }
  0x41   : > { %p13810_p10 = scmp.lt.s32.totalorder %s13801_s30, %s13801_s30 }
  0x42   : > { %p13804_p6 = pnand %p13802_p1, %p13766_p5 }
  0x43   : > { %p13811_p2 = por %p13810_p10, %p13809_p7 }
  0x44   : > { %p13805_p8 = pneg %p13804_p6 }
  0x45   : > { %13669 = dma.hbm_to_vmem [thread:$0]  (!%p14224_p4), %s20814_s9, 128, %s491_s15, [#allocation10]  }
  0x46   : > { %p13812_p3 = pnand %p13811_p2, %p13805_p8 }
  0x48   : > { %13815 = shalt.err (!%p13812_p3)
}
  0x49   : > { %s14032_s18 = smov 128   ;;  %s14033_s17 = smov 8  }
  0x4a   : > { %s20815_s11 = sld [smem:[#allocation97_spill]]  ;;  %p9989_p9 = scmp.ge.s32.totalorder %s14028_s28, 4 }
  0x4b   : > { %p20816_p13 = scmp.ne.s32.totalorder (!%p9989_p9), %s20804_s20, 0 }
  0x4c   : > { %522 = sbr.rel (%p9989_p9) target bundleno = 143 (0x8f), region = 52 }
  0x50   : > { %13672 = dma.hbm_to_vmem [thread:$0]  (!%p14224_p4), %s20815_s11, 384, %s504_s0, [#allocation10], %s14032_s18, %s14032_s18, %s14033_s17  }
  0x51   : > { %525 = sbr.rel (!%p20816_p13) target bundleno = 93 (0x5d), region = 56  ;;  %s527_s15 = sand.u32 (%p20816_p13), 1, %s14008_s23  }
  0x52   : > { %s9991_s12 = sshll.u32 (%p20816_p13), %s14020_s26, 1  ;;  %s9990_s19 = sshll.u32 (%p20816_p13), %s527_s15, 5 }
  0x53   : > { %s9992_s30 = sshll.u32 (%p20816_p13), %s14024_s27, 3  ;;  %s20817_s6 = sld [smem:[#allocation90_spill]] (%p20816_p13) }
  0x54   : > { %s532_s9 = sadd.s32 (%p20816_p13), %s9992_s30, %s9991_s12  ;;  %s529_s21 = scalar_lea.vmem (%p20816_p13), [#allocation2], %s9990_s19 }
  0x55   : > { %s9993_s10 = sshll.u32 (%p20816_p13), %s532_s9, 3 }
  0x59   : > { %s534_s14 = scalar_lea.vmem %s20817_s6, %s9993_s10 }
  0x5a   : > { %v547_v0 = vld [vmem:[%s534_s14] sm:$0xff]  ;;  %v549_v1 = vld [vmem:[%s534_s14 + $0x8] sm:$0xff] }
  0x5b   : > { %v551_v2 = vld [vmem:[%s534_s14 + $0x20] sm:$0xff]  ;;  %548 = vst [vmem:[%s529_s21] sm:$0xff] %v547_v0  ;;  %550 = vst [vmem:[%s529_s21 + $0x8] sm:$0xff] %v549_v1  ;;  %v553_v3 = vld [vmem:[%s534_s14 + $0x28] sm:$0xff] }
  0x5c   : > { %552 = vst [vmem:[%s529_s21 + $0x10] sm:$0xff] %v551_v2  ;;  %554 = vst [vmem:[%s529_s21 + $0x18] sm:$0xff] %v553_v3 }
  0x5d PF: > { %s14256_s9 = sand.u32 1, %s14008_s23   ;;  %s603_s1 = sand.u32 1, %s14028_s28  }
  0x5e   : > { %s9998_s6 = sshll.u32 %s14256_s9, 3  ;;  %s9999_s10 = sshll.u32 %s14020_s26, 3 }
  0x5f   : > { %s10000_s17 = sshll.u32 %s14024_s27, 4  ;;  %s607_s0 = scalar_lea.vmem [#allocation6], %s9998_s6 }
  0x60   : > { %s617_s18 = sshll.u32 %s607_s0, 4  ;;  %s613_s15 = sadd.s32 %s10000_s17, %s9999_s10  ;;  %s618_s18 = int_to_ptr.vmem [resolvable:$true] %s617_s18 }
  0x61   : > { %s10001_s12 = sshll.u32 %s613_s15, 4  ;;  %s20818_s4 = sld [smem:[#allocation92_spill]] }
  0x62   : > { %s9994_s14 = sshll.u32 %s14256_s9, 2  ;;  %s14266_s21 = scalar_lea.sflag [#allocation7], %s603_s1 }
  0x63   : > { %s13828_s11 = scalar_lea.vmem %s618_s18, 128  ;;  %p20819_p6 = scmp.ne.s32.totalorder %s20804_s20, 0 }
  0x64   : > { %p13829_p3 = scmp.ne.s32.totalorder %s618_s18, %s13828_s11  ;;  %s14034_s23 = smov [#allocation6]  }
  0x65   : > { %s13832_s28 = sshll.u32 %s14034_s23, 4  ;;  %s13833_s28 = int_to_ptr.vmem [resolvable:$false] %s13832_s28 }
  0x66   : > { %p13830_p8 = pnand %p13829_p3, %p20819_p6  ;;  %s13834_s6 = scalar_lea.vmem %s13833_s28, 256 }
  0x67   : > { %s615_s13 = scalar_lea.hbm %s20818_s4, %s10001_s12  ;;  %p13835_p4 = scmp.lt.s32.totalorder %s618_s18, %s13833_s28 }
  0x68   : > { %p13831_p2 = pneg %p13830_p8  ;;  %p13836_p5 = scmp.lt.s32.totalorder %s13834_s6, %s13828_s11 }
  0x6a   : > { %p13837_p11 = por %p13836_p5, %p13835_p4 }
  0x6c   : > { %p13838_p12 = pnand %p13837_p11, %p13831_p2 }
  0x6e   : > { %13841 = shalt.err (!%p13838_p12)
}
  0x6f   : > { %13653 = dma.hbm_to_vmem [thread:$0]  (%p20819_p6), %s615_s13, 128, %s618_s18, %s14266_s21  }
  0x70   : > { %s9995_s1 = sshll.u32 %s14020_s26, 2  ;;  %s9996_s10 = sshll.u32 %s14024_s27, 3 }
  0x71   : > { %s586_s17 = scalar_lea.vmem [#allocation3], %s9994_s14  ;;  %s592_s0 = sadd.s32 %s9996_s10, %s9995_s1 }
  0x72   : > { %s596_s23 = sshll.u32 %s586_s17, 4  ;;  %s9997_s28 = sshll.u32 %s592_s0, 4  ;;  %s597_s23 = int_to_ptr.vmem [resolvable:$true] %s596_s23 }
  0x73   : > { %s10002_s11 = sshll.u32 %s14256_s9, 4  ;;  %s594_s19 = scalar_lea.hbm %s20508_s3, %s9997_s28 }
  0x74   : > { %s583_s30 = scalar_lea.sflag [#allocation4], %s14256_s9  ;;  %s13854_s6 = scalar_lea.vmem %s597_s23, 64 }
  0x75   : > { %p13855_p0 = scmp.ne.s32.totalorder %s597_s23, %s13854_s6  ;;  %s14035_s4 = smov [#allocation3]  }
  0x76   : > { %s13858_s18 = sshll.u32 %s14035_s4, 4  ;;  %s13859_s18 = int_to_ptr.vmem [resolvable:$false] %s13858_s18 }
  0x77   : > { %p13856_p1 = pnand %p13855_p0, %p20819_p6  ;;  %s13860_s13 = scalar_lea.vmem %s13859_s18, 128 }
  0x78   : > { %p13861_p10 = scmp.lt.s32.totalorder %s597_s23, %s13859_s18  ;;  %p13862_p9 = scmp.lt.s32.totalorder %s13860_s13, %s13854_s6 }
  0x79   : > { %p13857_p7 = pneg %p13856_p1 }
  0x7a   : > { %p13863_p13 = por %p13862_p9, %p13861_p10 }
  0x7c   : > { %p13864_p3 = pnand %p13863_p13, %p13857_p7 }
  0x7e   : > { %13867 = shalt.err (!%p13864_p3)
}
  0x7f   : > { %13652 = dma.hbm_to_vmem [thread:$0]  (%p20819_p6), %s594_s19, 64, %s597_s23, %s583_s30  }
  0x80   : > { %s10003_s9 = sshll.u32 %s14020_s26, 4  ;;  %s10004_s14 = sshll.u32 %s14024_s27, 5 }
  0x81   : > { %s634_s1 = sadd.s32 %s10004_s14, %s10003_s9  ;;  %s628_s10 = scalar_lea.vmem [#allocation8], %s10002_s11 }
  0x82   : > { %s638_s17 = sshll.u32 %s628_s10, 4  ;;  %s10005_s0 = sshll.u32 %s634_s1, 4  ;;  %s639_s17 = int_to_ptr.vmem [resolvable:$true] %s638_s17 }
  0x83   : > { %s636_s15 = scalar_lea.hbm %s20510_s5, %s10005_s0  ;;  %s13880_s12 = scalar_lea.vmem %s639_s17, 256 }
  0x84   : > { %p13881_p8 = scmp.ne.s32.totalorder %s639_s17, %s13880_s12  ;;  %s14036_s6 = smov [#allocation8]  }
  0x85   : > { %s13884_s18 = sshll.u32 %s14036_s6, 4  ;;  %s13885_s18 = int_to_ptr.vmem [resolvable:$false] %s13884_s18 }
  0x86   : > { %p13882_p2 = pnand %p13881_p8, %p20819_p6  ;;  %s13886_s23 = scalar_lea.vmem %s13885_s18, 512 }
  0x87   : > { %p13887_p5 = scmp.lt.s32.totalorder %s639_s17, %s13885_s18  ;;  %p13888_p11 = scmp.lt.s32.totalorder %s13886_s23, %s13880_s12 }
  0x88   : > { %p13883_p4 = pneg %p13882_p2 }
  0x89   : > { %p13889_p12 = por %p13888_p11, %p13887_p5 }
  0x8b   : > { %p13890_p0 = pnand %p13889_p12, %p13883_p4 }
  0x8d   : > { %13893 = shalt.err (!%p13890_p0)
}
  0x8e   : > { %13654 = dma.hbm_to_vmem [thread:$0]  (%p20819_p6), %s636_s15, 256, %s639_s17, %s14266_s21  }
  0x8f PF: > { %p20820_p1 = scmp.ne.s32.totalorder %s20812_s8, 0 }
  0x91   : > { %647 = sbr.rel (%p20820_p1) target bundleno = 2399 (0x95f), region = 99 }
  0x96   : > { %s14297_s11 = sand.u32 1, %s14004_s22   ;;  %p20821_p6 = scmp.ne.s32.totalorder %s20806_s16, 0 }
  0x97   : > { %s10007_s19 = sshll.u32 %s14297_s11, 5  ;;  %s10008_s30 = sshll.u32 %s14297_s11, 2 }
  0x98   : > { %s14303_s13 = scalar_lea.vmem [#allocation2], %s10007_s19  ;;  %s657_s20 = scalar_lea.sflag [#allocation4], %s14297_s11 }
  0x99   : > { %s14306_s9 = scalar_lea.vmem [#allocation3], %s10008_s30 }
  0x9a   : > { %13979 = dma.done.wait (%p20821_p6), %s657_s20, 64  }
  0x9b   : > { %13981 = vsyncadd (%p20821_p6), %s657_s20, 4294967232  ;;  %s665_s8 = sand.u32 1, %s14171_s29   ;;  %s10009_s21 = sshll.u32 %s14297_s11, 3 }
  0x9c   : > { %s666_s14 = scalar_lea.sflag [#allocation7], %s665_s8  ;;  %s14314_s1 = scalar_lea.vmem [#allocation6], %s10009_s21 }
  0x9d   : > { %13983 = dma.done.wait (%p20821_p6), %s666_s14, 384  }
  0x9e   : > { %13985 = vsyncadd (%p20821_p6), %s666_s14, 4294966912  ;;  %s10010_s10 = sshll.u32 %s14297_s11, 4  ;;  %p20822_p7 = scmp.eq.s32.totalorder %s14171_s29, 0 }
  0x9f   : > { %s14321_s17 = scalar_lea.vmem [#allocation8], %s10010_s10 }
  0xa0   : > { %13987 = dma.done.wait (%p20822_p7), [#allocation10], 512   ;;  %p20823_p10 = pmov %p20822_p7 }
  0xa1   : > { %p769_p9 = scmp.lt.s32.totalorder %s14016_s25, 1  ;;  %s14329_s0 = sshll.u32 %s14012_s24, 1  ;;  %v20543_v4 = vmov 0.0   ;;  %v14038_v5 = vmov 0   ;;  %v793_v6 = vld [vmem:[%s14303_s13 + $0x18] sm:$0xff]  ;;  %v792_v7 = vld [vmem:[%s14303_s13 + $0x10] sm:$0xff]  ;;  %v1446_v54 = vlaneseq }
  0xa2   : > { %13989 = vsyncadd (%p20823_p10), [#allocation10], 4294966784  ;;  %p777_p13 = scmp.lt.s32.totalorder %s14329_s0, 3  ;;  %877 = vmatprep.mubr.f32.mxu0 %v20543_v4  ;;  %979 = vmatprep.mubr.f32.mxu1 %v20543_v4  ;;  %v791_v8 = vld [vmem:[%s14303_s13 + $0x8] sm:$0xff]  ;;  %v794_v11 = vld [vmem:[%s20512_s7] sm:$0xff]  ;;  %vm800_vm0 = vcmask 64512  }
  0xa3   : > { %s770_s16 = scalar_select %p769_p9, %s14016_s25, 1  ;;  %13759 = vset.pattern.permute.xlu0 %v14038_v5  ;;  %13760 = vset.pattern.permute.xlu1 %v14038_v5  ;;  %v790_v12 = vld [vmem:[%s14303_s13] sm:$0xff]  ;;  %vm902_vm1 = vcmask 130048   ;;  %v795_v17 = vld [vmem:[%s20512_s7 + $0x8] sm:$0xff]  ;;  %v796_v22 = vld [vmem:[%s20512_s7 + $0x10] sm:$0xff]  ;;  %v14432_v2 = vshrl.u32 %v1446_v54, 7 }
  0xa4   : > { %s778_s29 = scalar_select %p777_p13, %s14329_s0, 3  ;;  %943 = vmatprep.subr.mxu1 %v793_v6  ;;  %v797_v26 = vld [vmem:[%s20512_s7 + $0x18] sm:$0xff] }
  0xa5   : > { %s10018_s4 = sshll.u32 %s770_s16, 2  ;;  %s13647_s30 = sshll.u32 %s770_s16, 5  ;;  %944 = vmatpush1.msra.mxu1 %v792_v7  ;;  %v1052_v30 = vld [vmem:[#allocation9] sm:$0xff]  ;;  %20834 = vst [vmem:[#allocation31_spill] sm:$0xff] %v14432_v2  ;;  %v14539_v54 = vadd.s32 80, %v14432_v2 }
  0xa6   : > { %s780_s28 = sadd.s32 %s10018_s4, %s778_s29  ;;  %s20824_s21 = sld [smem:[#allocation93_spill]]  ;;  %945 = vmatprep.subr.mxu1 %v791_v8 }
  0xa7   : > { %s10019_s15 = sshll.u32 %s780_s28, 3  ;;  %s20826_s4 = sld [smem:[#allocation91_spill]]  ;;  %946 = vmatpush1.msra.mxu1 %v790_v12 }
  0xa8   : > { %s782_s6 = scalar_lea.vmem %s20507_s2, %s10019_s15  ;;  %s20827_s18 = sld [smem:[#allocation96_spill]] }
  0xa9   : > { %v799_v9 = vld [vmem:[%s782_s6 + $0x8] sm:$0xff]  ;;  %v798_v10 = vld [vmem:[%s782_s6] sm:$0xff]  ;;  %s20828_s20 = sld [smem:[#allocation98_spill]]  ;;  %s10013_s24 = sshll.u32 %s14297_s11, 6 }
  0xaa   : > { %843 = vmatprep.subr.mxu0 %v799_v9  ;;  %s20830_s15 = sld [smem:[#allocation100_spill]]  ;;  %s14428_s12 = scalar_lea.vmem [#allocation12], %s10013_s24 }
  0xab   : > { %844 = vmatpush1.msra.mxu0 %v798_v10  ;;  %s21112_s23 = sld [smem:[#allocation25_spill]]  ;;  %s13640_s10 = sshll.u32 %s14016_s25, 4 }
  0xac   : > { %s20825_s14 = smov %s20824_s21  ;;  %v786_v13 = vld [vmem:[%s20824_s21] sm:$0xff]  ;;  %10020 = vmatmul.mubr.msk.f32.vlgmr.msra.gmra.mxu0 %vm800_vm0, %v794_v11  ;;  %s9719_s29 = sadd.s32 %s13640_s10, %s14329_s0 }
  0xad   : > { %s773_s28 = scalar_lea.vmem %s20826_s4, %s13647_s30  ;;  %10024 = vmatmul.mubr.msk.f32.vlgmr.msra.gmra.mxu1 %vm902_vm1, %v786_v13  ;;  %883 = vmatprep.mubr.f32.mxu0 %v20543_v4  ;;  %v787_v19 = vld [vmem:[%s20825_s14 + $0x8] sm:$0xff]  ;;  %v788_v23 = vld [vmem:[%s20825_s14 + $0x10] sm:$0xff]  ;;  %v789_v27 = vld [vmem:[%s20825_s14 + $0x18] sm:$0xff]  ;;  %s20829_s30 = sld [smem:[#allocation94_spill]] }
  0xae   : > { %v1054_v14 = vld [vmem:[%s773_s28 + $0x8] sm:$0xff]  ;;  %v1056_v15 = vld [vmem:[%s773_s28 + $0x18] sm:$0xff]  ;;  %v1053_v16 = vld [vmem:[%s773_s28] sm:$0xff]  ;;  %985 = vmatprep.mubr.f32.mxu1 %v20543_v4  ;;  %s13641_s4 = sshll.u32 %s9719_s29, 7  ;;  %s21113_s16 = sld [smem:[#allocation101_spill]] }
  0xaf   : > { %v1055_v18 = vld [vmem:[%s773_s28 + $0x10] sm:$0xff]  ;;  %1096 = vmatprep.subr.mxu0 %v1054_v14  ;;  %1167 = vmatprep.subr.mxu1 %v1056_v15  ;;  %v1057_v20 = vld [vmem:[%s20827_s18] sm:$0xff]  ;;  %v10551_v21 = vld [vmem:[%s20828_s20 + $0x8] sm:$0xff]  ;;  %v14437_v15 = vsub.s32 1, %v14432_v2  ;;  %s20908_s18 = sld [smem:[#allocation99_spill]]  ;;  %s9722_s28 = sshll.u32 %s14428_s12, 4  ;;  %s20410_s28 = int_to_ptr.vmem [resolvable:$true] %s9722_s28 }
  0xb0   : > { %1097 = vmatpush1.msra.mxu0 %v1053_v16  ;;  %1168 = vmatpush1.msra.mxu1 %v1055_v18  ;;  %v1290_v24 = vld [vmem:[%s20828_s20] sm:$0xff]  ;;  %v11582_v25 = vld [vmem:[%s20828_s20 + $0x10] sm:$0xff]  ;;  %s14040_s6 = smov [#allocation12]  }
  0xb1   : > { %10021 = vmatmul.mubr.msk.f32.gmra.mxu0 %vm800_vm0, %v795_v17  ;;  %10025 = vmatmul.mubr.msk.f32.gmra.mxu1 %vm902_vm1, %v787_v19  ;;  %v9677_v33 = vld [vmem:[%s20830_s15] sm:$0xff]  ;;  %20835 = vst [vmem:[#allocation32_spill] sm:$0xff] %v14437_v15  ;;  %p21114_p8 = scmp.ne.s32.totalorder %s21112_s23, 0  ;;  %s13898_s8 = sshll.u32 %s14040_s6, 4  ;;  %s13899_s8 = int_to_ptr.vmem [resolvable:$false] %s13898_s8 }
  0xb2   : > { %889 = vmatprep.mubr.f32.mxu0 %v20543_v4  ;;  %991 = vmatprep.mubr.f32.mxu1 %v20543_v4  ;;  %p13901_p5 = scmp.lt.s32.totalorder %s20410_s28, %s13899_s8 }
  0xb3   : > { %1244 = vmatprep.subr.mxu0 %v799_v9  ;;  %1060 = vperm.xlu0 %13759, %v1057_v20   ;;  %v1004_v28 = vld [vmem:[%s20829_s30] sm:$0xff]  ;;  %v1005_v29 = vld [vmem:[%s20829_s30 + $0x8] sm:$0xff]  ;;  %v1006_v31 = vld [vmem:[%s20829_s30 + $0x10] sm:$0xff] }
  0xb4   : > { %2756 = vperm.xlu1 %13760, %v10551_v21   ;;  %v1007_v32 = vld [vmem:[%s20829_s30 + $0x18] sm:$0xff]  ;;  %v14441_v20 = vld [vmem:[%s14306_s9] sm:$0xf]  ;;  %v14444_v21 = vsub.s32 0, %v14432_v2  ;;  %s20408_s24 = scalar_lea.hbm %s21113_s16, %s13641_s4  ;;  %s9702_s9 = scalar_lea.sflag [#allocation5], %s14297_s11 }
  0xb5   : > { %10022 = vmatmul.mubr.msk.f32.gmra.mxu0 %vm800_vm0, %v796_v22  ;;  %10026 = vmatmul.mubr.msk.f32.gmra.mxu1 %vm902_vm1, %v788_v23 }
  0xb6   : > { %895 = vmatprep.mubr.f32.mxu0 %v20543_v4  ;;  %997 = vmatprep.mubr.f32.mxu1 %v20543_v4  ;;  %20836 = vst [vmem:[#allocation33_spill] sm:$0xff] %v14444_v21 }
  0xb7   : > { %1293 = vperm.xlu0 %13759, %v1290_v24  }
  0xb8   : > { %5147 = vperm.xlu1 %13760, %v11582_v25  }
  0xb9   : > { %10023 = vmatmul.mubr.msk.f32.gmra.mxu0 %vm800_vm0, %v797_v26  ;;  %10027 = vmatmul.mubr.msk.f32.gmra.mxu1 %vm902_vm1, %v789_v27 }
  0xba   : > { %1130 = vmatprep.mubr.f32.mxu0 %v20543_v4  ;;  %1201 = vmatprep.mubr.f32.mxu1 %v20543_v4 }
  0xbb   : > { %1010 = vperm.xlu0 %13759, %v1004_v28  }
  0xbc   : > { %1015 = vperm.xlu1 %13760, %v1005_v29  }
  0xbd   : > { %10028 = vmatmul.mubr.msk.f32.vlgmr.msra.gmra.mxu0 %vm800_vm0, %v1052_v30  ;;  %10029 = vmatmul.mubr.msk.f32.vlgmr.msra.gmra.mxu1 %vm800_vm0, %v1052_v30 }
  0xbe   : > { %1245 = vmatpush1.msra.mxu0 %v798_v10  ;;  %1278 = vmatprep.mubr.f32.mxu0 %v20543_v4 }
  0xbf   : > { %1363 = vmatprep.mubr.f32.mxu1 %v20543_v4  ;;  %1020 = vperm.xlu0 %13759, %v1006_v31   ;;  %v14455_v31 = vrot.slane %v14441_v20, %v14437_v15  ;;  %v14950_v15 = vadd.s32 152, %v14432_v2 }
  0xc0   : > { %1025 = vperm.xlu1 %13760, %v1007_v32  }
  0xc1   : > { %10030 = vmatmul.mubr.msk.f32.vlgmr.msra.gmra.mxu0 %vm800_vm0, %v1052_v30  ;;  %v14451_v30 = vadd.s32 120, %v14432_v2  ;;  %20873 = vst [vmem:[#allocation70_spill] sm:$0xff] %v14950_v15 }
  0xc2   : > { %1434 = vmatprep.mubr.f32.mxu0 %v20543_v4  ;;  %v14887_v4 = vadd.s32 440, %v14432_v2 }
  0xc3   : > { %9681 = vperm.xlu0 %13759, %v9677_v33   ;;  %vm1588_vm2 = vcmp.eq.s32.totalorder %v14451_v30, %v14455_v31 }
  0xc4   : > { %20866 = vst [vmem:[#allocation63_spill] sm:$0xff] %v14887_v4 }
 0x12e   : > { %v14419_v34 = vpop.permute.xlu0 %1060 }
 0x12f   : > { %20831 = vst [vmem:[#allocation28_spill] sm:$0xff] %v14419_v34  ;;  %v14421_v35 = vpop.permute.xlu1 %2756 }
 0x130   : > { %20832 = vst [vmem:[#allocation29_spill] sm:$0xff] %v14421_v35  ;;  %v14905_v35 = vadd.s32 432, %v14432_v2 }
 0x132   : > { %v14423_v36 = vpop.permute.xlu0 %1293  ;;  %20868 = vst [vmem:[#allocation65_spill] sm:$0xff] %v14905_v35 }
 0x133   : > { %v14425_v37 = vpop.permute.xlu1 %5147 }
 0x134   : > { %20833 = vst [vmem:[#allocation30_spill] sm:$0xff] %v14425_v37  ;;  %v14896_v37 = vadd.s32 176, %v14432_v2 }
 0x136   : > { %v1011_v40 = vpop.permute.xlu0 %1010  ;;  %20867 = vst [vmem:[#allocation64_spill] sm:$0xff] %v14896_v37 }
 0x137   : > { %v1016_v48 = vpop.permute.xlu1 %1015 }
 0x13a   : > { %v1021_v60 = vpop.permute.xlu0 %1020 }
 0x13b   : > { %v1026_v9 = vpop.permute.xlu1 %1025 }
 0x16c   : > { %v879_v38 = vpop.f32.mrf.mxu0 }
 0x16d   : > { %v981_v39 = vpop.f32.mrf.mxu1 }
 0x16e   : > { %v982_v41 = vadd.f32 %v981_v39, %v879_v38  ;;  %v881_v42 = vpop.f32.mrf.mxu0  ;;  %v14461_v38 = vrot.slane %v14441_v20, %v14444_v21  ;;  %v14464_v39 = vadd.s32 376, %v14432_v2  ;;  %v14932_v21 = vadd.s32 160, %v14432_v2 }
 0x16f   : > { %v983_v43 = vpop.f32.mrf.mxu1 }
 0x170   : > { %v1028_v44 = vadd.f32 %v1011_v40, %v982_v41  ;;  %v984_v45 = vadd.f32 %v983_v43, %v881_v42  ;;  %v14469_v41 = vadd.s32 112, %v14432_v2  ;;  %vm1587_vm3 = vcmp.eq.s32.totalorder %v14451_v30, %v14461_v38  ;;  %20871 = vst [vmem:[#allocation68_spill] sm:$0xff] %v14932_v21 }
 0x171   : > { %v885_v46 = vpop.f32.mrf.mxu0  ;;  %v987_v47 = vpop.f32.mrf.mxu1  ;;  %vm1716_vm4 = vcmp.eq.s32.totalorder %v14464_v39, %v14455_v31  ;;  %vm1715_vm6 = vcmp.eq.s32.totalorder %v14464_v39, %v14461_v38 }
 0x172   : > { %v1036_v49 = vmax.f32 %v1028_v44, 0.0  ;;  %v1029_v50 = vadd.f32 %v1011_v40, %v984_v45  ;;  %v988_v51 = vadd.f32 %v987_v47, %v885_v46  ;;  %v1289_v44 = vld [vmem:[#allocation11] sm:$0xff]  ;;  %v14477_v45 = vadd.s32 368, %v14432_v2 }
 0x173   : > { %v887_v52 = vpop.f32.mrf.mxu0  ;;  %v989_v53 = vpop.f32.mrf.mxu1  ;;  %v14485_v47 = vadd.s32 104, %v14432_v2  ;;  %vm1584_vm5 = vcmp.eq.s32.totalorder %v14469_v41, %v14455_v31  ;;  %vm1583_vm7 = vcmp.eq.s32.totalorder %v14469_v41, %v14461_v38 }
 0x174   : > { %1044 = vst [vmem:[%s14428_s12] sm:$0xff] %v1036_v49  ;;  %v1037_v55 = vmax.f32 %v1029_v50, 0.0  ;;  %v1030_v56 = vadd.f32 %v1016_v48, %v988_v51  ;;  %v990_v57 = vadd.f32 %v989_v53, %v887_v52  ;;  %v14503_v49 = vadd.s32 96, %v14432_v2 }
 0x175   : > { %v891_v58 = vpop.f32.mrf.mxu0  ;;  %v993_v59 = vpop.f32.mrf.mxu1  ;;  %v20589_v50 = vmov 1.0   ;;  %vm1712_vm8 = vcmp.eq.s32.totalorder %v14477_v45, %v14455_v31  ;;  %v14512_v51 = vadd.s32 352, %v14432_v2  ;;  %vm1580_vm9 = vcmp.eq.s32.totalorder %v14485_v47, %v14455_v31 }
 0x176   : > { %1045 = vst [vmem:[%s14428_s12 + $0x8] sm:$0xff] %v1037_v55  ;;  %v1038_v61 = vmax.f32 %v1030_v56, 0.0  ;;  %v1031_v62 = vadd.f32 %v1016_v48, %v990_v57  ;;  %v994_v63 = vadd.f32 %v993_v59, %v891_v58  ;;  %v14494_v48 = vadd.s32 360, %v14432_v2 }
 0x177   : > { %v893_v0 = vpop.f32.mrf.mxu0  ;;  %v995_v1 = vpop.f32.mrf.mxu1  ;;  %vm1711_vm10 = vcmp.eq.s32.totalorder %v14477_v45, %v14461_v38  ;;  %v14521_v52 = vadd.s32 88, %v14432_v2  ;;  %vm1579_vm11 = vcmp.eq.s32.totalorder %v14485_v47, %v14461_v38  ;;  %v14530_v53 = vadd.s32 344, %v14432_v2 }
 0x178   : > { %1046 = vst [vmem:[%s14428_s12 + $0x10] sm:$0xff] %v1038_v61  ;;  %v1039_v3 = vmax.f32 %v1031_v62, 0.0  ;;  %v1032_v5 = vadd.f32 %v1021_v60, %v994_v63  ;;  %v996_v6 = vadd.f32 %v995_v1, %v893_v0  ;;  %vm1708_vm12 = vcmp.eq.s32.totalorder %v14494_v48, %v14455_v31 }
 0x179   : > { %v897_v7 = vpop.f32.mrf.mxu0  ;;  %v999_v8 = vpop.f32.mrf.mxu1  ;;  %vm1576_vm13 = vcmp.eq.s32.totalorder %v14503_v49, %v14455_v31  ;;  %vm1707_vm14 = vcmp.eq.s32.totalorder %v14494_v48, %v14461_v38  ;;  %vm1575_vm15 = vcmp.eq.s32.totalorder %v14503_v49, %v14461_v38  ;;  %vm1704_vm1 = vcmp.eq.s32.totalorder %v14512_v51, %v14455_v31 }
 0x17a   : > { %1047 = vst [vmem:[%s14428_s12 + $0x18] sm:$0xff] %v1039_v3  ;;  %v1040_v10 = vmax.f32 %v1032_v5, 0.0  ;;  %v1033_v11 = vadd.f32 %v1021_v60, %v996_v6  ;;  %v1000_v12 = vadd.f32 %v999_v8, %v897_v7  ;;  %v14548_v55 = vadd.s32 336, %v14432_v2 }
 0x17b   : > { %v899_v13 = vpop.f32.mrf.mxu0  ;;  %v1001_v14 = vpop.f32.mrf.mxu1  ;;  %v14557_v56 = vadd.s32 72, %v14432_v2  ;;  %v14566_v57 = vadd.s32 328, %v14432_v2  ;;  %v14575_v58 = vadd.s32 64, %v14432_v2  ;;  %v14584_v59 = vadd.s32 320, %v14432_v2 }
 0x17c   : > { %1048 = vst [vmem:[%s14428_s12 + $0x20] sm:$0xff] %v1040_v10  ;;  %v1041_v16 = vmax.f32 %v1033_v11, 0.0  ;;  %v1034_v17 = vadd.f32 %v1026_v9, %v1000_v12  ;;  %v1002_v18 = vadd.f32 %v1001_v14, %v899_v13  ;;  %v14593_v60 = vadd.s32 56, %v14432_v2 }
 0x17d   : > { %v1132_v19 = vpop.f32.mrf.mxu0  ;;  %v1203_v22 = vpop.f32.mrf.mxu1  ;;  %v14602_v61 = vadd.s32 312, %v14432_v2  ;;  %v14611_v62 = vadd.s32 48, %v14432_v2  ;;  %v14620_v63 = vadd.s32 304, %v14432_v2  ;;  %v14629_v0 = vadd.s32 40, %v14432_v2 }
 0x17e   : > { %1049 = vst [vmem:[%s14428_s12 + $0x28] sm:$0xff] %v1041_v16  ;;  %v1042_v23 = vmax.f32 %v1034_v17, 0.0  ;;  %v1035_v24 = vadd.f32 %v1026_v9, %v1002_v18  ;;  %v1133_v25 = vadd.f32 %v1132_v19, %v14419_v34  ;;  %v1204_v27 = vadd.f32 %v1203_v22, %v14419_v34 }
 0x17f   : > { %v1134_v26 = vpop.f32.mrf.mxu0  ;;  %v1205_v29 = vpop.f32.mrf.mxu1  ;;  %20841 = vst [vmem:[#allocation38_spill] sm:$0xff] %v14611_v62  ;;  %20842 = vst [vmem:[#allocation39_spill] sm:$0xff] %v14629_v0  ;;  %v14638_v1 = vadd.s32 296, %v14432_v2  ;;  %v14647_v3 = vadd.s32 32, %v14432_v2  ;;  %v14656_v5 = vadd.s32 288, %v14432_v2  ;;  %v14665_v6 = vadd.s32 24, %v14432_v2 }
 0x180   : > { %v1135_v28 = vadd.f32 %v1134_v26, %v14419_v34  ;;  %1050 = vst [vmem:[%s14428_s12 + $0x30] sm:$0xff] %v1042_v23  ;;  %v1043_v32 = vmax.f32 %v1035_v24, 0.0  ;;  %v1206_v33 = vadd.f32 %v1205_v29, %v14419_v34  ;;  %v14472_v42 = vmax.f32 %v1133_v25, 0.0 }
 0x181   : > { %v14479_v46 = vmax.f32 %v1204_v27, 0.0  ;;  %20843 = vst [vmem:[#allocation40_spill] sm:$0xff] %v14647_v3  ;;  %20844 = vst [vmem:[#allocation41_spill] sm:$0xff] %v14665_v6  ;;  %v14674_v7 = vadd.s32 280, %v14432_v2  ;;  %v14683_v8 = vadd.s32 16, %v14432_v2  ;;  %v14692_v9 = vadd.s32 272, %v14432_v2 }
 0x182   : > { %v14466_v40 = vmax.f32 %v1135_v28, 0.0  ;;  %1051 = vst [vmem:[%s14428_s12 + $0x38] sm:$0xff] %v1043_v32  ;;  %20838 = vst [vmem:[#allocation35_spill] sm:$0xff] %v14472_v42  ;;  %v14474_v43 = vmax.f32 %v1206_v33, 0.0  ;;  %v14701_v10 = vadd.s32 8, %v14432_v2  ;;  %v14710_v11 = vadd.s32 264, %v14432_v2 }
 0x183   : > { %20840 = vst [vmem:[#allocation37_spill] sm:$0xff] %v14479_v46  ;;  %20845 = vst [vmem:[#allocation42_spill] sm:$0xff] %v14683_v8  ;;  %v14725_v12 = vadd.s32 256, %v14432_v2  ;;  %v14734_v13 = vadd.s32 248, %v14432_v2  ;;  %v14743_v14 = vadd.s32 504, %v14432_v2  ;;  %v14752_v16 = vadd.s32 240, %v14432_v2 }
 0x184   : > { %20837 = vst [vmem:[#allocation34_spill] sm:$0xff] %v14466_v40  ;;  %20839 = vst [vmem:[#allocation36_spill] sm:$0xff] %v14474_v43  ;;  %1329 = vmatprep.subr.mxu1 %v14466_v40  ;;  %1400 = vmatprep.subr.mxu0 %v14474_v43  ;;  %v14761_v17 = vadd.s32 496, %v14432_v2  ;;  %v14770_v18 = vadd.s32 232, %v14432_v2  ;;  %v14779_v19 = vadd.s32 488, %v14432_v2  ;;  %v14788_v22 = vadd.s32 224, %v14432_v2 }
 0x185   : > { %1330 = vmatpush1.msra.mxu1 %v14472_v42  ;;  %1401 = vmatpush1.msra.mxu0 %v14479_v46  ;;  %20846 = vst [vmem:[#allocation43_spill] sm:$0xff] %v14692_v9  ;;  %20847 = vst [vmem:[#allocation44_spill] sm:$0xff] %v14701_v10  ;;  %v14797_v23 = vadd.s32 480, %v14432_v2  ;;  %v14806_v24 = vadd.s32 216, %v14432_v2  ;;  %v14815_v25 = vadd.s32 472, %v14432_v2  ;;  %v14824_v26 = vadd.s32 208, %v14432_v2 }
 0x186   : > { %10031 = vmatmul.mubr.msk.f32.vlgmr.msra.gmra.mxu1 %vm800_vm0, %v1289_v44  ;;  %10032 = vmatmul.mubr.msk.f32.vlgmr.msra.gmra.mxu0 %vm800_vm0, %v1289_v44  ;;  %20848 = vst [vmem:[#allocation45_spill] sm:$0xff] %v14710_v11  ;;  %20849 = vst [vmem:[#allocation46_spill] sm:$0xff] %v14725_v12  ;;  %v14833_v27 = vadd.s32 464, %v14432_v2  ;;  %v14842_v28 = vadd.s32 200, %v14432_v2  ;;  %v14851_v29 = vadd.s32 456, %v14432_v2  ;;  %v14860_v32 = vadd.s32 192, %v14432_v2 }
 0x187   : > { %10289 = vmatprep.subr.msk.mxu1 %vm1588_vm2, %v20589_v50  ;;  %10353 = vmatprep.subr.msk.mxu0 %vm1716_vm4, %v20589_v50  ;;  %vm1572_vm2 = vcmp.eq.s32.totalorder %v14521_v52, %v14455_v31  ;;  %vm1571_vm4 = vcmp.eq.s32.totalorder %v14521_v52, %v14461_v38  ;;  %20850 = vst [vmem:[#allocation47_spill] sm:$0xff] %v14734_v13  ;;  %20851 = vst [vmem:[#allocation48_spill] sm:$0xff] %v14743_v14  ;;  %v14869_v33 = vadd.s32 448, %v14432_v2  ;;  %s13900_s12 = scalar_lea.vmem %s13899_s8, 2048 }
 0x188   : > { %10290 = vmatpush1.msk.msra.mxu1 %vm1587_vm3, %v20589_v50  ;;  %10354 = vmatpush1.msk.msra.mxu0 %vm1715_vm6, %v20589_v50  ;;  %vm1703_vm3 = vcmp.eq.s32.totalorder %v14512_v51, %v14461_v38  ;;  %vm1568_vm6 = vcmp.eq.s32.totalorder %v14539_v54, %v14455_v31  ;;  %20852 = vst [vmem:[#allocation49_spill] sm:$0xff] %v14752_v16  ;;  %20853 = vst [vmem:[#allocation50_spill] sm:$0xff] %v14770_v18  ;;  %v14878_v44 = vadd.s32 184, %v14432_v2 }
 0x189   : > { %10291 = vmatprep.subr.msk.mxu1 %vm1584_vm5, %v20589_v50  ;;  %10355 = vmatprep.subr.msk.mxu0 %vm1712_vm8, %v20589_v50  ;;  %vm1700_vm5 = vcmp.eq.s32.totalorder %v14530_v53, %v14455_v31  ;;  %vm1567_vm8 = vcmp.eq.s32.totalorder %v14539_v54, %v14461_v38  ;;  %20854 = vst [vmem:[#allocation51_spill] sm:$0xff] %v14779_v19  ;;  %20855 = vst [vmem:[#allocation52_spill] sm:$0xff] %v14788_v22  ;;  %v14914_v42 = vadd.s32 168, %v14432_v2 }
 0x18a   : > { %10292 = vmatpush1.msk.msra.mxu1 %vm1583_vm7, %v20589_v50  ;;  %10356 = vmatpush1.msk.msra.mxu0 %vm1711_vm10, %v20589_v50  ;;  %vm1699_vm7 = vcmp.eq.s32.totalorder %v14530_v53, %v14461_v38  ;;  %vm1564_vm10 = vcmp.eq.s32.totalorder %v14557_v56, %v14455_v31  ;;  %20856 = vst [vmem:[#allocation53_spill] sm:$0xff] %v14797_v23  ;;  %20857 = vst [vmem:[#allocation54_spill] sm:$0xff] %v14806_v24  ;;  %v14923_v40 = vadd.s32 424, %v14432_v2 }
 0x18b   : > { %10293 = vmatprep.subr.msk.mxu1 %vm1580_vm9, %v20589_v50  ;;  %10357 = vmatprep.subr.msk.mxu0 %vm1708_vm12, %v20589_v50  ;;  %vm1696_vm9 = vcmp.eq.s32.totalorder %v14548_v55, %v14455_v31  ;;  %vm1563_vm12 = vcmp.eq.s32.totalorder %v14557_v56, %v14461_v38  ;;  %20858 = vst [vmem:[#allocation55_spill] sm:$0xff] %v14815_v25  ;;  %20859 = vst [vmem:[#allocation56_spill] sm:$0xff] %v14824_v26  ;;  %v14941_v46 = vadd.s32 416, %v14432_v2 }
 0x18c   : > { %10294 = vmatpush1.msk.msra.mxu1 %vm1579_vm11, %v20589_v50  ;;  %10358 = vmatpush1.msk.msra.mxu0 %vm1707_vm14, %v20589_v50  ;;  %vm1695_vm11 = vcmp.eq.s32.totalorder %v14548_v55, %v14461_v38  ;;  %vm1560_vm14 = vcmp.eq.s32.totalorder %v14575_v58, %v14455_v31  ;;  %20860 = vst [vmem:[#allocation57_spill] sm:$0xff] %v14833_v27  ;;  %20861 = vst [vmem:[#allocation58_spill] sm:$0xff] %v14842_v28  ;;  %v14983_v43 = vadd.s32 408, %v14432_v2 }
 0x18d   : > { %10295 = vmatprep.subr.msk.mxu1 %vm1576_vm13, %v20589_v50  ;;  %10359 = vmatprep.subr.msk.mxu0 %vm1704_vm1, %v20589_v50  ;;  %vm1692_vm13 = vcmp.eq.s32.totalorder %v14566_v57, %v14455_v31  ;;  %vm1559_vm1 = vcmp.eq.s32.totalorder %v14575_v58, %v14461_v38  ;;  %20862 = vst [vmem:[#allocation59_spill] sm:$0xff] %v14851_v29  ;;  %20863 = vst [vmem:[#allocation60_spill] sm:$0xff] %v14860_v32  ;;  %v14986_v34 = vadd.s32 144, %v14432_v2 }
 0x18e   : > { %10296 = vmatpush1.msk.msra.mxu1 %vm1575_vm15, %v20589_v50  ;;  %10360 = vmatpush1.msk.msra.mxu0 %vm1703_vm3, %v20589_v50  ;;  %vm1691_vm15 = vcmp.eq.s32.totalorder %v14566_v57, %v14461_v38  ;;  %vm1556_vm3 = vcmp.eq.s32.totalorder %v14593_v60, %v14455_v31  ;;  %20864 = vst [vmem:[#allocation61_spill] sm:$0xff] %v14869_v33  ;;  %20865 = vst [vmem:[#allocation62_spill] sm:$0xff] %v14878_v44 }
 0x18f   : > { %10297 = vmatprep.subr.msk.mxu1 %vm1572_vm2, %v20589_v50  ;;  %10361 = vmatprep.subr.msk.mxu0 %vm1700_vm5, %v20589_v50  ;;  %vm1688_vm2 = vcmp.eq.s32.totalorder %v14584_v59, %v14455_v31  ;;  %vm1555_vm5 = vcmp.eq.s32.totalorder %v14593_v60, %v14461_v38  ;;  %20869 = vst [vmem:[#allocation66_spill] sm:$0xff] %v14914_v42  ;;  %20870 = vst [vmem:[#allocation67_spill] sm:$0xff] %v14923_v40 }
 0x190   : > { %10298 = vmatpush1.msk.msra.mxu1 %vm1571_vm4, %v20589_v50  ;;  %10362 = vmatpush1.msk.msra.mxu0 %vm1699_vm7, %v20589_v50  ;;  %vm1687_vm4 = vcmp.eq.s32.totalorder %v14584_v59, %v14461_v38  ;;  %vm1552_vm7 = vcmp.eq.s32.totalorder %v14611_v62, %v14455_v31  ;;  %20872 = vst [vmem:[#allocation69_spill] sm:$0xff] %v14941_v46  ;;  %20874 = vst [vmem:[#allocation71_spill] sm:$0xff] %v14983_v43 }
 0x191   : > { %10299 = vmatprep.subr.msk.mxu1 %vm1568_vm6, %v20589_v50  ;;  %10363 = vmatprep.subr.msk.mxu0 %vm1696_vm9, %v20589_v50  ;;  %vm1684_vm6 = vcmp.eq.s32.totalorder %v14602_v61, %v14455_v31  ;;  %vm1551_vm9 = vcmp.eq.s32.totalorder %v14611_v62, %v14461_v38  ;;  %20875 = vst [vmem:[#allocation72_spill] sm:$0xff] %v14986_v34 }
 0x192   : > { %10300 = vmatpush1.msk.msra.mxu1 %vm1567_vm8, %v20589_v50  ;;  %10364 = vmatpush1.msk.msra.mxu0 %vm1695_vm11, %v20589_v50  ;;  %vm1683_vm8 = vcmp.eq.s32.totalorder %v14602_v61, %v14461_v38  ;;  %vm1548_vm11 = vcmp.eq.s32.totalorder %v14629_v0, %v14455_v31 }
 0x193   : > { %10301 = vmatprep.subr.msk.mxu1 %vm1564_vm10, %v20589_v50  ;;  %10365 = vmatprep.subr.msk.mxu0 %vm1692_vm13, %v20589_v50  ;;  %vm1680_vm10 = vcmp.eq.s32.totalorder %v14620_v63, %v14455_v31  ;;  %vm1547_vm13 = vcmp.eq.s32.totalorder %v14629_v0, %v14461_v38 }
 0x194   : > { %10302 = vmatpush1.msk.msra.mxu1 %vm1563_vm12, %v20589_v50  ;;  %10366 = vmatpush1.msk.msra.mxu0 %vm1691_vm15, %v20589_v50  ;;  %vm1679_vm12 = vcmp.eq.s32.totalorder %v14620_v63, %v14461_v38  ;;  %vm1544_vm15 = vcmp.eq.s32.totalorder %v14647_v3, %v14455_v31 }
 0x195   : > { %10303 = vmatprep.subr.msk.mxu1 %vm1560_vm14, %v20589_v50  ;;  %10367 = vmatprep.subr.msk.mxu0 %vm1688_vm2, %v20589_v50  ;;  %vm1676_vm14 = vcmp.eq.s32.totalorder %v14638_v1, %v14455_v31  ;;  %vm1543_vm2 = vcmp.eq.s32.totalorder %v14647_v3, %v14461_v38 }
 0x196   : > { %10304 = vmatpush1.msk.msra.mxu1 %vm1559_vm1, %v20589_v50  ;;  %10368 = vmatpush1.msk.msra.mxu0 %vm1687_vm4, %v20589_v50  ;;  %vm1675_vm1 = vcmp.eq.s32.totalorder %v14638_v1, %v14461_v38  ;;  %vm1540_vm4 = vcmp.eq.s32.totalorder %v14665_v6, %v14455_v31 }
 0x197   : > { %10305 = vmatprep.subr.msk.mxu1 %vm1556_vm3, %v20589_v50  ;;  %10369 = vmatprep.subr.msk.mxu0 %vm1684_vm6, %v20589_v50  ;;  %vm1672_vm3 = vcmp.eq.s32.totalorder %v14656_v5, %v14455_v31  ;;  %vm1539_vm6 = vcmp.eq.s32.totalorder %v14665_v6, %v14461_v38 }
 0x198   : > { %10306 = vmatpush1.msk.msra.mxu1 %vm1555_vm5, %v20589_v50  ;;  %10370 = vmatpush1.msk.msra.mxu0 %vm1683_vm8, %v20589_v50  ;;  %vm1671_vm5 = vcmp.eq.s32.totalorder %v14656_v5, %v14461_v38  ;;  %vm1536_vm8 = vcmp.eq.s32.totalorder %v14683_v8, %v14455_v31 }
 0x199   : > { %10307 = vmatprep.subr.msk.mxu1 %vm1552_vm7, %v20589_v50  ;;  %10371 = vmatprep.subr.msk.mxu0 %vm1680_vm10, %v20589_v50  ;;  %vm1668_vm7 = vcmp.eq.s32.totalorder %v14674_v7, %v14455_v31  ;;  %vm1535_vm10 = vcmp.eq.s32.totalorder %v14683_v8, %v14461_v38 }
 0x19a   : > { %10308 = vmatpush1.msk.msra.mxu1 %vm1551_vm9, %v20589_v50  ;;  %10372 = vmatpush1.msk.msra.mxu0 %vm1679_vm12, %v20589_v50  ;;  %vm1667_vm9 = vcmp.eq.s32.totalorder %v14674_v7, %v14461_v38  ;;  %vm1532_vm12 = vcmp.eq.s32.totalorder %v14701_v10, %v14455_v31 }
 0x19b   : > { %10309 = vmatprep.subr.msk.mxu1 %vm1548_vm11, %v20589_v50  ;;  %10373 = vmatprep.subr.msk.mxu0 %vm1676_vm14, %v20589_v50  ;;  %vm1664_vm11 = vcmp.eq.s32.totalorder %v14692_v9, %v14455_v31  ;;  %vm1531_vm14 = vcmp.eq.s32.totalorder %v14701_v10, %v14461_v38 }
 0x19c   : > { %10310 = vmatpush1.msk.msra.mxu1 %vm1547_vm13, %v20589_v50  ;;  %10374 = vmatpush1.msk.msra.mxu0 %vm1675_vm1, %v20589_v50  ;;  %vm1663_vm13 = vcmp.eq.s32.totalorder %v14692_v9, %v14461_v38  ;;  %vm1528_vm1 = vcmp.eq.s32.totalorder %v14432_v2, %v14455_v31 }
 0x19d   : > { %10311 = vmatprep.subr.msk.mxu1 %vm1544_vm15, %v20589_v50  ;;  %10375 = vmatprep.subr.msk.mxu0 %vm1672_vm3, %v20589_v50  ;;  %vm1660_vm15 = vcmp.eq.s32.totalorder %v14710_v11, %v14455_v31  ;;  %vm1527_vm3 = vcmp.eq.s32.totalorder %v14432_v2, %v14461_v38 }
 0x19e   : > { %10312 = vmatpush1.msk.msra.mxu1 %vm1543_vm2, %v20589_v50  ;;  %10376 = vmatpush1.msk.msra.mxu0 %vm1671_vm5, %v20589_v50  ;;  %vm1659_vm2 = vcmp.eq.s32.totalorder %v14710_v11, %v14461_v38  ;;  %vm1652_vm5 = vcmp.eq.s32.totalorder %v14734_v13, %v14455_v31 }
 0x19f   : > { %10313 = vmatprep.subr.msk.mxu1 %vm1540_vm4, %v20589_v50  ;;  %10377 = vmatprep.subr.msk.mxu0 %vm1668_vm7, %v20589_v50  ;;  %vm1656_vm4 = vcmp.eq.s32.totalorder %v14725_v12, %v14455_v31  ;;  %vm1651_vm7 = vcmp.eq.s32.totalorder %v14734_v13, %v14461_v38 }
 0x1a0   : > { %10314 = vmatpush1.msk.msra.mxu1 %vm1539_vm6, %v20589_v50  ;;  %10378 = vmatpush1.msk.msra.mxu0 %vm1667_vm9, %v20589_v50  ;;  %vm1655_vm6 = vcmp.eq.s32.totalorder %v14725_v12, %v14461_v38  ;;  %vm1648_vm9 = vcmp.eq.s32.totalorder %v14752_v16, %v14455_v31 }
 0x1a1   : > { %10315 = vmatprep.subr.msk.mxu1 %vm1536_vm8, %v20589_v50  ;;  %10379 = vmatprep.subr.msk.mxu0 %vm1664_vm11, %v20589_v50  ;;  %vm1780_vm8 = vcmp.eq.s32.totalorder %v14743_v14, %v14455_v31  ;;  %vm1647_vm11 = vcmp.eq.s32.totalorder %v14752_v16, %v14461_v38 }
 0x1a2   : > { %10316 = vmatpush1.msk.msra.mxu1 %vm1535_vm10, %v20589_v50  ;;  %10380 = vmatpush1.msk.msra.mxu0 %vm1663_vm13, %v20589_v50  ;;  %vm1779_vm10 = vcmp.eq.s32.totalorder %v14743_v14, %v14461_v38  ;;  %vm1644_vm13 = vcmp.eq.s32.totalorder %v14770_v18, %v14455_v31 }
 0x1a3   : > { %10317 = vmatprep.subr.msk.mxu1 %vm1532_vm12, %v20589_v50  ;;  %10381 = vmatprep.subr.msk.mxu0 %vm1660_vm15, %v20589_v50  ;;  %vm1776_vm12 = vcmp.eq.s32.totalorder %v14761_v17, %v14455_v31  ;;  %vm1643_vm15 = vcmp.eq.s32.totalorder %v14770_v18, %v14461_v38 }
 0x1a4   : > { %10318 = vmatpush1.msk.msra.mxu1 %vm1531_vm14, %v20589_v50  ;;  %10382 = vmatpush1.msk.msra.mxu0 %vm1659_vm2, %v20589_v50  ;;  %vm1775_vm14 = vcmp.eq.s32.totalorder %v14761_v17, %v14461_v38  ;;  %vm1640_vm2 = vcmp.eq.s32.totalorder %v14788_v22, %v14455_v31 }
 0x1a5   : > { %10319 = vmatprep.subr.msk.mxu1 %vm1528_vm1, %v20589_v50  ;;  %10383 = vmatprep.subr.msk.mxu0 %vm1656_vm4, %v20589_v50  ;;  %vm1772_vm1 = vcmp.eq.s32.totalorder %v14779_v19, %v14455_v31  ;;  %vm1639_vm4 = vcmp.eq.s32.totalorder %v14788_v22, %v14461_v38 }
 0x1a6   : > { %10320 = vmatpush1.msk.msra.mxu1 %vm1527_vm3, %v20589_v50  ;;  %10384 = vmatpush1.msk.msra.mxu0 %vm1655_vm6, %v20589_v50  ;;  %vm1771_vm3 = vcmp.eq.s32.totalorder %v14779_v19, %v14461_v38  ;;  %vm1636_vm6 = vcmp.eq.s32.totalorder %v14806_v24, %v14455_v31 }
 0x1a7   : > { %10321 = vmatprep.subr.msk.mxu1 %vm1652_vm5, %v20589_v50  ;;  %10385 = vmatprep.subr.msk.mxu0 %vm1780_vm8, %v20589_v50  ;;  %vm1768_vm5 = vcmp.eq.s32.totalorder %v14797_v23, %v14455_v31  ;;  %vm1635_vm8 = vcmp.eq.s32.totalorder %v14806_v24, %v14461_v38 }
 0x1a8   : > { %10322 = vmatpush2.msk.msra.mxu1 %vm1651_vm7, %v20589_v50  ;;  %10386 = vmatpush2.msk.msra.mxu0 %vm1779_vm10, %v20589_v50  ;;  %vm1767_vm7 = vcmp.eq.s32.totalorder %v14797_v23, %v14461_v38  ;;  %vm1632_vm10 = vcmp.eq.s32.totalorder %v14824_v26, %v14455_v31 }
 0x1a9   : > { %10323 = vmatprep.subr.msk.mxu1 %vm1648_vm9, %v20589_v50  ;;  %10387 = vmatprep.subr.msk.mxu0 %vm1776_vm12, %v20589_v50  ;;  %vm1764_vm9 = vcmp.eq.s32.totalorder %v14815_v25, %v14455_v31  ;;  %vm1631_vm12 = vcmp.eq.s32.totalorder %v14824_v26, %v14461_v38 }
 0x1aa   : > { %10324 = vmatpush2.msk.msra.mxu1 %vm1647_vm11, %v20589_v50  ;;  %10388 = vmatpush2.msk.msra.mxu0 %vm1775_vm14, %v20589_v50  ;;  %vm1763_vm11 = vcmp.eq.s32.totalorder %v14815_v25, %v14461_v38  ;;  %vm1628_vm14 = vcmp.eq.s32.totalorder %v14842_v28, %v14455_v31 }
 0x1ab   : > { %10325 = vmatprep.subr.msk.mxu1 %vm1644_vm13, %v20589_v50  ;;  %10389 = vmatprep.subr.msk.mxu0 %vm1772_vm1, %v20589_v50  ;;  %vm1760_vm13 = vcmp.eq.s32.totalorder %v14833_v27, %v14455_v31  ;;  %vm1627_vm1 = vcmp.eq.s32.totalorder %v14842_v28, %v14461_v38 }
 0x1ac   : > { %10326 = vmatpush2.msk.msra.mxu1 %vm1643_vm15, %v20589_v50  ;;  %10390 = vmatpush2.msk.msra.mxu0 %vm1771_vm3, %v20589_v50  ;;  %vm1759_vm15 = vcmp.eq.s32.totalorder %v14833_v27, %v14461_v38  ;;  %vm1624_vm3 = vcmp.eq.s32.totalorder %v14860_v32, %v14455_v31 }
 0x1ad   : > { %10327 = vmatprep.subr.msk.mxu1 %vm1640_vm2, %v20589_v50  ;;  %10391 = vmatprep.subr.msk.mxu0 %vm1768_vm5, %v20589_v50  ;;  %vm1756_vm2 = vcmp.eq.s32.totalorder %v14851_v29, %v14455_v31  ;;  %vm1623_vm5 = vcmp.eq.s32.totalorder %v14860_v32, %v14461_v38 }
 0x1ae   : > { %10328 = vmatpush2.msk.msra.mxu1 %vm1639_vm4, %v20589_v50  ;;  %10392 = vmatpush2.msk.msra.mxu0 %vm1767_vm7, %v20589_v50  ;;  %vm1755_vm4 = vcmp.eq.s32.totalorder %v14851_v29, %v14461_v38  ;;  %vm1620_vm7 = vcmp.eq.s32.totalorder %v14878_v44, %v14455_v31 }
 0x1af   : > { %10329 = vmatprep.subr.msk.mxu1 %vm1636_vm6, %v20589_v50  ;;  %10393 = vmatprep.subr.msk.mxu0 %vm1764_vm9, %v20589_v50  ;;  %vm1752_vm6 = vcmp.eq.s32.totalorder %v14869_v33, %v14455_v31  ;;  %vm1619_vm9 = vcmp.eq.s32.totalorder %v14878_v44, %v14461_v38 }
 0x1b0   : > { %10330 = vmatpush2.msk.msra.mxu1 %vm1635_vm8, %v20589_v50  ;;  %10394 = vmatpush2.msk.msra.mxu0 %vm1763_vm11, %v20589_v50  ;;  %vm1751_vm8 = vcmp.eq.s32.totalorder %v14869_v33, %v14461_v38  ;;  %vm1616_vm11 = vcmp.eq.s32.totalorder %v14896_v37, %v14455_v31 }
 0x1b1   : > { %10331 = vmatprep.subr.msk.mxu1 %vm1632_vm10, %v20589_v50  ;;  %10395 = vmatprep.subr.msk.mxu0 %vm1760_vm13, %v20589_v50  ;;  %vm1748_vm10 = vcmp.eq.s32.totalorder %v14887_v4, %v14455_v31  ;;  %vm1615_vm13 = vcmp.eq.s32.totalorder %v14896_v37, %v14461_v38 }
 0x1b2   : > { %10332 = vmatpush2.msk.msra.mxu1 %vm1631_vm12, %v20589_v50  ;;  %10396 = vmatpush2.msk.msra.mxu0 %vm1759_vm15, %v20589_v50  ;;  %vm1747_vm12 = vcmp.eq.s32.totalorder %v14887_v4, %v14461_v38  ;;  %vm1612_vm15 = vcmp.eq.s32.totalorder %v14914_v42, %v14455_v31 }
 0x1b3   : > { %10333 = vmatprep.subr.msk.mxu1 %vm1628_vm14, %v20589_v50  ;;  %10397 = vmatprep.subr.msk.mxu0 %vm1756_vm2, %v20589_v50  ;;  %vm1744_vm14 = vcmp.eq.s32.totalorder %v14905_v35, %v14455_v31  ;;  %vm1611_vm2 = vcmp.eq.s32.totalorder %v14914_v42, %v14461_v38 }
 0x1b4   : > { %10334 = vmatpush2.msk.msra.mxu1 %vm1627_vm1, %v20589_v50  ;;  %10398 = vmatpush2.msk.msra.mxu0 %vm1755_vm4, %v20589_v50  ;;  %vm1743_vm1 = vcmp.eq.s32.totalorder %v14905_v35, %v14461_v38  ;;  %vm1608_vm4 = vcmp.eq.s32.totalorder %v14932_v21, %v14455_v31 }
 0x1b5   : > { %10335 = vmatprep.subr.msk.mxu1 %vm1624_vm3, %v20589_v50  ;;  %10399 = vmatprep.subr.msk.mxu0 %vm1752_vm6, %v20589_v50  ;;  %vm1740_vm3 = vcmp.eq.s32.totalorder %v14923_v40, %v14455_v31  ;;  %vm1607_vm6 = vcmp.eq.s32.totalorder %v14932_v21, %v14461_v38  ;;  %v15002_v21 = vadd.s32 136, %v14432_v2 }
 0x1b6   : > { %10336 = vmatpush2.msk.msra.mxu1 %vm1623_vm5, %v20589_v50  ;;  %10400 = vmatpush2.msk.msra.mxu0 %vm1751_vm8, %v20589_v50  ;;  %vm1739_vm5 = vcmp.eq.s32.totalorder %v14923_v40, %v14461_v38  ;;  %vm1604_vm8 = vcmp.eq.s32.totalorder %v14950_v15, %v14455_v31  ;;  %v15032_v40 = vadd.s32 384, %v14432_v2 }
 0x1b7   : > { %10337 = vmatprep.subr.msk.mxu1 %vm1620_vm7, %v20589_v50  ;;  %10401 = vmatprep.subr.msk.mxu0 %vm1748_vm10, %v20589_v50  ;;  %vm1736_vm7 = vcmp.eq.s32.totalorder %v14941_v46, %v14455_v31  ;;  %vm1603_vm10 = vcmp.eq.s32.totalorder %v14950_v15, %v14461_v38  ;;  %20877 = vst [vmem:[#allocation74_spill] sm:$0xff] %v15002_v21  ;;  %v15011_v15 = vadd.s32 392, %v14432_v2 }
 0x1b8   : > { %10338 = vmatpush2.msk.msra.mxu1 %vm1619_vm9, %v20589_v50  ;;  %10402 = vmatpush2.msk.msra.mxu0 %vm1747_vm12, %v20589_v50  ;;  %vm1735_vm9 = vcmp.eq.s32.totalorder %v14941_v46, %v14461_v38  ;;  %v14993_v46 = vadd.s32 400, %v14432_v2  ;;  %vm1600_vm12 = vcmp.eq.s32.totalorder %v14986_v34, %v14455_v31  ;;  %20881 = vst [vmem:[#allocation78_spill] sm:$0xff] %v15032_v40 }
 0x1b9   : > { %10339 = vmatprep.subr.msk.mxu1 %vm1616_vm11, %v20589_v50  ;;  %10403 = vmatprep.subr.msk.mxu0 %vm1744_vm14, %v20589_v50  ;;  %vm1732_vm11 = vcmp.eq.s32.totalorder %v14983_v43, %v14455_v31  ;;  %vm1599_vm14 = vcmp.eq.s32.totalorder %v14986_v34, %v14461_v38  ;;  %20878 = vst [vmem:[#allocation75_spill] sm:$0xff] %v15011_v15  ;;  %v15023_v34 = vsub.s32 3, %v14432_v2 }
 0x1ba   : > { %10340 = vmatpush2.msk.msra.mxu1 %vm1615_vm13, %v20589_v50  ;;  %10404 = vmatpush2.msk.msra.mxu0 %vm1743_vm1, %v20589_v50  ;;  %20876 = vst [vmem:[#allocation73_spill] sm:$0xff] %v14993_v46  ;;  %vm1731_vm13 = vcmp.eq.s32.totalorder %v14983_v43, %v14461_v38  ;;  %vm1596_vm1 = vcmp.eq.s32.totalorder %v15002_v21, %v14455_v31  ;;  %v15020_v43 = vadd.s32 128, %v14432_v2 }
 0x1bb   : > { %10341 = vmatprep.subr.msk.mxu1 %vm1612_vm15, %v20589_v50  ;;  %10405 = vmatprep.subr.msk.mxu0 %vm1740_vm3, %v20589_v50  ;;  %vm1728_vm15 = vcmp.eq.s32.totalorder %v14993_v46, %v14455_v31  ;;  %20880 = vst [vmem:[#allocation77_spill] sm:$0xff] %v15023_v34  ;;  %vm1595_vm3 = vcmp.eq.s32.totalorder %v15002_v21, %v14461_v38 }
 0x1bc   : > { %10342 = vmatpush2.msk.msra.mxu1 %vm1611_vm2, %v20589_v50  ;;  %10406 = vmatpush2.msk.msra.mxu0 %vm1739_vm5, %v20589_v50  ;;  %vm1727_vm2 = vcmp.eq.s32.totalorder %v14993_v46, %v14461_v38  ;;  %20879 = vst [vmem:[#allocation76_spill] sm:$0xff] %v15020_v43  ;;  %vm1592_vm5 = vcmp.eq.s32.totalorder %v15020_v43, %v14455_v31 }
 0x1bd   : > { %10343 = vmatprep.subr.msk.mxu1 %vm1608_vm4, %v20589_v50  ;;  %10407 = vmatprep.subr.msk.mxu0 %vm1736_vm7, %v20589_v50  ;;  %vm1724_vm4 = vcmp.eq.s32.totalorder %v15011_v15, %v14455_v31  ;;  %v15042_v46 = vrot.slane %v14441_v20, %v15023_v34  ;;  %vm1591_vm7 = vcmp.eq.s32.totalorder %v15020_v43, %v14461_v38  ;;  %v15064_v34 = vsub.s32 2, %v14432_v2 }
 0x1be   : > { %10344 = vmatpush2.msk.msra.mxu1 %vm1607_vm6, %v20589_v50  ;;  %10408 = vmatpush2.msk.msra.mxu0 %vm1735_vm9, %v20589_v50  ;;  %vm1723_vm6 = vcmp.eq.s32.totalorder %v15011_v15, %v14461_v38  ;;  %vm1719_vm9 = vcmp.eq.s32.totalorder %v15032_v40, %v14461_v38 }
 0x1bf   : > { %10345 = vmatprep.subr.msk.mxu1 %vm1604_vm8, %v20589_v50  ;;  %10409 = vmatprep.subr.msk.mxu0 %vm1732_vm11, %v20589_v50  ;;  %vm1720_vm8 = vcmp.eq.s32.totalorder %v15032_v40, %v14455_v31  ;;  %vm1718_vm11 = vcmp.eq.s32.totalorder %v14464_v39, %v15042_v46  ;;  %v15061_v31 = vpop.f32.mrf.mxu0  ;;  %20883 = vst [vmem:[#allocation80_spill] sm:$0xff] %v15064_v34 }
 0x1c0   : > { %10346 = vmatpush2.msk.msra.mxu1 %vm1603_vm10, %v20589_v50  ;;  %10410 = vmatpush2.msk.msra.mxu0 %vm1731_vm13, %v20589_v50  ;;  %vm1590_vm10 = vcmp.eq.s32.totalorder %v14451_v30, %v15042_v46  ;;  %20882 = vst [vmem:[#allocation79_spill] sm:$0xff] %v15061_v31  ;;  %v15073_v42 = vrot.slane %v14441_v20, %v15064_v34  ;;  %v20888_v20 = vld [vmem:[#allocation64_spill] sm:$0xff] }
 0x1c1   : > { %10347 = vmatprep.subr.msk.mxu1 %vm1600_vm12, %v20589_v50  ;;  %10411 = vmatprep.subr.msk.mxu0 %vm1728_vm15, %v20589_v50  ;;  %v15066_v43 = vpop.f32.mrf.mxu0  ;;  %vm1586_vm13 = vcmp.eq.s32.totalorder %v14469_v41, %v15042_v46 }
 0x1c2   : > { %10348 = vmatpush2.msk.msra.mxu1 %vm1599_vm14, %v20589_v50  ;;  %10412 = vmatpush2.msk.msra.mxu0 %vm1727_vm2, %v20589_v50  ;;  %20884 = vst [vmem:[#allocation81_spill] sm:$0xff] %v15066_v43  ;;  %vm1589_vm12 = vcmp.eq.s32.totalorder %v14451_v30, %v15073_v42  ;;  %vm1717_vm14 = vcmp.eq.s32.totalorder %v14464_v39, %v15073_v42 }
 0x1c3   : > { %10349 = vmatprep.subr.msk.mxu1 %vm1596_vm1, %v20589_v50  ;;  %10413 = vmatprep.subr.msk.mxu0 %vm1724_vm4, %v20589_v50  ;;  %vm1585_vm15 = vcmp.eq.s32.totalorder %v14469_v41, %v15073_v42  ;;  %vm1714_vm1 = vcmp.eq.s32.totalorder %v14477_v45, %v15042_v46  ;;  %vm1582_vm2 = vcmp.eq.s32.totalorder %v14485_v47, %v15042_v46 }
 0x1c4   : > { %10350 = vmatpush2.msk.msra.mxu1 %vm1595_vm3, %v20589_v50  ;;  %10414 = vmatpush2.msk.msra.mxu0 %vm1723_vm6, %v20589_v50  ;;  %vm1713_vm3 = vcmp.eq.s32.totalorder %v14477_v45, %v15073_v42  ;;  %vm1581_vm4 = vcmp.eq.s32.totalorder %v14485_v47, %v15073_v42  ;;  %vm1578_vm6 = vcmp.eq.s32.totalorder %v14503_v49, %v15042_v46 }
 0x1c5   : > { %10351 = vmatprep.subr.msk.mxu1 %vm1592_vm5, %v20589_v50  ;;  %10415 = vmatprep.subr.msk.mxu0 %vm1720_vm8, %v20589_v50  ;;  %vm1710_vm5 = vcmp.eq.s32.totalorder %v14494_v48, %v15042_v46  ;;  %vm1577_vm8 = vcmp.eq.s32.totalorder %v14503_v49, %v15073_v42 }
 0x1c6   : > { %10352 = vmatpush2.msk.msra.mxu1 %vm1591_vm7, %v20589_v50  ;;  %10416 = vmatpush2.msk.msra.mxu0 %vm1719_vm9, %v20589_v50  ;;  %vm1709_vm7 = vcmp.eq.s32.totalorder %v14494_v48, %v15073_v42  ;;  %vm1706_vm9 = vcmp.eq.s32.totalorder %v14512_v51, %v15042_v46 }
 0x1c7   : > { %10417 = vmatprep.subr.msk.mxu1 %vm1590_vm10, %v20589_v50  ;;  %10481 = vmatprep.subr.msk.mxu0 %vm1718_vm11, %v20589_v50  ;;  %vm1574_vm10 = vcmp.eq.s32.totalorder %v14521_v52, %v15042_v46  ;;  %vm1705_vm11 = vcmp.eq.s32.totalorder %v14512_v51, %v15073_v42 }
 0x246   : > { %v1365_v38 = vpop.f32.mrf.mxu1  ;;  %v1436_v40 = vpop.f32.mrf.mxu0 }
 0x247   : > { %v15069_v15 = vadd.f32 %v1365_v38, %v14423_v36  ;;  %v15076_v35 = vadd.f32 %v1436_v40, %v14423_v36  ;;  %v20890_v40 = vld [vmem:[#allocation66_spill] sm:$0xff] }
 0x248   : > { %v1367_v21 = vpop.f32.mrf.mxu1  ;;  %v1438_v31 = vpop.f32.mrf.mxu0 }
 0x249   : > { %v1368_v50 = vadd.f32 %v1367_v21, %v14423_v36  ;;  %v1439_v37 = vadd.f32 %v1438_v31, %v14423_v36  ;;  %v20598_v43 = vmax.f32 %v15069_v15, 0.0  ;;  %v20597_v38 = vmax.f32 %v15076_v35, 0.0  ;;  %v20889_v21 = vld [vmem:[#allocation65_spill] sm:$0xff] }
 0x24a   : > { %v20885_v36 = vmov 1.0   ;;  %v20893_v31 = vld [vmem:[#allocation69_spill] sm:$0xff] }
 0x24b   : > { %v1442_v4 = vmax.f32 %v1368_v50, 0.0  ;;  %v1444_v44 = vmax.f32 %v1439_v37, 0.0  ;;  %v20887_v37 = vld [vmem:[#allocation63_spill] sm:$0xff] }
 0x24c   : > { %v20891_v50 = vld [vmem:[#allocation67_spill] sm:$0xff] }
 0x24d   : > { %2359 = vmatprep.mubr.f32.mxu1 %v1442_v4  ;;  %2430 = vmatprep.mubr.f32.mxu0 %v1444_v44 }
 0x24e   : > { %2360 = vmatmul.mubr.f32.vlgmr.msra.gmra.mxu1 %v20598_v43  ;;  %2431 = vmatmul.mubr.f32.vlgmr.msra.gmra.mxu0 %v20597_v38  ;;  %v20894_v38 = vld [vmem:[#allocation70_spill] sm:$0xff]  ;;  %v20895_v43 = vld [vmem:[#allocation71_spill] sm:$0xff] }
 0x24f   : > { %10418 = vmatpush1.msk.msra.mxu1 %vm1589_vm12, %v20885_v36  ;;  %2501 = vmatprep.mubr.f32.mxu1 %v1442_v4  ;;  %vm1573_vm12 = vcmp.eq.s32.totalorder %v14521_v52, %v15073_v42  ;;  %v20886_v4 = vld [vmem:[#allocation62_spill] sm:$0xff] }
 0x250   : > { %10419 = vmatprep.subr.msk.mxu1 %vm1586_vm13, %v20885_v36  ;;  %10482 = vmatpush1.msk.msra.mxu0 %vm1717_vm14, %v20885_v36  ;;  %vm1702_vm13 = vcmp.eq.s32.totalorder %v14530_v53, %v15042_v46  ;;  %vm1570_vm14 = vcmp.eq.s32.totalorder %v14539_v54, %v15042_v46 }
 0x251   : > { %10420 = vmatpush1.msk.msra.mxu1 %vm1585_vm15, %v20885_v36  ;;  %10483 = vmatprep.subr.msk.mxu0 %vm1714_vm1, %v20885_v36  ;;  %vm1701_vm15 = vcmp.eq.s32.totalorder %v14530_v53, %v15073_v42  ;;  %vm1569_vm1 = vcmp.eq.s32.totalorder %v14539_v54, %v15073_v42 }
 0x252   : > { %2572 = vmatprep.mubr.f32.mxu0 %v1444_v44  ;;  %10421 = vmatprep.subr.msk.mxu1 %vm1582_vm2, %v20885_v36  ;;  %vm1698_vm2 = vcmp.eq.s32.totalorder %v14548_v55, %v15042_v46  ;;  %v20892_v44 = vld [vmem:[#allocation68_spill] sm:$0xff] }
 0x253   : > { %10484 = vmatpush1.msk.msra.mxu0 %vm1713_vm3, %v20885_v36  ;;  %10422 = vmatpush1.msk.msra.mxu1 %vm1581_vm4, %v20885_v36  ;;  %vm1566_vm3 = vcmp.eq.s32.totalorder %v14557_v56, %v15042_v46  ;;  %vm1697_vm4 = vcmp.eq.s32.totalorder %v14548_v55, %v15073_v42 }
 0x254   : > { %10485 = vmatprep.subr.msk.mxu0 %vm1710_vm5, %v20885_v36  ;;  %10423 = vmatprep.subr.msk.mxu1 %vm1578_vm6, %v20885_v36  ;;  %vm1565_vm5 = vcmp.eq.s32.totalorder %v14557_v56, %v15073_v42  ;;  %vm1694_vm6 = vcmp.eq.s32.totalorder %v14566_v57, %v15042_v46 }
 0x255   : > { %10486 = vmatpush1.msk.msra.mxu0 %vm1709_vm7, %v20885_v36  ;;  %10424 = vmatpush1.msk.msra.mxu1 %vm1577_vm8, %v20885_v36  ;;  %vm1562_vm7 = vcmp.eq.s32.totalorder %v14575_v58, %v15042_v46  ;;  %vm1693_vm8 = vcmp.eq.s32.totalorder %v14566_v57, %v15073_v42 }
 0x256   : > { %10487 = vmatprep.subr.msk.mxu0 %vm1706_vm9, %v20885_v36  ;;  %10425 = vmatprep.subr.msk.mxu1 %vm1574_vm10, %v20885_v36  ;;  %vm1561_vm9 = vcmp.eq.s32.totalorder %v14575_v58, %v15073_v42  ;;  %vm1690_vm10 = vcmp.eq.s32.totalorder %v14584_v59, %v15042_v46 }
 0x257   : > { %10488 = vmatpush1.msk.msra.mxu0 %vm1705_vm11, %v20885_v36  ;;  %10426 = vmatpush1.msk.msra.mxu1 %vm1573_vm12, %v20885_v36  ;;  %vm1558_vm11 = vcmp.eq.s32.totalorder %v14593_v60, %v15042_v46  ;;  %vm1689_vm12 = vcmp.eq.s32.totalorder %v14584_v59, %v15073_v42 }
 0x258   : > { %10489 = vmatprep.subr.msk.mxu0 %vm1702_vm13, %v20885_v36  ;;  %10427 = vmatprep.subr.msk.mxu1 %vm1570_vm14, %v20885_v36  ;;  %vm1557_vm13 = vcmp.eq.s32.totalorder %v14593_v60, %v15073_v42  ;;  %vm1686_vm14 = vcmp.eq.s32.totalorder %v14602_v61, %v15042_v46 }
 0x259   : > { %10490 = vmatpush1.msk.msra.mxu0 %vm1701_vm15, %v20885_v36  ;;  %10428 = vmatpush1.msk.msra.mxu1 %vm1569_vm1, %v20885_v36  ;;  %vm1554_vm15 = vcmp.eq.s32.totalorder %v14611_v62, %v15042_v46  ;;  %vm1685_vm1 = vcmp.eq.s32.totalorder %v14602_v61, %v15073_v42 }
 0x25a   : > { %10491 = vmatprep.subr.msk.mxu0 %vm1698_vm2, %v20885_v36  ;;  %10429 = vmatprep.subr.msk.mxu1 %vm1566_vm3, %v20885_v36  ;;  %vm1553_vm2 = vcmp.eq.s32.totalorder %v14611_v62, %v15073_v42  ;;  %vm1682_vm3 = vcmp.eq.s32.totalorder %v14620_v63, %v15042_v46 }
 0x25b   : > { %10492 = vmatpush1.msk.msra.mxu0 %vm1697_vm4, %v20885_v36  ;;  %10430 = vmatpush1.msk.msra.mxu1 %vm1565_vm5, %v20885_v36  ;;  %vm1550_vm4 = vcmp.eq.s32.totalorder %v14629_v0, %v15042_v46  ;;  %vm1681_vm5 = vcmp.eq.s32.totalorder %v14620_v63, %v15073_v42 }
 0x25c   : > { %10493 = vmatprep.subr.msk.mxu0 %vm1694_vm6, %v20885_v36  ;;  %10431 = vmatprep.subr.msk.mxu1 %vm1562_vm7, %v20885_v36  ;;  %vm1549_vm6 = vcmp.eq.s32.totalorder %v14629_v0, %v15073_v42  ;;  %vm1678_vm7 = vcmp.eq.s32.totalorder %v14638_v1, %v15042_v46 }
 0x25d   : > { %10494 = vmatpush1.msk.msra.mxu0 %vm1693_vm8, %v20885_v36  ;;  %10432 = vmatpush1.msk.msra.mxu1 %vm1561_vm9, %v20885_v36  ;;  %vm1546_vm8 = vcmp.eq.s32.totalorder %v14647_v3, %v15042_v46  ;;  %vm1677_vm9 = vcmp.eq.s32.totalorder %v14638_v1, %v15073_v42 }
 0x25e   : > { %10495 = vmatprep.subr.msk.mxu0 %vm1690_vm10, %v20885_v36  ;;  %10433 = vmatprep.subr.msk.mxu1 %vm1558_vm11, %v20885_v36  ;;  %vm1545_vm10 = vcmp.eq.s32.totalorder %v14647_v3, %v15073_v42  ;;  %vm1674_vm11 = vcmp.eq.s32.totalorder %v14656_v5, %v15042_v46 }
 0x25f   : > { %10496 = vmatpush1.msk.msra.mxu0 %vm1689_vm12, %v20885_v36  ;;  %10434 = vmatpush1.msk.msra.mxu1 %vm1557_vm13, %v20885_v36  ;;  %vm1542_vm12 = vcmp.eq.s32.totalorder %v14665_v6, %v15042_v46  ;;  %vm1673_vm13 = vcmp.eq.s32.totalorder %v14656_v5, %v15073_v42 }
 0x260   : > { %10497 = vmatprep.subr.msk.mxu0 %vm1686_vm14, %v20885_v36  ;;  %10435 = vmatprep.subr.msk.mxu1 %vm1554_vm15, %v20885_v36  ;;  %vm1541_vm14 = vcmp.eq.s32.totalorder %v14665_v6, %v15073_v42  ;;  %vm1670_vm15 = vcmp.eq.s32.totalorder %v14674_v7, %v15042_v46 }
 0x261   : > { %10498 = vmatpush1.msk.msra.mxu0 %vm1685_vm1, %v20885_v36  ;;  %10436 = vmatpush1.msk.msra.mxu1 %vm1553_vm2, %v20885_v36  ;;  %vm1538_vm1 = vcmp.eq.s32.totalorder %v14683_v8, %v15042_v46  ;;  %vm1669_vm2 = vcmp.eq.s32.totalorder %v14674_v7, %v15073_v42 }
 0x262   : > { %10499 = vmatprep.subr.msk.mxu0 %vm1682_vm3, %v20885_v36  ;;  %10437 = vmatprep.subr.msk.mxu1 %vm1550_vm4, %v20885_v36  ;;  %vm1537_vm3 = vcmp.eq.s32.totalorder %v14683_v8, %v15073_v42  ;;  %vm1666_vm4 = vcmp.eq.s32.totalorder %v14692_v9, %v15042_v46 }
 0x263   : > { %10500 = vmatpush1.msk.msra.mxu0 %vm1681_vm5, %v20885_v36  ;;  %10438 = vmatpush1.msk.msra.mxu1 %vm1549_vm6, %v20885_v36  ;;  %vm1534_vm5 = vcmp.eq.s32.totalorder %v14701_v10, %v15042_v46  ;;  %vm1665_vm6 = vcmp.eq.s32.totalorder %v14692_v9, %v15073_v42 }
 0x264   : > { %10501 = vmatprep.subr.msk.mxu0 %vm1678_vm7, %v20885_v36  ;;  %10439 = vmatprep.subr.msk.mxu1 %vm1546_vm8, %v20885_v36  ;;  %vm1533_vm7 = vcmp.eq.s32.totalorder %v14701_v10, %v15073_v42  ;;  %vm1662_vm8 = vcmp.eq.s32.totalorder %v14710_v11, %v15042_v46 }
 0x265   : > { %10502 = vmatpush1.msk.msra.mxu0 %vm1677_vm9, %v20885_v36  ;;  %10440 = vmatpush1.msk.msra.mxu1 %vm1545_vm10, %v20885_v36  ;;  %vm1530_vm9 = vcmp.eq.s32.totalorder %v14432_v2, %v15042_v46  ;;  %vm1661_vm10 = vcmp.eq.s32.totalorder %v14710_v11, %v15073_v42 }
 0x266   : > { %10503 = vmatprep.subr.msk.mxu0 %vm1674_vm11, %v20885_v36  ;;  %10441 = vmatprep.subr.msk.mxu1 %vm1542_vm12, %v20885_v36  ;;  %vm1529_vm11 = vcmp.eq.s32.totalorder %v14432_v2, %v15073_v42  ;;  %vm1658_vm12 = vcmp.eq.s32.totalorder %v14725_v12, %v15042_v46 }
 0x267   : > { %10504 = vmatpush1.msk.msra.mxu0 %vm1673_vm13, %v20885_v36  ;;  %10442 = vmatpush1.msk.msra.mxu1 %vm1541_vm14, %v20885_v36  ;;  %vm1654_vm13 = vcmp.eq.s32.totalorder %v14734_v13, %v15042_v46  ;;  %vm1657_vm14 = vcmp.eq.s32.totalorder %v14725_v12, %v15073_v42 }
 0x268   : > { %10505 = vmatprep.subr.msk.mxu0 %vm1670_vm15, %v20885_v36  ;;  %10443 = vmatprep.subr.msk.mxu1 %vm1538_vm1, %v20885_v36  ;;  %vm1653_vm15 = vcmp.eq.s32.totalorder %v14734_v13, %v15073_v42  ;;  %vm1782_vm1 = vcmp.eq.s32.totalorder %v14743_v14, %v15042_v46 }
 0x269   : > { %10506 = vmatpush1.msk.msra.mxu0 %vm1669_vm2, %v20885_v36  ;;  %10444 = vmatpush1.msk.msra.mxu1 %vm1537_vm3, %v20885_v36  ;;  %vm1650_vm2 = vcmp.eq.s32.totalorder %v14752_v16, %v15042_v46  ;;  %vm1781_vm3 = vcmp.eq.s32.totalorder %v14743_v14, %v15073_v42 }
 0x26a   : > { %10507 = vmatprep.subr.msk.mxu0 %vm1666_vm4, %v20885_v36  ;;  %10445 = vmatprep.subr.msk.mxu1 %vm1534_vm5, %v20885_v36  ;;  %vm1649_vm4 = vcmp.eq.s32.totalorder %v14752_v16, %v15073_v42  ;;  %vm1778_vm5 = vcmp.eq.s32.totalorder %v14761_v17, %v15042_v46 }
 0x26b   : > { %10508 = vmatpush1.msk.msra.mxu0 %vm1665_vm6, %v20885_v36  ;;  %10446 = vmatpush1.msk.msra.mxu1 %vm1533_vm7, %v20885_v36  ;;  %vm1646_vm6 = vcmp.eq.s32.totalorder %v14770_v18, %v15042_v46  ;;  %vm1777_vm7 = vcmp.eq.s32.totalorder %v14761_v17, %v15073_v42 }
 0x26c   : > { %10509 = vmatprep.subr.msk.mxu0 %vm1662_vm8, %v20885_v36  ;;  %10447 = vmatprep.subr.msk.mxu1 %vm1530_vm9, %v20885_v36  ;;  %vm1645_vm8 = vcmp.eq.s32.totalorder %v14770_v18, %v15073_v42  ;;  %vm1774_vm9 = vcmp.eq.s32.totalorder %v14779_v19, %v15042_v46 }
 0x26d   : > { %10510 = vmatpush1.msk.msra.mxu0 %vm1661_vm10, %v20885_v36  ;;  %10448 = vmatpush1.msk.msra.mxu1 %vm1529_vm11, %v20885_v36  ;;  %vm1642_vm10 = vcmp.eq.s32.totalorder %v14788_v22, %v15042_v46  ;;  %vm1773_vm11 = vcmp.eq.s32.totalorder %v14779_v19, %v15073_v42 }
 0x26e   : > { %10511 = vmatprep.subr.msk.mxu0 %vm1658_vm12, %v20885_v36  ;;  %10449 = vmatprep.subr.msk.mxu1 %vm1654_vm13, %v20885_v36  ;;  %vm1641_vm12 = vcmp.eq.s32.totalorder %v14788_v22, %v15073_v42  ;;  %vm1770_vm13 = vcmp.eq.s32.totalorder %v14797_v23, %v15042_v46  ;;  %v15478_v22 = vld [vmem:[%s14314_s1] sm:$0xff] }
 0x26f   : > { %10512 = vmatpush1.msk.msra.mxu0 %vm1657_vm14, %v20885_v36  ;;  %10450 = vmatpush2.msk.msra.mxu1 %vm1653_vm15, %v20885_v36  ;;  %vm1638_vm14 = vcmp.eq.s32.totalorder %v14806_v24, %v15042_v46  ;;  %vm1769_vm15 = vcmp.eq.s32.totalorder %v14797_v23, %v15073_v42 }
 0x270   : > { %10513 = vmatprep.subr.msk.mxu0 %vm1782_vm1, %v20885_v36  ;;  %10451 = vmatprep.subr.msk.mxu1 %vm1650_vm2, %v20885_v36  ;;  %vm1637_vm1 = vcmp.eq.s32.totalorder %v14806_v24, %v15073_v42  ;;  %vm1766_vm2 = vcmp.eq.s32.totalorder %v14815_v25, %v15042_v46 }
 0x271   : > { %10514 = vmatpush2.msk.msra.mxu0 %vm1781_vm3, %v20885_v36  ;;  %10452 = vmatpush2.msk.msra.mxu1 %vm1649_vm4, %v20885_v36  ;;  %vm1634_vm3 = vcmp.eq.s32.totalorder %v14824_v26, %v15042_v46  ;;  %vm1765_vm4 = vcmp.eq.s32.totalorder %v14815_v25, %v15073_v42 }
 0x272   : > { %10515 = vmatprep.subr.msk.mxu0 %vm1778_vm5, %v20885_v36  ;;  %10453 = vmatprep.subr.msk.mxu1 %vm1646_vm6, %v20885_v36  ;;  %vm1633_vm5 = vcmp.eq.s32.totalorder %v14824_v26, %v15073_v42  ;;  %vm1762_vm6 = vcmp.eq.s32.totalorder %v14833_v27, %v15042_v46  ;;  %v20903_v26 = vld [vmem:[#allocation79_spill] sm:$0xff] }
 0x273   : > { %10516 = vmatpush2.msk.msra.mxu0 %vm1777_vm7, %v20885_v36  ;;  %10454 = vmatpush2.msk.msra.mxu1 %vm1645_vm8, %v20885_v36  ;;  %vm1630_vm7 = vcmp.eq.s32.totalorder %v14842_v28, %v15042_v46  ;;  %vm1761_vm8 = vcmp.eq.s32.totalorder %v14833_v27, %v15073_v42 }
 0x274   : > { %10517 = vmatprep.subr.msk.mxu0 %vm1774_vm9, %v20885_v36  ;;  %10455 = vmatprep.subr.msk.mxu1 %vm1642_vm10, %v20885_v36  ;;  %vm1629_vm9 = vcmp.eq.s32.totalorder %v14842_v28, %v15073_v42  ;;  %vm1758_vm10 = vcmp.eq.s32.totalorder %v14851_v29, %v15042_v46  ;;  %v20902_v28 = vld [vmem:[#allocation76_spill] sm:$0xff] }
 0x275   : > { %10518 = vmatpush2.msk.msra.mxu0 %vm1773_vm11, %v20885_v36  ;;  %10456 = vmatpush2.msk.msra.mxu1 %vm1641_vm12, %v20885_v36  ;;  %vm1626_vm11 = vcmp.eq.s32.totalorder %v14860_v32, %v15042_v46  ;;  %vm1757_vm12 = vcmp.eq.s32.totalorder %v14851_v29, %v15073_v42 }
 0x276   : > { %10519 = vmatprep.subr.msk.mxu0 %vm1770_vm13, %v20885_v36  ;;  %10457 = vmatprep.subr.msk.mxu1 %vm1638_vm14, %v20885_v36  ;;  %vm1625_vm13 = vcmp.eq.s32.totalorder %v14860_v32, %v15073_v42  ;;  %vm1754_vm14 = vcmp.eq.s32.totalorder %v14869_v33, %v15042_v46 }
 0x277   : > { %10520 = vmatpush2.msk.msra.mxu0 %vm1769_vm15, %v20885_v36  ;;  %10458 = vmatpush2.msk.msra.mxu1 %vm1637_vm1, %v20885_v36  ;;  %vm1622_vm15 = vcmp.eq.s32.totalorder %v20886_v4, %v15042_v46  ;;  %vm1753_vm1 = vcmp.eq.s32.totalorder %v14869_v33, %v15073_v42 }
 0x278   : > { %10521 = vmatprep.subr.msk.mxu0 %vm1766_vm2, %v20885_v36  ;;  %10459 = vmatprep.subr.msk.mxu1 %vm1634_vm3, %v20885_v36  ;;  %vm1621_vm2 = vcmp.eq.s32.totalorder %v20886_v4, %v15073_v42  ;;  %vm1750_vm3 = vcmp.eq.s32.totalorder %v20887_v37, %v15042_v46  ;;  %v20901_v4 = vld [vmem:[#allocation81_spill] sm:$0xff] }
 0x279   : > { %10522 = vmatpush2.msk.msra.mxu0 %vm1765_vm4, %v20885_v36  ;;  %10460 = vmatpush2.msk.msra.mxu1 %vm1633_vm5, %v20885_v36  ;;  %vm1618_vm4 = vcmp.eq.s32.totalorder %v20888_v20, %v15042_v46  ;;  %vm1749_vm5 = vcmp.eq.s32.totalorder %v20887_v37, %v15073_v42 }
 0x27a   : > { %10523 = vmatprep.subr.msk.mxu0 %vm1762_vm6, %v20885_v36  ;;  %10461 = vmatprep.subr.msk.mxu1 %vm1630_vm7, %v20885_v36  ;;  %vm1617_vm6 = vcmp.eq.s32.totalorder %v20888_v20, %v15073_v42  ;;  %vm1746_vm7 = vcmp.eq.s32.totalorder %v20889_v21, %v15042_v46  ;;  %v20900_v20 = vld [vmem:[#allocation28_spill] sm:$0xff] }
 0x27b   : > { %10524 = vmatpush2.msk.msra.mxu0 %vm1761_vm8, %v20885_v36  ;;  %10462 = vmatpush2.msk.msra.mxu1 %vm1629_vm9, %v20885_v36  ;;  %vm1614_vm8 = vcmp.eq.s32.totalorder %v20890_v40, %v15042_v46  ;;  %vm1745_vm9 = vcmp.eq.s32.totalorder %v20889_v21, %v15073_v42  ;;  %v1283_v32 = vadd.f32 %v20901_v4, %v20900_v20  ;;  %v20904_v4 = vld [vmem:[#allocation78_spill] sm:$0xff] }
 0x27c   : > { %10525 = vmatprep.subr.msk.mxu0 %vm1758_vm10, %v20885_v36  ;;  %10463 = vmatprep.subr.msk.mxu1 %vm1626_vm11, %v20885_v36  ;;  %vm1613_vm10 = vcmp.eq.s32.totalorder %v20890_v40, %v15073_v42  ;;  %vm1742_vm11 = vcmp.eq.s32.totalorder %v20891_v50, %v15042_v46  ;;  %v20898_v40 = vld [vmem:[#allocation74_spill] sm:$0xff]  ;;  %v1281_v24 = vadd.f32 %v20903_v26, %v20900_v20 }
 0x27d   : > { %10526 = vmatpush2.msk.msra.mxu0 %vm1757_vm12, %v20885_v36  ;;  %10464 = vmatpush2.msk.msra.mxu1 %vm1625_vm13, %v20885_v36  ;;  %vm1610_vm12 = vcmp.eq.s32.totalorder %v20892_v44, %v15042_v46  ;;  %vm1741_vm13 = vcmp.eq.s32.totalorder %v20891_v50, %v15073_v42  ;;  %v1286_v26 = vmax.f32 %v1283_v32, 0.0  ;;  %v1287_v32 = vld [vmem:[%s20908_s18] sm:$0xff] }
 0x27e   : > { %10527 = vmatprep.subr.msk.mxu0 %vm1754_vm14, %v20885_v36  ;;  %10465 = vmatprep.subr.msk.mxu1 %vm1622_vm15, %v20885_v36  ;;  %vm1609_vm14 = vcmp.eq.s32.totalorder %v20892_v44, %v15073_v42  ;;  %vm1738_vm15 = vcmp.eq.s32.totalorder %v20893_v31, %v15042_v46  ;;  %v20896_v44 = vld [vmem:[#allocation72_spill] sm:$0xff]  ;;  %v1285_v20 = vmax.f32 %v1281_v24, 0.0 }
 0x27f   : > { %10528 = vmatpush2.msk.msra.mxu0 %vm1753_vm1, %v20885_v36  ;;  %10466 = vmatpush2.msk.msra.mxu1 %vm1621_vm2, %v20885_v36  ;;  %vm1606_vm1 = vcmp.eq.s32.totalorder %v20894_v38, %v15042_v46  ;;  %vm1737_vm2 = vcmp.eq.s32.totalorder %v20893_v31, %v15073_v42 }
 0x280   : > { %10529 = vmatprep.subr.msk.mxu0 %vm1750_vm3, %v20885_v36  ;;  %10467 = vmatprep.subr.msk.mxu1 %vm1618_vm4, %v20885_v36  ;;  %vm1605_vm3 = vcmp.eq.s32.totalorder %v20894_v38, %v15073_v42  ;;  %vm1734_vm4 = vcmp.eq.s32.totalorder %v20895_v43, %v15042_v46  ;;  %v20897_v38 = vld [vmem:[#allocation73_spill] sm:$0xff] }
 0x281   : > { %10530 = vmatpush2.msk.msra.mxu0 %vm1749_vm5, %v20885_v36  ;;  %10468 = vmatpush2.msk.msra.mxu1 %vm1617_vm6, %v20885_v36  ;;  %vm1602_vm5 = vcmp.eq.s32.totalorder %v20896_v44, %v15042_v46  ;;  %vm1733_vm6 = vcmp.eq.s32.totalorder %v20895_v43, %v15073_v42 }
 0x282   : > { %10531 = vmatprep.subr.msk.mxu0 %vm1746_vm7, %v20885_v36  ;;  %10469 = vmatprep.subr.msk.mxu1 %vm1614_vm8, %v20885_v36  ;;  %vm1601_vm7 = vcmp.eq.s32.totalorder %v20896_v44, %v15073_v42  ;;  %vm1730_vm8 = vcmp.eq.s32.totalorder %v20897_v38, %v15042_v46  ;;  %v20899_v44 = vld [vmem:[#allocation75_spill] sm:$0xff] }
 0x283   : > { %10532 = vmatpush2.msk.msra.mxu0 %vm1745_vm9, %v20885_v36  ;;  %10470 = vmatpush2.msk.msra.mxu1 %vm1613_vm10, %v20885_v36  ;;  %vm1598_vm9 = vcmp.eq.s32.totalorder %v20898_v40, %v15042_v46  ;;  %vm1729_vm10 = vcmp.eq.s32.totalorder %v20897_v38, %v15073_v42 }
 0x284   : > { %10533 = vmatprep.subr.msk.mxu0 %vm1742_vm11, %v20885_v36  ;;  %10471 = vmatprep.subr.msk.mxu1 %vm1610_vm12, %v20885_v36  ;;  %vm1597_vm11 = vcmp.eq.s32.totalorder %v20898_v40, %v15073_v42  ;;  %vm1726_vm12 = vcmp.eq.s32.totalorder %v20899_v44, %v15042_v46  ;;  %v20909_v40 = vld [vmem:[#allocation36_spill] sm:$0xff] }
 0x285   : > { %10534 = vmatpush2.msk.msra.mxu0 %vm1741_vm13, %v20885_v36  ;;  %10472 = vmatpush2.msk.msra.mxu1 %vm1609_vm14, %v20885_v36  ;;  %vm1594_vm13 = vcmp.eq.s32.totalorder %v20902_v28, %v15042_v46  ;;  %vm1725_vm14 = vcmp.eq.s32.totalorder %v20899_v44, %v15073_v42 }
 0x286   : > { %10535 = vmatprep.subr.msk.mxu0 %vm1738_vm15, %v20885_v36  ;;  %10473 = vmatprep.subr.msk.mxu1 %vm1606_vm1, %v20885_v36  ;;  %vm1593_vm15 = vcmp.eq.s32.totalorder %v20902_v28, %v15073_v42  ;;  %vm1722_vm1 = vcmp.eq.s32.totalorder %v20904_v4, %v15042_v46  ;;  %v20905_v46 = vmax.f32 %v15069_v15, 0.0  ;;  %v20906_v28 = vmax.f32 %v15076_v35, 0.0  ;;  %v20910_v15 = vld [vmem:[#allocation32_spill] sm:$0xff]  ;;  %v20911_v35 = vld [vmem:[#allocation37_spill] sm:$0xff] }
 0x287   : > { %10536 = vmatpush2.msk.msra.mxu0 %vm1737_vm2, %v20885_v36  ;;  %10474 = vmatpush2.msk.msra.mxu1 %vm1605_vm3, %v20885_v36  ;;  %vm1721_vm2 = vcmp.eq.s32.totalorder %v20904_v4, %v15073_v42  ;;  %v20907_v42 = vmov 0.0   ;;  %v15483_v24 = vrot.slane %v15478_v22, %v20910_v15 }
 0x288   : > { %10537 = vmatprep.subr.msk.mxu0 %vm1734_vm4, %v20885_v36  ;;  %10475 = vmatprep.subr.msk.mxu1 %vm1602_vm5, %v20885_v36 }
 0x289   : > { %10538 = vmatpush2.msk.msra.mxu0 %vm1733_vm6, %v20885_v36  ;;  %10476 = vmatpush2.msk.msra.mxu1 %vm1601_vm7, %v20885_v36  ;;  %vm3318_vm3 = vcmp.eq.s32.totalorder %v14464_v39, %v15483_v24  ;;  %vm3310_vm5 = vcmp.eq.s32.totalorder %v14477_v45, %v15483_v24  ;;  %vm3302_vm7 = vcmp.eq.s32.totalorder %v14494_v48, %v15483_v24 }
 0x28a   : > { %10539 = vmatprep.subr.msk.mxu0 %vm1730_vm8, %v20885_v36  ;;  %10477 = vmatprep.subr.msk.mxu1 %vm1598_vm9, %v20885_v36  ;;  %vm3294_vm9 = vcmp.eq.s32.totalorder %v14512_v51, %v15483_v24 }
 0x28b   : > { %10540 = vmatpush2.msk.msra.mxu0 %vm1729_vm10, %v20885_v36  ;;  %10478 = vmatpush2.msk.msra.mxu1 %vm1597_vm11, %v20885_v36  ;;  %vm3286_vm11 = vcmp.eq.s32.totalorder %v14530_v53, %v15483_v24 }
 0x28c   : > { %10541 = vmatprep.subr.msk.mxu0 %vm1726_vm12, %v20885_v36  ;;  %10479 = vmatprep.subr.msk.mxu1 %vm1594_vm13, %v20885_v36  ;;  %vm3278_vm13 = vcmp.eq.s32.totalorder %v14548_v55, %v15483_v24 }
 0x28d   : > { %10542 = vmatpush2.msk.msra.mxu0 %vm1725_vm14, %v20885_v36  ;;  %10480 = vmatpush2.msk.msra.mxu1 %vm1593_vm15, %v20885_v36  ;;  %vm3270_vm15 = vcmp.eq.s32.totalorder %v14566_v57, %v15483_v24 }
 0x28e   : > { %10543 = vmatprep.subr.msk.mxu0 %vm1722_vm1, %v20885_v36  ;;  %2502 = vmatmul.mubr.f32.vlgmr.msra.gmra.mxu1 %v20905_v46  ;;  %v15500_v46 = vld [vmem:[#allocation11 + $0x8] sm:$0xff] }
 0x28f   : > { %10544 = vmatpush2.msk.msra.mxu0 %vm1721_vm2, %v20885_v36  ;;  %2654 = vmatprep.mubr.f32.mxu1 %v20907_v42  ;;  %vm3262_vm2 = vcmp.eq.s32.totalorder %v14584_v59, %v15483_v24 }
 0x290   : > { %2573 = vmatmul.mubr.f32.vlgmr.msra.gmra.mxu0 %v20906_v28  ;;  %2703 = vmatprep.subr.mxu0 %v1286_v26  ;;  %v1288_v28 = vld [vmem:[%s20908_s18 + $0x8] sm:$0xff]  ;;  %v20912_v26 = vld [vmem:[#allocation33_spill] sm:$0xff] }
 0x291   : > { %2704 = vmatpush1.msra.mxu0 %v1285_v20  ;;  %2737 = vmatprep.mubr.f32.mxu0 %v20907_v42  ;;  %v15496_v20 = vrot.slane %v15478_v22, %v20912_v26  ;;  %v9678_v26 = vld [vmem:[%s20830_s15 + $0x8] sm:$0xff] }
 0x292   : > { %2863 = vmatprep.subr.mxu0 %v20909_v40  ;;  %9686 = vperm.xlu1 %13760, %v9678_v26   ;;  %v10545_v26 = vld [vmem:[%s20908_s18 + $0x10] sm:$0xff] }
 0x293   : > { %vm3317_vm4 = vcmp.eq.s32.totalorder %v14464_v39, %v15496_v20  ;;  %vm3309_vm6 = vcmp.eq.s32.totalorder %v14477_v45, %v15496_v20  ;;  %vm3301_vm8 = vcmp.eq.s32.totalorder %v14494_v48, %v15496_v20  ;;  %vm3293_vm10 = vcmp.eq.s32.totalorder %v14512_v51, %v15496_v20 }
 0x294   : > { %10549 = vmatmul.mubr.msk.f32.vlgmr.msra.gmra.mxu0 %vm800_vm0, %v1287_v32  ;;  %vm3285_vm12 = vcmp.eq.s32.totalorder %v14530_v53, %v15496_v20  ;;  %vm3277_vm14 = vcmp.eq.s32.totalorder %v14548_v55, %v15496_v20  ;;  %vm3269_vm1 = vcmp.eq.s32.totalorder %v14566_v57, %v15496_v20  ;;  %v20913_v32 = vld [vmem:[#allocation77_spill] sm:$0xff] }
 0x295   : > { %2864 = vmatpush1.msra.mxu0 %v20911_v35  ;;  %2743 = vmatprep.mubr.f32.mxu0 %v20907_v42 }
 0x296   : > { %11130 = vmatprep.subr.msk.mxu0 %vm3318_vm3, %v20885_v36  ;;  %vm3261_vm3 = vcmp.eq.s32.totalorder %v14584_v59, %v15496_v20 }
 0x298   : > { %10550 = vmatmul.mubr.msk.f32.gmra.mxu0 %vm800_vm0, %v1288_v28  ;;  %v15693_v28 = vrot.slane %v15478_v22, %v20913_v32 }
 0x299   : > { %2897 = vmatprep.mubr.f32.mxu0 %v20907_v42 }
 0x29c   : > { %10553 = vmatmul.mubr.msk.f32.vlgmr.msra.gmra.mxu0 %vm800_vm0, %v15500_v46 }
 0x29d   : > { %11131 = vmatpush1.msk.msra.mxu0 %vm3317_vm4, %v20885_v36  ;;  %vm3254_vm4 = vcmp.eq.s32.totalorder %v14602_v61, %v15483_v24 }
 0x29e   : > { %11132 = vmatprep.subr.msk.mxu0 %vm3310_vm5, %v20885_v36  ;;  %vm3253_vm5 = vcmp.eq.s32.totalorder %v14602_v61, %v15496_v20 }
 0x29f   : > { %11133 = vmatpush1.msk.msra.mxu0 %vm3309_vm6, %v20885_v36  ;;  %vm3246_vm6 = vcmp.eq.s32.totalorder %v14620_v63, %v15483_v24 }
 0x2a0   : > { %11134 = vmatprep.subr.msk.mxu0 %vm3302_vm7, %v20885_v36  ;;  %vm3245_vm7 = vcmp.eq.s32.totalorder %v14620_v63, %v15496_v20 }
 0x2a1   : > { %11135 = vmatpush1.msk.msra.mxu0 %vm3301_vm8, %v20885_v36  ;;  %vm3238_vm8 = vcmp.eq.s32.totalorder %v14638_v1, %v15483_v24 }
 0x2a2   : > { %11136 = vmatprep.subr.msk.mxu0 %vm3294_vm9, %v20885_v36  ;;  %vm3237_vm9 = vcmp.eq.s32.totalorder %v14638_v1, %v15496_v20 }
 0x2a3   : > { %11137 = vmatpush1.msk.msra.mxu0 %vm3293_vm10, %v20885_v36  ;;  %vm3230_vm10 = vcmp.eq.s32.totalorder %v14656_v5, %v15483_v24 }
 0x2a4   : > { %11138 = vmatprep.subr.msk.mxu0 %vm3286_vm11, %v20885_v36  ;;  %vm3229_vm11 = vcmp.eq.s32.totalorder %v14656_v5, %v15496_v20 }
 0x2a5   : > { %11139 = vmatpush1.msk.msra.mxu0 %vm3285_vm12, %v20885_v36  ;;  %vm3222_vm12 = vcmp.eq.s32.totalorder %v14674_v7, %v15483_v24 }
 0x2a6   : > { %11140 = vmatprep.subr.msk.mxu0 %vm3278_vm13, %v20885_v36  ;;  %vm3221_vm13 = vcmp.eq.s32.totalorder %v14674_v7, %v15496_v20 }
 0x2a7   : > { %11141 = vmatpush1.msk.msra.mxu0 %vm3277_vm14, %v20885_v36  ;;  %vm3214_vm14 = vcmp.eq.s32.totalorder %v14692_v9, %v15483_v24 }
 0x2a8   : > { %11142 = vmatprep.subr.msk.mxu0 %vm3270_vm15, %v20885_v36  ;;  %vm3213_vm15 = vcmp.eq.s32.totalorder %v14692_v9, %v15496_v20 }
 0x2a9   : > { %11143 = vmatpush1.msk.msra.mxu0 %vm3269_vm1, %v20885_v36  ;;  %vm3206_vm1 = vcmp.eq.s32.totalorder %v14710_v11, %v15483_v24 }
 0x2aa   : > { %11144 = vmatprep.subr.msk.mxu0 %vm3262_vm2, %v20885_v36  ;;  %vm3205_vm2 = vcmp.eq.s32.totalorder %v14710_v11, %v15496_v20 }
 0x2ab   : > { %11145 = vmatpush1.msk.msra.mxu0 %vm3261_vm3, %v20885_v36  ;;  %vm3198_vm3 = vcmp.eq.s32.totalorder %v14725_v12, %v15483_v24 }
 0x2ac   : > { %11146 = vmatprep.subr.msk.mxu0 %vm3254_vm4, %v20885_v36  ;;  %vm3197_vm4 = vcmp.eq.s32.totalorder %v14725_v12, %v15496_v20 }
 0x2ad   : > { %11147 = vmatpush1.msk.msra.mxu0 %vm3253_vm5, %v20885_v36  ;;  %vm3446_vm5 = vcmp.eq.s32.totalorder %v14743_v14, %v15483_v24 }
 0x2ae   : > { %11148 = vmatprep.subr.msk.mxu0 %vm3246_vm6, %v20885_v36  ;;  %vm3445_vm6 = vcmp.eq.s32.totalorder %v14743_v14, %v15496_v20 }
 0x2af   : > { %11149 = vmatpush1.msk.msra.mxu0 %vm3245_vm7, %v20885_v36  ;;  %vm3438_vm7 = vcmp.eq.s32.totalorder %v14761_v17, %v15483_v24 }
 0x2b0   : > { %11150 = vmatprep.subr.msk.mxu0 %vm3238_vm8, %v20885_v36  ;;  %vm3437_vm8 = vcmp.eq.s32.totalorder %v14761_v17, %v15496_v20 }
 0x2b1   : > { %11151 = vmatpush1.msk.msra.mxu0 %vm3237_vm9, %v20885_v36  ;;  %vm3430_vm9 = vcmp.eq.s32.totalorder %v14779_v19, %v15483_v24 }
 0x2b2   : > { %11152 = vmatprep.subr.msk.mxu0 %vm3230_vm10, %v20885_v36  ;;  %vm3429_vm10 = vcmp.eq.s32.totalorder %v14779_v19, %v15496_v20 }
 0x2b3   : > { %11153 = vmatpush1.msk.msra.mxu0 %vm3229_vm11, %v20885_v36  ;;  %vm3422_vm11 = vcmp.eq.s32.totalorder %v14797_v23, %v15483_v24 }
 0x2b4   : > { %11154 = vmatprep.subr.msk.mxu0 %vm3222_vm12, %v20885_v36  ;;  %vm3421_vm12 = vcmp.eq.s32.totalorder %v14797_v23, %v15496_v20 }
 0x2b5   : > { %11155 = vmatpush1.msk.msra.mxu0 %vm3221_vm13, %v20885_v36  ;;  %vm3414_vm13 = vcmp.eq.s32.totalorder %v14815_v25, %v15483_v24 }
 0x2b6   : > { %11156 = vmatprep.subr.msk.mxu0 %vm3214_vm14, %v20885_v36  ;;  %vm3413_vm14 = vcmp.eq.s32.totalorder %v14815_v25, %v15496_v20 }
 0x2b7   : > { %11157 = vmatpush1.msk.msra.mxu0 %vm3213_vm15, %v20885_v36  ;;  %vm3406_vm15 = vcmp.eq.s32.totalorder %v14833_v27, %v15483_v24 }
 0x2b8   : > { %11158 = vmatprep.subr.msk.mxu0 %vm3206_vm1, %v20885_v36  ;;  %vm3405_vm1 = vcmp.eq.s32.totalorder %v14833_v27, %v15496_v20 }
 0x2b9   : > { %11159 = vmatpush1.msk.msra.mxu0 %vm3205_vm2, %v20885_v36  ;;  %vm3398_vm2 = vcmp.eq.s32.totalorder %v14851_v29, %v15483_v24 }
 0x2ba   : > { %11160 = vmatprep.subr.msk.mxu0 %vm3198_vm3, %v20885_v36  ;;  %vm3397_vm3 = vcmp.eq.s32.totalorder %v14851_v29, %v15496_v20 }
 0x2bb   : > { %11161 = vmatpush1.msk.msra.mxu0 %vm3197_vm4, %v20885_v36  ;;  %vm3390_vm4 = vcmp.eq.s32.totalorder %v14869_v33, %v15483_v24 }
 0x2bc   : > { %11162 = vmatprep.subr.msk.mxu0 %vm3446_vm5, %v20885_v36  ;;  %vm3389_vm5 = vcmp.eq.s32.totalorder %v14869_v33, %v15496_v20 }
 0x2bd   : > { %11163 = vmatpush2.msk.msra.mxu0 %vm3445_vm6, %v20885_v36  ;;  %vm3382_vm6 = vcmp.eq.s32.totalorder %v20887_v37, %v15483_v24 }
 0x2be   : > { %11164 = vmatprep.subr.msk.mxu0 %vm3438_vm7, %v20885_v36  ;;  %vm3381_vm7 = vcmp.eq.s32.totalorder %v20887_v37, %v15496_v20 }
 0x2bf   : > { %11165 = vmatpush2.msk.msra.mxu0 %vm3437_vm8, %v20885_v36  ;;  %vm3374_vm8 = vcmp.eq.s32.totalorder %v20889_v21, %v15483_v24 }
 0x2c0   : > { %11166 = vmatprep.subr.msk.mxu0 %vm3430_vm9, %v20885_v36  ;;  %vm3373_vm9 = vcmp.eq.s32.totalorder %v20889_v21, %v15496_v20 }
 0x2c1   : > { %11167 = vmatpush2.msk.msra.mxu0 %vm3429_vm10, %v20885_v36  ;;  %vm3366_vm10 = vcmp.eq.s32.totalorder %v20891_v50, %v15483_v24 }
 0x2c2   : > { %11168 = vmatprep.subr.msk.mxu0 %vm3422_vm11, %v20885_v36  ;;  %vm3365_vm11 = vcmp.eq.s32.totalorder %v20891_v50, %v15496_v20 }
 0x2c3   : > { %11169 = vmatpush2.msk.msra.mxu0 %vm3421_vm12, %v20885_v36  ;;  %vm3358_vm12 = vcmp.eq.s32.totalorder %v20893_v31, %v15483_v24 }
 0x2c4   : > { %11170 = vmatprep.subr.msk.mxu0 %vm3414_vm13, %v20885_v36  ;;  %vm3357_vm13 = vcmp.eq.s32.totalorder %v20893_v31, %v15496_v20 }
 0x2c5   : > { %11171 = vmatpush2.msk.msra.mxu0 %vm3413_vm14, %v20885_v36  ;;  %vm3350_vm14 = vcmp.eq.s32.totalorder %v20895_v43, %v15483_v24 }
 0x2c6   : > { %11172 = vmatprep.subr.msk.mxu0 %vm3406_vm15, %v20885_v36  ;;  %vm3349_vm15 = vcmp.eq.s32.totalorder %v20895_v43, %v15496_v20 }
 0x2c7   : > { %11173 = vmatpush2.msk.msra.mxu0 %vm3405_vm1, %v20885_v36  ;;  %vm3342_vm1 = vcmp.eq.s32.totalorder %v20897_v38, %v15483_v24 }
 0x2c8   : > { %11174 = vmatprep.subr.msk.mxu0 %vm3398_vm2, %v20885_v36  ;;  %vm3341_vm2 = vcmp.eq.s32.totalorder %v20897_v38, %v15496_v20 }
 0x2c9   : > { %11175 = vmatpush2.msk.msra.mxu0 %vm3397_vm3, %v20885_v36  ;;  %vm3334_vm3 = vcmp.eq.s32.totalorder %v20899_v44, %v15483_v24 }
 0x2ca   : > { %11176 = vmatprep.subr.msk.mxu0 %vm3390_vm4, %v20885_v36  ;;  %vm3333_vm4 = vcmp.eq.s32.totalorder %v20899_v44, %v15496_v20 }
 0x2cb   : > { %11177 = vmatpush2.msk.msra.mxu0 %vm3389_vm5, %v20885_v36  ;;  %vm3326_vm5 = vcmp.eq.s32.totalorder %v20904_v4, %v15483_v24 }
 0x2cc   : > { %11178 = vmatprep.subr.msk.mxu0 %vm3382_vm6, %v20885_v36  ;;  %vm3325_vm6 = vcmp.eq.s32.totalorder %v20904_v4, %v15496_v20 }
 0x2cd   : > { %11179 = vmatpush2.msk.msra.mxu0 %vm3381_vm7, %v20885_v36  ;;  %vm3320_vm7 = vcmp.eq.s32.totalorder %v14464_v39, %v15693_v28 }
 0x2ce   : > { %11180 = vmatprep.subr.msk.mxu0 %vm3374_vm8, %v20885_v36 }
 0x2cf   : > { %11181 = vmatpush2.msk.msra.mxu0 %vm3373_vm9, %v20885_v36  ;;  %vm3312_vm9 = vcmp.eq.s32.totalorder %v14477_v45, %v15693_v28 }
 0x2d0   : > { %11182 = vmatprep.subr.msk.mxu0 %vm3366_vm10, %v20885_v36 }
 0x2d1   : > { %11183 = vmatpush2.msk.msra.mxu0 %vm3365_vm11, %v20885_v36  ;;  %vm3304_vm11 = vcmp.eq.s32.totalorder %v14494_v48, %v15693_v28 }
 0x2d2   : > { %11184 = vmatprep.subr.msk.mxu0 %vm3358_vm12, %v20885_v36 }
 0x2d3   : > { %11185 = vmatpush2.msk.msra.mxu0 %vm3357_vm13, %v20885_v36  ;;  %vm3296_vm13 = vcmp.eq.s32.totalorder %v14512_v51, %v15693_v28 }
 0x2d4   : > { %11186 = vmatprep.subr.msk.mxu0 %vm3350_vm14, %v20885_v36 }
 0x2d5   : > { %11187 = vmatpush2.msk.msra.mxu0 %vm3349_vm15, %v20885_v36  ;;  %vm3062_vm15 = vcmp.eq.s32.totalorder %v14451_v30, %v15483_v24 }
 0x2d6   : > { %11188 = vmatprep.subr.msk.mxu0 %vm3342_vm1, %v20885_v36  ;;  %vm3288_vm1 = vcmp.eq.s32.totalorder %v14530_v53, %v15693_v28 }
 0x2d7   : > { %11189 = vmatpush2.msk.msra.mxu0 %vm3341_vm2, %v20885_v36  ;;  %vm3061_vm2 = vcmp.eq.s32.totalorder %v14451_v30, %v15496_v20 }
 0x2d8   : > { %11190 = vmatprep.subr.msk.mxu0 %vm3334_vm3, %v20885_v36 }
 0x2d9   : > { %11191 = vmatpush2.msk.msra.mxu0 %vm3333_vm4, %v20885_v36  ;;  %vm3054_vm4 = vcmp.eq.s32.totalorder %v14469_v41, %v15483_v24 }
 0x2da   : > { %11192 = vmatprep.subr.msk.mxu0 %vm3326_vm5, %v20885_v36  ;;  %vm3280_vm5 = vcmp.eq.s32.totalorder %v14548_v55, %v15693_v28 }
 0x2db   : > { %11193 = vmatpush2.msk.msra.mxu0 %vm3325_vm6, %v20885_v36  ;;  %vm3053_vm6 = vcmp.eq.s32.totalorder %v14469_v41, %v15496_v20 }
 0x2dc   : > { %11258 = vmatprep.subr.msk.mxu0 %vm3320_vm7, %v20885_v36 }
 0x30e   : > { %v2361_v15 = vpop.f32.mrf.mxu1  ;;  %v2432_v35 = vpop.f32.mrf.mxu0 }
 0x30f   : > { %v2433_v37 = vadd.f32 %v2432_v35, %v2361_v15  ;;  %v20921_v35 = vld [vmem:[#allocation49_spill] sm:$0xff] }
 0x310   : > { %v2363_v40 = vpop.f32.mrf.mxu1  ;;  %v2434_v4 = vpop.f32.mrf.mxu0 }
 0x311   : > { %v2435_v50 = vadd.f32 %v2434_v4, %v2363_v40  ;;  %v20919_v40 = vld [vmem:[#allocation35_spill] sm:$0xff] }
 0x34e   : > { %v2503_v32 = vpop.f32.mrf.mxu1 }
 0x350   : > { %v2574_v44 = vpop.f32.mrf.mxu0  ;;  %v2505_v38 = vpop.f32.mrf.mxu1 }
 0x351   : > { %v2575_v43 = vadd.f32 %v2574_v44, %v2503_v32  ;;  %v20917_v44 = vld [vmem:[#allocation34_spill] sm:$0xff] }
 0x352   : > { %v2576_v31 = vpop.f32.mrf.mxu0  ;;  %v20923_v32 = vld [vmem:[#allocation50_spill] sm:$0xff] }
 0x353   : > { %v2577_v21 = vadd.f32 %v2576_v31, %v2505_v38  ;;  %v2579_v18 = vmax.f32 %v2433_v37, %v2575_v43  ;;  %v10546_v43 = vld [vmem:[%s20908_s18 + $0x18] sm:$0xff] }
 0x354   : > { %v15703_v33 = vpop.f32.mrf.mxu0 }
 0x355   : > { %20914 = vst [vmem:[#allocation28_spill] sm:$0xff] %v15703_v33  ;;  %v2580_v29 = vmax.f32 %v2435_v50, %v2577_v21  ;;  %v20920_v21 = vld [vmem:[#allocation29_spill] sm:$0xff]  ;;  %v15726_v50 = vrot.slane %v15478_v22, %v15064_v34  ;;  %v20933_v33 = vld [vmem:[#allocation60_spill] sm:$0xff] }
 0x356   : > { %v15705_v27 = vpop.f32.mrf.mxu0  ;;  %v20934_v34 = vld [vmem:[#allocation69_spill] sm:$0xff] }
 0x357   : > { %20915 = vst [vmem:[#allocation81_spill] sm:$0xff] %v15705_v27  ;;  %2620 = vmatprep.subr.mxu1 %v2580_v29  ;;  %vm3319_vm8 = vcmp.eq.s32.totalorder %v14464_v39, %v15726_v50  ;;  %vm3311_vm10 = vcmp.eq.s32.totalorder %v14477_v45, %v15726_v50  ;;  %vm3303_vm12 = vcmp.eq.s32.totalorder %v14494_v48, %v15726_v50  ;;  %v20932_v27 = vld [vmem:[#allocation67_spill] sm:$0xff] }
 0x358   : > { %2621 = vmatpush1.msra.mxu1 %v2579_v18  ;;  %v15710_v16 = vpop.f32.mrf.mxu0  ;;  %vm3295_vm14 = vcmp.eq.s32.totalorder %v14512_v51, %v15726_v50  ;;  %vm3287_vm3 = vcmp.eq.s32.totalorder %v14530_v53, %v15726_v50  ;;  %vm3279_vm7 = vcmp.eq.s32.totalorder %v14548_v55, %v15726_v50 }
 0x359   : > { %20916 = vst [vmem:[#allocation79_spill] sm:$0xff] %v15710_v16  ;;  %10547 = vmatmul.mubr.msk.f32.vlgmr.msra.gmra.mxu1 %vm800_vm0, %v10545_v26  ;;  %2792 = vmatprep.subr.mxu1 %v20917_v44  ;;  %v20924_v26 = vld [vmem:[#allocation59_spill] sm:$0xff]  ;;  %v20931_v16 = vld [vmem:[#allocation58_spill] sm:$0xff] }
 0x35a   : > { %v15714_v38 = vpop.f32.mrf.mxu0  ;;  %2793 = vmatpush1.msra.mxu1 %v20919_v40  ;;  %2660 = vmatprep.mubr.f32.mxu1 %v20907_v42 }
 0x35b   : > { %20918 = vst [vmem:[#allocation34_spill] sm:$0xff] %v15714_v38  ;;  %11066 = vmatprep.subr.msk.mxu1 %vm3062_vm15, %v20885_v36  ;;  %vm3263_vm15 = vcmp.eq.s32.totalorder %v14584_v59, %v15726_v50  ;;  %v20930_v38 = vld [vmem:[#allocation65_spill] sm:$0xff] }
 0x35c   : > { %v2899_v37 = vpop.f32.mrf.mxu0 }
 0x35d   : > { %v2900_v29 = vadd.f32 %v2899_v37, %v20920_v21  ;;  %10548 = vmatmul.mubr.msk.f32.gmra.mxu1 %vm800_vm0, %v10546_v43  ;;  %v20925_v43 = vld [vmem:[#allocation52_spill] sm:$0xff]  ;;  %v20926_v37 = vld [vmem:[#allocation61_spill] sm:$0xff] }
 0x35e   : > { %v2901_v18 = vpop.f32.mrf.mxu0  ;;  %2826 = vmatprep.mubr.f32.mxu1 %v20907_v42 }
 0x35f   : > { %v2902_v31 = vadd.f32 %v2901_v18, %v20920_v21  ;;  %v15729_v4 = vmax.f32 %v2900_v29, 0.0  ;;  %v20927_v29 = vld [vmem:[#allocation54_spill] sm:$0xff]  ;;  %v20928_v18 = vld [vmem:[#allocation63_spill] sm:$0xff] }
 0x361   : > { %v15731_v15 = vmax.f32 %v2902_v31, 0.0  ;;  %10552 = vmatmul.mubr.msk.f32.vlgmr.msra.gmra.mxu1 %vm800_vm0, %v15500_v46  ;;  %v20922_v46 = vld [vmem:[#allocation57_spill] sm:$0xff]  ;;  %v20929_v31 = vld [vmem:[#allocation56_spill] sm:$0xff] }
 0x362   : > { %11067 = vmatpush1.msk.msra.mxu1 %vm3061_vm2, %v20885_v36  ;;  %vm3256_vm2 = vcmp.eq.s32.totalorder %v14602_v61, %v15693_v28 }
 0x363   : > { %4612 = vmatprep.mubr.f32.mxu0 %v15731_v15  ;;  %11068 = vmatprep.subr.msk.mxu1 %vm3054_vm4, %v20885_v36  ;;  %vm3255_vm4 = vcmp.eq.s32.totalorder %v14602_v61, %v15726_v50 }
 0x364   : > { %4613 = vmatmul.mubr.f32.vlgmr.msra.gmra.mxu0 %v15729_v4  ;;  %11069 = vmatpush1.msk.msra.mxu1 %vm3053_vm6, %v20885_v36  ;;  %vm3248_vm6 = vcmp.eq.s32.totalorder %v14620_v63, %v15693_v28 }
 0x365   : > { %11259 = vmatpush1.msk.msra.mxu0 %vm3319_vm8, %v20885_v36  ;;  %4754 = vmatprep.mubr.f32.mxu0 %v15731_v15  ;;  %vm3046_vm8 = vcmp.eq.s32.totalorder %v14485_v47, %v15483_v24 }
 0x366   : > { %11260 = vmatprep.subr.msk.mxu0 %vm3312_vm9, %v20885_v36  ;;  %vm3272_vm9 = vcmp.eq.s32.totalorder %v14566_v57, %v15693_v28  ;;  %11070 = vmatprep.subr.msk.mxu1 %vm3046_vm8, %v20885_v36  ;;  %vm3247_vm8 = vcmp.eq.s32.totalorder %v14620_v63, %v15726_v50 }
 0x367   : > { %11261 = vmatpush1.msk.msra.mxu0 %vm3311_vm10, %v20885_v36  ;;  %vm3045_vm10 = vcmp.eq.s32.totalorder %v14485_v47, %v15496_v20 }
 0x368   : > { %11262 = vmatprep.subr.msk.mxu0 %vm3304_vm11, %v20885_v36  ;;  %vm3271_vm11 = vcmp.eq.s32.totalorder %v14566_v57, %v15726_v50  ;;  %11071 = vmatpush1.msk.msra.mxu1 %vm3045_vm10, %v20885_v36  ;;  %vm3240_vm10 = vcmp.eq.s32.totalorder %v14638_v1, %v15693_v28 }
 0x369   : > { %11263 = vmatpush1.msk.msra.mxu0 %vm3303_vm12, %v20885_v36  ;;  %vm3038_vm12 = vcmp.eq.s32.totalorder %v14503_v49, %v15483_v24 }
 0x36a   : > { %11264 = vmatprep.subr.msk.mxu0 %vm3296_vm13, %v20885_v36  ;;  %vm3264_vm13 = vcmp.eq.s32.totalorder %v14584_v59, %v15693_v28  ;;  %11072 = vmatprep.subr.msk.mxu1 %vm3038_vm12, %v20885_v36  ;;  %vm3239_vm12 = vcmp.eq.s32.totalorder %v14638_v1, %v15726_v50 }
 0x36b   : > { %11265 = vmatpush1.msk.msra.mxu0 %vm3295_vm14, %v20885_v36  ;;  %vm3037_vm14 = vcmp.eq.s32.totalorder %v14503_v49, %v15496_v20 }
 0x36c   : > { %11266 = vmatprep.subr.msk.mxu0 %vm3288_vm1, %v20885_v36  ;;  %11073 = vmatpush1.msk.msra.mxu1 %vm3037_vm14, %v20885_v36  ;;  %vm3030_vm1 = vcmp.eq.s32.totalorder %v14521_v52, %v15483_v24  ;;  %vm3232_vm14 = vcmp.eq.s32.totalorder %v14656_v5, %v15693_v28 }
 0x36d   : > { %11267 = vmatpush1.msk.msra.mxu0 %vm3287_vm3, %v20885_v36  ;;  %11074 = vmatprep.subr.msk.mxu1 %vm3030_vm1, %v20885_v36  ;;  %vm3029_vm3 = vcmp.eq.s32.totalorder %v14521_v52, %v15496_v20  ;;  %vm3231_vm1 = vcmp.eq.s32.totalorder %v14656_v5, %v15726_v50 }
 0x36e   : > { %11268 = vmatprep.subr.msk.mxu0 %vm3280_vm5, %v20885_v36  ;;  %11075 = vmatpush1.msk.msra.mxu1 %vm3029_vm3, %v20885_v36  ;;  %vm3022_vm5 = vcmp.eq.s32.totalorder %v14539_v54, %v15483_v24  ;;  %vm3224_vm3 = vcmp.eq.s32.totalorder %v14674_v7, %v15693_v28 }
 0x36f   : > { %11269 = vmatpush1.msk.msra.mxu0 %vm3279_vm7, %v20885_v36  ;;  %11076 = vmatprep.subr.msk.mxu1 %vm3022_vm5, %v20885_v36  ;;  %vm3021_vm7 = vcmp.eq.s32.totalorder %v14539_v54, %v15496_v20  ;;  %vm3223_vm5 = vcmp.eq.s32.totalorder %v14674_v7, %v15726_v50 }
 0x370   : > { %11270 = vmatprep.subr.msk.mxu0 %vm3272_vm9, %v20885_v36  ;;  %11077 = vmatpush1.msk.msra.mxu1 %vm3021_vm7, %v20885_v36  ;;  %vm3014_vm9 = vcmp.eq.s32.totalorder %v14557_v56, %v15483_v24  ;;  %vm3216_vm7 = vcmp.eq.s32.totalorder %v14692_v9, %v15693_v28 }
 0x371   : > { %11271 = vmatpush1.msk.msra.mxu0 %vm3271_vm11, %v20885_v36  ;;  %11078 = vmatprep.subr.msk.mxu1 %vm3014_vm9, %v20885_v36  ;;  %vm3013_vm11 = vcmp.eq.s32.totalorder %v14557_v56, %v15496_v20  ;;  %vm3215_vm9 = vcmp.eq.s32.totalorder %v14692_v9, %v15726_v50 }
 0x372   : > { %11272 = vmatprep.subr.msk.mxu0 %vm3264_vm13, %v20885_v36  ;;  %11079 = vmatpush1.msk.msra.mxu1 %vm3013_vm11, %v20885_v36  ;;  %vm3006_vm13 = vcmp.eq.s32.totalorder %v14575_v58, %v15483_v24  ;;  %vm3208_vm11 = vcmp.eq.s32.totalorder %v14710_v11, %v15693_v28 }
 0x373   : > { %11273 = vmatpush1.msk.msra.mxu0 %vm3263_vm15, %v20885_v36  ;;  %11080 = vmatprep.subr.msk.mxu1 %vm3006_vm13, %v20885_v36  ;;  %vm3005_vm15 = vcmp.eq.s32.totalorder %v14575_v58, %v15496_v20  ;;  %vm3207_vm13 = vcmp.eq.s32.totalorder %v14710_v11, %v15726_v50 }
 0x374   : > { %11274 = vmatprep.subr.msk.mxu0 %vm3256_vm2, %v20885_v36  ;;  %11081 = vmatpush1.msk.msra.mxu1 %vm3005_vm15, %v20885_v36  ;;  %vm2998_vm2 = vcmp.eq.s32.totalorder %v14593_v60, %v15483_v24  ;;  %vm3200_vm15 = vcmp.eq.s32.totalorder %v14725_v12, %v15693_v28 }
 0x375   : > { %11275 = vmatpush1.msk.msra.mxu0 %vm3255_vm4, %v20885_v36  ;;  %11082 = vmatprep.subr.msk.mxu1 %vm2998_vm2, %v20885_v36  ;;  %vm2997_vm4 = vcmp.eq.s32.totalorder %v14593_v60, %v15496_v20  ;;  %vm3199_vm2 = vcmp.eq.s32.totalorder %v14725_v12, %v15726_v50 }
 0x376   : > { %11276 = vmatprep.subr.msk.mxu0 %vm3248_vm6, %v20885_v36  ;;  %11083 = vmatpush1.msk.msra.mxu1 %vm2997_vm4, %v20885_v36  ;;  %vm2990_vm6 = vcmp.eq.s32.totalorder %v14611_v62, %v15483_v24  ;;  %vm3448_vm4 = vcmp.eq.s32.totalorder %v14743_v14, %v15693_v28 }
 0x377   : > { %11277 = vmatpush1.msk.msra.mxu0 %vm3247_vm8, %v20885_v36  ;;  %11084 = vmatprep.subr.msk.mxu1 %vm2990_vm6, %v20885_v36  ;;  %vm2989_vm8 = vcmp.eq.s32.totalorder %v14611_v62, %v15496_v20  ;;  %vm3447_vm6 = vcmp.eq.s32.totalorder %v14743_v14, %v15726_v50 }
 0x378   : > { %11278 = vmatprep.subr.msk.mxu0 %vm3240_vm10, %v20885_v36  ;;  %11085 = vmatpush1.msk.msra.mxu1 %vm2989_vm8, %v20885_v36  ;;  %vm2982_vm10 = vcmp.eq.s32.totalorder %v14629_v0, %v15483_v24  ;;  %vm3440_vm8 = vcmp.eq.s32.totalorder %v14761_v17, %v15693_v28 }
 0x379   : > { %11279 = vmatpush1.msk.msra.mxu0 %vm3239_vm12, %v20885_v36  ;;  %11086 = vmatprep.subr.msk.mxu1 %vm2982_vm10, %v20885_v36  ;;  %vm2981_vm12 = vcmp.eq.s32.totalorder %v14629_v0, %v15496_v20  ;;  %vm3439_vm10 = vcmp.eq.s32.totalorder %v14761_v17, %v15726_v50 }
 0x37a   : > { %11280 = vmatprep.subr.msk.mxu0 %vm3232_vm14, %v20885_v36  ;;  %11087 = vmatpush1.msk.msra.mxu1 %vm2981_vm12, %v20885_v36  ;;  %vm2974_vm14 = vcmp.eq.s32.totalorder %v14647_v3, %v15483_v24  ;;  %vm3432_vm12 = vcmp.eq.s32.totalorder %v14779_v19, %v15693_v28 }
 0x37b   : > { %11281 = vmatpush1.msk.msra.mxu0 %vm3231_vm1, %v20885_v36  ;;  %11088 = vmatprep.subr.msk.mxu1 %vm2974_vm14, %v20885_v36  ;;  %vm2973_vm1 = vcmp.eq.s32.totalorder %v14647_v3, %v15496_v20  ;;  %vm3431_vm14 = vcmp.eq.s32.totalorder %v14779_v19, %v15726_v50 }
 0x37c   : > { %11282 = vmatprep.subr.msk.mxu0 %vm3224_vm3, %v20885_v36  ;;  %11089 = vmatpush1.msk.msra.mxu1 %vm2973_vm1, %v20885_v36  ;;  %vm2966_vm3 = vcmp.eq.s32.totalorder %v14665_v6, %v15483_v24  ;;  %vm3424_vm1 = vcmp.eq.s32.totalorder %v14797_v23, %v15693_v28 }
 0x37d   : > { %11283 = vmatpush1.msk.msra.mxu0 %vm3223_vm5, %v20885_v36  ;;  %11090 = vmatprep.subr.msk.mxu1 %vm2966_vm3, %v20885_v36  ;;  %vm2965_vm5 = vcmp.eq.s32.totalorder %v14665_v6, %v15496_v20  ;;  %vm3423_vm3 = vcmp.eq.s32.totalorder %v14797_v23, %v15726_v50 }
 0x37e   : > { %11284 = vmatprep.subr.msk.mxu0 %vm3216_vm7, %v20885_v36  ;;  %11091 = vmatpush1.msk.msra.mxu1 %vm2965_vm5, %v20885_v36  ;;  %vm2958_vm7 = vcmp.eq.s32.totalorder %v14683_v8, %v15483_v24  ;;  %vm3416_vm5 = vcmp.eq.s32.totalorder %v14815_v25, %v15693_v28 }
 0x37f   : > { %11285 = vmatpush1.msk.msra.mxu0 %vm3215_vm9, %v20885_v36  ;;  %11092 = vmatprep.subr.msk.mxu1 %vm2958_vm7, %v20885_v36  ;;  %vm2957_vm9 = vcmp.eq.s32.totalorder %v14683_v8, %v15496_v20  ;;  %vm3415_vm7 = vcmp.eq.s32.totalorder %v14815_v25, %v15726_v50 }
 0x380   : > { %11286 = vmatprep.subr.msk.mxu0 %vm3208_vm11, %v20885_v36  ;;  %11093 = vmatpush1.msk.msra.mxu1 %vm2957_vm9, %v20885_v36  ;;  %vm2950_vm11 = vcmp.eq.s32.totalorder %v14701_v10, %v15483_v24  ;;  %vm3408_vm9 = vcmp.eq.s32.totalorder %v20922_v46, %v15693_v28 }
 0x381   : > { %11287 = vmatpush1.msk.msra.mxu0 %vm3207_vm13, %v20885_v36  ;;  %11094 = vmatprep.subr.msk.mxu1 %vm2950_vm11, %v20885_v36  ;;  %vm2949_vm13 = vcmp.eq.s32.totalorder %v14701_v10, %v15496_v20  ;;  %vm3407_vm11 = vcmp.eq.s32.totalorder %v20922_v46, %v15726_v50  ;;  %v20943_v10 = vld [vmem:[#allocation68_spill] sm:$0xff] }
 0x382   : > { %11288 = vmatprep.subr.msk.mxu0 %vm3200_vm15, %v20885_v36  ;;  %11095 = vmatpush1.msk.msra.mxu1 %vm2949_vm13, %v20885_v36  ;;  %vm2942_vm15 = vcmp.eq.s32.totalorder %v14432_v2, %v15483_v24  ;;  %vm3400_vm13 = vcmp.eq.s32.totalorder %v20924_v26, %v15693_v28 }
 0x383   : > { %11289 = vmatpush1.msk.msra.mxu0 %vm3199_vm2, %v20885_v36  ;;  %11096 = vmatprep.subr.msk.mxu1 %vm2942_vm15, %v20885_v36  ;;  %vm2941_vm2 = vcmp.eq.s32.totalorder %v14432_v2, %v15496_v20  ;;  %vm3399_vm15 = vcmp.eq.s32.totalorder %v20924_v26, %v15726_v50 }
 0x384   : > { %11290 = vmatprep.subr.msk.mxu0 %vm3448_vm4, %v20885_v36  ;;  %11097 = vmatpush1.msk.msra.mxu1 %vm2941_vm2, %v20885_v36  ;;  %vm3190_vm4 = vcmp.eq.s32.totalorder %v14734_v13, %v15483_v24  ;;  %vm3392_vm2 = vcmp.eq.s32.totalorder %v20926_v37, %v15693_v28 }
 0x385   : > { %11291 = vmatpush2.msk.msra.mxu0 %vm3447_vm6, %v20885_v36  ;;  %11098 = vmatprep.subr.msk.mxu1 %vm3190_vm4, %v20885_v36  ;;  %vm3189_vm6 = vcmp.eq.s32.totalorder %v14734_v13, %v15496_v20  ;;  %vm3391_vm4 = vcmp.eq.s32.totalorder %v20926_v37, %v15726_v50 }
 0x386   : > { %11292 = vmatprep.subr.msk.mxu0 %vm3440_vm8, %v20885_v36  ;;  %11099 = vmatpush2.msk.msra.mxu1 %vm3189_vm6, %v20885_v36  ;;  %vm3182_vm8 = vcmp.eq.s32.totalorder %v20921_v35, %v15483_v24  ;;  %vm3384_vm6 = vcmp.eq.s32.totalorder %v20928_v18, %v15693_v28 }
 0x387   : > { %11293 = vmatpush2.msk.msra.mxu0 %vm3439_vm10, %v20885_v36  ;;  %11100 = vmatprep.subr.msk.mxu1 %vm3182_vm8, %v20885_v36  ;;  %vm3181_vm10 = vcmp.eq.s32.totalorder %v20921_v35, %v15496_v20  ;;  %vm3383_vm8 = vcmp.eq.s32.totalorder %v20928_v18, %v15726_v50  ;;  %v20942_v35 = vld [vmem:[#allocation75_spill] sm:$0xff] }
 0x388   : > { %11294 = vmatprep.subr.msk.mxu0 %vm3432_vm12, %v20885_v36  ;;  %11101 = vmatpush2.msk.msra.mxu1 %vm3181_vm10, %v20885_v36  ;;  %vm3174_vm12 = vcmp.eq.s32.totalorder %v20923_v32, %v15483_v24  ;;  %vm3376_vm10 = vcmp.eq.s32.totalorder %v20930_v38, %v15693_v28 }
 0x389   : > { %11295 = vmatpush2.msk.msra.mxu0 %vm3431_vm14, %v20885_v36  ;;  %11102 = vmatprep.subr.msk.mxu1 %vm3174_vm12, %v20885_v36  ;;  %vm3173_vm14 = vcmp.eq.s32.totalorder %v20923_v32, %v15496_v20  ;;  %vm3375_vm12 = vcmp.eq.s32.totalorder %v20930_v38, %v15726_v50  ;;  %v20940_v32 = vld [vmem:[#allocation73_spill] sm:$0xff] }
 0x38a   : > { %11296 = vmatprep.subr.msk.mxu0 %vm3424_vm1, %v20885_v36  ;;  %11103 = vmatpush2.msk.msra.mxu1 %vm3173_vm14, %v20885_v36  ;;  %vm3166_vm1 = vcmp.eq.s32.totalorder %v20925_v43, %v15483_v24  ;;  %vm3368_vm14 = vcmp.eq.s32.totalorder %v20932_v27, %v15693_v28 }
 0x38b   : > { %11297 = vmatpush2.msk.msra.mxu0 %vm3423_vm3, %v20885_v36  ;;  %11104 = vmatprep.subr.msk.mxu1 %vm3166_vm1, %v20885_v36  ;;  %vm3165_vm3 = vcmp.eq.s32.totalorder %v20925_v43, %v15496_v20  ;;  %vm3367_vm1 = vcmp.eq.s32.totalorder %v20932_v27, %v15726_v50  ;;  %v20939_v43 = vld [vmem:[#allocation64_spill] sm:$0xff] }
 0x38c   : > { %11298 = vmatprep.subr.msk.mxu0 %vm3416_vm5, %v20885_v36  ;;  %11105 = vmatpush2.msk.msra.mxu1 %vm3165_vm3, %v20885_v36  ;;  %vm3158_vm5 = vcmp.eq.s32.totalorder %v20927_v29, %v15483_v24  ;;  %vm3360_vm3 = vcmp.eq.s32.totalorder %v20934_v34, %v15693_v28 }
 0x38d   : > { %11299 = vmatpush2.msk.msra.mxu0 %vm3415_vm7, %v20885_v36  ;;  %11106 = vmatprep.subr.msk.mxu1 %vm3158_vm5, %v20885_v36  ;;  %vm3157_vm7 = vcmp.eq.s32.totalorder %v20927_v29, %v15496_v20  ;;  %vm3359_vm5 = vcmp.eq.s32.totalorder %v20934_v34, %v15726_v50  ;;  %v16050_v29 = vsub.s32 5, %v14432_v2 }
 0x38e   : > { %11300 = vmatprep.subr.msk.mxu0 %vm3408_vm9, %v20885_v36  ;;  %11107 = vmatpush2.msk.msra.mxu1 %vm3157_vm7, %v20885_v36  ;;  %vm3150_vm9 = vcmp.eq.s32.totalorder %v20929_v31, %v15483_v24 }
 0x38f   : > { %11301 = vmatpush2.msk.msra.mxu0 %vm3407_vm11, %v20885_v36  ;;  %11108 = vmatprep.subr.msk.mxu1 %vm3150_vm9, %v20885_v36  ;;  %vm3149_vm11 = vcmp.eq.s32.totalorder %v20929_v31, %v15496_v20  ;;  %v20936_v31 = vld [vmem:[#allocation71_spill] sm:$0xff]  ;;  %20937 = vst [vmem:[#allocation35_spill] sm:$0xff] %v16050_v29  ;;  %v16081_v13 = vrot.slane %v15478_v22, %v16050_v29  ;;  %v20944_v29 = vld [vmem:[#allocation78_spill] sm:$0xff] }
 0x390   : > { %11302 = vmatprep.subr.msk.mxu0 %vm3400_vm13, %v20885_v36  ;;  %11109 = vmatpush2.msk.msra.mxu1 %vm3149_vm11, %v20885_v36  ;;  %vm3142_vm13 = vcmp.eq.s32.totalorder %v20931_v16, %v15483_v24  ;;  %vm3352_vm7 = vcmp.eq.s32.totalorder %v20936_v31, %v15693_v28  ;;  %vm3351_vm9 = vcmp.eq.s32.totalorder %v20936_v31, %v15726_v50 }
 0x391   : > { %11303 = vmatpush2.msk.msra.mxu0 %vm3399_vm15, %v20885_v36  ;;  %11110 = vmatprep.subr.msk.mxu1 %vm3142_vm13, %v20885_v36  ;;  %vm3141_vm15 = vcmp.eq.s32.totalorder %v20931_v16, %v15496_v20  ;;  %v20935_v16 = vld [vmem:[#allocation62_spill] sm:$0xff]  ;;  %vm3344_vm11 = vcmp.eq.s32.totalorder %v20940_v32, %v15693_v28  ;;  %vm3343_vm13 = vcmp.eq.s32.totalorder %v20940_v32, %v15726_v50 }
 0x392   : > { %11304 = vmatprep.subr.msk.mxu0 %vm3392_vm2, %v20885_v36  ;;  %11111 = vmatpush2.msk.msra.mxu1 %vm3141_vm15, %v20885_v36  ;;  %vm3134_vm2 = vcmp.eq.s32.totalorder %v20933_v33, %v15483_v24  ;;  %vm3336_vm15 = vcmp.eq.s32.totalorder %v20942_v35, %v15693_v28 }
 0x393   : > { %11305 = vmatpush2.msk.msra.mxu0 %vm3391_vm4, %v20885_v36  ;;  %11112 = vmatprep.subr.msk.mxu1 %vm3134_vm2, %v20885_v36  ;;  %vm3133_vm4 = vcmp.eq.s32.totalorder %v20933_v33, %v15496_v20  ;;  %v16059_v33 = vsub.s32 4, %v14432_v2  ;;  %vm3335_vm2 = vcmp.eq.s32.totalorder %v20942_v35, %v15726_v50 }
 0x394   : > { %11306 = vmatprep.subr.msk.mxu0 %vm3384_vm6, %v20885_v36  ;;  %11113 = vmatpush2.msk.msra.mxu1 %vm3133_vm4, %v20885_v36  ;;  %vm3126_vm6 = vcmp.eq.s32.totalorder %v20935_v16, %v15483_v24  ;;  %vm3328_vm4 = vcmp.eq.s32.totalorder %v20944_v29, %v15693_v28 }
 0x395   : > { %11307 = vmatpush2.msk.msra.mxu0 %vm3383_vm8, %v20885_v36  ;;  %11114 = vmatprep.subr.msk.mxu1 %vm3126_vm6, %v20885_v36  ;;  %vm3125_vm8 = vcmp.eq.s32.totalorder %v20935_v16, %v15496_v20  ;;  %20938 = vst [vmem:[#allocation29_spill] sm:$0xff] %v16059_v33  ;;  %v20941_v16 = vld [vmem:[#allocation66_spill] sm:$0xff]  ;;  %vm3327_vm6 = vcmp.eq.s32.totalorder %v20944_v29, %v15726_v50 }
 0x396   : > { %11308 = vmatprep.subr.msk.mxu0 %vm3376_vm10, %v20885_v36  ;;  %11115 = vmatpush2.msk.msra.mxu1 %vm3125_vm8, %v20885_v36  ;;  %vm3118_vm10 = vcmp.eq.s32.totalorder %v20939_v43, %v15483_v24  ;;  %vm3322_vm8 = vcmp.eq.s32.totalorder %v14464_v39, %v16081_v13 }
 0x397   : > { %11309 = vmatpush2.msk.msra.mxu0 %vm3375_vm12, %v20885_v36  ;;  %11116 = vmatprep.subr.msk.mxu1 %vm3118_vm10, %v20885_v36  ;;  %vm3117_vm12 = vcmp.eq.s32.totalorder %v20939_v43, %v15496_v20  ;;  %v16091_v43 = vrot.slane %v15478_v22, %v16059_v33  ;;  %v20945_v22 = vld [vmem:[#allocation70_spill] sm:$0xff]  ;;  %v20946_v33 = vld [vmem:[#allocation72_spill] sm:$0xff] }
 0x398   : > { %11310 = vmatprep.subr.msk.mxu0 %vm3368_vm14, %v20885_v36  ;;  %11117 = vmatpush2.msk.msra.mxu1 %vm3117_vm12, %v20885_v36  ;;  %vm3110_vm14 = vcmp.eq.s32.totalorder %v20941_v16, %v15483_v24  ;;  %vm3314_vm12 = vcmp.eq.s32.totalorder %v14477_v45, %v16081_v13 }
 0x399   : > { %11311 = vmatpush2.msk.msra.mxu0 %vm3367_vm1, %v20885_v36  ;;  %11118 = vmatprep.subr.msk.mxu1 %vm3110_vm14, %v20885_v36  ;;  %vm3109_vm1 = vcmp.eq.s32.totalorder %v20941_v16, %v15496_v20  ;;  %vm3321_vm10 = vcmp.eq.s32.totalorder %v14464_v39, %v16091_v43  ;;  %vm3313_vm14 = vcmp.eq.s32.totalorder %v14477_v45, %v16091_v43 }
 0x39a   : > { %11312 = vmatprep.subr.msk.mxu0 %vm3360_vm3, %v20885_v36  ;;  %11119 = vmatpush2.msk.msra.mxu1 %vm3109_vm1, %v20885_v36  ;;  %vm3102_vm3 = vcmp.eq.s32.totalorder %v20943_v10, %v15483_v24  ;;  %vm3306_vm1 = vcmp.eq.s32.totalorder %v14494_v48, %v16081_v13 }
 0x39b   : > { %11313 = vmatpush2.msk.msra.mxu0 %vm3359_vm5, %v20885_v36  ;;  %11120 = vmatprep.subr.msk.mxu1 %vm3102_vm3, %v20885_v36  ;;  %vm3101_vm5 = vcmp.eq.s32.totalorder %v20943_v10, %v15496_v20  ;;  %vm3305_vm3 = vcmp.eq.s32.totalorder %v14494_v48, %v16091_v43 }
 0x39c   : > { %11314 = vmatprep.subr.msk.mxu0 %vm3352_vm7, %v20885_v36  ;;  %11121 = vmatpush2.msk.msra.mxu1 %vm3101_vm5, %v20885_v36  ;;  %vm3094_vm7 = vcmp.eq.s32.totalorder %v20945_v22, %v15483_v24  ;;  %vm3298_vm5 = vcmp.eq.s32.totalorder %v14512_v51, %v16081_v13 }
 0x39d   : > { %11315 = vmatpush2.msk.msra.mxu0 %vm3351_vm9, %v20885_v36  ;;  %11122 = vmatprep.subr.msk.mxu1 %vm3094_vm7, %v20885_v36  ;;  %vm3093_vm9 = vcmp.eq.s32.totalorder %v20945_v22, %v15496_v20  ;;  %v20947_v22 = vld [vmem:[#allocation74_spill] sm:$0xff]  ;;  %vm3297_vm7 = vcmp.eq.s32.totalorder %v14512_v51, %v16091_v43 }
 0x39e   : > { %11316 = vmatprep.subr.msk.mxu0 %vm3344_vm11, %v20885_v36  ;;  %11123 = vmatpush2.msk.msra.mxu1 %vm3093_vm9, %v20885_v36  ;;  %vm3086_vm11 = vcmp.eq.s32.totalorder %v20946_v33, %v15483_v24  ;;  %vm3064_vm9 = vcmp.eq.s32.totalorder %v14451_v30, %v15693_v28 }
 0x39f   : > { %11317 = vmatpush2.msk.msra.mxu0 %vm3343_vm13, %v20885_v36  ;;  %11124 = vmatprep.subr.msk.mxu1 %vm3086_vm11, %v20885_v36  ;;  %vm3085_vm13 = vcmp.eq.s32.totalorder %v20946_v33, %v15496_v20  ;;  %v20948_v33 = vld [vmem:[#allocation76_spill] sm:$0xff]  ;;  %vm3282_vm11 = vcmp.eq.s32.totalorder %v14548_v55, %v16081_v13 }
 0x3a0   : > { %11318 = vmatprep.subr.msk.mxu0 %vm3336_vm15, %v20885_v36  ;;  %vm3078_vm15 = vcmp.eq.s32.totalorder %v20947_v22, %v15483_v24  ;;  %11125 = vmatpush2.msk.msra.mxu1 %vm3085_vm13, %v20885_v36  ;;  %vm3274_vm13 = vcmp.eq.s32.totalorder %v14566_v57, %v16081_v13 }
 0x3a1   : > { %11319 = vmatpush2.msk.msra.mxu0 %vm3335_vm2, %v20885_v36  ;;  %vm3077_vm2 = vcmp.eq.s32.totalorder %v20947_v22, %v15496_v20  ;;  %11126 = vmatprep.subr.msk.mxu1 %vm3078_vm15, %v20885_v36  ;;  %vm3266_vm15 = vcmp.eq.s32.totalorder %v14584_v59, %v16081_v13 }
 0x3a2   : > { %11320 = vmatprep.subr.msk.mxu0 %vm3328_vm4, %v20885_v36  ;;  %vm3070_vm4 = vcmp.eq.s32.totalorder %v20948_v33, %v15483_v24  ;;  %11127 = vmatpush2.msk.msra.mxu1 %vm3077_vm2, %v20885_v36  ;;  %vm3258_vm2 = vcmp.eq.s32.totalorder %v14602_v61, %v16081_v13  ;;  %v16307_v24 = vsub.s32 7, %v14432_v2 }
 0x3a3   : > { %11321 = vmatpush2.msk.msra.mxu0 %vm3327_vm6, %v20885_v36  ;;  %vm3069_vm6 = vcmp.eq.s32.totalorder %v20948_v33, %v15496_v20  ;;  %11128 = vmatprep.subr.msk.mxu1 %vm3070_vm4, %v20885_v36  ;;  %vm3250_vm4 = vcmp.eq.s32.totalorder %v14620_v63, %v16081_v13  ;;  %v16313_v20 = vsub.s32 6, %v14432_v2  ;;  %v13761_v33 = vld [vmem:[%s14314_s1] sm:$0xff] }
 0x3a4   : > { %11386 = vmatprep.subr.msk.mxu0 %vm3322_vm8, %v20885_v36  ;;  %4755 = vmatmul.mubr.f32.vlgmr.msra.gmra.mxu0 %v15729_v4  ;;  %vm3290_vm8 = vcmp.eq.s32.totalorder %v14530_v53, %v16081_v13  ;;  %20949 = vst [vmem:[#allocation82_spill] sm:$0xff] %v16307_v24  ;;  %v16326_v22 = vrot.slane %v13761_v33, %v16307_v24 }
 0x3a5   : > { %11387 = vmatpush1.msk.msra.mxu0 %vm3321_vm10, %v20885_v36  ;;  %4896 = vmatprep.mubr.f32.mxu0 %v15731_v15  ;;  %vm3289_vm10 = vcmp.eq.s32.totalorder %v14530_v53, %v16091_v43  ;;  %20950 = vst [vmem:[#allocation83_spill] sm:$0xff] %v16313_v20  ;;  %v16332_v10 = vrot.slane %v13761_v33, %v16313_v20 }
 0x3a6   : > { %11388 = vmatprep.subr.msk.mxu0 %vm3314_vm12, %v20885_v36  ;;  %11129 = vmatpush2.msk.msra.mxu1 %vm3069_vm6, %v20885_v36  ;;  %vm3281_vm12 = vcmp.eq.s32.totalorder %v14548_v55, %v16091_v43  ;;  %vm3242_vm6 = vcmp.eq.s32.totalorder %v14638_v1, %v16081_v13  ;;  %20951 = vst [vmem:[#allocation84_spill] sm:$0xff] %v16326_v22 }
 0x3a7   : > { %11389 = vmatpush1.msk.msra.mxu0 %vm3313_vm14, %v20885_v36  ;;  %11194 = vmatprep.subr.msk.mxu1 %vm3064_vm9, %v20885_v36  ;;  %vm3273_vm14 = vcmp.eq.s32.totalorder %v14566_v57, %v16091_v43  ;;  %vm3233_vm9 = vcmp.eq.s32.totalorder %v14656_v5, %v16091_v43  ;;  %20952 = vst [vmem:[#allocation85_spill] sm:$0xff] %v16332_v10 }
 0x3a8   : > { %11390 = vmatprep.subr.msk.mxu0 %vm3306_vm1, %v20885_v36  ;;  %vm3265_vm1 = vcmp.eq.s32.totalorder %v14584_v59, %v16091_v43 }
 0x3a9   : > { %11391 = vmatpush1.msk.msra.mxu0 %vm3305_vm3, %v20885_v36  ;;  %vm3257_vm3 = vcmp.eq.s32.totalorder %v14602_v61, %v16091_v43 }
 0x3aa   : > { %11392 = vmatprep.subr.msk.mxu0 %vm3298_vm5, %v20885_v36  ;;  %vm3249_vm5 = vcmp.eq.s32.totalorder %v14620_v63, %v16091_v43 }
 0x3ab   : > { %11393 = vmatpush1.msk.msra.mxu0 %vm3297_vm7, %v20885_v36  ;;  %vm3241_vm7 = vcmp.eq.s32.totalorder %v14638_v1, %v16091_v43 }
 0x3ac   : > { %11394 = vmatprep.subr.msk.mxu0 %vm3290_vm8, %v20885_v36  ;;  %vm3234_vm8 = vcmp.eq.s32.totalorder %v14656_v5, %v16081_v13 }
 0x3ad   : > { %11395 = vmatpush1.msk.msra.mxu0 %vm3289_vm10, %v20885_v36  ;;  %vm3226_vm10 = vcmp.eq.s32.totalorder %v14674_v7, %v16081_v13 }
 0x3ae   : > { %11396 = vmatprep.subr.msk.mxu0 %vm3282_vm11, %v20885_v36  ;;  %vm3225_vm11 = vcmp.eq.s32.totalorder %v14674_v7, %v16091_v43 }
 0x3af   : > { %11397 = vmatpush1.msk.msra.mxu0 %vm3281_vm12, %v20885_v36  ;;  %vm3218_vm12 = vcmp.eq.s32.totalorder %v14692_v9, %v16081_v13 }
 0x3b0   : > { %11398 = vmatprep.subr.msk.mxu0 %vm3274_vm13, %v20885_v36  ;;  %vm3217_vm13 = vcmp.eq.s32.totalorder %v14692_v9, %v16091_v43 }
 0x3b1   : > { %11399 = vmatpush1.msk.msra.mxu0 %vm3273_vm14, %v20885_v36  ;;  %vm3210_vm14 = vcmp.eq.s32.totalorder %v14710_v11, %v16081_v13 }
 0x3b2   : > { %11400 = vmatprep.subr.msk.mxu0 %vm3266_vm15, %v20885_v36  ;;  %vm3209_vm15 = vcmp.eq.s32.totalorder %v14710_v11, %v16091_v43 }
 0x3b3   : > { %11401 = vmatpush1.msk.msra.mxu0 %vm3265_vm1, %v20885_v36  ;;  %vm3202_vm1 = vcmp.eq.s32.totalorder %v14725_v12, %v16081_v13 }
 0x3b4   : > { %11402 = vmatprep.subr.msk.mxu0 %vm3258_vm2, %v20885_v36  ;;  %vm3201_vm2 = vcmp.eq.s32.totalorder %v14725_v12, %v16091_v43 }
 0x3b5   : > { %11403 = vmatpush1.msk.msra.mxu0 %vm3257_vm3, %v20885_v36  ;;  %vm3450_vm3 = vcmp.eq.s32.totalorder %v14743_v14, %v16081_v13 }
 0x3b6   : > { %11404 = vmatprep.subr.msk.mxu0 %vm3250_vm4, %v20885_v36  ;;  %vm3449_vm4 = vcmp.eq.s32.totalorder %v14743_v14, %v16091_v43 }
 0x3b7   : > { %11405 = vmatpush1.msk.msra.mxu0 %vm3249_vm5, %v20885_v36  ;;  %vm3442_vm5 = vcmp.eq.s32.totalorder %v14761_v17, %v16081_v13 }
 0x3b8   : > { %11406 = vmatprep.subr.msk.mxu0 %vm3242_vm6, %v20885_v36  ;;  %vm3441_vm6 = vcmp.eq.s32.totalorder %v14761_v17, %v16091_v43 }
 0x3b9   : > { %11407 = vmatpush1.msk.msra.mxu0 %vm3241_vm7, %v20885_v36  ;;  %vm3434_vm7 = vcmp.eq.s32.totalorder %v14779_v19, %v16081_v13 }
 0x3ba   : > { %11408 = vmatprep.subr.msk.mxu0 %vm3234_vm8, %v20885_v36  ;;  %vm3433_vm8 = vcmp.eq.s32.totalorder %v14779_v19, %v16091_v43 }
 0x3bb   : > { %11409 = vmatpush1.msk.msra.mxu0 %vm3233_vm9, %v20885_v36  ;;  %vm3426_vm9 = vcmp.eq.s32.totalorder %v14797_v23, %v16081_v13 }
 0x3bc   : > { %11410 = vmatprep.subr.msk.mxu0 %vm3226_vm10, %v20885_v36  ;;  %vm3425_vm10 = vcmp.eq.s32.totalorder %v14797_v23, %v16091_v43 }
 0x3bd   : > { %11411 = vmatpush1.msk.msra.mxu0 %vm3225_vm11, %v20885_v36  ;;  %vm3418_vm11 = vcmp.eq.s32.totalorder %v14815_v25, %v16081_v13 }
 0x3be   : > { %11412 = vmatprep.subr.msk.mxu0 %vm3218_vm12, %v20885_v36  ;;  %vm3417_vm12 = vcmp.eq.s32.totalorder %v14815_v25, %v16091_v43 }
 0x3bf   : > { %11413 = vmatpush1.msk.msra.mxu0 %vm3217_vm13, %v20885_v36  ;;  %vm3410_vm13 = vcmp.eq.s32.totalorder %v20922_v46, %v16081_v13 }
 0x3c0   : > { %11414 = vmatprep.subr.msk.mxu0 %vm3210_vm14, %v20885_v36  ;;  %vm3409_vm14 = vcmp.eq.s32.totalorder %v20922_v46, %v16091_v43 }
 0x3c1   : > { %11415 = vmatpush1.msk.msra.mxu0 %vm3209_vm15, %v20885_v36  ;;  %vm3402_vm15 = vcmp.eq.s32.totalorder %v20924_v26, %v16081_v13 }
 0x3c2   : > { %11416 = vmatprep.subr.msk.mxu0 %vm3202_vm1, %v20885_v36  ;;  %vm3401_vm1 = vcmp.eq.s32.totalorder %v20924_v26, %v16091_v43 }
 0x3c3   : > { %11417 = vmatpush1.msk.msra.mxu0 %vm3201_vm2, %v20885_v36  ;;  %vm3394_vm2 = vcmp.eq.s32.totalorder %v20926_v37, %v16081_v13 }
 0x3c4   : > { %11418 = vmatprep.subr.msk.mxu0 %vm3450_vm3, %v20885_v36  ;;  %vm3393_vm3 = vcmp.eq.s32.totalorder %v20926_v37, %v16091_v43 }
 0x3c5   : > { %11419 = vmatpush2.msk.msra.mxu0 %vm3449_vm4, %v20885_v36  ;;  %vm3386_vm4 = vcmp.eq.s32.totalorder %v20928_v18, %v16081_v13 }
 0x3c6   : > { %11420 = vmatprep.subr.msk.mxu0 %vm3442_vm5, %v20885_v36  ;;  %vm3385_vm5 = vcmp.eq.s32.totalorder %v20928_v18, %v16091_v43 }
 0x3c7   : > { %11421 = vmatpush2.msk.msra.mxu0 %vm3441_vm6, %v20885_v36  ;;  %vm3378_vm6 = vcmp.eq.s32.totalorder %v20930_v38, %v16081_v13 }
 0x3c8   : > { %11422 = vmatprep.subr.msk.mxu0 %vm3434_vm7, %v20885_v36  ;;  %vm3377_vm7 = vcmp.eq.s32.totalorder %v20930_v38, %v16091_v43 }
 0x3c9   : > { %11423 = vmatpush2.msk.msra.mxu0 %vm3433_vm8, %v20885_v36  ;;  %vm3370_vm8 = vcmp.eq.s32.totalorder %v20932_v27, %v16081_v13 }
 0x3ca   : > { %11424 = vmatprep.subr.msk.mxu0 %vm3426_vm9, %v20885_v36  ;;  %vm3369_vm9 = vcmp.eq.s32.totalorder %v20932_v27, %v16091_v43 }
 0x3cb   : > { %11425 = vmatpush2.msk.msra.mxu0 %vm3425_vm10, %v20885_v36  ;;  %vm3362_vm10 = vcmp.eq.s32.totalorder %v20934_v34, %v16081_v13 }
 0x3cc   : > { %11426 = vmatprep.subr.msk.mxu0 %vm3418_vm11, %v20885_v36  ;;  %vm3361_vm11 = vcmp.eq.s32.totalorder %v20934_v34, %v16091_v43 }
 0x3cd   : > { %11427 = vmatpush2.msk.msra.mxu0 %vm3417_vm12, %v20885_v36  ;;  %vm3354_vm12 = vcmp.eq.s32.totalorder %v20936_v31, %v16081_v13 }
 0x3ce   : > { %11428 = vmatprep.subr.msk.mxu0 %vm3410_vm13, %v20885_v36  ;;  %vm3353_vm13 = vcmp.eq.s32.totalorder %v20936_v31, %v16091_v43 }
 0x3cf   : > { %11429 = vmatpush2.msk.msra.mxu0 %vm3409_vm14, %v20885_v36  ;;  %vm3346_vm14 = vcmp.eq.s32.totalorder %v20940_v32, %v16081_v13 }
 0x3d0   : > { %11430 = vmatprep.subr.msk.mxu0 %vm3402_vm15, %v20885_v36  ;;  %vm3345_vm15 = vcmp.eq.s32.totalorder %v20940_v32, %v16091_v43 }
 0x3d1   : > { %11431 = vmatpush2.msk.msra.mxu0 %vm3401_vm1, %v20885_v36  ;;  %vm3338_vm1 = vcmp.eq.s32.totalorder %v20942_v35, %v16081_v13 }
 0x3d2   : > { %11432 = vmatprep.subr.msk.mxu0 %vm3394_vm2, %v20885_v36  ;;  %vm3337_vm2 = vcmp.eq.s32.totalorder %v20942_v35, %v16091_v43 }
 0x3d3   : > { %11433 = vmatpush2.msk.msra.mxu0 %vm3393_vm3, %v20885_v36  ;;  %vm3330_vm3 = vcmp.eq.s32.totalorder %v20944_v29, %v16081_v13 }
 0x3d4   : > { %11434 = vmatprep.subr.msk.mxu0 %vm3386_vm4, %v20885_v36  ;;  %vm3329_vm4 = vcmp.eq.s32.totalorder %v20944_v29, %v16091_v43 }
 0x3d5   : > { %11435 = vmatpush2.msk.msra.mxu0 %vm3385_vm5, %v20885_v36  ;;  %vm3324_vm5 = vcmp.eq.s32.totalorder %v14464_v39, %v16326_v22 }
 0x3d6   : > { %11436 = vmatprep.subr.msk.mxu0 %vm3378_vm6, %v20885_v36  ;;  %vm3323_vm6 = vcmp.eq.s32.totalorder %v14464_v39, %v16332_v10 }
 0x3d7   : > { %11437 = vmatpush2.msk.msra.mxu0 %vm3377_vm7, %v20885_v36  ;;  %vm3316_vm7 = vcmp.eq.s32.totalorder %v14477_v45, %v16326_v22 }
 0x3d8   : > { %11438 = vmatprep.subr.msk.mxu0 %vm3370_vm8, %v20885_v36  ;;  %vm3315_vm8 = vcmp.eq.s32.totalorder %v14477_v45, %v16332_v10 }
 0x3d9   : > { %11439 = vmatpush2.msk.msra.mxu0 %vm3369_vm9, %v20885_v36  ;;  %vm3308_vm9 = vcmp.eq.s32.totalorder %v14494_v48, %v16326_v22 }
 0x3da   : > { %11440 = vmatprep.subr.msk.mxu0 %vm3362_vm10, %v20885_v36  ;;  %vm3307_vm10 = vcmp.eq.s32.totalorder %v14494_v48, %v16332_v10 }
 0x3db   : > { %11441 = vmatpush2.msk.msra.mxu0 %vm3361_vm11, %v20885_v36  ;;  %vm3300_vm11 = vcmp.eq.s32.totalorder %v14512_v51, %v16326_v22 }
 0x3dc   : > { %11442 = vmatprep.subr.msk.mxu0 %vm3354_vm12, %v20885_v36  ;;  %vm3299_vm12 = vcmp.eq.s32.totalorder %v14512_v51, %v16332_v10 }
 0x3dd   : > { %11443 = vmatpush2.msk.msra.mxu0 %vm3353_vm13, %v20885_v36  ;;  %vm3292_vm13 = vcmp.eq.s32.totalorder %v14530_v53, %v16326_v22 }
 0x3de   : > { %11444 = vmatprep.subr.msk.mxu0 %vm3346_vm14, %v20885_v36  ;;  %vm3291_vm14 = vcmp.eq.s32.totalorder %v14530_v53, %v16332_v10 }
 0x3df   : > { %11445 = vmatpush2.msk.msra.mxu0 %vm3345_vm15, %v20885_v36  ;;  %vm3284_vm15 = vcmp.eq.s32.totalorder %v14548_v55, %v16326_v22 }
 0x3e0   : > { %11446 = vmatprep.subr.msk.mxu0 %vm3338_vm1, %v20885_v36  ;;  %vm3283_vm1 = vcmp.eq.s32.totalorder %v14548_v55, %v16332_v10 }
 0x3e1   : > { %11447 = vmatpush2.msk.msra.mxu0 %vm3337_vm2, %v20885_v36  ;;  %vm3276_vm2 = vcmp.eq.s32.totalorder %v14566_v57, %v16326_v22 }
 0x3e2   : > { %11448 = vmatprep.subr.msk.mxu0 %vm3330_vm3, %v20885_v36  ;;  %vm3275_vm3 = vcmp.eq.s32.totalorder %v14566_v57, %v16332_v10 }
 0x3e3   : > { %11449 = vmatpush2.msk.msra.mxu0 %vm3329_vm4, %v20885_v36  ;;  %vm3268_vm4 = vcmp.eq.s32.totalorder %v14584_v59, %v16326_v22 }
 0x3e4   : > { %11514 = vmatprep.subr.msk.mxu0 %vm3324_vm5, %v20885_v36  ;;  %4897 = vmatmul.mubr.f32.vlgmr.msra.gmra.mxu0 %v15729_v4  ;;  %vm3267_vm5 = vcmp.eq.s32.totalorder %v14584_v59, %v16332_v10 }
 0x3e5   : > { %11515 = vmatpush1.msk.msra.mxu0 %vm3323_vm6, %v20885_v36  ;;  %5038 = vmatprep.mubr.f32.mxu0 %v15731_v15  ;;  %vm3260_vm6 = vcmp.eq.s32.totalorder %v14602_v61, %v16326_v22 }
 0x3e6   : > { %11516 = vmatprep.subr.msk.mxu0 %vm3316_vm7, %v20885_v36  ;;  %vm3259_vm7 = vcmp.eq.s32.totalorder %v14602_v61, %v16332_v10 }
 0x3e7   : > { %11517 = vmatpush1.msk.msra.mxu0 %vm3315_vm8, %v20885_v36  ;;  %vm3252_vm8 = vcmp.eq.s32.totalorder %v14620_v63, %v16326_v22 }
 0x3e8   : > { %11518 = vmatprep.subr.msk.mxu0 %vm3308_vm9, %v20885_v36  ;;  %vm3251_vm9 = vcmp.eq.s32.totalorder %v14620_v63, %v16332_v10 }
 0x3e9   : > { %11519 = vmatpush1.msk.msra.mxu0 %vm3307_vm10, %v20885_v36  ;;  %vm3244_vm10 = vcmp.eq.s32.totalorder %v14638_v1, %v16326_v22 }
 0x3ea   : > { %11520 = vmatprep.subr.msk.mxu0 %vm3300_vm11, %v20885_v36  ;;  %vm3243_vm11 = vcmp.eq.s32.totalorder %v14638_v1, %v16332_v10 }
 0x3eb   : > { %11521 = vmatpush1.msk.msra.mxu0 %vm3299_vm12, %v20885_v36  ;;  %vm3236_vm12 = vcmp.eq.s32.totalorder %v14656_v5, %v16326_v22 }
 0x3ec   : > { %11522 = vmatprep.subr.msk.mxu0 %vm3292_vm13, %v20885_v36  ;;  %vm3235_vm13 = vcmp.eq.s32.totalorder %v14656_v5, %v16332_v10 }
 0x3ed   : > { %11523 = vmatpush1.msk.msra.mxu0 %vm3291_vm14, %v20885_v36  ;;  %vm3228_vm14 = vcmp.eq.s32.totalorder %v14674_v7, %v16326_v22 }
 0x3ee   : > { %11524 = vmatprep.subr.msk.mxu0 %vm3284_vm15, %v20885_v36  ;;  %vm3227_vm15 = vcmp.eq.s32.totalorder %v14674_v7, %v16332_v10 }
 0x3ef   : > { %11525 = vmatpush1.msk.msra.mxu0 %vm3283_vm1, %v20885_v36  ;;  %vm3220_vm1 = vcmp.eq.s32.totalorder %v14692_v9, %v16326_v22 }
 0x3f0   : > { %11526 = vmatprep.subr.msk.mxu0 %vm3276_vm2, %v20885_v36  ;;  %vm3219_vm2 = vcmp.eq.s32.totalorder %v14692_v9, %v16332_v10 }
 0x3f1   : > { %11527 = vmatpush1.msk.msra.mxu0 %vm3275_vm3, %v20885_v36  ;;  %vm3212_vm3 = vcmp.eq.s32.totalorder %v14710_v11, %v16326_v22 }
 0x3f2   : > { %11528 = vmatprep.subr.msk.mxu0 %vm3268_vm4, %v20885_v36  ;;  %vm3211_vm4 = vcmp.eq.s32.totalorder %v14710_v11, %v16332_v10 }
 0x3f3   : > { %11529 = vmatpush1.msk.msra.mxu0 %vm3267_vm5, %v20885_v36  ;;  %vm3204_vm5 = vcmp.eq.s32.totalorder %v14725_v12, %v16326_v22 }
 0x3f4   : > { %11530 = vmatprep.subr.msk.mxu0 %vm3260_vm6, %v20885_v36  ;;  %vm3203_vm6 = vcmp.eq.s32.totalorder %v14725_v12, %v16332_v10 }
 0x3f5   : > { %11531 = vmatpush1.msk.msra.mxu0 %vm3259_vm7, %v20885_v36  ;;  %vm3452_vm7 = vcmp.eq.s32.totalorder %v14743_v14, %v16326_v22 }
 0x3f6   : > { %11532 = vmatprep.subr.msk.mxu0 %vm3252_vm8, %v20885_v36  ;;  %vm3451_vm8 = vcmp.eq.s32.totalorder %v14743_v14, %v16332_v10 }
 0x3f7   : > { %11533 = vmatpush1.msk.msra.mxu0 %vm3251_vm9, %v20885_v36  ;;  %vm3444_vm9 = vcmp.eq.s32.totalorder %v14761_v17, %v16326_v22 }
 0x3f8   : > { %11534 = vmatprep.subr.msk.mxu0 %vm3244_vm10, %v20885_v36  ;;  %vm3443_vm10 = vcmp.eq.s32.totalorder %v14761_v17, %v16332_v10 }
 0x3f9   : > { %11535 = vmatpush1.msk.msra.mxu0 %vm3243_vm11, %v20885_v36  ;;  %vm3436_vm11 = vcmp.eq.s32.totalorder %v14779_v19, %v16326_v22 }
 0x3fa   : > { %11536 = vmatprep.subr.msk.mxu0 %vm3236_vm12, %v20885_v36  ;;  %vm3435_vm12 = vcmp.eq.s32.totalorder %v14779_v19, %v16332_v10 }
 0x3fb   : > { %11537 = vmatpush1.msk.msra.mxu0 %vm3235_vm13, %v20885_v36  ;;  %vm3428_vm13 = vcmp.eq.s32.totalorder %v14797_v23, %v16326_v22 }
 0x3fc   : > { %11538 = vmatprep.subr.msk.mxu0 %vm3228_vm14, %v20885_v36  ;;  %vm3427_vm14 = vcmp.eq.s32.totalorder %v14797_v23, %v16332_v10 }
 0x3fd   : > { %11539 = vmatpush1.msk.msra.mxu0 %vm3227_vm15, %v20885_v36  ;;  %vm3420_vm15 = vcmp.eq.s32.totalorder %v14815_v25, %v16326_v22 }
 0x3fe   : > { %11540 = vmatprep.subr.msk.mxu0 %vm3220_vm1, %v20885_v36  ;;  %vm3419_vm1 = vcmp.eq.s32.totalorder %v14815_v25, %v16332_v10 }
 0x3ff   : > { %11541 = vmatpush1.msk.msra.mxu0 %vm3219_vm2, %v20885_v36  ;;  %vm3412_vm2 = vcmp.eq.s32.totalorder %v20922_v46, %v16326_v22 }
 0x400   : > { %11542 = vmatprep.subr.msk.mxu0 %vm3212_vm3, %v20885_v36  ;;  %vm3411_vm3 = vcmp.eq.s32.totalorder %v20922_v46, %v16332_v10 }
 0x401   : > { %11543 = vmatpush1.msk.msra.mxu0 %vm3211_vm4, %v20885_v36  ;;  %vm3404_vm4 = vcmp.eq.s32.totalorder %v20924_v26, %v16326_v22 }
 0x402   : > { %11544 = vmatprep.subr.msk.mxu0 %vm3204_vm5, %v20885_v36  ;;  %vm3403_vm5 = vcmp.eq.s32.totalorder %v20924_v26, %v16332_v10 }
 0x403   : > { %11545 = vmatpush1.msk.msra.mxu0 %vm3203_vm6, %v20885_v36  ;;  %vm3396_vm6 = vcmp.eq.s32.totalorder %v20926_v37, %v16326_v22 }
 0x404   : > { %11546 = vmatprep.subr.msk.mxu0 %vm3452_vm7, %v20885_v36  ;;  %vm3395_vm7 = vcmp.eq.s32.totalorder %v20926_v37, %v16332_v10 }
 0x405   : > { %11547 = vmatpush2.msk.msra.mxu0 %vm3451_vm8, %v20885_v36  ;;  %vm3388_vm8 = vcmp.eq.s32.totalorder %v20928_v18, %v16326_v22 }
 0x406   : > { %11548 = vmatprep.subr.msk.mxu0 %vm3444_vm9, %v20885_v36  ;;  %vm3387_vm9 = vcmp.eq.s32.totalorder %v20928_v18, %v16332_v10 }
 0x407   : > { %11549 = vmatpush2.msk.msra.mxu0 %vm3443_vm10, %v20885_v36  ;;  %vm3380_vm10 = vcmp.eq.s32.totalorder %v20930_v38, %v16326_v22 }
 0x408   : > { %11550 = vmatprep.subr.msk.mxu0 %vm3436_vm11, %v20885_v36  ;;  %vm3379_vm11 = vcmp.eq.s32.totalorder %v20930_v38, %v16332_v10 }
 0x409   : > { %11551 = vmatpush2.msk.msra.mxu0 %vm3435_vm12, %v20885_v36  ;;  %vm3372_vm12 = vcmp.eq.s32.totalorder %v20932_v27, %v16326_v22 }
 0x40a   : > { %11552 = vmatprep.subr.msk.mxu0 %vm3428_vm13, %v20885_v36  ;;  %vm3371_vm13 = vcmp.eq.s32.totalorder %v20932_v27, %v16332_v10 }
 0x40b   : > { %11553 = vmatpush2.msk.msra.mxu0 %vm3427_vm14, %v20885_v36  ;;  %vm3364_vm14 = vcmp.eq.s32.totalorder %v20934_v34, %v16326_v22 }
 0x40c   : > { %11554 = vmatprep.subr.msk.mxu0 %vm3420_vm15, %v20885_v36  ;;  %vm3363_vm15 = vcmp.eq.s32.totalorder %v20934_v34, %v16332_v10 }
 0x40d   : > { %11555 = vmatpush2.msk.msra.mxu0 %vm3419_vm1, %v20885_v36  ;;  %vm3356_vm1 = vcmp.eq.s32.totalorder %v20936_v31, %v16326_v22 }
 0x40e   : > { %11556 = vmatprep.subr.msk.mxu0 %vm3412_vm2, %v20885_v36  ;;  %vm3355_vm2 = vcmp.eq.s32.totalorder %v20936_v31, %v16332_v10 }
 0x40f   : > { %11557 = vmatpush2.msk.msra.mxu0 %vm3411_vm3, %v20885_v36  ;;  %vm3348_vm3 = vcmp.eq.s32.totalorder %v20940_v32, %v16326_v22 }
 0x410   : > { %11558 = vmatprep.subr.msk.mxu0 %vm3404_vm4, %v20885_v36  ;;  %vm3347_vm4 = vcmp.eq.s32.totalorder %v20940_v32, %v16332_v10 }
 0x411   : > { %11559 = vmatpush2.msk.msra.mxu0 %vm3403_vm5, %v20885_v36  ;;  %vm3340_vm5 = vcmp.eq.s32.totalorder %v20942_v35, %v16326_v22 }
 0x412   : > { %11560 = vmatprep.subr.msk.mxu0 %vm3396_vm6, %v20885_v36  ;;  %vm3339_vm6 = vcmp.eq.s32.totalorder %v20942_v35, %v16332_v10 }
 0x413   : > { %11561 = vmatpush2.msk.msra.mxu0 %vm3395_vm7, %v20885_v36  ;;  %vm3332_vm7 = vcmp.eq.s32.totalorder %v20944_v29, %v16326_v22 }
 0x414   : > { %11562 = vmatprep.subr.msk.mxu0 %vm3388_vm8, %v20885_v36  ;;  %vm3331_vm8 = vcmp.eq.s32.totalorder %v20944_v29, %v16332_v10  ;;  %v5142_v10 = vld [vmem:[#allocation11 + $0x10] sm:$0xff]  ;;  %v20957_v29 = vld [vmem:[#allocation36_spill] sm:$0xff] }
 0x415   : > { %11563 = vmatpush2.msk.msra.mxu0 %vm3387_vm9, %v20885_v36  ;;  %vm3063_vm9 = vcmp.eq.s32.totalorder %v14451_v30, %v15726_v50 }
 0x416   : > { %11564 = vmatprep.subr.msk.mxu0 %vm3380_vm10, %v20885_v36  ;;  %vm3056_vm10 = vcmp.eq.s32.totalorder %v14469_v41, %v15693_v28 }
 0x417   : > { %11565 = vmatpush2.msk.msra.mxu0 %vm3379_vm11, %v20885_v36  ;;  %vm3055_vm11 = vcmp.eq.s32.totalorder %v14469_v41, %v15726_v50 }
 0x418   : > { %11566 = vmatprep.subr.msk.mxu0 %vm3372_vm12, %v20885_v36  ;;  %vm3048_vm12 = vcmp.eq.s32.totalorder %v14485_v47, %v15693_v28 }
 0x419   : > { %11567 = vmatpush2.msk.msra.mxu0 %vm3371_vm13, %v20885_v36  ;;  %v16511_v33 = vpop.f32.mrf.mxu1  ;;  %vm3047_vm13 = vcmp.eq.s32.totalorder %v14485_v47, %v15726_v50 }
 0x41a   : > { %20953 = vst [vmem:[#allocation86_spill] sm:$0xff] %v16511_v33  ;;  %11568 = vmatprep.subr.msk.mxu0 %vm3364_vm14, %v20885_v36  ;;  %vm3040_vm14 = vcmp.eq.s32.totalorder %v14503_v49, %v15693_v28 }
 0x41b   : > { %11569 = vmatpush2.msk.msra.mxu0 %vm3363_vm15, %v20885_v36  ;;  %v16519_v15 = vpop.f32.mrf.mxu1  ;;  %vm3039_vm15 = vcmp.eq.s32.totalorder %v14503_v49, %v15726_v50 }
 0x41c   : > { %20954 = vst [vmem:[#allocation87_spill] sm:$0xff] %v16519_v15  ;;  %11570 = vmatprep.subr.msk.mxu0 %vm3356_vm1, %v20885_v36  ;;  %vm3032_vm1 = vcmp.eq.s32.totalorder %v14521_v52, %v15693_v28 }
 0x41d   : > { %11571 = vmatpush2.msk.msra.mxu0 %vm3355_vm2, %v20885_v36  ;;  %v16527_v33 = vpop.f32.mrf.mxu1  ;;  %vm3031_vm2 = vcmp.eq.s32.totalorder %v14521_v52, %v15726_v50 }
 0x41e   : > { %20955 = vst [vmem:[#allocation88_spill] sm:$0xff] %v16527_v33  ;;  %11572 = vmatprep.subr.msk.mxu0 %vm3348_vm3, %v20885_v36  ;;  %vm3024_vm3 = vcmp.eq.s32.totalorder %v14539_v54, %v15693_v28 }
 0x41f   : > { %11573 = vmatpush2.msk.msra.mxu0 %vm3347_vm4, %v20885_v36  ;;  %v16535_v15 = vpop.f32.mrf.mxu1  ;;  %vm3023_vm4 = vcmp.eq.s32.totalorder %v14539_v54, %v15726_v50 }
 0x420   : > { %20956 = vst [vmem:[#allocation89_spill] sm:$0xff] %v16535_v15  ;;  %11574 = vmatprep.subr.msk.mxu0 %vm3340_vm5, %v20885_v36  ;;  %vm3016_vm5 = vcmp.eq.s32.totalorder %v14557_v56, %v15693_v28 }
 0x421   : > { %11575 = vmatpush2.msk.msra.mxu0 %vm3339_vm6, %v20885_v36  ;;  %v2828_v33 = vpop.f32.mrf.mxu1  ;;  %vm3015_vm6 = vcmp.eq.s32.totalorder %v14557_v56, %v15726_v50 }
 0x422   : > { %11576 = vmatprep.subr.msk.mxu0 %vm3332_vm7, %v20885_v36  ;;  %v2829_v20 = vadd.f32 %v2828_v33, %v20920_v21  ;;  %v20963_v33 = vld [vmem:[#allocation49_spill] sm:$0xff] }
 0x423   : > { %11577 = vmatpush2.msk.msra.mxu0 %vm3331_vm8, %v20885_v36  ;;  %v2830_v24 = vpop.f32.mrf.mxu1  ;;  %vm3008_vm8 = vcmp.eq.s32.totalorder %v14575_v58, %v15693_v28 }
 0x424   : > { %v2831_v15 = vadd.f32 %v2830_v24, %v20920_v21  ;;  %5039 = vmatmul.mubr.f32.vlgmr.msra.gmra.mxu0 %v15729_v4  ;;  %5183 = vmatprep.subr.mxu0 %v20917_v44  ;;  %v16554_v35 = vmax.f32 %v2829_v20, 0.0  ;;  %v20958_v44 = vld [vmem:[#allocation37_spill] sm:$0xff]  ;;  %v20961_v24 = vld [vmem:[#allocation44_spill] sm:$0xff]  ;;  %v20962_v20 = vld [vmem:[#allocation47_spill] sm:$0xff] }
 0x425   : > { %5184 = vmatpush1.msra.mxu0 %v20919_v40  ;;  %5217 = vmatprep.mubr.f32.mxu0 %v20907_v42  ;;  %v20959_v40 = vld [vmem:[#allocation32_spill] sm:$0xff]  ;;  %v20960_v4 = vld [vmem:[#allocation33_spill] sm:$0xff] }
 0x426   : > { %v16551_v22 = vmax.f32 %v2831_v15, 0.0  ;;  %5254 = vmatprep.subr.mxu0 %v20957_v29  ;;  %v20964_v15 = vld [vmem:[#allocation50_spill] sm:$0xff] }
 0x428   : > { %11583 = vmatmul.mubr.msk.f32.vlgmr.msra.gmra.mxu0 %vm800_vm0, %v5142_v10  ;;  %4541 = vmatprep.mubr.f32.mxu1 %v16551_v22 }
 0x429   : > { %5255 = vmatpush1.msra.mxu0 %v20958_v44  ;;  %4542 = vmatmul.mubr.f32.vlgmr.msra.gmra.mxu1 %v16554_v35  ;;  %v20965_v44 = vld [vmem:[#allocation52_spill] sm:$0xff] }
 0x42a   : > { %11195 = vmatpush1.msk.msra.mxu1 %vm3063_vm9, %v20885_v36  ;;  %4683 = vmatprep.mubr.f32.mxu1 %v16551_v22 }
 0x42b   : > { %11196 = vmatprep.subr.msk.mxu1 %vm3056_vm10, %v20885_v36  ;;  %5288 = vmatprep.mubr.f32.mxu0 %v20907_v42  ;;  %vm3007_vm10 = vcmp.eq.s32.totalorder %v14575_v58, %v15726_v50 }
 0x42c   : > { %11197 = vmatpush1.msk.msra.mxu1 %vm3055_vm11, %v20885_v36  ;;  %11584 = vmatmul.mubr.msk.f32.vlgmr.msra.gmra.mxu0 %vm800_vm0, %v5142_v10  ;;  %v16591_v10 = vld [vmem:[%s14321_s17] sm:$0xff] }
 0x42d   : > { %11198 = vmatprep.subr.msk.mxu1 %vm3048_vm12, %v20885_v36  ;;  %v16598_v21 = vrot.slane %v16591_v10, %v20959_v40  ;;  %v16605_v29 = vrot.slane %v16591_v10, %v20960_v4  ;;  %vm3000_vm12 = vcmp.eq.s32.totalorder %v14593_v60, %v15693_v28  ;;  %v20966_v4 = vld [vmem:[#allocation54_spill] sm:$0xff]  ;;  %v20967_v40 = vld [vmem:[#allocation56_spill] sm:$0xff] }
 0x42e   : > { %11199 = vmatpush1.msk.msra.mxu1 %vm3047_vm13, %v20885_v36 }
 0x42f   : > { %11200 = vmatprep.subr.msk.mxu1 %vm3040_vm14, %v20885_v36  ;;  %vm6118_vm7 = vcmp.eq.s32.totalorder %v14464_v39, %v16598_v21  ;;  %vm6117_vm9 = vcmp.eq.s32.totalorder %v14464_v39, %v16605_v29  ;;  %vm6102_vm11 = vcmp.eq.s32.totalorder %v14477_v45, %v16598_v21  ;;  %vm6101_vm13 = vcmp.eq.s32.totalorder %v14477_v45, %v16605_v29 }
 0x430   : > { %11201 = vmatpush1.msk.msra.mxu1 %vm3039_vm15, %v20885_v36  ;;  %12673 = vmatprep.subr.msk.mxu0 %vm6118_vm7, %v20885_v36  ;;  %vm2999_vm14 = vcmp.eq.s32.totalorder %v14593_v60, %v15726_v50  ;;  %vm6086_vm15 = vcmp.eq.s32.totalorder %v14494_v48, %v16598_v21  ;;  %vm2983_vm7 = vcmp.eq.s32.totalorder %v14629_v0, %v15726_v50 }
 0x431   : > { %11202 = vmatprep.subr.msk.mxu1 %vm3032_vm1, %v20885_v36  ;;  %12674 = vmatpush1.msk.msra.mxu0 %vm6117_vm9, %v20885_v36  ;;  %vm2992_vm1 = vcmp.eq.s32.totalorder %v14611_v62, %v15693_v28  ;;  %vm2976_vm9 = vcmp.eq.s32.totalorder %v14647_v3, %v15693_v28 }
 0x432   : > { %11203 = vmatpush1.msk.msra.mxu1 %vm3031_vm2, %v20885_v36  ;;  %12675 = vmatprep.subr.msk.mxu0 %vm6102_vm11, %v20885_v36  ;;  %vm6085_vm2 = vcmp.eq.s32.totalorder %v14494_v48, %v16605_v29  ;;  %vm2975_vm11 = vcmp.eq.s32.totalorder %v14647_v3, %v15726_v50 }
 0x433   : > { %11204 = vmatprep.subr.msk.mxu1 %vm3024_vm3, %v20885_v36  ;;  %12676 = vmatpush1.msk.msra.mxu0 %vm6101_vm13, %v20885_v36  ;;  %vm2991_vm3 = vcmp.eq.s32.totalorder %v14611_v62, %v15726_v50  ;;  %vm2968_vm13 = vcmp.eq.s32.totalorder %v14665_v6, %v15693_v28 }
 0x434   : > { %11205 = vmatpush1.msk.msra.mxu1 %vm3023_vm4, %v20885_v36  ;;  %12677 = vmatprep.subr.msk.mxu0 %vm6086_vm15, %v20885_v36  ;;  %vm6070_vm4 = vcmp.eq.s32.totalorder %v14512_v51, %v16598_v21  ;;  %vm2967_vm15 = vcmp.eq.s32.totalorder %v14665_v6, %v15726_v50 }
 0x435   : > { %11206 = vmatprep.subr.msk.mxu1 %vm3016_vm5, %v20885_v36  ;;  %12678 = vmatpush1.msk.msra.mxu0 %vm6085_vm2, %v20885_v36  ;;  %vm2984_vm5 = vcmp.eq.s32.totalorder %v14629_v0, %v15693_v28  ;;  %vm2960_vm2 = vcmp.eq.s32.totalorder %v14683_v8, %v15693_v28 }
 0x436   : > { %11207 = vmatpush1.msk.msra.mxu1 %vm3015_vm6, %v20885_v36  ;;  %12679 = vmatprep.subr.msk.mxu0 %vm6070_vm4, %v20885_v36  ;;  %vm6069_vm6 = vcmp.eq.s32.totalorder %v14512_v51, %v16605_v29  ;;  %vm2959_vm4 = vcmp.eq.s32.totalorder %v14683_v8, %v15726_v50 }
 0x437   : > { %11208 = vmatprep.subr.msk.mxu1 %vm3008_vm8, %v20885_v36  ;;  %12680 = vmatpush1.msk.msra.mxu0 %vm6069_vm6, %v20885_v36  ;;  %vm6054_vm8 = vcmp.eq.s32.totalorder %v14530_v53, %v16598_v21  ;;  %vm2952_vm6 = vcmp.eq.s32.totalorder %v20961_v24, %v15693_v28 }
 0x438   : > { %11209 = vmatpush1.msk.msra.mxu1 %vm3007_vm10, %v20885_v36  ;;  %12681 = vmatprep.subr.msk.mxu0 %vm6054_vm8, %v20885_v36  ;;  %vm6053_vm10 = vcmp.eq.s32.totalorder %v14530_v53, %v16605_v29  ;;  %vm2951_vm8 = vcmp.eq.s32.totalorder %v20961_v24, %v15726_v50 }
 0x439   : > { %11210 = vmatprep.subr.msk.mxu1 %vm3000_vm12, %v20885_v36  ;;  %12682 = vmatpush1.msk.msra.mxu0 %vm6053_vm10, %v20885_v36  ;;  %vm6038_vm12 = vcmp.eq.s32.totalorder %v14548_v55, %v16598_v21  ;;  %vm2944_vm10 = vcmp.eq.s32.totalorder %v14432_v2, %v15693_v28 }
 0x43a   : > { %11211 = vmatpush1.msk.msra.mxu1 %vm2999_vm14, %v20885_v36  ;;  %12683 = vmatprep.subr.msk.mxu0 %vm6038_vm12, %v20885_v36  ;;  %vm6037_vm14 = vcmp.eq.s32.totalorder %v14548_v55, %v16605_v29  ;;  %vm2943_vm12 = vcmp.eq.s32.totalorder %v14432_v2, %v15726_v50 }
 0x43b   : > { %11212 = vmatprep.subr.msk.mxu1 %vm2992_vm1, %v20885_v36  ;;  %12684 = vmatpush1.msk.msra.mxu0 %vm6037_vm14, %v20885_v36  ;;  %vm6022_vm1 = vcmp.eq.s32.totalorder %v14566_v57, %v16598_v21  ;;  %vm3192_vm14 = vcmp.eq.s32.totalorder %v20962_v20, %v15693_v28 }
 0x43c   : > { %11213 = vmatpush1.msk.msra.mxu1 %vm2991_vm3, %v20885_v36  ;;  %12685 = vmatprep.subr.msk.mxu0 %vm6022_vm1, %v20885_v36  ;;  %vm6021_vm3 = vcmp.eq.s32.totalorder %v14566_v57, %v16605_v29  ;;  %vm3191_vm1 = vcmp.eq.s32.totalorder %v20962_v20, %v15726_v50 }
 0x43d   : > { %11214 = vmatprep.subr.msk.mxu1 %vm2984_vm5, %v20885_v36  ;;  %12686 = vmatpush1.msk.msra.mxu0 %vm6021_vm3, %v20885_v36  ;;  %vm6006_vm5 = vcmp.eq.s32.totalorder %v14584_v59, %v16598_v21  ;;  %vm3184_vm3 = vcmp.eq.s32.totalorder %v20963_v33, %v15693_v28 }
 0x43e   : > { %11215 = vmatpush1.msk.msra.mxu1 %vm2983_vm7, %v20885_v36  ;;  %12687 = vmatprep.subr.msk.mxu0 %vm6006_vm5, %v20885_v36  ;;  %vm6005_vm7 = vcmp.eq.s32.totalorder %v14584_v59, %v16605_v29  ;;  %vm3183_vm5 = vcmp.eq.s32.totalorder %v20963_v33, %v15726_v50 }
 0x43f   : > { %11216 = vmatprep.subr.msk.mxu1 %vm2976_vm9, %v20885_v36  ;;  %12688 = vmatpush1.msk.msra.mxu0 %vm6005_vm7, %v20885_v36  ;;  %vm5990_vm9 = vcmp.eq.s32.totalorder %v14602_v61, %v16598_v21  ;;  %vm3176_vm7 = vcmp.eq.s32.totalorder %v20964_v15, %v15693_v28 }
 0x440   : > { %11217 = vmatpush1.msk.msra.mxu1 %vm2975_vm11, %v20885_v36  ;;  %12689 = vmatprep.subr.msk.mxu0 %vm5990_vm9, %v20885_v36  ;;  %vm5989_vm11 = vcmp.eq.s32.totalorder %v14602_v61, %v16605_v29  ;;  %vm3175_vm9 = vcmp.eq.s32.totalorder %v20964_v15, %v15726_v50 }
 0x441   : > { %11218 = vmatprep.subr.msk.mxu1 %vm2968_vm13, %v20885_v36  ;;  %12690 = vmatpush1.msk.msra.mxu0 %vm5989_vm11, %v20885_v36  ;;  %vm5974_vm13 = vcmp.eq.s32.totalorder %v14620_v63, %v16598_v21  ;;  %vm3168_vm11 = vcmp.eq.s32.totalorder %v20965_v44, %v15693_v28 }
 0x442   : > { %11219 = vmatpush1.msk.msra.mxu1 %vm2967_vm15, %v20885_v36  ;;  %12691 = vmatprep.subr.msk.mxu0 %vm5974_vm13, %v20885_v36  ;;  %vm5973_vm15 = vcmp.eq.s32.totalorder %v14620_v63, %v16605_v29  ;;  %vm3167_vm13 = vcmp.eq.s32.totalorder %v20965_v44, %v15726_v50 }
 0x443   : > { %11220 = vmatprep.subr.msk.mxu1 %vm2960_vm2, %v20885_v36  ;;  %12692 = vmatpush1.msk.msra.mxu0 %vm5973_vm15, %v20885_v36  ;;  %vm5958_vm2 = vcmp.eq.s32.totalorder %v14638_v1, %v16598_v21  ;;  %vm3160_vm15 = vcmp.eq.s32.totalorder %v20966_v4, %v15693_v28 }
 0x444   : > { %11221 = vmatpush1.msk.msra.mxu1 %vm2959_vm4, %v20885_v36  ;;  %12693 = vmatprep.subr.msk.mxu0 %vm5958_vm2, %v20885_v36  ;;  %vm5957_vm4 = vcmp.eq.s32.totalorder %v14638_v1, %v16605_v29  ;;  %vm3159_vm2 = vcmp.eq.s32.totalorder %v20966_v4, %v15726_v50 }
 0x445   : > { %11222 = vmatprep.subr.msk.mxu1 %vm2952_vm6, %v20885_v36  ;;  %12694 = vmatpush1.msk.msra.mxu0 %vm5957_vm4, %v20885_v36  ;;  %vm5942_vm6 = vcmp.eq.s32.totalorder %v14656_v5, %v16598_v21  ;;  %vm3152_vm4 = vcmp.eq.s32.totalorder %v20967_v40, %v15693_v28 }
 0x446   : > { %11223 = vmatpush1.msk.msra.mxu1 %vm2951_vm8, %v20885_v36  ;;  %12695 = vmatprep.subr.msk.mxu0 %vm5942_vm6, %v20885_v36  ;;  %vm5941_vm8 = vcmp.eq.s32.totalorder %v14656_v5, %v16605_v29  ;;  %vm3151_vm6 = vcmp.eq.s32.totalorder %v20967_v40, %v15726_v50 }
 0x447   : > { %11224 = vmatprep.subr.msk.mxu1 %vm2944_vm10, %v20885_v36  ;;  %12696 = vmatpush1.msk.msra.mxu0 %vm5941_vm8, %v20885_v36  ;;  %vm5926_vm10 = vcmp.eq.s32.totalorder %v14674_v7, %v16598_v21 }
 0x448   : > { %11225 = vmatpush1.msk.msra.mxu1 %vm2943_vm12, %v20885_v36  ;;  %12697 = vmatprep.subr.msk.mxu0 %vm5926_vm10, %v20885_v36  ;;  %vm5925_vm12 = vcmp.eq.s32.totalorder %v14674_v7, %v16605_v29 }
 0x449   : > { %11226 = vmatprep.subr.msk.mxu1 %vm3192_vm14, %v20885_v36  ;;  %12698 = vmatpush1.msk.msra.mxu0 %vm5925_vm12, %v20885_v36  ;;  %vm5910_vm14 = vcmp.eq.s32.totalorder %v14692_v9, %v16598_v21 }
 0x44a   : > { %11227 = vmatpush2.msk.msra.mxu1 %vm3191_vm1, %v20885_v36  ;;  %12699 = vmatprep.subr.msk.mxu0 %vm5910_vm14, %v20885_v36  ;;  %vm5909_vm1 = vcmp.eq.s32.totalorder %v14692_v9, %v16605_v29  ;;  %v20968_v9 = vld [vmem:[#allocation58_spill] sm:$0xff] }
 0x44b   : > { %11228 = vmatprep.subr.msk.mxu1 %vm3184_vm3, %v20885_v36  ;;  %12700 = vmatpush1.msk.msra.mxu0 %vm5909_vm1, %v20885_v36  ;;  %vm5894_vm3 = vcmp.eq.s32.totalorder %v14710_v11, %v16598_v21  ;;  %vm3144_vm8 = vcmp.eq.s32.totalorder %v20968_v9, %v15693_v28  ;;  %vm3143_vm10 = vcmp.eq.s32.totalorder %v20968_v9, %v15726_v50 }
 0x44c   : > { %11229 = vmatpush2.msk.msra.mxu1 %vm3183_vm5, %v20885_v36  ;;  %12701 = vmatprep.subr.msk.mxu0 %vm5894_vm3, %v20885_v36  ;;  %vm5893_vm5 = vcmp.eq.s32.totalorder %v14710_v11, %v16605_v29  ;;  %v20969_v11 = vld [vmem:[#allocation60_spill] sm:$0xff] }
 0x44d   : > { %11230 = vmatprep.subr.msk.mxu1 %vm3176_vm7, %v20885_v36  ;;  %12702 = vmatpush1.msk.msra.mxu0 %vm5893_vm5, %v20885_v36  ;;  %vm5878_vm7 = vcmp.eq.s32.totalorder %v14725_v12, %v16598_v21  ;;  %vm3136_vm12 = vcmp.eq.s32.totalorder %v20969_v11, %v15693_v28  ;;  %vm3135_vm14 = vcmp.eq.s32.totalorder %v20969_v11, %v15726_v50 }
 0x44e   : > { %11231 = vmatpush2.msk.msra.mxu1 %vm3175_vm9, %v20885_v36  ;;  %12703 = vmatprep.subr.msk.mxu0 %vm5878_vm7, %v20885_v36  ;;  %vm5877_vm9 = vcmp.eq.s32.totalorder %v14725_v12, %v16605_v29  ;;  %v20970_v12 = vld [vmem:[#allocation62_spill] sm:$0xff] }
 0x44f   : > { %11232 = vmatprep.subr.msk.mxu1 %vm3168_vm11, %v20885_v36  ;;  %12704 = vmatpush1.msk.msra.mxu0 %vm5877_vm9, %v20885_v36  ;;  %vm6374_vm11 = vcmp.eq.s32.totalorder %v14743_v14, %v16598_v21  ;;  %vm3128_vm1 = vcmp.eq.s32.totalorder %v20970_v12, %v15693_v28  ;;  %vm3127_vm3 = vcmp.eq.s32.totalorder %v20970_v12, %v15726_v50 }
 0x450   : > { %11233 = vmatpush2.msk.msra.mxu1 %vm3167_vm13, %v20885_v36  ;;  %12705 = vmatprep.subr.msk.mxu0 %vm6374_vm11, %v20885_v36  ;;  %vm6373_vm13 = vcmp.eq.s32.totalorder %v14743_v14, %v16605_v29  ;;  %v20971_v14 = vld [vmem:[#allocation64_spill] sm:$0xff]  ;;  %vm3112_vm9 = vcmp.eq.s32.totalorder %v20941_v16, %v15693_v28  ;;  %vm3111_vm11 = vcmp.eq.s32.totalorder %v20941_v16, %v15726_v50 }
 0x451   : > { %11234 = vmatprep.subr.msk.mxu1 %vm3160_vm15, %v20885_v36  ;;  %12706 = vmatpush2.msk.msra.mxu0 %vm6373_vm13, %v20885_v36  ;;  %vm6358_vm15 = vcmp.eq.s32.totalorder %v14761_v17, %v16598_v21  ;;  %vm3120_vm5 = vcmp.eq.s32.totalorder %v20971_v14, %v15693_v28  ;;  %vm3119_vm7 = vcmp.eq.s32.totalorder %v20971_v14, %v15726_v50 }
 0x452   : > { %11235 = vmatpush2.msk.msra.mxu1 %vm3159_vm2, %v20885_v36  ;;  %12707 = vmatprep.subr.msk.mxu0 %vm6358_vm15, %v20885_v36  ;;  %vm6357_vm2 = vcmp.eq.s32.totalorder %v14761_v17, %v16605_v29 }
 0x453   : > { %11236 = vmatprep.subr.msk.mxu1 %vm3152_vm4, %v20885_v36  ;;  %12708 = vmatpush2.msk.msra.mxu0 %vm6357_vm2, %v20885_v36  ;;  %vm6342_vm4 = vcmp.eq.s32.totalorder %v14779_v19, %v16598_v21 }
 0x454   : > { %11237 = vmatpush2.msk.msra.mxu1 %vm3151_vm6, %v20885_v36  ;;  %12709 = vmatprep.subr.msk.mxu0 %vm6342_vm4, %v20885_v36  ;;  %vm6341_vm6 = vcmp.eq.s32.totalorder %v14779_v19, %v16605_v29  ;;  %v20972_v19 = vld [vmem:[#allocation68_spill] sm:$0xff] }
 0x455   : > { %11238 = vmatprep.subr.msk.mxu1 %vm3144_vm8, %v20885_v36  ;;  %12710 = vmatpush2.msk.msra.mxu0 %vm6341_vm6, %v20885_v36  ;;  %vm6326_vm8 = vcmp.eq.s32.totalorder %v14797_v23, %v16598_v21  ;;  %vm3104_vm13 = vcmp.eq.s32.totalorder %v20972_v19, %v15693_v28  ;;  %vm3103_vm15 = vcmp.eq.s32.totalorder %v20972_v19, %v15726_v50 }
 0x456   : > { %11239 = vmatpush2.msk.msra.mxu1 %vm3143_vm10, %v20885_v36  ;;  %12711 = vmatprep.subr.msk.mxu0 %vm6326_vm8, %v20885_v36  ;;  %vm6325_vm10 = vcmp.eq.s32.totalorder %v14797_v23, %v16605_v29  ;;  %v20973_v23 = vld [vmem:[#allocation70_spill] sm:$0xff] }
 0x457   : > { %11240 = vmatprep.subr.msk.mxu1 %vm3136_vm12, %v20885_v36  ;;  %12712 = vmatpush2.msk.msra.mxu0 %vm6325_vm10, %v20885_v36  ;;  %vm6310_vm12 = vcmp.eq.s32.totalorder %v14815_v25, %v16598_v21  ;;  %vm3096_vm2 = vcmp.eq.s32.totalorder %v20973_v23, %v15693_v28  ;;  %vm3095_vm4 = vcmp.eq.s32.totalorder %v20973_v23, %v15726_v50 }
 0x458   : > { %11241 = vmatpush2.msk.msra.mxu1 %vm3135_vm14, %v20885_v36  ;;  %12713 = vmatprep.subr.msk.mxu0 %vm6310_vm12, %v20885_v36  ;;  %vm6309_vm14 = vcmp.eq.s32.totalorder %v14815_v25, %v16605_v29  ;;  %v20974_v25 = vld [vmem:[#allocation72_spill] sm:$0xff] }
 0x459   : > { %11242 = vmatprep.subr.msk.mxu1 %vm3128_vm1, %v20885_v36  ;;  %12714 = vmatpush2.msk.msra.mxu0 %vm6309_vm14, %v20885_v36  ;;  %vm6294_vm1 = vcmp.eq.s32.totalorder %v20922_v46, %v16598_v21  ;;  %vm3088_vm6 = vcmp.eq.s32.totalorder %v20974_v25, %v15693_v28  ;;  %vm3087_vm8 = vcmp.eq.s32.totalorder %v20974_v25, %v15726_v50 }
 0x45a   : > { %11243 = vmatpush2.msk.msra.mxu1 %vm3127_vm3, %v20885_v36  ;;  %12715 = vmatprep.subr.msk.mxu0 %vm6294_vm1, %v20885_v36  ;;  %vm6293_vm3 = vcmp.eq.s32.totalorder %v20922_v46, %v16605_v29  ;;  %v20975_v46 = vld [vmem:[#allocation74_spill] sm:$0xff] }
 0x45b   : > { %11244 = vmatprep.subr.msk.mxu1 %vm3120_vm5, %v20885_v36  ;;  %12716 = vmatpush2.msk.msra.mxu0 %vm6293_vm3, %v20885_v36  ;;  %vm6278_vm5 = vcmp.eq.s32.totalorder %v20924_v26, %v16598_v21  ;;  %vm3080_vm10 = vcmp.eq.s32.totalorder %v20975_v46, %v15693_v28  ;;  %vm3079_vm12 = vcmp.eq.s32.totalorder %v20975_v46, %v15726_v50 }
 0x45c   : > { %11245 = vmatpush2.msk.msra.mxu1 %vm3119_vm7, %v20885_v36  ;;  %12717 = vmatprep.subr.msk.mxu0 %vm6278_vm5, %v20885_v36  ;;  %vm6277_vm7 = vcmp.eq.s32.totalorder %v20924_v26, %v16605_v29  ;;  %v20976_v26 = vld [vmem:[#allocation76_spill] sm:$0xff]  ;;  %vm3066_vm3 = vcmp.eq.s32.totalorder %v14451_v30, %v16081_v13  ;;  %vm3065_vm5 = vcmp.eq.s32.totalorder %v14451_v30, %v16091_v43 }
 0x45d   : > { %11246 = vmatprep.subr.msk.mxu1 %vm3112_vm9, %v20885_v36  ;;  %12718 = vmatpush2.msk.msra.mxu0 %vm6277_vm7, %v20885_v36  ;;  %vm6262_vm9 = vcmp.eq.s32.totalorder %v20926_v37, %v16598_v21  ;;  %vm3072_vm14 = vcmp.eq.s32.totalorder %v20976_v26, %v15693_v28  ;;  %vm3071_vm1 = vcmp.eq.s32.totalorder %v20976_v26, %v15726_v50  ;;  %v20977_v28 = vld [vmem:[#allocation75_spill] sm:$0xff]  ;;  %v20978_v50 = vld [vmem:[#allocation78_spill] sm:$0xff] }
 0x45e   : > { %11247 = vmatpush2.msk.msra.mxu1 %vm3111_vm11, %v20885_v36  ;;  %12719 = vmatprep.subr.msk.mxu0 %vm6262_vm9, %v20885_v36  ;;  %vm6261_vm11 = vcmp.eq.s32.totalorder %v20926_v37, %v16605_v29  ;;  %vm3058_vm7 = vcmp.eq.s32.totalorder %v14469_v41, %v16081_v13  ;;  %vm3057_vm9 = vcmp.eq.s32.totalorder %v14469_v41, %v16091_v43 }
 0x45f   : > { %11248 = vmatprep.subr.msk.mxu1 %vm3104_vm13, %v20885_v36  ;;  %12720 = vmatpush2.msk.msra.mxu0 %vm6261_vm11, %v20885_v36  ;;  %vm6246_vm13 = vcmp.eq.s32.totalorder %v20928_v18, %v16598_v21  ;;  %vm3050_vm11 = vcmp.eq.s32.totalorder %v14485_v47, %v16081_v13 }
 0x460   : > { %11249 = vmatpush2.msk.msra.mxu1 %vm3103_vm15, %v20885_v36  ;;  %12721 = vmatprep.subr.msk.mxu0 %vm6246_vm13, %v20885_v36  ;;  %vm6245_vm15 = vcmp.eq.s32.totalorder %v20928_v18, %v16605_v29  ;;  %vm3049_vm13 = vcmp.eq.s32.totalorder %v14485_v47, %v16091_v43 }
 0x461   : > { %11250 = vmatprep.subr.msk.mxu1 %vm3096_vm2, %v20885_v36  ;;  %12722 = vmatpush2.msk.msra.mxu0 %vm6245_vm15, %v20885_v36  ;;  %vm6230_vm2 = vcmp.eq.s32.totalorder %v20930_v38, %v16598_v21  ;;  %vm3042_vm15 = vcmp.eq.s32.totalorder %v14503_v49, %v16081_v13 }
 0x462   : > { %11251 = vmatpush2.msk.msra.mxu1 %vm3095_vm4, %v20885_v36  ;;  %12723 = vmatprep.subr.msk.mxu0 %vm6230_vm2, %v20885_v36  ;;  %vm6229_vm4 = vcmp.eq.s32.totalorder %v20930_v38, %v16605_v29  ;;  %vm3041_vm2 = vcmp.eq.s32.totalorder %v14503_v49, %v16091_v43 }
 0x463   : > { %11252 = vmatprep.subr.msk.mxu1 %vm3088_vm6, %v20885_v36  ;;  %12724 = vmatpush2.msk.msra.mxu0 %vm6229_vm4, %v20885_v36  ;;  %vm6214_vm6 = vcmp.eq.s32.totalorder %v20932_v27, %v16598_v21  ;;  %vm3034_vm4 = vcmp.eq.s32.totalorder %v14521_v52, %v16081_v13 }
 0x464   : > { %11253 = vmatpush2.msk.msra.mxu1 %vm3087_vm8, %v20885_v36  ;;  %12725 = vmatprep.subr.msk.mxu0 %vm6214_vm6, %v20885_v36  ;;  %vm6213_vm8 = vcmp.eq.s32.totalorder %v20932_v27, %v16605_v29  ;;  %vm3033_vm6 = vcmp.eq.s32.totalorder %v14521_v52, %v16091_v43 }
 0x465   : > { %11254 = vmatprep.subr.msk.mxu1 %vm3080_vm10, %v20885_v36  ;;  %vm6198_vm10 = vcmp.eq.s32.totalorder %v20934_v34, %v16598_v21  ;;  %12726 = vmatpush2.msk.msra.mxu0 %vm6213_vm8, %v20885_v36  ;;  %vm3026_vm8 = vcmp.eq.s32.totalorder %v14539_v54, %v16081_v13 }
 0x466   : > { %11255 = vmatpush2.msk.msra.mxu1 %vm3079_vm12, %v20885_v36  ;;  %vm6197_vm12 = vcmp.eq.s32.totalorder %v20934_v34, %v16605_v29  ;;  %12727 = vmatprep.subr.msk.mxu0 %vm6198_vm10, %v20885_v36  ;;  %vm3025_vm10 = vcmp.eq.s32.totalorder %v14539_v54, %v16091_v43 }
 0x467   : > { %11256 = vmatprep.subr.msk.mxu1 %vm3072_vm14, %v20885_v36  ;;  %vm6182_vm14 = vcmp.eq.s32.totalorder %v20936_v31, %v16598_v21  ;;  %12728 = vmatpush2.msk.msra.mxu0 %vm6197_vm12, %v20885_v36  ;;  %vm3018_vm12 = vcmp.eq.s32.totalorder %v14557_v56, %v16081_v13 }
 0x468   : > { %11257 = vmatpush2.msk.msra.mxu1 %vm3071_vm1, %v20885_v36  ;;  %vm6181_vm1 = vcmp.eq.s32.totalorder %v20936_v31, %v16605_v29  ;;  %12729 = vmatprep.subr.msk.mxu0 %vm6182_vm14, %v20885_v36  ;;  %vm3017_vm14 = vcmp.eq.s32.totalorder %v14557_v56, %v16091_v43 }
 0x469   : > { %4684 = vmatmul.mubr.f32.vlgmr.msra.gmra.mxu1 %v16554_v35  ;;  %11322 = vmatprep.subr.msk.mxu1 %vm3066_vm3, %v20885_v36  ;;  %vm6166_vm3 = vcmp.eq.s32.totalorder %v20940_v32, %v16598_v21 }
 0x46a   : > { %11323 = vmatpush1.msk.msra.mxu1 %vm3065_vm5, %v20885_v36  ;;  %4825 = vmatprep.mubr.f32.mxu1 %v16551_v22  ;;  %vm6165_vm5 = vcmp.eq.s32.totalorder %v20940_v32, %v16605_v29  ;;  %v20979_v32 = vld [vmem:[#allocation77_spill] sm:$0xff] }
 0x46b   : > { %11324 = vmatprep.subr.msk.mxu1 %vm3058_vm7, %v20885_v36  ;;  %12730 = vmatpush2.msk.msra.mxu0 %vm6181_vm1, %v20885_v36  ;;  %vm6150_vm7 = vcmp.eq.s32.totalorder %v20977_v28, %v16598_v21  ;;  %v16986_v31 = vrot.slane %v16591_v10, %v20979_v32  ;;  %vm3010_vm1 = vcmp.eq.s32.totalorder %v14575_v58, %v16081_v13  ;;  %v20981_v10 = vld [vmem:[#allocation84_spill] sm:$0xff]  ;;  %v20982_v32 = vld [vmem:[#allocation85_spill] sm:$0xff] }
 0x46c   : > { %11325 = vmatpush1.msk.msra.mxu1 %vm3057_vm9, %v20885_v36  ;;  %12731 = vmatprep.subr.msk.mxu0 %vm6166_vm3, %v20885_v36  ;;  %vm6149_vm9 = vcmp.eq.s32.totalorder %v20977_v28, %v16605_v29  ;;  %vm3002_vm3 = vcmp.eq.s32.totalorder %v14593_v60, %v16081_v13 }
 0x46d   : > { %11326 = vmatprep.subr.msk.mxu1 %vm3050_vm11, %v20885_v36  ;;  %12732 = vmatpush2.msk.msra.mxu0 %vm6165_vm5, %v20885_v36  ;;  %vm6134_vm11 = vcmp.eq.s32.totalorder %v20978_v50, %v16598_v21  ;;  %20980 = vst [vmem:[#allocation36_spill] sm:$0xff] %v16986_v31  ;;  %vm2994_vm5 = vcmp.eq.s32.totalorder %v14611_v62, %v16081_v13 }
 0x46e   : > { %11327 = vmatpush1.msk.msra.mxu1 %vm3049_vm13, %v20885_v36  ;;  %12733 = vmatprep.subr.msk.mxu0 %vm6150_vm7, %v20885_v36  ;;  %vm6133_vm13 = vcmp.eq.s32.totalorder %v20978_v50, %v16605_v29  ;;  %vm2986_vm7 = vcmp.eq.s32.totalorder %v14629_v0, %v16081_v13 }
 0x46f   : > { %11328 = vmatprep.subr.msk.mxu1 %vm3042_vm15, %v20885_v36  ;;  %12734 = vmatpush2.msk.msra.mxu0 %vm6149_vm9, %v20885_v36  ;;  %vm6120_vm15 = vcmp.eq.s32.totalorder %v14464_v39, %v16986_v31  ;;  %vm2978_vm9 = vcmp.eq.s32.totalorder %v14647_v3, %v16081_v13 }
 0x470   : > { %11329 = vmatpush1.msk.msra.mxu1 %vm3041_vm2, %v20885_v36  ;;  %12735 = vmatprep.subr.msk.mxu0 %vm6134_vm11, %v20885_v36  ;;  %vm3009_vm2 = vcmp.eq.s32.totalorder %v14575_v58, %v16091_v43  ;;  %vm2970_vm11 = vcmp.eq.s32.totalorder %v14665_v6, %v16081_v13 }
 0x471   : > { %11330 = vmatprep.subr.msk.mxu1 %vm3034_vm4, %v20885_v36  ;;  %12736 = vmatpush2.msk.msra.mxu0 %vm6133_vm13, %v20885_v36  ;;  %vm3001_vm4 = vcmp.eq.s32.totalorder %v14593_v60, %v16091_v43  ;;  %vm2962_vm13 = vcmp.eq.s32.totalorder %v14683_v8, %v16081_v13 }
 0x472   : > { %11331 = vmatpush1.msk.msra.mxu1 %vm3033_vm6, %v20885_v36  ;;  %12801 = vmatprep.subr.msk.mxu0 %vm6120_vm15, %v20885_v36  ;;  %vm2993_vm6 = vcmp.eq.s32.totalorder %v14611_v62, %v16091_v43  ;;  %vm2954_vm15 = vcmp.eq.s32.totalorder %v20961_v24, %v16081_v13 }
 0x473   : > { %11332 = vmatprep.subr.msk.mxu1 %vm3026_vm8, %v20885_v36  ;;  %vm2985_vm8 = vcmp.eq.s32.totalorder %v14629_v0, %v16091_v43 }
 0x474   : > { %11333 = vmatpush1.msk.msra.mxu1 %vm3025_vm10, %v20885_v36  ;;  %vm2977_vm10 = vcmp.eq.s32.totalorder %v14647_v3, %v16091_v43 }
 0x475   : > { %11334 = vmatprep.subr.msk.mxu1 %vm3018_vm12, %v20885_v36  ;;  %vm2969_vm12 = vcmp.eq.s32.totalorder %v14665_v6, %v16091_v43 }
 0x476   : > { %11335 = vmatpush1.msk.msra.mxu1 %vm3017_vm14, %v20885_v36  ;;  %vm2961_vm14 = vcmp.eq.s32.totalorder %v14683_v8, %v16091_v43 }
 0x477   : > { %11336 = vmatprep.subr.msk.mxu1 %vm3010_vm1, %v20885_v36  ;;  %vm2953_vm1 = vcmp.eq.s32.totalorder %v20961_v24, %v16091_v43 }
 0x478   : > { %11337 = vmatpush1.msk.msra.mxu1 %vm3009_vm2, %v20885_v36  ;;  %vm2946_vm2 = vcmp.eq.s32.totalorder %v14432_v2, %v16081_v13 }
 0x479   : > { %11338 = vmatprep.subr.msk.mxu1 %vm3002_vm3, %v20885_v36  ;;  %vm2945_vm3 = vcmp.eq.s32.totalorder %v14432_v2, %v16091_v43 }
 0x47a   : > { %11339 = vmatpush1.msk.msra.mxu1 %vm3001_vm4, %v20885_v36  ;;  %vm3194_vm4 = vcmp.eq.s32.totalorder %v20962_v20, %v16081_v13 }
 0x47b   : > { %11340 = vmatprep.subr.msk.mxu1 %vm2994_vm5, %v20885_v36  ;;  %vm3193_vm5 = vcmp.eq.s32.totalorder %v20962_v20, %v16091_v43 }
 0x47c   : > { %11341 = vmatpush1.msk.msra.mxu1 %vm2993_vm6, %v20885_v36  ;;  %vm3186_vm6 = vcmp.eq.s32.totalorder %v20963_v33, %v16081_v13 }
 0x47d   : > { %11342 = vmatprep.subr.msk.mxu1 %vm2986_vm7, %v20885_v36  ;;  %vm3185_vm7 = vcmp.eq.s32.totalorder %v20963_v33, %v16091_v43 }
 0x47e   : > { %11343 = vmatpush1.msk.msra.mxu1 %vm2985_vm8, %v20885_v36  ;;  %vm3178_vm8 = vcmp.eq.s32.totalorder %v20964_v15, %v16081_v13 }
 0x47f   : > { %11344 = vmatprep.subr.msk.mxu1 %vm2978_vm9, %v20885_v36  ;;  %vm3177_vm9 = vcmp.eq.s32.totalorder %v20964_v15, %v16091_v43 }
 0x480   : > { %11345 = vmatpush1.msk.msra.mxu1 %vm2977_vm10, %v20885_v36  ;;  %vm3170_vm10 = vcmp.eq.s32.totalorder %v20965_v44, %v16081_v13 }
 0x481   : > { %11346 = vmatprep.subr.msk.mxu1 %vm2970_vm11, %v20885_v36  ;;  %vm3169_vm11 = vcmp.eq.s32.totalorder %v20965_v44, %v16091_v43 }
 0x482   : > { %11347 = vmatpush1.msk.msra.mxu1 %vm2969_vm12, %v20885_v36  ;;  %vm3162_vm12 = vcmp.eq.s32.totalorder %v20966_v4, %v16081_v13 }
 0x483   : > { %11348 = vmatprep.subr.msk.mxu1 %vm2962_vm13, %v20885_v36  ;;  %vm3161_vm13 = vcmp.eq.s32.totalorder %v20966_v4, %v16091_v43 }
 0x484   : > { %11349 = vmatpush1.msk.msra.mxu1 %vm2961_vm14, %v20885_v36  ;;  %vm3154_vm14 = vcmp.eq.s32.totalorder %v20967_v40, %v16081_v13 }
 0x485   : > { %11350 = vmatprep.subr.msk.mxu1 %vm2954_vm15, %v20885_v36  ;;  %vm3153_vm15 = vcmp.eq.s32.totalorder %v20967_v40, %v16091_v43 }
 0x486   : > { %11351 = vmatpush1.msk.msra.mxu1 %vm2953_vm1, %v20885_v36  ;;  %vm3146_vm1 = vcmp.eq.s32.totalorder %v20968_v9, %v16081_v13 }
 0x487   : > { %11352 = vmatprep.subr.msk.mxu1 %vm2946_vm2, %v20885_v36  ;;  %vm3145_vm2 = vcmp.eq.s32.totalorder %v20968_v9, %v16091_v43 }
 0x488   : > { %11353 = vmatpush1.msk.msra.mxu1 %vm2945_vm3, %v20885_v36  ;;  %vm3138_vm3 = vcmp.eq.s32.totalorder %v20969_v11, %v16081_v13 }
 0x489   : > { %11354 = vmatprep.subr.msk.mxu1 %vm3194_vm4, %v20885_v36  ;;  %vm3137_vm4 = vcmp.eq.s32.totalorder %v20969_v11, %v16091_v43 }
 0x48a   : > { %11355 = vmatpush2.msk.msra.mxu1 %vm3193_vm5, %v20885_v36  ;;  %vm3130_vm5 = vcmp.eq.s32.totalorder %v20970_v12, %v16081_v13 }
 0x48b   : > { %11356 = vmatprep.subr.msk.mxu1 %vm3186_vm6, %v20885_v36  ;;  %vm3129_vm6 = vcmp.eq.s32.totalorder %v20970_v12, %v16091_v43 }
 0x48c   : > { %11357 = vmatpush2.msk.msra.mxu1 %vm3185_vm7, %v20885_v36  ;;  %vm3122_vm7 = vcmp.eq.s32.totalorder %v20971_v14, %v16081_v13 }
 0x48d   : > { %11358 = vmatprep.subr.msk.mxu1 %vm3178_vm8, %v20885_v36  ;;  %vm3121_vm8 = vcmp.eq.s32.totalorder %v20971_v14, %v16091_v43 }
 0x48e   : > { %11359 = vmatpush2.msk.msra.mxu1 %vm3177_vm9, %v20885_v36  ;;  %vm3114_vm9 = vcmp.eq.s32.totalorder %v20941_v16, %v16081_v13 }
 0x48f   : > { %11360 = vmatprep.subr.msk.mxu1 %vm3170_vm10, %v20885_v36  ;;  %vm3113_vm10 = vcmp.eq.s32.totalorder %v20941_v16, %v16091_v43 }
 0x490   : > { %11361 = vmatpush2.msk.msra.mxu1 %vm3169_vm11, %v20885_v36  ;;  %vm3106_vm11 = vcmp.eq.s32.totalorder %v20972_v19, %v16081_v13 }
 0x491   : > { %11362 = vmatprep.subr.msk.mxu1 %vm3162_vm12, %v20885_v36  ;;  %vm3105_vm12 = vcmp.eq.s32.totalorder %v20972_v19, %v16091_v43 }
 0x492   : > { %11363 = vmatpush2.msk.msra.mxu1 %vm3161_vm13, %v20885_v36  ;;  %vm3098_vm13 = vcmp.eq.s32.totalorder %v20973_v23, %v16081_v13 }
 0x493   : > { %11364 = vmatprep.subr.msk.mxu1 %vm3154_vm14, %v20885_v36  ;;  %vm3097_vm14 = vcmp.eq.s32.totalorder %v20973_v23, %v16091_v43 }
 0x494   : > { %11365 = vmatpush2.msk.msra.mxu1 %vm3153_vm15, %v20885_v36  ;;  %vm3090_vm15 = vcmp.eq.s32.totalorder %v20974_v25, %v16081_v13 }
 0x495   : > { %11366 = vmatprep.subr.msk.mxu1 %vm3146_vm1, %v20885_v36  ;;  %vm3089_vm1 = vcmp.eq.s32.totalorder %v20974_v25, %v16091_v43 }
 0x496   : > { %11367 = vmatpush2.msk.msra.mxu1 %vm3145_vm2, %v20885_v36  ;;  %vm3082_vm2 = vcmp.eq.s32.totalorder %v20975_v46, %v16081_v13 }
 0x497   : > { %11368 = vmatprep.subr.msk.mxu1 %vm3138_vm3, %v20885_v36  ;;  %vm3081_vm3 = vcmp.eq.s32.totalorder %v20975_v46, %v16091_v43 }
 0x498   : > { %11369 = vmatpush2.msk.msra.mxu1 %vm3137_vm4, %v20885_v36  ;;  %vm3074_vm4 = vcmp.eq.s32.totalorder %v20976_v26, %v16081_v13  ;;  %v17272_v13 = vpop.f32.mrf.mxu0 }
 0x499   : > { %11370 = vmatprep.subr.msk.mxu1 %vm3130_vm5, %v20885_v36  ;;  %vm3073_vm5 = vcmp.eq.s32.totalorder %v20976_v26, %v16091_v43 }
 0x49a   : > { %11371 = vmatpush2.msk.msra.mxu1 %vm3129_vm6, %v20885_v36  ;;  %vm3068_vm6 = vcmp.eq.s32.totalorder %v14451_v30, %v20981_v10  ;;  %v17286_v43 = vpop.f32.mrf.mxu0 }
 0x49b   : > { %11372 = vmatprep.subr.msk.mxu1 %vm3122_vm7, %v20885_v36  ;;  %vm3067_vm7 = vcmp.eq.s32.totalorder %v14451_v30, %v20982_v32 }
 0x49c   : > { %11373 = vmatpush2.msk.msra.mxu1 %vm3121_vm8, %v20885_v36  ;;  %vm3060_vm8 = vcmp.eq.s32.totalorder %v14469_v41, %v20981_v10 }
 0x49d   : > { %11374 = vmatprep.subr.msk.mxu1 %vm3114_vm9, %v20885_v36  ;;  %vm3059_vm9 = vcmp.eq.s32.totalorder %v14469_v41, %v20982_v32 }
 0x49e   : > { %11375 = vmatpush2.msk.msra.mxu1 %vm3113_vm10, %v20885_v36  ;;  %vm3052_vm10 = vcmp.eq.s32.totalorder %v14485_v47, %v20981_v10 }
 0x49f   : > { %11376 = vmatprep.subr.msk.mxu1 %vm3106_vm11, %v20885_v36  ;;  %vm3051_vm11 = vcmp.eq.s32.totalorder %v14485_v47, %v20982_v32 }
 0x4a0   : > { %11377 = vmatpush2.msk.msra.mxu1 %vm3105_vm12, %v20885_v36  ;;  %vm3044_vm12 = vcmp.eq.s32.totalorder %v14503_v49, %v20981_v10 }
 0x4a1   : > { %11378 = vmatprep.subr.msk.mxu1 %vm3098_vm13, %v20885_v36  ;;  %vm3043_vm13 = vcmp.eq.s32.totalorder %v14503_v49, %v20982_v32 }
 0x4a2   : > { %11379 = vmatpush2.msk.msra.mxu1 %vm3097_vm14, %v20885_v36  ;;  %vm3036_vm14 = vcmp.eq.s32.totalorder %v14521_v52, %v20981_v10 }
 0x4a3   : > { %11380 = vmatprep.subr.msk.mxu1 %vm3090_vm15, %v20885_v36  ;;  %vm3035_vm15 = vcmp.eq.s32.totalorder %v14521_v52, %v20982_v32 }
 0x4a4   : > { %11381 = vmatpush2.msk.msra.mxu1 %vm3089_vm1, %v20885_v36  ;;  %vm3028_vm1 = vcmp.eq.s32.totalorder %v14539_v54, %v20981_v10 }
 0x4a5   : > { %11382 = vmatprep.subr.msk.mxu1 %vm3082_vm2, %v20885_v36  ;;  %vm3027_vm2 = vcmp.eq.s32.totalorder %v14539_v54, %v20982_v32 }
 0x4a6   : > { %11383 = vmatpush2.msk.msra.mxu1 %vm3081_vm3, %v20885_v36  ;;  %vm3020_vm3 = vcmp.eq.s32.totalorder %v14557_v56, %v20981_v10 }
 0x4a7   : > { %11384 = vmatprep.subr.msk.mxu1 %vm3074_vm4, %v20885_v36  ;;  %vm3019_vm4 = vcmp.eq.s32.totalorder %v14557_v56, %v20982_v32 }
 0x4a8   : > { %11385 = vmatpush2.msk.msra.mxu1 %vm3073_vm5, %v20885_v36  ;;  %vm3012_vm5 = vcmp.eq.s32.totalorder %v14575_v58, %v20981_v10 }
 0x4a9   : > { %4826 = vmatmul.mubr.f32.vlgmr.msra.gmra.mxu1 %v16554_v35  ;;  %11450 = vmatprep.subr.msk.mxu1 %vm3068_vm6, %v20885_v36  ;;  %vm3011_vm6 = vcmp.eq.s32.totalorder %v14575_v58, %v20982_v32 }
 0x4aa   : > { %11451 = vmatpush1.msk.msra.mxu1 %vm3067_vm7, %v20885_v36  ;;  %4967 = vmatprep.mubr.f32.mxu1 %v16551_v22  ;;  %vm3004_vm7 = vcmp.eq.s32.totalorder %v14593_v60, %v20981_v10  ;;  %v17300_v22 = vpop.f32.mrf.mxu0 }
 0x4ab   : > { %11452 = vmatprep.subr.msk.mxu1 %vm3060_vm8, %v20885_v36  ;;  %vm3003_vm8 = vcmp.eq.s32.totalorder %v14593_v60, %v20982_v32 }
 0x4ac   : > { %11453 = vmatpush1.msk.msra.mxu1 %vm3059_vm9, %v20885_v36  ;;  %vm2996_vm9 = vcmp.eq.s32.totalorder %v14611_v62, %v20981_v10 }
 0x4ad   : > { %11454 = vmatprep.subr.msk.mxu1 %vm3052_vm10, %v20885_v36  ;;  %vm2995_vm10 = vcmp.eq.s32.totalorder %v14611_v62, %v20982_v32 }
 0x4ae   : > { %11455 = vmatpush1.msk.msra.mxu1 %vm3051_vm11, %v20885_v36  ;;  %vm2988_vm11 = vcmp.eq.s32.totalorder %v14629_v0, %v20981_v10 }
 0x4af   : > { %11456 = vmatprep.subr.msk.mxu1 %vm3044_vm12, %v20885_v36  ;;  %vm2987_vm12 = vcmp.eq.s32.totalorder %v14629_v0, %v20982_v32  ;;  %v21000_v0 = vld [vmem:[#allocation29_spill] sm:$0xff] }
 0x4b0   : > { %11457 = vmatpush1.msk.msra.mxu1 %vm3043_vm13, %v20885_v36  ;;  %vm2980_vm13 = vcmp.eq.s32.totalorder %v14647_v3, %v20981_v10 }
 0x4b1   : > { %11458 = vmatprep.subr.msk.mxu1 %vm3036_vm14, %v20885_v36  ;;  %vm2979_vm14 = vcmp.eq.s32.totalorder %v14647_v3, %v20982_v32 }
 0x4b2   : > { %11459 = vmatpush1.msk.msra.mxu1 %vm3035_vm15, %v20885_v36  ;;  %vm2972_vm15 = vcmp.eq.s32.totalorder %v14665_v6, %v20981_v10 }
 0x4b3   : > { %11460 = vmatprep.subr.msk.mxu1 %vm3028_vm1, %v20885_v36  ;;  %vm2971_vm1 = vcmp.eq.s32.totalorder %v14665_v6, %v20982_v32  ;;  %v20998_v6 = vld [vmem:[#allocation35_spill] sm:$0xff] }
 0x4b4   : > { %11461 = vmatpush1.msk.msra.mxu1 %vm3027_vm2, %v20885_v36  ;;  %vm2964_vm2 = vcmp.eq.s32.totalorder %v14683_v8, %v20981_v10 }
 0x4b5   : > { %11462 = vmatprep.subr.msk.mxu1 %vm3020_vm3, %v20885_v36  ;;  %vm2963_vm3 = vcmp.eq.s32.totalorder %v14683_v8, %v20982_v32  ;;  %v20997_v8 = vld [vmem:[#allocation73_spill] sm:$0xff] }
 0x4b6   : > { %11463 = vmatpush1.msk.msra.mxu1 %vm3019_vm4, %v20885_v36  ;;  %vm2956_vm4 = vcmp.eq.s32.totalorder %v20961_v24, %v20981_v10 }
 0x4b7   : > { %11464 = vmatprep.subr.msk.mxu1 %vm3012_vm5, %v20885_v36  ;;  %vm2955_vm5 = vcmp.eq.s32.totalorder %v20961_v24, %v20982_v32  ;;  %v20996_v24 = vld [vmem:[#allocation71_spill] sm:$0xff] }
 0x4b8   : > { %11465 = vmatpush1.msk.msra.mxu1 %vm3011_vm6, %v20885_v36  ;;  %vm2948_vm6 = vcmp.eq.s32.totalorder %v14432_v2, %v20981_v10 }
 0x4b9   : > { %11466 = vmatprep.subr.msk.mxu1 %vm3004_vm7, %v20885_v36  ;;  %vm2947_vm7 = vcmp.eq.s32.totalorder %v14432_v2, %v20982_v32  ;;  %v20995_v2 = vld [vmem:[#allocation59_spill] sm:$0xff] }
 0x4ba   : > { %11467 = vmatpush1.msk.msra.mxu1 %vm3003_vm8, %v20885_v36  ;;  %vm3196_vm8 = vcmp.eq.s32.totalorder %v20962_v20, %v20981_v10 }
 0x4bb   : > { %11468 = vmatprep.subr.msk.mxu1 %vm2996_vm9, %v20885_v36  ;;  %vm3195_vm9 = vcmp.eq.s32.totalorder %v20962_v20, %v20982_v32  ;;  %v20994_v20 = vld [vmem:[#allocation57_spill] sm:$0xff] }
 0x4bc   : > { %11469 = vmatpush1.msk.msra.mxu1 %vm2995_vm10, %v20885_v36  ;;  %vm3188_vm10 = vcmp.eq.s32.totalorder %v20963_v33, %v20981_v10 }
 0x4bd   : > { %11470 = vmatprep.subr.msk.mxu1 %vm2988_vm11, %v20885_v36  ;;  %vm3187_vm11 = vcmp.eq.s32.totalorder %v20963_v33, %v20982_v32  ;;  %v20993_v33 = vld [vmem:[#allocation55_spill] sm:$0xff] }
 0x4be   : > { %11471 = vmatpush1.msk.msra.mxu1 %vm2987_vm12, %v20885_v36  ;;  %vm3180_vm12 = vcmp.eq.s32.totalorder %v20964_v15, %v20981_v10 }
 0x4bf   : > { %11472 = vmatprep.subr.msk.mxu1 %vm2980_vm13, %v20885_v36  ;;  %vm3179_vm13 = vcmp.eq.s32.totalorder %v20964_v15, %v20982_v32 }
 0x4c0   : > { %11473 = vmatpush1.msk.msra.mxu1 %vm2979_vm14, %v20885_v36  ;;  %vm3172_vm14 = vcmp.eq.s32.totalorder %v20965_v44, %v20981_v10 }
 0x4c1   : > { %11474 = vmatprep.subr.msk.mxu1 %vm2972_vm15, %v20885_v36  ;;  %vm3171_vm15 = vcmp.eq.s32.totalorder %v20965_v44, %v20982_v32 }
 0x4c2   : > { %11475 = vmatpush1.msk.msra.mxu1 %vm2971_vm1, %v20885_v36  ;;  %vm3164_vm1 = vcmp.eq.s32.totalorder %v20966_v4, %v20981_v10 }
 0x4c3   : > { %11476 = vmatprep.subr.msk.mxu1 %vm2964_vm2, %v20885_v36  ;;  %vm3163_vm2 = vcmp.eq.s32.totalorder %v20966_v4, %v20982_v32 }
 0x4c4   : > { %11477 = vmatpush1.msk.msra.mxu1 %vm2963_vm3, %v20885_v36  ;;  %vm3156_vm3 = vcmp.eq.s32.totalorder %v20967_v40, %v20981_v10 }
 0x4c5   : > { %11478 = vmatprep.subr.msk.mxu1 %vm2956_vm4, %v20885_v36  ;;  %vm3155_vm4 = vcmp.eq.s32.totalorder %v20967_v40, %v20982_v32  ;;  %v20985_v40 = vld [vmem:[#allocation80_spill] sm:$0xff] }
 0x4c6   : > { %11479 = vmatpush1.msk.msra.mxu1 %vm2955_vm5, %v20885_v36  ;;  %vm3148_vm5 = vcmp.eq.s32.totalorder %v20968_v9, %v20981_v10 }
 0x4c7   : > { %11480 = vmatprep.subr.msk.mxu1 %vm2948_vm6, %v20885_v36  ;;  %vm3147_vm6 = vcmp.eq.s32.totalorder %v20968_v9, %v20982_v32  ;;  %v17314_v9 = vpop.f32.mrf.mxu0 }
 0x4c8   : > { %11481 = vmatpush1.msk.msra.mxu1 %vm2947_vm7, %v20885_v36  ;;  %vm3140_vm7 = vcmp.eq.s32.totalorder %v20969_v11, %v20981_v10 }
 0x4c9   : > { %11482 = vmatprep.subr.msk.mxu1 %vm3196_vm8, %v20885_v36  ;;  %vm3139_vm8 = vcmp.eq.s32.totalorder %v20969_v11, %v20982_v32 }
 0x4ca   : > { %11483 = vmatpush2.msk.msra.mxu1 %vm3195_vm9, %v20885_v36  ;;  %vm3132_vm9 = vcmp.eq.s32.totalorder %v20970_v12, %v20981_v10 }
 0x4cb   : > { %11484 = vmatprep.subr.msk.mxu1 %vm3188_vm10, %v20885_v36  ;;  %vm3131_vm10 = vcmp.eq.s32.totalorder %v20970_v12, %v20982_v32  ;;  %v17328_v12 = vpop.f32.mrf.mxu0 }
 0x4cc   : > { %11485 = vmatpush2.msk.msra.mxu1 %vm3187_vm11, %v20885_v36  ;;  %vm3124_vm11 = vcmp.eq.s32.totalorder %v20971_v14, %v20981_v10 }
 0x4cd   : > { %11486 = vmatprep.subr.msk.mxu1 %vm3180_vm12, %v20885_v36  ;;  %vm3123_vm12 = vcmp.eq.s32.totalorder %v20971_v14, %v20982_v32  ;;  %v20984_v14 = vld [vmem:[#allocation30_spill] sm:$0xff] }
 0x4ce   : > { %11487 = vmatpush2.msk.msra.mxu1 %vm3179_vm13, %v20885_v36  ;;  %vm3116_vm13 = vcmp.eq.s32.totalorder %v20941_v16, %v20981_v10 }
 0x4cf   : > { %11488 = vmatprep.subr.msk.mxu1 %vm3172_vm14, %v20885_v36  ;;  %vm3115_vm14 = vcmp.eq.s32.totalorder %v20941_v16, %v20982_v32  ;;  %v17340_v16 = vpop.f32.mrf.mxu0 }
 0x4d0   : > { %11489 = vmatpush2.msk.msra.mxu1 %vm3171_vm15, %v20885_v36  ;;  %vm3108_vm15 = vcmp.eq.s32.totalorder %v20972_v19, %v20981_v10 }
 0x4d1   : > { %11490 = vmatprep.subr.msk.mxu1 %vm3164_vm1, %v20885_v36  ;;  %vm3107_vm1 = vcmp.eq.s32.totalorder %v20972_v19, %v20982_v32 }
 0x4d2   : > { %11491 = vmatpush2.msk.msra.mxu1 %vm3163_vm2, %v20885_v36  ;;  %vm3100_vm2 = vcmp.eq.s32.totalorder %v20973_v23, %v20981_v10 }
 0x4d3   : > { %11492 = vmatprep.subr.msk.mxu1 %vm3156_vm3, %v20885_v36  ;;  %vm3099_vm3 = vcmp.eq.s32.totalorder %v20973_v23, %v20982_v32 }
 0x4d4   : > { %11493 = vmatpush2.msk.msra.mxu1 %vm3155_vm4, %v20885_v36  ;;  %vm3092_vm4 = vcmp.eq.s32.totalorder %v20974_v25, %v20981_v10 }
 0x4d5   : > { %11494 = vmatprep.subr.msk.mxu1 %vm3148_vm5, %v20885_v36  ;;  %vm3091_vm5 = vcmp.eq.s32.totalorder %v20974_v25, %v20982_v32 }
 0x4d6   : > { %11495 = vmatpush2.msk.msra.mxu1 %vm3147_vm6, %v20885_v36  ;;  %vm3084_vm6 = vcmp.eq.s32.totalorder %v20975_v46, %v20981_v10 }
 0x4d7   : > { %11496 = vmatprep.subr.msk.mxu1 %vm3140_vm7, %v20885_v36  ;;  %vm3083_vm7 = vcmp.eq.s32.totalorder %v20975_v46, %v20982_v32 }
 0x4d8   : > { %11497 = vmatpush2.msk.msra.mxu1 %vm3139_vm8, %v20885_v36  ;;  %vm3076_vm8 = vcmp.eq.s32.totalorder %v20976_v26, %v20981_v10 }
 0x4d9   : > { %11498 = vmatprep.subr.msk.mxu1 %vm3132_vm9, %v20885_v36  ;;  %vm3075_vm9 = vcmp.eq.s32.totalorder %v20976_v26, %v20982_v32  ;;  %v17374_v26 = vld [vmem:[%s14321_s17] sm:$0xff] }
 0x4da   : > { %11499 = vmatpush2.msk.msra.mxu1 %vm3131_vm10, %v20885_v36  ;;  %v17378_v4 = vrot.slane %v17374_v26, %v20985_v40  ;;  %v20992_v40 = vld [vmem:[#allocation53_spill] sm:$0xff]  ;;  %v17567_v3 = vrot.slane %v17374_v26, %v20998_v6  ;;  %v17574_v62 = vrot.slane %v17374_v26, %v21000_v0  ;;  %v21002_v0 = vld [vmem:[#allocation82_spill] sm:$0xff] }
 0x4db   : > { %11500 = vmatprep.subr.msk.mxu1 %vm3124_vm11, %v20885_v36  ;;  %vm6104_vm11 = vcmp.eq.s32.totalorder %v14477_v45, %v16986_v31  ;;  %v17769_v6 = vrot.slane %v17374_v26, %v21002_v0 }
 0x4dc   : > { %11501 = vmatpush2.msk.msra.mxu1 %vm3123_vm12, %v20885_v36  ;;  %20986 = vst [vmem:[#allocation75_spill] sm:$0xff] %v17378_v4  ;;  %vm6119_vm10 = vcmp.eq.s32.totalorder %v14464_v39, %v17378_v4  ;;  %vm6103_vm12 = vcmp.eq.s32.totalorder %v14477_v45, %v17378_v4  ;;  %20999 = vst [vmem:[#allocation78_spill] sm:$0xff] %v17567_v3 }
 0x4dd   : > { %11502 = vmatprep.subr.msk.mxu1 %vm3116_vm13, %v20885_v36  ;;  %vm6088_vm13 = vcmp.eq.s32.totalorder %v14494_v48, %v16986_v31  ;;  %21001 = vst [vmem:[#allocation84_spill] sm:$0xff] %v17574_v62  ;;  %21003 = vst [vmem:[#allocation85_spill] sm:$0xff] %v17769_v6 }
 0x4de   : > { %11503 = vmatpush2.msk.msra.mxu1 %vm3115_vm14, %v20885_v36  ;;  %vm6087_vm14 = vcmp.eq.s32.totalorder %v14494_v48, %v17378_v4 }
 0x4df   : > { %11504 = vmatprep.subr.msk.mxu1 %vm3108_vm15, %v20885_v36  ;;  %vm6072_vm15 = vcmp.eq.s32.totalorder %v14512_v51, %v16986_v31 }
 0x4e0   : > { %11505 = vmatpush2.msk.msra.mxu1 %vm3107_vm1, %v20885_v36  ;;  %vm6071_vm1 = vcmp.eq.s32.totalorder %v14512_v51, %v17378_v4 }
 0x4e1   : > { %11506 = vmatprep.subr.msk.mxu1 %vm3100_vm2, %v20885_v36  ;;  %vm6056_vm2 = vcmp.eq.s32.totalorder %v14530_v53, %v16986_v31 }
 0x4e2   : > { %11507 = vmatpush2.msk.msra.mxu1 %vm3099_vm3, %v20885_v36  ;;  %vm6055_vm3 = vcmp.eq.s32.totalorder %v14530_v53, %v17378_v4 }
 0x4e3   : > { %11508 = vmatprep.subr.msk.mxu1 %vm3092_vm4, %v20885_v36  ;;  %vm6040_vm4 = vcmp.eq.s32.totalorder %v14548_v55, %v16986_v31 }
 0x4e4   : > { %11509 = vmatpush2.msk.msra.mxu1 %vm3091_vm5, %v20885_v36  ;;  %v17354_v23 = vpop.f32.mrf.mxu0  ;;  %vm6039_vm5 = vcmp.eq.s32.totalorder %v14548_v55, %v17378_v4 }
 0x4e5   : > { %11510 = vmatprep.subr.msk.mxu1 %vm3084_vm6, %v20885_v36  ;;  %vm6024_vm6 = vcmp.eq.s32.totalorder %v14566_v57, %v16986_v31 }
 0x4e6   : > { %11511 = vmatpush2.msk.msra.mxu1 %vm3083_vm7, %v20885_v36  ;;  %v17362_v25 = vpop.f32.mrf.mxu0  ;;  %vm6023_vm7 = vcmp.eq.s32.totalorder %v14566_v57, %v17378_v4 }
 0x4e7   : > { %11512 = vmatprep.subr.msk.mxu1 %vm3076_vm8, %v20885_v36  ;;  %vm6008_vm8 = vcmp.eq.s32.totalorder %v14584_v59, %v16986_v31 }
 0x4e8   : > { %11513 = vmatpush2.msk.msra.mxu1 %vm3075_vm9, %v20885_v36  ;;  %v17366_v46 = vpop.f32.mrf.mxu0  ;;  %vm6007_vm9 = vcmp.eq.s32.totalorder %v14584_v59, %v17378_v4 }
 0x4e9   : > { %20983 = vst [vmem:[#allocation37_spill] sm:$0xff] %v17366_v46  ;;  %4968 = vmatmul.mubr.f32.vlgmr.msra.gmra.mxu1 %v16554_v35  ;;  %v20988_v35 = vld [vmem:[#allocation45_spill] sm:$0xff] }
 0x4ea   : > { %v17369_v19 = vpop.f32.mrf.mxu0  ;;  %5124 = vmatprep.mubr.f32.mxu1 %v20907_v42 }
 0x4ec   : > { %v5290_v10 = vpop.f32.mrf.mxu0 }
 0x4ed   : > { %v5291_v11 = vadd.f32 %v5290_v10, %v20984_v14  ;;  %v20990_v10 = vld [vmem:[#allocation48_spill] sm:$0xff] }
 0x4ee   : > { %v5292_v32 = vpop.f32.mrf.mxu0 }
 0x4ef   : > { %v5293_v44 = vadd.f32 %v5292_v32, %v20984_v14  ;;  %v17383_v46 = vmax.f32 %v5291_v11, 0.0  ;;  %v20987_v11 = vld [vmem:[#allocation43_spill] sm:$0xff] }
 0x4f0   : > { %v20991_v32 = vld [vmem:[#allocation51_spill] sm:$0xff] }
 0x4f1   : > { %v17381_v15 = vmax.f32 %v5293_v44, 0.0  ;;  %v20989_v44 = vld [vmem:[#allocation46_spill] sm:$0xff] }
 0x4f3   : > { %8572 = vmatprep.mubr.f32.mxu0 %v17381_v15 }
 0x4f4   : > { %8573 = vmatmul.mubr.f32.vlgmr.msra.gmra.mxu0 %v17383_v46 }
 0x4f5   : > { %12802 = vmatpush1.msk.msra.mxu0 %vm6119_vm10, %v20885_v36  ;;  %8714 = vmatprep.mubr.f32.mxu0 %v17381_v15  ;;  %vm5992_vm10 = vcmp.eq.s32.totalorder %v14602_v61, %v16986_v31 }
 0x4f6   : > { %12803 = vmatprep.subr.msk.mxu0 %vm6104_vm11, %v20885_v36  ;;  %vm5991_vm11 = vcmp.eq.s32.totalorder %v14602_v61, %v17378_v4 }
 0x4f7   : > { %12804 = vmatpush1.msk.msra.mxu0 %vm6103_vm12, %v20885_v36  ;;  %vm5976_vm12 = vcmp.eq.s32.totalorder %v14620_v63, %v16986_v31 }
 0x4f8   : > { %12805 = vmatprep.subr.msk.mxu0 %vm6088_vm13, %v20885_v36  ;;  %vm5975_vm13 = vcmp.eq.s32.totalorder %v14620_v63, %v17378_v4 }
 0x4f9   : > { %12806 = vmatpush1.msk.msra.mxu0 %vm6087_vm14, %v20885_v36  ;;  %vm5960_vm14 = vcmp.eq.s32.totalorder %v14638_v1, %v16986_v31 }
 0x4fa   : > { %12807 = vmatprep.subr.msk.mxu0 %vm6072_vm15, %v20885_v36  ;;  %vm5959_vm15 = vcmp.eq.s32.totalorder %v14638_v1, %v17378_v4 }
 0x4fb   : > { %12808 = vmatpush1.msk.msra.mxu0 %vm6071_vm1, %v20885_v36  ;;  %vm5944_vm1 = vcmp.eq.s32.totalorder %v14656_v5, %v16986_v31 }
 0x4fc   : > { %12809 = vmatprep.subr.msk.mxu0 %vm6056_vm2, %v20885_v36  ;;  %vm5943_vm2 = vcmp.eq.s32.totalorder %v14656_v5, %v17378_v4 }
 0x4fd   : > { %12810 = vmatpush1.msk.msra.mxu0 %vm6055_vm3, %v20885_v36  ;;  %vm5928_vm3 = vcmp.eq.s32.totalorder %v14674_v7, %v16986_v31 }
 0x4fe   : > { %12811 = vmatprep.subr.msk.mxu0 %vm6040_vm4, %v20885_v36  ;;  %vm5927_vm4 = vcmp.eq.s32.totalorder %v14674_v7, %v17378_v4 }
 0x4ff   : > { %12812 = vmatpush1.msk.msra.mxu0 %vm6039_vm5, %v20885_v36  ;;  %vm5912_vm5 = vcmp.eq.s32.totalorder %v20987_v11, %v16986_v31 }
 0x500   : > { %12813 = vmatprep.subr.msk.mxu0 %vm6024_vm6, %v20885_v36  ;;  %vm5911_vm6 = vcmp.eq.s32.totalorder %v20987_v11, %v17378_v4 }
 0x501   : > { %12814 = vmatpush1.msk.msra.mxu0 %vm6023_vm7, %v20885_v36  ;;  %vm5896_vm7 = vcmp.eq.s32.totalorder %v20988_v35, %v16986_v31 }
 0x502   : > { %12815 = vmatprep.subr.msk.mxu0 %vm6008_vm8, %v20885_v36  ;;  %vm5895_vm8 = vcmp.eq.s32.totalorder %v20988_v35, %v17378_v4 }
 0x503   : > { %12816 = vmatpush1.msk.msra.mxu0 %vm6007_vm9, %v20885_v36  ;;  %vm5880_vm9 = vcmp.eq.s32.totalorder %v20989_v44, %v16986_v31 }
 0x504   : > { %12817 = vmatprep.subr.msk.mxu0 %vm5992_vm10, %v20885_v36  ;;  %vm5879_vm10 = vcmp.eq.s32.totalorder %v20989_v44, %v17378_v4 }
 0x505   : > { %12818 = vmatpush1.msk.msra.mxu0 %vm5991_vm11, %v20885_v36  ;;  %vm6376_vm11 = vcmp.eq.s32.totalorder %v20990_v10, %v16986_v31 }
 0x506   : > { %12819 = vmatprep.subr.msk.mxu0 %vm5976_vm12, %v20885_v36  ;;  %vm6375_vm12 = vcmp.eq.s32.totalorder %v20990_v10, %v17378_v4 }
 0x507   : > { %12820 = vmatpush1.msk.msra.mxu0 %vm5975_vm13, %v20885_v36  ;;  %vm6360_vm13 = vcmp.eq.s32.totalorder %v14761_v17, %v16986_v31 }
 0x508   : > { %12821 = vmatprep.subr.msk.mxu0 %vm5960_vm14, %v20885_v36  ;;  %vm6359_vm14 = vcmp.eq.s32.totalorder %v14761_v17, %v17378_v4 }
 0x509   : > { %12822 = vmatpush1.msk.msra.mxu0 %vm5959_vm15, %v20885_v36  ;;  %vm6344_vm15 = vcmp.eq.s32.totalorder %v20991_v32, %v16986_v31 }
 0x50a   : > { %12823 = vmatprep.subr.msk.mxu0 %vm5944_vm1, %v20885_v36  ;;  %vm6343_vm1 = vcmp.eq.s32.totalorder %v20991_v32, %v17378_v4 }
 0x50b   : > { %12824 = vmatpush1.msk.msra.mxu0 %vm5943_vm2, %v20885_v36  ;;  %vm6328_vm2 = vcmp.eq.s32.totalorder %v20992_v40, %v16986_v31 }
 0x50c   : > { %12825 = vmatprep.subr.msk.mxu0 %vm5928_vm3, %v20885_v36  ;;  %vm6327_vm3 = vcmp.eq.s32.totalorder %v20992_v40, %v17378_v4 }
 0x50d   : > { %12826 = vmatpush1.msk.msra.mxu0 %vm5927_vm4, %v20885_v36  ;;  %vm6312_vm4 = vcmp.eq.s32.totalorder %v20993_v33, %v16986_v31 }
 0x50e   : > { %12827 = vmatprep.subr.msk.mxu0 %vm5912_vm5, %v20885_v36  ;;  %vm6311_vm5 = vcmp.eq.s32.totalorder %v20993_v33, %v17378_v4 }
 0x50f   : > { %12828 = vmatpush1.msk.msra.mxu0 %vm5911_vm6, %v20885_v36  ;;  %vm6296_vm6 = vcmp.eq.s32.totalorder %v20994_v20, %v16986_v31 }
 0x510   : > { %12829 = vmatprep.subr.msk.mxu0 %vm5896_vm7, %v20885_v36  ;;  %vm6295_vm7 = vcmp.eq.s32.totalorder %v20994_v20, %v17378_v4 }
 0x511   : > { %12830 = vmatpush1.msk.msra.mxu0 %vm5895_vm8, %v20885_v36  ;;  %vm6280_vm8 = vcmp.eq.s32.totalorder %v20995_v2, %v16986_v31 }
 0x512   : > { %12831 = vmatprep.subr.msk.mxu0 %vm5880_vm9, %v20885_v36  ;;  %vm6279_vm9 = vcmp.eq.s32.totalorder %v20995_v2, %v17378_v4 }
 0x513   : > { %12832 = vmatpush1.msk.msra.mxu0 %vm5879_vm10, %v20885_v36  ;;  %vm6264_vm10 = vcmp.eq.s32.totalorder %v20926_v37, %v16986_v31 }
 0x514   : > { %12833 = vmatprep.subr.msk.mxu0 %vm6376_vm11, %v20885_v36  ;;  %vm6263_vm11 = vcmp.eq.s32.totalorder %v20926_v37, %v17378_v4 }
 0x515   : > { %12834 = vmatpush2.msk.msra.mxu0 %vm6375_vm12, %v20885_v36  ;;  %vm6248_vm12 = vcmp.eq.s32.totalorder %v20928_v18, %v16986_v31 }
 0x516   : > { %12835 = vmatprep.subr.msk.mxu0 %vm6360_vm13, %v20885_v36  ;;  %vm6247_vm13 = vcmp.eq.s32.totalorder %v20928_v18, %v17378_v4 }
 0x517   : > { %12836 = vmatpush2.msk.msra.mxu0 %vm6359_vm14, %v20885_v36  ;;  %vm6232_vm14 = vcmp.eq.s32.totalorder %v20930_v38, %v16986_v31 }
 0x518   : > { %12837 = vmatprep.subr.msk.mxu0 %vm6344_vm15, %v20885_v36  ;;  %vm6231_vm15 = vcmp.eq.s32.totalorder %v20930_v38, %v17378_v4 }
 0x519   : > { %12838 = vmatpush2.msk.msra.mxu0 %vm6343_vm1, %v20885_v36  ;;  %vm6216_vm1 = vcmp.eq.s32.totalorder %v20932_v27, %v16986_v31 }
 0x51a   : > { %12839 = vmatprep.subr.msk.mxu0 %vm6328_vm2, %v20885_v36  ;;  %vm6215_vm2 = vcmp.eq.s32.totalorder %v20932_v27, %v17378_v4 }
 0x51b   : > { %12840 = vmatpush2.msk.msra.mxu0 %vm6327_vm3, %v20885_v36  ;;  %vm6200_vm3 = vcmp.eq.s32.totalorder %v20934_v34, %v16986_v31 }
 0x51c   : > { %12841 = vmatprep.subr.msk.mxu0 %vm6312_vm4, %v20885_v36  ;;  %vm6199_vm4 = vcmp.eq.s32.totalorder %v20934_v34, %v17378_v4 }
 0x51d   : > { %12842 = vmatpush2.msk.msra.mxu0 %vm6311_vm5, %v20885_v36  ;;  %vm6184_vm5 = vcmp.eq.s32.totalorder %v20996_v24, %v16986_v31 }
 0x51e   : > { %12843 = vmatprep.subr.msk.mxu0 %vm6296_vm6, %v20885_v36  ;;  %vm6183_vm6 = vcmp.eq.s32.totalorder %v20996_v24, %v17378_v4 }
 0x51f   : > { %12844 = vmatpush2.msk.msra.mxu0 %vm6295_vm7, %v20885_v36  ;;  %vm6168_vm7 = vcmp.eq.s32.totalorder %v20997_v8, %v16986_v31 }
 0x520   : > { %12845 = vmatprep.subr.msk.mxu0 %vm6280_vm8, %v20885_v36  ;;  %vm6167_vm8 = vcmp.eq.s32.totalorder %v20997_v8, %v17378_v4 }
 0x521   : > { %12846 = vmatpush2.msk.msra.mxu0 %vm6279_vm9, %v20885_v36  ;;  %vm6152_vm9 = vcmp.eq.s32.totalorder %v20977_v28, %v16986_v31 }
 0x522   : > { %12847 = vmatprep.subr.msk.mxu0 %vm6264_vm10, %v20885_v36  ;;  %vm6151_vm10 = vcmp.eq.s32.totalorder %v20977_v28, %v17378_v4 }
 0x523   : > { %12848 = vmatpush2.msk.msra.mxu0 %vm6263_vm11, %v20885_v36  ;;  %vm6136_vm11 = vcmp.eq.s32.totalorder %v20978_v50, %v16986_v31 }
 0x524   : > { %12849 = vmatprep.subr.msk.mxu0 %vm6248_vm12, %v20885_v36  ;;  %vm6135_vm12 = vcmp.eq.s32.totalorder %v20978_v50, %v17378_v4  ;;  %v21004_v4 = vld [vmem:[#allocation83_spill] sm:$0xff] }
 0x525   : > { %12850 = vmatpush2.msk.msra.mxu0 %vm6247_vm13, %v20885_v36  ;;  %vm6122_vm13 = vcmp.eq.s32.totalorder %v14464_v39, %v17567_v3  ;;  %v17776_v31 = vrot.slane %v17374_v26, %v21004_v4  ;;  %v4543_v26 = vpop.f32.mrf.mxu1 }
 0x526   : > { %12851 = vmatprep.subr.msk.mxu0 %vm6232_vm14, %v20885_v36  ;;  %vm6121_vm14 = vcmp.eq.s32.totalorder %v14464_v39, %v17574_v62 }
 0x527   : > { %12852 = vmatpush2.msk.msra.mxu0 %vm6231_vm15, %v20885_v36  ;;  %vm6106_vm15 = vcmp.eq.s32.totalorder %v14477_v45, %v17567_v3  ;;  %21005 = vst [vmem:[#allocation30_spill] sm:$0xff] %v17776_v31  ;;  %v4545_v4 = vpop.f32.mrf.mxu1 }
 0x528   : > { %12853 = vmatprep.subr.msk.mxu0 %vm6216_vm1, %v20885_v36  ;;  %vm6105_vm1 = vcmp.eq.s32.totalorder %v14477_v45, %v17574_v62 }
 0x529   : > { %12854 = vmatpush2.msk.msra.mxu0 %vm6215_vm2, %v20885_v36  ;;  %vm6090_vm2 = vcmp.eq.s32.totalorder %v14494_v48, %v17567_v3  ;;  %v4685_v0 = vpop.f32.mrf.mxu1 }
 0x52a   : > { %12855 = vmatprep.subr.msk.mxu0 %vm6200_vm3, %v20885_v36  ;;  %vm6089_vm3 = vcmp.eq.s32.totalorder %v14494_v48, %v17574_v62 }
 0x52b   : > { %12856 = vmatpush2.msk.msra.mxu0 %vm6199_vm4, %v20885_v36  ;;  %vm6074_vm4 = vcmp.eq.s32.totalorder %v14512_v51, %v17567_v3 }
 0x52c   : > { %12857 = vmatprep.subr.msk.mxu0 %vm6184_vm5, %v20885_v36  ;;  %vm6073_vm5 = vcmp.eq.s32.totalorder %v14512_v51, %v17574_v62 }
 0x52d   : > { %12858 = vmatpush2.msk.msra.mxu0 %vm6183_vm6, %v20885_v36  ;;  %vm6058_vm6 = vcmp.eq.s32.totalorder %v14530_v53, %v17567_v3 }
 0x52e   : > { %12859 = vmatprep.subr.msk.mxu0 %vm6168_vm7, %v20885_v36  ;;  %vm6057_vm7 = vcmp.eq.s32.totalorder %v14530_v53, %v17574_v62 }
 0x52f   : > { %12860 = vmatpush2.msk.msra.mxu0 %vm6167_vm8, %v20885_v36  ;;  %vm6042_vm8 = vcmp.eq.s32.totalorder %v14548_v55, %v17567_v3 }
 0x530   : > { %12861 = vmatprep.subr.msk.mxu0 %vm6152_vm9, %v20885_v36  ;;  %vm6041_vm9 = vcmp.eq.s32.totalorder %v14548_v55, %v17574_v62 }
 0x531   : > { %12862 = vmatpush2.msk.msra.mxu0 %vm6151_vm10, %v20885_v36  ;;  %vm6026_vm10 = vcmp.eq.s32.totalorder %v14566_v57, %v17567_v3 }
 0x532   : > { %12863 = vmatprep.subr.msk.mxu0 %vm6136_vm11, %v20885_v36  ;;  %vm6025_vm11 = vcmp.eq.s32.totalorder %v14566_v57, %v17574_v62 }
 0x533   : > { %12864 = vmatpush2.msk.msra.mxu0 %vm6135_vm12, %v20885_v36  ;;  %vm6010_vm12 = vcmp.eq.s32.totalorder %v14584_v59, %v17567_v3 }
 0x534   : > { %8715 = vmatmul.mubr.f32.vlgmr.msra.gmra.mxu0 %v17383_v46  ;;  %12929 = vmatprep.subr.msk.mxu0 %vm6122_vm13, %v20885_v36  ;;  %vm6009_vm13 = vcmp.eq.s32.totalorder %v14584_v59, %v17574_v62 }
 0x535   : > { %12930 = vmatpush1.msk.msra.mxu0 %vm6121_vm14, %v20885_v36  ;;  %8856 = vmatprep.mubr.f32.mxu0 %v17381_v15  ;;  %vm5994_vm14 = vcmp.eq.s32.totalorder %v14602_v61, %v17567_v3 }
 0x536   : > { %12931 = vmatprep.subr.msk.mxu0 %vm6106_vm15, %v20885_v36  ;;  %vm5993_vm15 = vcmp.eq.s32.totalorder %v14602_v61, %v17574_v62 }
 0x537   : > { %12932 = vmatpush1.msk.msra.mxu0 %vm6105_vm1, %v20885_v36  ;;  %vm5978_vm1 = vcmp.eq.s32.totalorder %v14620_v63, %v17567_v3 }
 0x538   : > { %12933 = vmatprep.subr.msk.mxu0 %vm6090_vm2, %v20885_v36  ;;  %vm5977_vm2 = vcmp.eq.s32.totalorder %v14620_v63, %v17574_v62 }
 0x539   : > { %12934 = vmatpush1.msk.msra.mxu0 %vm6089_vm3, %v20885_v36  ;;  %vm5962_vm3 = vcmp.eq.s32.totalorder %v14638_v1, %v17567_v3 }
 0x53a   : > { %12935 = vmatprep.subr.msk.mxu0 %vm6074_vm4, %v20885_v36  ;;  %vm5961_vm4 = vcmp.eq.s32.totalorder %v14638_v1, %v17574_v62 }
 0x53b   : > { %12936 = vmatpush1.msk.msra.mxu0 %vm6073_vm5, %v20885_v36  ;;  %vm5946_vm5 = vcmp.eq.s32.totalorder %v14656_v5, %v17567_v3 }
 0x53c   : > { %12937 = vmatprep.subr.msk.mxu0 %vm6058_vm6, %v20885_v36  ;;  %vm5945_vm6 = vcmp.eq.s32.totalorder %v14656_v5, %v17574_v62 }
 0x53d   : > { %12938 = vmatpush1.msk.msra.mxu0 %vm6057_vm7, %v20885_v36  ;;  %vm5930_vm7 = vcmp.eq.s32.totalorder %v14674_v7, %v17567_v3 }
 0x53e   : > { %12939 = vmatprep.subr.msk.mxu0 %vm6042_vm8, %v20885_v36  ;;  %vm5929_vm8 = vcmp.eq.s32.totalorder %v14674_v7, %v17574_v62 }
 0x53f   : > { %12940 = vmatpush1.msk.msra.mxu0 %vm6041_vm9, %v20885_v36  ;;  %vm5914_vm9 = vcmp.eq.s32.totalorder %v20987_v11, %v17567_v3 }
 0x540   : > { %12941 = vmatprep.subr.msk.mxu0 %vm6026_vm10, %v20885_v36  ;;  %vm5913_vm10 = vcmp.eq.s32.totalorder %v20987_v11, %v17574_v62 }
 0x541   : > { %12942 = vmatpush1.msk.msra.mxu0 %vm6025_vm11, %v20885_v36  ;;  %vm5898_vm11 = vcmp.eq.s32.totalorder %v20988_v35, %v17567_v3 }
 0x542   : > { %12943 = vmatprep.subr.msk.mxu0 %vm6010_vm12, %v20885_v36  ;;  %vm5897_vm12 = vcmp.eq.s32.totalorder %v20988_v35, %v17574_v62 }
 0x543   : > { %12944 = vmatpush1.msk.msra.mxu0 %vm6009_vm13, %v20885_v36  ;;  %vm5882_vm13 = vcmp.eq.s32.totalorder %v20989_v44, %v17567_v3 }
 0x544   : > { %12945 = vmatprep.subr.msk.mxu0 %vm5994_vm14, %v20885_v36  ;;  %vm5881_vm14 = vcmp.eq.s32.totalorder %v20989_v44, %v17574_v62 }
 0x545   : > { %12946 = vmatpush1.msk.msra.mxu0 %vm5993_vm15, %v20885_v36  ;;  %vm6378_vm15 = vcmp.eq.s32.totalorder %v20990_v10, %v17567_v3 }
 0x546   : > { %12947 = vmatprep.subr.msk.mxu0 %vm5978_vm1, %v20885_v36  ;;  %vm6377_vm1 = vcmp.eq.s32.totalorder %v20990_v10, %v17574_v62 }
 0x547   : > { %12948 = vmatpush1.msk.msra.mxu0 %vm5977_vm2, %v20885_v36  ;;  %vm6362_vm2 = vcmp.eq.s32.totalorder %v14761_v17, %v17567_v3 }
 0x548   : > { %12949 = vmatprep.subr.msk.mxu0 %vm5962_vm3, %v20885_v36  ;;  %vm6361_vm3 = vcmp.eq.s32.totalorder %v14761_v17, %v17574_v62 }
 0x549   : > { %12950 = vmatpush1.msk.msra.mxu0 %vm5961_vm4, %v20885_v36  ;;  %vm6346_vm4 = vcmp.eq.s32.totalorder %v20991_v32, %v17567_v3 }
 0x54a   : > { %12951 = vmatprep.subr.msk.mxu0 %vm5946_vm5, %v20885_v36  ;;  %vm6345_vm5 = vcmp.eq.s32.totalorder %v20991_v32, %v17574_v62 }
 0x54b   : > { %12952 = vmatpush1.msk.msra.mxu0 %vm5945_vm6, %v20885_v36  ;;  %vm6330_vm6 = vcmp.eq.s32.totalorder %v20992_v40, %v17567_v3 }
 0x54c   : > { %12953 = vmatprep.subr.msk.mxu0 %vm5930_vm7, %v20885_v36  ;;  %vm6329_vm7 = vcmp.eq.s32.totalorder %v20992_v40, %v17574_v62 }
 0x54d   : > { %12954 = vmatpush1.msk.msra.mxu0 %vm5929_vm8, %v20885_v36  ;;  %vm6314_vm8 = vcmp.eq.s32.totalorder %v20993_v33, %v17567_v3 }
 0x54e   : > { %12955 = vmatprep.subr.msk.mxu0 %vm5914_vm9, %v20885_v36  ;;  %vm6313_vm9 = vcmp.eq.s32.totalorder %v20993_v33, %v17574_v62 }
 0x54f   : > { %12956 = vmatpush1.msk.msra.mxu0 %vm5913_vm10, %v20885_v36  ;;  %vm6298_vm10 = vcmp.eq.s32.totalorder %v20994_v20, %v17567_v3 }
 0x550   : > { %12957 = vmatprep.subr.msk.mxu0 %vm5898_vm11, %v20885_v36  ;;  %vm6297_vm11 = vcmp.eq.s32.totalorder %v20994_v20, %v17574_v62 }
 0x551   : > { %12958 = vmatpush1.msk.msra.mxu0 %vm5897_vm12, %v20885_v36  ;;  %vm6282_vm12 = vcmp.eq.s32.totalorder %v20995_v2, %v17567_v3 }
 0x552   : > { %12959 = vmatprep.subr.msk.mxu0 %vm5882_vm13, %v20885_v36  ;;  %vm6281_vm13 = vcmp.eq.s32.totalorder %v20995_v2, %v17574_v62 }
 0x553   : > { %12960 = vmatpush1.msk.msra.mxu0 %vm5881_vm14, %v20885_v36  ;;  %vm6266_vm14 = vcmp.eq.s32.totalorder %v20926_v37, %v17567_v3 }
 0x554   : > { %12961 = vmatprep.subr.msk.mxu0 %vm6378_vm15, %v20885_v36  ;;  %vm6265_vm15 = vcmp.eq.s32.totalorder %v20926_v37, %v17574_v62 }
 0x555   : > { %12962 = vmatpush2.msk.msra.mxu0 %vm6377_vm1, %v20885_v36  ;;  %vm6250_vm1 = vcmp.eq.s32.totalorder %v20928_v18, %v17567_v3 }
 0x556   : > { %12963 = vmatprep.subr.msk.mxu0 %vm6362_vm2, %v20885_v36  ;;  %vm6249_vm2 = vcmp.eq.s32.totalorder %v20928_v18, %v17574_v62 }
 0x557   : > { %12964 = vmatpush2.msk.msra.mxu0 %vm6361_vm3, %v20885_v36  ;;  %vm6234_vm3 = vcmp.eq.s32.totalorder %v20930_v38, %v17567_v3 }
 0x558   : > { %12965 = vmatprep.subr.msk.mxu0 %vm6346_vm4, %v20885_v36  ;;  %vm6233_vm4 = vcmp.eq.s32.totalorder %v20930_v38, %v17574_v62 }
 0x559   : > { %12966 = vmatpush2.msk.msra.mxu0 %vm6345_vm5, %v20885_v36  ;;  %vm6218_vm5 = vcmp.eq.s32.totalorder %v20932_v27, %v17567_v3 }
 0x55a   : > { %12967 = vmatprep.subr.msk.mxu0 %vm6330_vm6, %v20885_v36  ;;  %vm6217_vm6 = vcmp.eq.s32.totalorder %v20932_v27, %v17574_v62 }
 0x55b   : > { %12968 = vmatpush2.msk.msra.mxu0 %vm6329_vm7, %v20885_v36  ;;  %vm6202_vm7 = vcmp.eq.s32.totalorder %v20934_v34, %v17567_v3 }
 0x55c   : > { %12969 = vmatprep.subr.msk.mxu0 %vm6314_vm8, %v20885_v36  ;;  %vm6201_vm8 = vcmp.eq.s32.totalorder %v20934_v34, %v17574_v62 }
 0x55d   : > { %12970 = vmatpush2.msk.msra.mxu0 %vm6313_vm9, %v20885_v36  ;;  %vm6186_vm9 = vcmp.eq.s32.totalorder %v20996_v24, %v17567_v3 }
 0x55e   : > { %12971 = vmatprep.subr.msk.mxu0 %vm6298_vm10, %v20885_v36  ;;  %vm6185_vm10 = vcmp.eq.s32.totalorder %v20996_v24, %v17574_v62 }
 0x55f   : > { %12972 = vmatpush2.msk.msra.mxu0 %vm6297_vm11, %v20885_v36  ;;  %vm6170_vm11 = vcmp.eq.s32.totalorder %v20997_v8, %v17567_v3 }
 0x560   : > { %12973 = vmatprep.subr.msk.mxu0 %vm6282_vm12, %v20885_v36  ;;  %vm6169_vm12 = vcmp.eq.s32.totalorder %v20997_v8, %v17574_v62 }
 0x561   : > { %12974 = vmatpush2.msk.msra.mxu0 %vm6281_vm13, %v20885_v36  ;;  %vm6154_vm13 = vcmp.eq.s32.totalorder %v20977_v28, %v17567_v3 }
 0x562   : > { %12975 = vmatprep.subr.msk.mxu0 %vm6266_vm14, %v20885_v36  ;;  %vm6153_vm14 = vcmp.eq.s32.totalorder %v20977_v28, %v17574_v62 }
 0x563   : > { %12976 = vmatpush2.msk.msra.mxu0 %vm6265_vm15, %v20885_v36  ;;  %vm6138_vm15 = vcmp.eq.s32.totalorder %v20978_v50, %v17567_v3 }
 0x564   : > { %12977 = vmatprep.subr.msk.mxu0 %vm6250_vm1, %v20885_v36  ;;  %vm6137_vm1 = vcmp.eq.s32.totalorder %v20978_v50, %v17574_v62  ;;  %v4687_v62 = vpop.f32.mrf.mxu1 }
 0x565   : > { %12978 = vmatpush2.msk.msra.mxu0 %vm6249_vm2, %v20885_v36  ;;  %vm6124_vm2 = vcmp.eq.s32.totalorder %v14464_v39, %v17769_v6 }
 0x566   : > { %12979 = vmatprep.subr.msk.mxu0 %vm6234_vm3, %v20885_v36  ;;  %vm6123_vm3 = vcmp.eq.s32.totalorder %v14464_v39, %v17776_v31 }
 0x567   : > { %12980 = vmatpush2.msk.msra.mxu0 %vm6233_vm4, %v20885_v36  ;;  %vm6108_vm4 = vcmp.eq.s32.totalorder %v14477_v45, %v17769_v6 }
 0x568   : > { %12981 = vmatprep.subr.msk.mxu0 %vm6218_vm5, %v20885_v36  ;;  %vm6107_vm5 = vcmp.eq.s32.totalorder %v14477_v45, %v17776_v31 }
 0x569   : > { %12982 = vmatpush2.msk.msra.mxu0 %vm6217_vm6, %v20885_v36  ;;  %vm6092_vm6 = vcmp.eq.s32.totalorder %v14494_v48, %v17769_v6  ;;  %v4827_v3 = vpop.f32.mrf.mxu1 }
 0x56a   : > { %12983 = vmatprep.subr.msk.mxu0 %vm6202_vm7, %v20885_v36  ;;  %vm6091_vm7 = vcmp.eq.s32.totalorder %v14494_v48, %v17776_v31 }
 0x56b   : > { %12984 = vmatpush2.msk.msra.mxu0 %vm6201_vm8, %v20885_v36  ;;  %vm6076_vm8 = vcmp.eq.s32.totalorder %v14512_v51, %v17769_v6 }
 0x56c   : > { %12985 = vmatprep.subr.msk.mxu0 %vm6186_vm9, %v20885_v36  ;;  %vm6075_vm9 = vcmp.eq.s32.totalorder %v14512_v51, %v17776_v31 }
 0x56d   : > { %12986 = vmatpush2.msk.msra.mxu0 %vm6185_vm10, %v20885_v36  ;;  %vm6060_vm10 = vcmp.eq.s32.totalorder %v14530_v53, %v17769_v6 }
 0x56e   : > { %12987 = vmatprep.subr.msk.mxu0 %vm6170_vm11, %v20885_v36  ;;  %vm6059_vm11 = vcmp.eq.s32.totalorder %v14530_v53, %v17776_v31 }
 0x56f   : > { %12988 = vmatpush2.msk.msra.mxu0 %vm6169_vm12, %v20885_v36  ;;  %vm6044_vm12 = vcmp.eq.s32.totalorder %v14548_v55, %v17769_v6 }
 0x570   : > { %12989 = vmatprep.subr.msk.mxu0 %vm6154_vm13, %v20885_v36  ;;  %vm6043_vm13 = vcmp.eq.s32.totalorder %v14548_v55, %v17776_v31 }
 0x571   : > { %12990 = vmatpush2.msk.msra.mxu0 %vm6153_vm14, %v20885_v36  ;;  %vm6028_vm14 = vcmp.eq.s32.totalorder %v14566_v57, %v17769_v6 }
 0x572   : > { %12991 = vmatprep.subr.msk.mxu0 %vm6138_vm15, %v20885_v36  ;;  %vm6027_vm15 = vcmp.eq.s32.totalorder %v14566_v57, %v17776_v31 }
 0x573   : > { %12992 = vmatpush2.msk.msra.mxu0 %vm6137_vm1, %v20885_v36  ;;  %vm6012_vm1 = vcmp.eq.s32.totalorder %v14584_v59, %v17769_v6 }
 0x574   : > { %8857 = vmatmul.mubr.f32.vlgmr.msra.gmra.mxu0 %v17383_v46  ;;  %13057 = vmatprep.subr.msk.mxu0 %vm6124_vm2, %v20885_v36  ;;  %vm6011_vm2 = vcmp.eq.s32.totalorder %v14584_v59, %v17776_v31 }
 0x575   : > { %13058 = vmatpush1.msk.msra.mxu0 %vm6123_vm3, %v20885_v36  ;;  %8998 = vmatprep.mubr.f32.mxu0 %v17381_v15  ;;  %vm5996_vm3 = vcmp.eq.s32.totalorder %v14602_v61, %v17769_v6 }
 0x576   : > { %13059 = vmatprep.subr.msk.mxu0 %vm6108_vm4, %v20885_v36  ;;  %vm5995_vm4 = vcmp.eq.s32.totalorder %v14602_v61, %v17776_v31 }
 0x577   : > { %13060 = vmatpush1.msk.msra.mxu0 %vm6107_vm5, %v20885_v36  ;;  %vm5980_vm5 = vcmp.eq.s32.totalorder %v14620_v63, %v17769_v6 }
 0x578   : > { %13061 = vmatprep.subr.msk.mxu0 %vm6092_vm6, %v20885_v36  ;;  %vm5979_vm6 = vcmp.eq.s32.totalorder %v14620_v63, %v17776_v31 }
 0x579   : > { %13062 = vmatpush1.msk.msra.mxu0 %vm6091_vm7, %v20885_v36  ;;  %vm5964_vm7 = vcmp.eq.s32.totalorder %v14638_v1, %v17769_v6 }
 0x57a   : > { %13063 = vmatprep.subr.msk.mxu0 %vm6076_vm8, %v20885_v36  ;;  %vm5963_vm8 = vcmp.eq.s32.totalorder %v14638_v1, %v17776_v31 }
 0x57b   : > { %13064 = vmatpush1.msk.msra.mxu0 %vm6075_vm9, %v20885_v36  ;;  %vm5948_vm9 = vcmp.eq.s32.totalorder %v14656_v5, %v17769_v6 }
 0x57c   : > { %13065 = vmatprep.subr.msk.mxu0 %vm6060_vm10, %v20885_v36  ;;  %vm5947_vm10 = vcmp.eq.s32.totalorder %v14656_v5, %v17776_v31 }
 0x57d   : > { %13066 = vmatpush1.msk.msra.mxu0 %vm6059_vm11, %v20885_v36  ;;  %vm5932_vm11 = vcmp.eq.s32.totalorder %v14674_v7, %v17769_v6 }
 0x57e   : > { %13067 = vmatprep.subr.msk.mxu0 %vm6044_vm12, %v20885_v36  ;;  %vm5931_vm12 = vcmp.eq.s32.totalorder %v14674_v7, %v17776_v31 }
 0x57f   : > { %13068 = vmatpush1.msk.msra.mxu0 %vm6043_vm13, %v20885_v36  ;;  %vm5916_vm13 = vcmp.eq.s32.totalorder %v20987_v11, %v17769_v6 }
 0x580   : > { %13069 = vmatprep.subr.msk.mxu0 %vm6028_vm14, %v20885_v36  ;;  %vm5915_vm14 = vcmp.eq.s32.totalorder %v20987_v11, %v17776_v31 }
 0x581   : > { %13070 = vmatpush1.msk.msra.mxu0 %vm6027_vm15, %v20885_v36  ;;  %vm5900_vm15 = vcmp.eq.s32.totalorder %v20988_v35, %v17769_v6 }
 0x582   : > { %13071 = vmatprep.subr.msk.mxu0 %vm6012_vm1, %v20885_v36  ;;  %vm5899_vm1 = vcmp.eq.s32.totalorder %v20988_v35, %v17776_v31 }
 0x583   : > { %13072 = vmatpush1.msk.msra.mxu0 %vm6011_vm2, %v20885_v36  ;;  %vm5884_vm2 = vcmp.eq.s32.totalorder %v20989_v44, %v17769_v6 }
 0x584   : > { %13073 = vmatprep.subr.msk.mxu0 %vm5996_vm3, %v20885_v36  ;;  %vm5883_vm3 = vcmp.eq.s32.totalorder %v20989_v44, %v17776_v31 }
 0x585   : > { %13074 = vmatpush1.msk.msra.mxu0 %vm5995_vm4, %v20885_v36  ;;  %vm6380_vm4 = vcmp.eq.s32.totalorder %v20990_v10, %v17769_v6 }
 0x586   : > { %13075 = vmatprep.subr.msk.mxu0 %vm5980_vm5, %v20885_v36  ;;  %vm6379_vm5 = vcmp.eq.s32.totalorder %v20990_v10, %v17776_v31 }
 0x587   : > { %13076 = vmatpush1.msk.msra.mxu0 %vm5979_vm6, %v20885_v36  ;;  %vm6364_vm6 = vcmp.eq.s32.totalorder %v14761_v17, %v17769_v6 }
 0x588   : > { %13077 = vmatprep.subr.msk.mxu0 %vm5964_vm7, %v20885_v36  ;;  %vm6363_vm7 = vcmp.eq.s32.totalorder %v14761_v17, %v17776_v31 }
 0x589   : > { %13078 = vmatpush1.msk.msra.mxu0 %vm5963_vm8, %v20885_v36  ;;  %vm6348_vm8 = vcmp.eq.s32.totalorder %v20991_v32, %v17769_v6 }
 0x58a   : > { %13079 = vmatprep.subr.msk.mxu0 %vm5948_vm9, %v20885_v36  ;;  %vm6347_vm9 = vcmp.eq.s32.totalorder %v20991_v32, %v17776_v31 }
 0x58b   : > { %13080 = vmatpush1.msk.msra.mxu0 %vm5947_vm10, %v20885_v36  ;;  %vm6332_vm10 = vcmp.eq.s32.totalorder %v20992_v40, %v17769_v6 }
 0x58c   : > { %13081 = vmatprep.subr.msk.mxu0 %vm5932_vm11, %v20885_v36  ;;  %vm6331_vm11 = vcmp.eq.s32.totalorder %v20992_v40, %v17776_v31 }
 0x58d   : > { %13082 = vmatpush1.msk.msra.mxu0 %vm5931_vm12, %v20885_v36  ;;  %vm6316_vm12 = vcmp.eq.s32.totalorder %v20993_v33, %v17769_v6 }
 0x58e   : > { %13083 = vmatprep.subr.msk.mxu0 %vm5916_vm13, %v20885_v36  ;;  %vm6315_vm13 = vcmp.eq.s32.totalorder %v20993_v33, %v17776_v31 }
 0x58f   : > { %13084 = vmatpush1.msk.msra.mxu0 %vm5915_vm14, %v20885_v36  ;;  %vm6300_vm14 = vcmp.eq.s32.totalorder %v20994_v20, %v17769_v6 }
 0x590   : > { %13085 = vmatprep.subr.msk.mxu0 %vm5900_vm15, %v20885_v36  ;;  %vm6299_vm15 = vcmp.eq.s32.totalorder %v20994_v20, %v17776_v31 }
 0x591   : > { %13086 = vmatpush1.msk.msra.mxu0 %vm5899_vm1, %v20885_v36  ;;  %vm6284_vm1 = vcmp.eq.s32.totalorder %v20995_v2, %v17769_v6 }
 0x592   : > { %13087 = vmatprep.subr.msk.mxu0 %vm5884_vm2, %v20885_v36  ;;  %vm6283_vm2 = vcmp.eq.s32.totalorder %v20995_v2, %v17776_v31  ;;  %v4759_v2 = vadd.f32 %v17314_v9, %v4687_v62  ;;  %v4615_v62 = vadd.f32 %v17272_v13, %v4543_v26  ;;  %v4899_v9 = vadd.f32 %v17328_v12, %v4827_v3  ;;  %v17971_v3 = vld [vmem:[%s14321_s17 + $0x8] sm:$0xff] }
 0x593   : > { %13088 = vmatpush1.msk.msra.mxu0 %vm5883_vm3, %v20885_v36  ;;  %vm6268_vm3 = vcmp.eq.s32.totalorder %v20926_v37, %v17769_v6 }
 0x594   : > { %13089 = vmatprep.subr.msk.mxu0 %vm6380_vm4, %v20885_v36  ;;  %vm6267_vm4 = vcmp.eq.s32.totalorder %v20926_v37, %v17776_v31  ;;  %v4829_v37 = vpop.f32.mrf.mxu1 }
 0x595   : > { %13090 = vmatpush2.msk.msra.mxu0 %vm6379_vm5, %v20885_v36  ;;  %vm6252_vm5 = vcmp.eq.s32.totalorder %v20928_v18, %v17769_v6  ;;  %v4901_v20 = vadd.f32 %v17340_v16, %v4829_v37 }
 0x596   : > { %13091 = vmatprep.subr.msk.mxu0 %vm6364_vm6, %v20885_v36  ;;  %vm6251_vm6 = vcmp.eq.s32.totalorder %v20928_v18, %v17776_v31  ;;  %v4757_v18 = vadd.f32 %v17300_v22, %v4685_v0 }
 0x597   : > { %13092 = vmatpush2.msk.msra.mxu0 %vm6363_vm7, %v20885_v36  ;;  %vm6236_vm7 = vcmp.eq.s32.totalorder %v20930_v38, %v17769_v6 }
 0x598   : > { %13093 = vmatprep.subr.msk.mxu0 %vm6348_vm8, %v20885_v36  ;;  %vm6235_vm8 = vcmp.eq.s32.totalorder %v20930_v38, %v17776_v31  ;;  %v4617_v38 = vadd.f32 %v17286_v43, %v4545_v4  ;;  %v5045_v16 = vmax.f32 %v4615_v62, %v4757_v18  ;;  %v21008_v43 = vld [vmem:[#allocation33_spill] sm:$0xff]  ;;  %v5222_v62 = vadd.f32 %v17369_v19, %v20984_v14 }
 0x599   : > { %13094 = vmatpush2.msk.msra.mxu0 %vm6347_vm9, %v20885_v36  ;;  %vm6220_vm9 = vcmp.eq.s32.totalorder %v20932_v27, %v17769_v6  ;;  %v17995_v26 = vrot.slane %v17971_v3, %v21008_v43  ;;  %v21022_v43 = vld [vmem:[#allocation56_spill] sm:$0xff] }
 0x59a   : > { %13095 = vmatprep.subr.msk.mxu0 %vm6332_vm10, %v20885_v36  ;;  %vm6219_vm10 = vcmp.eq.s32.totalorder %v20932_v27, %v17776_v31  ;;  %v5046_v22 = vmax.f32 %v4617_v38, %v4759_v2  ;;  %v5047_v2 = vmax.f32 %v5045_v16, %v4899_v9  ;;  %v21006_v38 = vld [vmem:[#allocation32_spill] sm:$0xff]  ;;  %v11579_v9 = vld [vmem:[%s20908_s18 + $0x28] sm:$0xff]  ;;  %v18038_v19 = vmax.f32 %v5222_v62, 0.0  ;;  %v21023_v62 = vld [vmem:[#allocation57_spill] sm:$0xff] }
 0x59b   : > { %13096 = vmatpush2.msk.msra.mxu0 %vm6331_vm11, %v20885_v36  ;;  %vm6204_vm11 = vcmp.eq.s32.totalorder %v20934_v34, %v17769_v6  ;;  %21009 = vst [vmem:[#allocation45_spill] sm:$0xff] %v17995_v26  ;;  %v21012_v16 = vld [vmem:[#allocation40_spill] sm:$0xff] }
 0x59c   : > { %13097 = vmatprep.subr.msk.mxu0 %vm6316_vm12, %v20885_v36  ;;  %vm6203_vm12 = vcmp.eq.s32.totalorder %v20934_v34, %v17776_v31  ;;  %v5048_v12 = vmax.f32 %v5046_v22, %v4901_v20  ;;  %v11578_v20 = vld [vmem:[%s20908_s18 + $0x20] sm:$0xff]  ;;  %v21011_v22 = vld [vmem:[#allocation39_spill] sm:$0xff] }
 0x59d   : > { %13098 = vmatpush2.msk.msra.mxu0 %vm6315_vm13, %v20885_v36  ;;  %vm6188_vm13 = vcmp.eq.s32.totalorder %v20996_v24, %v17769_v6 }
 0x59e   : > { %13099 = vmatprep.subr.msk.mxu0 %vm6300_vm14, %v20885_v36  ;;  %vm6187_vm14 = vcmp.eq.s32.totalorder %v20996_v24, %v17776_v31 }
 0x59f   : > { %13100 = vmatpush2.msk.msra.mxu0 %vm6299_vm15, %v20885_v36  ;;  %vm6172_vm15 = vcmp.eq.s32.totalorder %v20997_v8, %v17769_v6 }
 0x5a0   : > { %13101 = vmatprep.subr.msk.mxu0 %vm6284_vm1, %v20885_v36  ;;  %vm6171_vm1 = vcmp.eq.s32.totalorder %v20997_v8, %v17776_v31 }
 0x5a1   : > { %13102 = vmatpush2.msk.msra.mxu0 %vm6283_vm2, %v20885_v36  ;;  %vm6156_vm2 = vcmp.eq.s32.totalorder %v20977_v28, %v17769_v6 }
 0x5a2   : > { %13103 = vmatprep.subr.msk.mxu0 %vm6268_vm3, %v20885_v36  ;;  %vm6155_vm3 = vcmp.eq.s32.totalorder %v20977_v28, %v17776_v31 }
 0x5a3   : > { %13104 = vmatpush2.msk.msra.mxu0 %vm6267_vm4, %v20885_v36  ;;  %vm6140_vm4 = vcmp.eq.s32.totalorder %v20978_v50, %v17769_v6  ;;  %v21027_v6 = vld [vmem:[#allocation61_spill] sm:$0xff] }
 0x5a4   : > { %13105 = vmatprep.subr.msk.mxu0 %vm6252_vm5, %v20885_v36  ;;  %vm5606_vm5 = vcmp.eq.s32.totalorder %v14451_v30, %v16598_v21 }
 0x5a5   : > { %13106 = vmatpush2.msk.msra.mxu0 %vm6251_vm6, %v20885_v36  ;;  %vm6139_vm6 = vcmp.eq.s32.totalorder %v20978_v50, %v17776_v31  ;;  %v21026_v31 = vld [vmem:[#allocation60_spill] sm:$0xff] }
 0x5a6   : > { %13107 = vmatprep.subr.msk.mxu0 %vm6236_vm7, %v20885_v36  ;;  %vm5605_vm7 = vcmp.eq.s32.totalorder %v14451_v30, %v16605_v29 }
 0x5a7   : > { %13108 = vmatpush2.msk.msra.mxu0 %vm6235_vm8, %v20885_v36 }
 0x5a8   : > { %13109 = vmatprep.subr.msk.mxu0 %vm6220_vm9, %v20885_v36  ;;  %vm5590_vm9 = vcmp.eq.s32.totalorder %v14469_v41, %v16598_v21 }
 0x5a9   : > { %13110 = vmatpush2.msk.msra.mxu0 %vm6219_vm10, %v20885_v36  ;;  %v4969_v0 = vpop.f32.mrf.mxu1  ;;  %vm6125_vm10 = vcmp.eq.s32.totalorder %v14464_v39, %v17995_v26 }
 0x5aa   : > { %13111 = vmatprep.subr.msk.mxu0 %vm6204_vm11, %v20885_v36  ;;  %v5041_v37 = vadd.f32 %v17354_v23, %v4969_v0  ;;  %vm5589_vm11 = vcmp.eq.s32.totalorder %v14469_v41, %v16605_v29  ;;  %v21010_v0 = vld [vmem:[#allocation38_spill] sm:$0xff] }
 0x5ab   : > { %13112 = vmatpush2.msk.msra.mxu0 %vm6203_vm12, %v20885_v36  ;;  %v4971_v4 = vpop.f32.mrf.mxu1 }
 0x5ac   : > { %v5043_v13 = vadd.f32 %v17362_v25, %v4971_v4  ;;  %13113 = vmatprep.subr.msk.mxu0 %vm6188_vm13, %v20885_v36  ;;  %v17985_v25 = vrot.slane %v17971_v3, %v21006_v38  ;;  %v5049_v18 = vmax.f32 %v5047_v2, %v5041_v37  ;;  %vm5574_vm13 = vcmp.eq.s32.totalorder %v14485_v47, %v16598_v21  ;;  %v21013_v37 = vld [vmem:[#allocation41_spill] sm:$0xff]  ;;  %v21014_v4 = vld [vmem:[#allocation42_spill] sm:$0xff]  ;;  %v21017_v2 = vld [vmem:[#allocation47_spill] sm:$0xff] }
 0x5ad   : > { %13114 = vmatpush2.msk.msra.mxu0 %vm6187_vm14, %v20885_v36  ;;  %vm6109_vm14 = vcmp.eq.s32.totalorder %v14477_v45, %v17995_v26  ;;  %v21019_v38 = vld [vmem:[#allocation50_spill] sm:$0xff] }
 0x5ae   : > { %v5050_v23 = vmax.f32 %v5048_v12, %v5043_v13  ;;  %13115 = vmatprep.subr.msk.mxu0 %vm6172_vm15, %v20885_v36  ;;  %21007 = vst [vmem:[#allocation43_spill] sm:$0xff] %v17985_v25  ;;  %vm6126_vm8 = vcmp.eq.s32.totalorder %v14464_v39, %v17985_v25  ;;  %vm6110_vm12 = vcmp.eq.s32.totalorder %v14477_v45, %v17985_v25  ;;  %v21015_v12 = vld [vmem:[#allocation44_spill] sm:$0xff]  ;;  %v21016_v13 = vld [vmem:[#allocation31_spill] sm:$0xff] }
 0x5af   : > { %13116 = vmatpush2.msk.msra.mxu0 %vm6171_vm1, %v20885_v36  ;;  %vm5573_vm15 = vcmp.eq.s32.totalorder %v14485_v47, %v16605_v29  ;;  %vm6094_vm1 = vcmp.eq.s32.totalorder %v14494_v48, %v17985_v25 }
 0x5b0   : > { %13117 = vmatprep.subr.msk.mxu0 %vm6156_vm2, %v20885_v36  ;;  %5090 = vmatprep.subr.mxu1 %v5050_v23  ;;  %vm5558_vm2 = vcmp.eq.s32.totalorder %v14503_v49, %v16598_v21  ;;  %v21018_v23 = vld [vmem:[#allocation49_spill] sm:$0xff] }
 0x5b1   : > { %13118 = vmatpush2.msk.msra.mxu0 %vm6155_vm3, %v20885_v36  ;;  %5091 = vmatpush1.msra.mxu1 %v5049_v18  ;;  %vm6093_vm3 = vcmp.eq.s32.totalorder %v14494_v48, %v17995_v26  ;;  %v21020_v18 = vld [vmem:[#allocation52_spill] sm:$0xff] }
 0x5b2   : > { %13119 = vmatprep.subr.msk.mxu0 %vm6140_vm4, %v20885_v36  ;;  %11580 = vmatmul.mubr.msk.f32.vlgmr.msra.gmra.mxu1 %vm800_vm0, %v11578_v20  ;;  %vm5557_vm4 = vcmp.eq.s32.totalorder %v14503_v49, %v16605_v29  ;;  %v21021_v20 = vld [vmem:[#allocation54_spill] sm:$0xff] }
 0x5b3   : > { %12609 = vmatprep.subr.msk.mxu1 %vm5606_vm5, %v20885_v36  ;;  %13120 = vmatpush2.msk.msra.mxu0 %vm6139_vm6, %v20885_v36  ;;  %vm6078_vm5 = vcmp.eq.s32.totalorder %v14512_v51, %v17985_v25  ;;  %vm5542_vm6 = vcmp.eq.s32.totalorder %v14521_v52, %v16598_v21 }
 0x5b4   : > { %12610 = vmatpush1.msk.msra.mxu1 %vm5605_vm7, %v20885_v36  ;;  %8999 = vmatmul.mubr.f32.vlgmr.msra.gmra.mxu0 %v17383_v46  ;;  %vm6077_vm7 = vcmp.eq.s32.totalorder %v14512_v51, %v17995_v26 }
 0x5b5   : > { %13185 = vmatprep.subr.msk.mxu0 %vm6126_vm8, %v20885_v36  ;;  %12611 = vmatprep.subr.msk.mxu1 %vm5590_vm9, %v20885_v36  ;;  %vm5541_vm8 = vcmp.eq.s32.totalorder %v14521_v52, %v16605_v29  ;;  %vm6062_vm9 = vcmp.eq.s32.totalorder %v14530_v53, %v17985_v25 }
 0x5b6   : > { %13186 = vmatpush1.msk.msra.mxu0 %vm6125_vm10, %v20885_v36  ;;  %9140 = vmatprep.mubr.f32.mxu0 %v17381_v15  ;;  %vm5526_vm10 = vcmp.eq.s32.totalorder %v14539_v54, %v16598_v21 }
 0x5b7   : > { %5130 = vmatprep.mubr.f32.mxu1 %v20907_v42  ;;  %12612 = vmatpush1.msk.msra.mxu1 %vm5589_vm11, %v20885_v36  ;;  %vm6061_vm11 = vcmp.eq.s32.totalorder %v14530_v53, %v17995_v26  ;;  %v21025_v42 = vld [vmem:[#allocation59_spill] sm:$0xff] }
 0x5b8   : > { %13187 = vmatprep.subr.msk.mxu0 %vm6110_vm12, %v20885_v36  ;;  %11581 = vmatmul.mubr.msk.f32.gmra.mxu1 %vm800_vm0, %v11579_v9  ;;  %vm5525_vm12 = vcmp.eq.s32.totalorder %v14539_v54, %v16605_v29  ;;  %v21024_v9 = vld [vmem:[#allocation58_spill] sm:$0xff] }
 0x5b9   : > { %12613 = vmatprep.subr.msk.mxu1 %vm5574_vm13, %v20885_v36  ;;  %13188 = vmatpush1.msk.msra.mxu0 %vm6109_vm14, %v20885_v36  ;;  %vm6046_vm13 = vcmp.eq.s32.totalorder %v14548_v55, %v17985_v25  ;;  %vm5510_vm14 = vcmp.eq.s32.totalorder %v14557_v56, %v16598_v21 }
 0x5ba   : > { %12614 = vmatpush1.msk.msra.mxu1 %vm5573_vm15, %v20885_v36  ;;  %8501 = vmatprep.mubr.f32.mxu1 %v18038_v19  ;;  %vm6045_vm15 = vcmp.eq.s32.totalorder %v14548_v55, %v17995_v26 }
 0x5bb   : > { %13189 = vmatprep.subr.msk.mxu0 %vm6094_vm1, %v20885_v36  ;;  %12615 = vmatprep.subr.msk.mxu1 %vm5558_vm2, %v20885_v36  ;;  %vm5509_vm1 = vcmp.eq.s32.totalorder %v14557_v56, %v16605_v29  ;;  %vm6030_vm2 = vcmp.eq.s32.totalorder %v14566_v57, %v17985_v25 }
 0x5bc   : > { %13190 = vmatpush1.msk.msra.mxu0 %vm6093_vm3, %v20885_v36  ;;  %12616 = vmatpush1.msk.msra.mxu1 %vm5557_vm4, %v20885_v36  ;;  %vm5494_vm3 = vcmp.eq.s32.totalorder %v14575_v58, %v16598_v21  ;;  %vm6029_vm4 = vcmp.eq.s32.totalorder %v14566_v57, %v17995_v26 }
 0x5bd   : > { %13191 = vmatprep.subr.msk.mxu0 %vm6078_vm5, %v20885_v36  ;;  %12617 = vmatprep.subr.msk.mxu1 %vm5542_vm6, %v20885_v36  ;;  %vm5493_vm5 = vcmp.eq.s32.totalorder %v14575_v58, %v16605_v29  ;;  %vm6014_vm6 = vcmp.eq.s32.totalorder %v14584_v59, %v17985_v25 }
 0x5be   : > { %13192 = vmatpush1.msk.msra.mxu0 %vm6077_vm7, %v20885_v36  ;;  %12618 = vmatpush1.msk.msra.mxu1 %vm5541_vm8, %v20885_v36  ;;  %vm5478_vm7 = vcmp.eq.s32.totalorder %v14593_v60, %v16598_v21  ;;  %vm6013_vm8 = vcmp.eq.s32.totalorder %v14584_v59, %v17995_v26 }
 0x5bf   : > { %13193 = vmatprep.subr.msk.mxu0 %vm6062_vm9, %v20885_v36  ;;  %12619 = vmatprep.subr.msk.mxu1 %vm5526_vm10, %v20885_v36  ;;  %vm5477_vm9 = vcmp.eq.s32.totalorder %v14593_v60, %v16605_v29  ;;  %vm5998_vm10 = vcmp.eq.s32.totalorder %v14602_v61, %v17985_v25 }
 0x5c0   : > { %13194 = vmatpush1.msk.msra.mxu0 %vm6061_vm11, %v20885_v36  ;;  %12620 = vmatpush1.msk.msra.mxu1 %vm5525_vm12, %v20885_v36  ;;  %vm5462_vm11 = vcmp.eq.s32.totalorder %v21010_v0, %v16598_v21  ;;  %vm5997_vm12 = vcmp.eq.s32.totalorder %v14602_v61, %v17995_v26 }
 0x5c1   : > { %13195 = vmatprep.subr.msk.mxu0 %vm6046_vm13, %v20885_v36  ;;  %12621 = vmatprep.subr.msk.mxu1 %vm5510_vm14, %v20885_v36  ;;  %vm5461_vm13 = vcmp.eq.s32.totalorder %v21010_v0, %v16605_v29  ;;  %vm5982_vm14 = vcmp.eq.s32.totalorder %v14620_v63, %v17985_v25 }
 0x5c2   : > { %13196 = vmatpush1.msk.msra.mxu0 %vm6045_vm15, %v20885_v36  ;;  %12622 = vmatpush1.msk.msra.mxu1 %vm5509_vm1, %v20885_v36  ;;  %vm5446_vm15 = vcmp.eq.s32.totalorder %v21011_v22, %v16598_v21  ;;  %vm5981_vm1 = vcmp.eq.s32.totalorder %v14620_v63, %v17995_v26 }
 0x5c3   : > { %13197 = vmatprep.subr.msk.mxu0 %vm6030_vm2, %v20885_v36  ;;  %12623 = vmatprep.subr.msk.mxu1 %vm5494_vm3, %v20885_v36  ;;  %vm5445_vm2 = vcmp.eq.s32.totalorder %v21011_v22, %v16605_v29  ;;  %vm5966_vm3 = vcmp.eq.s32.totalorder %v14638_v1, %v17985_v25 }
 0x5c4   : > { %13198 = vmatpush1.msk.msra.mxu0 %vm6029_vm4, %v20885_v36  ;;  %12624 = vmatpush1.msk.msra.mxu1 %vm5493_vm5, %v20885_v36  ;;  %vm5430_vm4 = vcmp.eq.s32.totalorder %v21012_v16, %v16598_v21  ;;  %vm5965_vm5 = vcmp.eq.s32.totalorder %v14638_v1, %v17995_v26 }
 0x5c5   : > { %13199 = vmatprep.subr.msk.mxu0 %vm6014_vm6, %v20885_v36  ;;  %12625 = vmatprep.subr.msk.mxu1 %vm5478_vm7, %v20885_v36  ;;  %vm5429_vm6 = vcmp.eq.s32.totalorder %v21012_v16, %v16605_v29  ;;  %vm5950_vm7 = vcmp.eq.s32.totalorder %v14656_v5, %v17985_v25 }
 0x5c6   : > { %13200 = vmatpush1.msk.msra.mxu0 %vm6013_vm8, %v20885_v36  ;;  %12626 = vmatpush1.msk.msra.mxu1 %vm5477_vm9, %v20885_v36  ;;  %vm5414_vm8 = vcmp.eq.s32.totalorder %v21013_v37, %v16598_v21  ;;  %vm5949_vm9 = vcmp.eq.s32.totalorder %v14656_v5, %v17995_v26 }
 0x5c7   : > { %13201 = vmatprep.subr.msk.mxu0 %vm5998_vm10, %v20885_v36  ;;  %12627 = vmatprep.subr.msk.mxu1 %vm5462_vm11, %v20885_v36  ;;  %vm5413_vm10 = vcmp.eq.s32.totalorder %v21013_v37, %v16605_v29  ;;  %vm5934_vm11 = vcmp.eq.s32.totalorder %v14674_v7, %v17985_v25 }
 0x5c8   : > { %13202 = vmatpush1.msk.msra.mxu0 %vm5997_vm12, %v20885_v36  ;;  %12628 = vmatpush1.msk.msra.mxu1 %vm5461_vm13, %v20885_v36  ;;  %vm5398_vm12 = vcmp.eq.s32.totalorder %v21014_v4, %v16598_v21  ;;  %vm5933_vm13 = vcmp.eq.s32.totalorder %v14674_v7, %v17995_v26 }
 0x5c9   : > { %13203 = vmatprep.subr.msk.mxu0 %vm5982_vm14, %v20885_v36  ;;  %12629 = vmatprep.subr.msk.mxu1 %vm5446_vm15, %v20885_v36  ;;  %vm5397_vm14 = vcmp.eq.s32.totalorder %v21014_v4, %v16605_v29  ;;  %vm5918_vm15 = vcmp.eq.s32.totalorder %v20987_v11, %v17985_v25 }
 0x5ca   : > { %13204 = vmatpush1.msk.msra.mxu0 %vm5981_vm1, %v20885_v36  ;;  %12630 = vmatpush1.msk.msra.mxu1 %vm5445_vm2, %v20885_v36  ;;  %vm5382_vm1 = vcmp.eq.s32.totalorder %v21015_v12, %v16598_v21  ;;  %vm5917_vm2 = vcmp.eq.s32.totalorder %v20987_v11, %v17995_v26 }
 0x5cb   : > { %13205 = vmatprep.subr.msk.mxu0 %vm5966_vm3, %v20885_v36  ;;  %12631 = vmatprep.subr.msk.mxu1 %vm5430_vm4, %v20885_v36  ;;  %vm5381_vm3 = vcmp.eq.s32.totalorder %v21015_v12, %v16605_v29  ;;  %vm5902_vm4 = vcmp.eq.s32.totalorder %v20988_v35, %v17985_v25 }
 0x5cc   : > { %13206 = vmatpush1.msk.msra.mxu0 %vm5965_vm5, %v20885_v36  ;;  %12632 = vmatpush1.msk.msra.mxu1 %vm5429_vm6, %v20885_v36  ;;  %vm5366_vm5 = vcmp.eq.s32.totalorder %v21016_v13, %v16598_v21  ;;  %vm5901_vm6 = vcmp.eq.s32.totalorder %v20988_v35, %v17995_v26 }
 0x5cd   : > { %13207 = vmatprep.subr.msk.mxu0 %vm5950_vm7, %v20885_v36  ;;  %12633 = vmatprep.subr.msk.mxu1 %vm5414_vm8, %v20885_v36  ;;  %vm5365_vm7 = vcmp.eq.s32.totalorder %v21016_v13, %v16605_v29  ;;  %vm5886_vm8 = vcmp.eq.s32.totalorder %v20989_v44, %v17985_v25 }
 0x5ce   : > { %13208 = vmatpush1.msk.msra.mxu0 %vm5949_vm9, %v20885_v36  ;;  %12634 = vmatpush1.msk.msra.mxu1 %vm5413_vm10, %v20885_v36  ;;  %vm5862_vm9 = vcmp.eq.s32.totalorder %v21017_v2, %v16598_v21  ;;  %vm5885_vm10 = vcmp.eq.s32.totalorder %v20989_v44, %v17995_v26 }
 0x5cf   : > { %13209 = vmatprep.subr.msk.mxu0 %vm5934_vm11, %v20885_v36  ;;  %12635 = vmatprep.subr.msk.mxu1 %vm5398_vm12, %v20885_v36  ;;  %vm5861_vm11 = vcmp.eq.s32.totalorder %v21017_v2, %v16605_v29  ;;  %vm6382_vm12 = vcmp.eq.s32.totalorder %v20990_v10, %v17985_v25 }
 0x5d0   : > { %13210 = vmatpush1.msk.msra.mxu0 %vm5933_vm13, %v20885_v36  ;;  %12636 = vmatpush1.msk.msra.mxu1 %vm5397_vm14, %v20885_v36  ;;  %vm5846_vm13 = vcmp.eq.s32.totalorder %v21018_v23, %v16598_v21  ;;  %vm6381_vm14 = vcmp.eq.s32.totalorder %v20990_v10, %v17995_v26 }
 0x5d1   : > { %13211 = vmatprep.subr.msk.mxu0 %vm5918_vm15, %v20885_v36  ;;  %12637 = vmatprep.subr.msk.mxu1 %vm5382_vm1, %v20885_v36  ;;  %vm5845_vm15 = vcmp.eq.s32.totalorder %v21018_v23, %v16605_v29  ;;  %vm6366_vm1 = vcmp.eq.s32.totalorder %v14761_v17, %v17985_v25 }
 0x5d2   : > { %13212 = vmatpush1.msk.msra.mxu0 %vm5917_vm2, %v20885_v36  ;;  %12638 = vmatpush1.msk.msra.mxu1 %vm5381_vm3, %v20885_v36  ;;  %vm5830_vm2 = vcmp.eq.s32.totalorder %v21019_v38, %v16598_v21  ;;  %vm6365_vm3 = vcmp.eq.s32.totalorder %v14761_v17, %v17995_v26 }
 0x5d3   : > { %13213 = vmatprep.subr.msk.mxu0 %vm5902_vm4, %v20885_v36  ;;  %12639 = vmatprep.subr.msk.mxu1 %vm5366_vm5, %v20885_v36  ;;  %vm5829_vm4 = vcmp.eq.s32.totalorder %v21019_v38, %v16605_v29  ;;  %vm6350_vm5 = vcmp.eq.s32.totalorder %v20991_v32, %v17985_v25 }
 0x5d4   : > { %13214 = vmatpush1.msk.msra.mxu0 %vm5901_vm6, %v20885_v36  ;;  %12640 = vmatpush1.msk.msra.mxu1 %vm5365_vm7, %v20885_v36  ;;  %vm5814_vm6 = vcmp.eq.s32.totalorder %v21020_v18, %v16598_v21  ;;  %vm6349_vm7 = vcmp.eq.s32.totalorder %v20991_v32, %v17995_v26 }
 0x5d5   : > { %13215 = vmatprep.subr.msk.mxu0 %vm5886_vm8, %v20885_v36  ;;  %12641 = vmatprep.subr.msk.mxu1 %vm5862_vm9, %v20885_v36  ;;  %vm5813_vm8 = vcmp.eq.s32.totalorder %v21020_v18, %v16605_v29  ;;  %vm6334_vm9 = vcmp.eq.s32.totalorder %v20992_v40, %v17985_v25 }
 0x5d6   : > { %13216 = vmatpush1.msk.msra.mxu0 %vm5885_vm10, %v20885_v36  ;;  %12642 = vmatpush2.msk.msra.mxu1 %vm5861_vm11, %v20885_v36  ;;  %vm5798_vm10 = vcmp.eq.s32.totalorder %v21021_v20, %v16598_v21  ;;  %vm6333_vm11 = vcmp.eq.s32.totalorder %v20992_v40, %v17995_v26 }
 0x5d7   : > { %13217 = vmatprep.subr.msk.mxu0 %vm6382_vm12, %v20885_v36  ;;  %12643 = vmatprep.subr.msk.mxu1 %vm5846_vm13, %v20885_v36  ;;  %vm5797_vm12 = vcmp.eq.s32.totalorder %v21021_v20, %v16605_v29  ;;  %vm6318_vm13 = vcmp.eq.s32.totalorder %v20993_v33, %v17985_v25 }
 0x5d8   : > { %13218 = vmatpush2.msk.msra.mxu0 %vm6381_vm14, %v20885_v36  ;;  %12644 = vmatpush2.msk.msra.mxu1 %vm5845_vm15, %v20885_v36  ;;  %vm5782_vm14 = vcmp.eq.s32.totalorder %v21022_v43, %v16598_v21  ;;  %vm6317_vm15 = vcmp.eq.s32.totalorder %v20993_v33, %v17995_v26 }
 0x5d9   : > { %13219 = vmatprep.subr.msk.mxu0 %vm6366_vm1, %v20885_v36  ;;  %12645 = vmatprep.subr.msk.mxu1 %vm5830_vm2, %v20885_v36  ;;  %vm5781_vm1 = vcmp.eq.s32.totalorder %v21022_v43, %v16605_v29  ;;  %vm6302_vm2 = vcmp.eq.s32.totalorder %v21023_v62, %v17985_v25 }
 0x5da   : > { %13220 = vmatpush2.msk.msra.mxu0 %vm6365_vm3, %v20885_v36  ;;  %12646 = vmatpush2.msk.msra.mxu1 %vm5829_vm4, %v20885_v36  ;;  %vm5766_vm3 = vcmp.eq.s32.totalorder %v21024_v9, %v16598_v21  ;;  %vm6301_vm4 = vcmp.eq.s32.totalorder %v21023_v62, %v17995_v26 }
 0x5db   : > { %13221 = vmatprep.subr.msk.mxu0 %vm6350_vm5, %v20885_v36  ;;  %12647 = vmatprep.subr.msk.mxu1 %vm5814_vm6, %v20885_v36  ;;  %vm5765_vm5 = vcmp.eq.s32.totalorder %v21024_v9, %v16605_v29  ;;  %vm6286_vm6 = vcmp.eq.s32.totalorder %v21025_v42, %v17985_v25  ;;  %v21028_v9 = vld [vmem:[#allocation62_spill] sm:$0xff] }
 0x5dc   : > { %13222 = vmatpush2.msk.msra.mxu0 %vm6349_vm7, %v20885_v36  ;;  %12648 = vmatpush2.msk.msra.mxu1 %vm5813_vm8, %v20885_v36  ;;  %vm5750_vm7 = vcmp.eq.s32.totalorder %v21026_v31, %v16598_v21  ;;  %vm6285_vm8 = vcmp.eq.s32.totalorder %v21025_v42, %v17995_v26  ;;  %v21030_v42 = vld [vmem:[#allocation64_spill] sm:$0xff] }
 0x5dd   : > { %13223 = vmatprep.subr.msk.mxu0 %vm6334_vm9, %v20885_v36  ;;  %12649 = vmatprep.subr.msk.mxu1 %vm5798_vm10, %v20885_v36  ;;  %vm5749_vm9 = vcmp.eq.s32.totalorder %v21026_v31, %v16605_v29  ;;  %vm6270_vm10 = vcmp.eq.s32.totalorder %v21027_v6, %v17985_v25  ;;  %v21029_v31 = vld [vmem:[#allocation63_spill] sm:$0xff] }
 0x5de   : > { %13224 = vmatpush2.msk.msra.mxu0 %vm6333_vm11, %v20885_v36  ;;  %12650 = vmatpush2.msk.msra.mxu1 %vm5797_vm12, %v20885_v36  ;;  %vm5734_vm11 = vcmp.eq.s32.totalorder %v21028_v9, %v16598_v21  ;;  %vm6269_vm12 = vcmp.eq.s32.totalorder %v21027_v6, %v17995_v26  ;;  %v21032_v6 = vld [vmem:[#allocation66_spill] sm:$0xff] }
 0x5df   : > { %13225 = vmatprep.subr.msk.mxu0 %vm6318_vm13, %v20885_v36  ;;  %12651 = vmatprep.subr.msk.mxu1 %vm5782_vm14, %v20885_v36  ;;  %vm5733_vm13 = vcmp.eq.s32.totalorder %v21028_v9, %v16605_v29  ;;  %vm6254_vm14 = vcmp.eq.s32.totalorder %v21029_v31, %v17985_v25  ;;  %v21031_v9 = vld [vmem:[#allocation65_spill] sm:$0xff] }
 0x5e0   : > { %13226 = vmatpush2.msk.msra.mxu0 %vm6317_vm15, %v20885_v36  ;;  %12652 = vmatpush2.msk.msra.mxu1 %vm5781_vm1, %v20885_v36  ;;  %vm5718_vm15 = vcmp.eq.s32.totalorder %v21030_v42, %v16598_v21  ;;  %vm6253_vm1 = vcmp.eq.s32.totalorder %v21029_v31, %v17995_v26 }
 0x5e1   : > { %13227 = vmatprep.subr.msk.mxu0 %vm6302_vm2, %v20885_v36  ;;  %12653 = vmatprep.subr.msk.mxu1 %vm5766_vm3, %v20885_v36  ;;  %vm5717_vm2 = vcmp.eq.s32.totalorder %v21030_v42, %v16605_v29  ;;  %vm6238_vm3 = vcmp.eq.s32.totalorder %v21031_v9, %v17985_v25  ;;  %v21033_v42 = vld [vmem:[#allocation68_spill] sm:$0xff] }
 0x5e2   : > { %13228 = vmatpush2.msk.msra.mxu0 %vm6301_vm4, %v20885_v36  ;;  %12654 = vmatpush2.msk.msra.mxu1 %vm5765_vm5, %v20885_v36  ;;  %vm5702_vm4 = vcmp.eq.s32.totalorder %v21032_v6, %v16598_v21  ;;  %vm6237_vm5 = vcmp.eq.s32.totalorder %v21031_v9, %v17995_v26 }
 0x5e3   : > { %13229 = vmatprep.subr.msk.mxu0 %vm6286_vm6, %v20885_v36  ;;  %12655 = vmatprep.subr.msk.mxu1 %vm5750_vm7, %v20885_v36  ;;  %vm5701_vm6 = vcmp.eq.s32.totalorder %v21032_v6, %v16605_v29  ;;  %vm6222_vm7 = vcmp.eq.s32.totalorder %v20932_v27, %v17985_v25  ;;  %v21034_v6 = vld [vmem:[#allocation70_spill] sm:$0xff] }
 0x5e4   : > { %13230 = vmatpush2.msk.msra.mxu0 %vm6285_vm8, %v20885_v36  ;;  %12656 = vmatpush2.msk.msra.mxu1 %vm5749_vm9, %v20885_v36  ;;  %vm5686_vm8 = vcmp.eq.s32.totalorder %v21033_v42, %v16598_v21  ;;  %vm6221_vm9 = vcmp.eq.s32.totalorder %v20932_v27, %v17995_v26 }
 0x5e5   : > { %13231 = vmatprep.subr.msk.mxu0 %vm6270_vm10, %v20885_v36  ;;  %12657 = vmatprep.subr.msk.mxu1 %vm5734_vm11, %v20885_v36  ;;  %vm5685_vm10 = vcmp.eq.s32.totalorder %v21033_v42, %v16605_v29  ;;  %vm6206_vm11 = vcmp.eq.s32.totalorder %v20934_v34, %v17985_v25  ;;  %v21035_v42 = vld [vmem:[#allocation72_spill] sm:$0xff] }
 0x5e6   : > { %13232 = vmatpush2.msk.msra.mxu0 %vm6269_vm12, %v20885_v36  ;;  %12658 = vmatpush2.msk.msra.mxu1 %vm5733_vm13, %v20885_v36  ;;  %vm5670_vm12 = vcmp.eq.s32.totalorder %v21034_v6, %v16598_v21  ;;  %vm6205_vm13 = vcmp.eq.s32.totalorder %v20934_v34, %v17995_v26  ;;  %v21037_v34 = vld [vmem:[#allocation37_spill] sm:$0xff] }
 0x5e7   : > { %13233 = vmatprep.subr.msk.mxu0 %vm6254_vm14, %v20885_v36  ;;  %12659 = vmatprep.subr.msk.mxu1 %vm5718_vm15, %v20885_v36  ;;  %vm5669_vm14 = vcmp.eq.s32.totalorder %v21034_v6, %v16605_v29  ;;  %vm6190_vm15 = vcmp.eq.s32.totalorder %v20996_v24, %v17985_v25  ;;  %v21036_v6 = vld [vmem:[#allocation74_spill] sm:$0xff]  ;;  %v5220_v27 = vadd.f32 %v21037_v34, %v20984_v14  ;;  %v21039_v34 = vld [vmem:[#allocation77_spill] sm:$0xff] }
 0x5e8   : > { %13234 = vmatpush2.msk.msra.mxu0 %vm6253_vm1, %v20885_v36  ;;  %12660 = vmatpush2.msk.msra.mxu1 %vm5717_vm2, %v20885_v36  ;;  %vm5654_vm1 = vcmp.eq.s32.totalorder %v21035_v42, %v16598_v21  ;;  %vm6189_vm2 = vcmp.eq.s32.totalorder %v20996_v24, %v17995_v26  ;;  %v18392_v14 = vrot.slane %v17971_v3, %v21039_v34  ;;  %v21044_v34 = vld [vmem:[#allocation75_spill] sm:$0xff] }
 0x5e9   : > { %13235 = vmatprep.subr.msk.mxu0 %vm6238_vm3, %v20885_v36  ;;  %12661 = vmatprep.subr.msk.mxu1 %vm5702_vm4, %v20885_v36  ;;  %vm5653_vm3 = vcmp.eq.s32.totalorder %v21035_v42, %v16605_v29  ;;  %vm6174_vm4 = vcmp.eq.s32.totalorder %v20997_v8, %v17985_v25  ;;  %v21038_v42 = vld [vmem:[#allocation76_spill] sm:$0xff] }
 0x5ea   : > { %13236 = vmatpush2.msk.msra.mxu0 %vm6237_vm5, %v20885_v36  ;;  %12662 = vmatpush2.msk.msra.mxu1 %vm5701_vm6, %v20885_v36  ;;  %vm5638_vm5 = vcmp.eq.s32.totalorder %v21036_v6, %v16598_v21  ;;  %vm6173_vm6 = vcmp.eq.s32.totalorder %v20997_v8, %v17995_v26  ;;  %21040 = vst [vmem:[#allocation46_spill] sm:$0xff] %v18392_v14  ;;  %v18402_v8 = vmax.f32 %v5220_v27, 0.0  ;;  %v21045_v27 = vld [vmem:[#allocation58_spill] sm:$0xff] }
 0x5eb   : > { %13237 = vmatprep.subr.msk.mxu0 %vm6222_vm7, %v20885_v36  ;;  %12663 = vmatprep.subr.msk.mxu1 %vm5686_vm8, %v20885_v36  ;;  %vm5637_vm7 = vcmp.eq.s32.totalorder %v21036_v6, %v16605_v29  ;;  %vm6158_vm8 = vcmp.eq.s32.totalorder %v20977_v28, %v17985_v25 }
 0x5ec   : > { %13238 = vmatpush2.msk.msra.mxu0 %vm6221_vm9, %v20885_v36  ;;  %12664 = vmatpush2.msk.msra.mxu1 %vm5685_vm10, %v20885_v36  ;;  %vm5622_vm9 = vcmp.eq.s32.totalorder %v21038_v42, %v16598_v21  ;;  %vm6157_vm10 = vcmp.eq.s32.totalorder %v20977_v28, %v17995_v26  ;;  %v21041_v21 = vld [vmem:[#allocation80_spill] sm:$0xff] }
 0x5ed   : > { %13239 = vmatprep.subr.msk.mxu0 %vm6206_vm11, %v20885_v36  ;;  %12665 = vmatprep.subr.msk.mxu1 %vm5670_vm12, %v20885_v36  ;;  %vm5621_vm11 = vcmp.eq.s32.totalorder %v21038_v42, %v16605_v29  ;;  %vm6142_vm12 = vcmp.eq.s32.totalorder %v20978_v50, %v17985_v25  ;;  %v18400_v6 = vrot.slane %v17971_v3, %v21041_v21  ;;  %v21043_v29 = vld [vmem:[#allocation36_spill] sm:$0xff]  ;;  %v21046_v3 = vld [vmem:[#allocation59_spill] sm:$0xff]  ;;  %v21049_v25 = vld [vmem:[#allocation62_spill] sm:$0xff] }
 0x5ee   : > { %13240 = vmatpush2.msk.msra.mxu0 %vm6205_vm13, %v20885_v36  ;;  %12666 = vmatpush2.msk.msra.mxu1 %vm5669_vm14, %v20885_v36  ;;  %vm5608_vm13 = vcmp.eq.s32.totalorder %v14451_v30, %v21043_v29  ;;  %vm6141_vm14 = vcmp.eq.s32.totalorder %v20978_v50, %v17995_v26  ;;  %v21047_v21 = vld [vmem:[#allocation60_spill] sm:$0xff]  ;;  %v21048_v26 = vld [vmem:[#allocation61_spill] sm:$0xff] }
 0x5ef   : > { %13241 = vmatprep.subr.msk.mxu0 %vm6190_vm15, %v20885_v36  ;;  %12667 = vmatprep.subr.msk.mxu1 %vm5654_vm1, %v20885_v36  ;;  %21042 = vst [vmem:[#allocation48_spill] sm:$0xff] %v18400_v6  ;;  %vm5607_vm15 = vcmp.eq.s32.totalorder %v14451_v30, %v21044_v34  ;;  %vm6128_vm1 = vcmp.eq.s32.totalorder %v14464_v39, %v18392_v14 }
 0x5f0   : > { %13242 = vmatpush2.msk.msra.mxu0 %vm6189_vm2, %v20885_v36  ;;  %12668 = vmatpush2.msk.msra.mxu1 %vm5653_vm3, %v20885_v36  ;;  %vm5592_vm2 = vcmp.eq.s32.totalorder %v14469_v41, %v21043_v29  ;;  %vm6127_vm3 = vcmp.eq.s32.totalorder %v14464_v39, %v18400_v6 }
 0x5f1   : > { %13243 = vmatprep.subr.msk.mxu0 %vm6174_vm4, %v20885_v36  ;;  %12669 = vmatprep.subr.msk.mxu1 %vm5638_vm5, %v20885_v36  ;;  %vm5591_vm4 = vcmp.eq.s32.totalorder %v14469_v41, %v21044_v34  ;;  %vm6112_vm5 = vcmp.eq.s32.totalorder %v14477_v45, %v18392_v14 }
 0x5f2   : > { %13244 = vmatpush2.msk.msra.mxu0 %vm6173_vm6, %v20885_v36  ;;  %12670 = vmatpush2.msk.msra.mxu1 %vm5637_vm7, %v20885_v36  ;;  %vm5576_vm6 = vcmp.eq.s32.totalorder %v14485_v47, %v21043_v29  ;;  %vm6111_vm7 = vcmp.eq.s32.totalorder %v14477_v45, %v18400_v6 }
 0x5f3   : > { %13245 = vmatprep.subr.msk.mxu0 %vm6158_vm8, %v20885_v36  ;;  %12671 = vmatprep.subr.msk.mxu1 %vm5622_vm9, %v20885_v36  ;;  %vm5575_vm8 = vcmp.eq.s32.totalorder %v14485_v47, %v21044_v34  ;;  %vm6096_vm9 = vcmp.eq.s32.totalorder %v14494_v48, %v18392_v14 }
 0x5f4   : > { %13246 = vmatpush2.msk.msra.mxu0 %vm6157_vm10, %v20885_v36  ;;  %12672 = vmatpush2.msk.msra.mxu1 %vm5621_vm11, %v20885_v36  ;;  %vm5560_vm10 = vcmp.eq.s32.totalorder %v14503_v49, %v21043_v29  ;;  %vm6095_vm11 = vcmp.eq.s32.totalorder %v14494_v48, %v18400_v6 }
 0x5f5   : > { %13247 = vmatprep.subr.msk.mxu0 %vm6142_vm12, %v20885_v36  ;;  %8502 = vmatmul.mubr.f32.vlgmr.msra.gmra.mxu1 %v18402_v8  ;;  %vm5559_vm12 = vcmp.eq.s32.totalorder %v14503_v49, %v21044_v34 }
 0x5f6   : > { %12737 = vmatprep.subr.msk.mxu1 %vm5608_vm13, %v20885_v36  ;;  %13248 = vmatpush2.msk.msra.mxu0 %vm6141_vm14, %v20885_v36  ;;  %vm6080_vm13 = vcmp.eq.s32.totalorder %v14512_v51, %v18392_v14  ;;  %vm5544_vm14 = vcmp.eq.s32.totalorder %v14521_v52, %v21043_v29 }
 0x5f7   : > { %12738 = vmatpush1.msk.msra.mxu1 %vm5607_vm15, %v20885_v36  ;;  %8643 = vmatprep.mubr.f32.mxu1 %v18038_v19  ;;  %vm6079_vm15 = vcmp.eq.s32.totalorder %v14512_v51, %v18400_v6 }
 0x5f8   : > { %9141 = vmatmul.mubr.f32.vlgmr.msra.gmra.mxu0 %v17383_v46  ;;  %13313 = vmatprep.subr.msk.mxu0 %vm6128_vm1, %v20885_v36  ;;  %vm5543_vm1 = vcmp.eq.s32.totalorder %v14521_v52, %v21044_v34 }
 0x5f9   : > { %12739 = vmatprep.subr.msk.mxu1 %vm5592_vm2, %v20885_v36  ;;  %13314 = vmatpush1.msk.msra.mxu0 %vm6127_vm3, %v20885_v36  ;;  %vm6064_vm2 = vcmp.eq.s32.totalorder %v14530_v53, %v18392_v14  ;;  %vm5528_vm3 = vcmp.eq.s32.totalorder %v14539_v54, %v21043_v29 }
 0x5fa   : > { %9282 = vmatprep.mubr.f32.mxu0 %v17381_v15  ;;  %12740 = vmatpush1.msk.msra.mxu1 %vm5591_vm4, %v20885_v36  ;;  %vm6063_vm4 = vcmp.eq.s32.totalorder %v14530_v53, %v18400_v6 }
 0x5fb   : > { %13315 = vmatprep.subr.msk.mxu0 %vm6112_vm5, %v20885_v36  ;;  %12741 = vmatprep.subr.msk.mxu1 %vm5576_vm6, %v20885_v36  ;;  %vm5527_vm5 = vcmp.eq.s32.totalorder %v14539_v54, %v21044_v34  ;;  %vm6048_vm6 = vcmp.eq.s32.totalorder %v14548_v55, %v18392_v14 }
 0x5fc   : > { %13316 = vmatpush1.msk.msra.mxu0 %vm6111_vm7, %v20885_v36  ;;  %12742 = vmatpush1.msk.msra.mxu1 %vm5575_vm8, %v20885_v36  ;;  %vm5512_vm7 = vcmp.eq.s32.totalorder %v14557_v56, %v21043_v29  ;;  %vm6047_vm8 = vcmp.eq.s32.totalorder %v14548_v55, %v18400_v6 }
 0x5fd   : > { %13317 = vmatprep.subr.msk.mxu0 %vm6096_vm9, %v20885_v36  ;;  %12743 = vmatprep.subr.msk.mxu1 %vm5560_vm10, %v20885_v36  ;;  %vm5511_vm9 = vcmp.eq.s32.totalorder %v14557_v56, %v21044_v34  ;;  %vm6032_vm10 = vcmp.eq.s32.totalorder %v14566_v57, %v18392_v14 }
 0x5fe   : > { %13318 = vmatpush1.msk.msra.mxu0 %vm6095_vm11, %v20885_v36  ;;  %12744 = vmatpush1.msk.msra.mxu1 %vm5559_vm12, %v20885_v36  ;;  %vm5496_vm11 = vcmp.eq.s32.totalorder %v14575_v58, %v21043_v29  ;;  %vm6031_vm12 = vcmp.eq.s32.totalorder %v14566_v57, %v18400_v6 }
 0x5ff   : > { %13319 = vmatprep.subr.msk.mxu0 %vm6080_vm13, %v20885_v36  ;;  %12745 = vmatprep.subr.msk.mxu1 %vm5544_vm14, %v20885_v36  ;;  %vm5495_vm13 = vcmp.eq.s32.totalorder %v14575_v58, %v21044_v34  ;;  %vm6016_vm14 = vcmp.eq.s32.totalorder %v14584_v59, %v18392_v14 }
 0x600   : > { %13320 = vmatpush1.msk.msra.mxu0 %vm6079_vm15, %v20885_v36  ;;  %12746 = vmatpush1.msk.msra.mxu1 %vm5543_vm1, %v20885_v36  ;;  %vm5480_vm15 = vcmp.eq.s32.totalorder %v14593_v60, %v21043_v29  ;;  %vm6015_vm1 = vcmp.eq.s32.totalorder %v14584_v59, %v18400_v6 }
 0x601   : > { %13321 = vmatprep.subr.msk.mxu0 %vm6064_vm2, %v20885_v36  ;;  %12747 = vmatprep.subr.msk.mxu1 %vm5528_vm3, %v20885_v36  ;;  %vm5479_vm2 = vcmp.eq.s32.totalorder %v14593_v60, %v21044_v34  ;;  %vm6000_vm3 = vcmp.eq.s32.totalorder %v14602_v61, %v18392_v14 }
 0x602   : > { %13322 = vmatpush1.msk.msra.mxu0 %vm6063_vm4, %v20885_v36  ;;  %12748 = vmatpush1.msk.msra.mxu1 %vm5527_vm5, %v20885_v36  ;;  %vm5464_vm4 = vcmp.eq.s32.totalorder %v21010_v0, %v21043_v29  ;;  %vm5999_vm5 = vcmp.eq.s32.totalorder %v14602_v61, %v18400_v6 }
 0x603   : > { %13323 = vmatprep.subr.msk.mxu0 %vm6048_vm6, %v20885_v36  ;;  %12749 = vmatprep.subr.msk.mxu1 %vm5512_vm7, %v20885_v36  ;;  %vm5463_vm6 = vcmp.eq.s32.totalorder %v21010_v0, %v21044_v34  ;;  %vm5984_vm7 = vcmp.eq.s32.totalorder %v14620_v63, %v18392_v14 }
 0x604   : > { %13324 = vmatpush1.msk.msra.mxu0 %vm6047_vm8, %v20885_v36  ;;  %12750 = vmatpush1.msk.msra.mxu1 %vm5511_vm9, %v20885_v36  ;;  %vm5448_vm8 = vcmp.eq.s32.totalorder %v21011_v22, %v21043_v29  ;;  %vm5983_vm9 = vcmp.eq.s32.totalorder %v14620_v63, %v18400_v6 }
 0x605   : > { %13325 = vmatprep.subr.msk.mxu0 %vm6032_vm10, %v20885_v36  ;;  %12751 = vmatprep.subr.msk.mxu1 %vm5496_vm11, %v20885_v36  ;;  %vm5447_vm10 = vcmp.eq.s32.totalorder %v21011_v22, %v21044_v34  ;;  %vm5968_vm11 = vcmp.eq.s32.totalorder %v14638_v1, %v18392_v14 }
 0x606   : > { %13326 = vmatpush1.msk.msra.mxu0 %vm6031_vm12, %v20885_v36  ;;  %12752 = vmatpush1.msk.msra.mxu1 %vm5495_vm13, %v20885_v36  ;;  %vm5432_vm12 = vcmp.eq.s32.totalorder %v21012_v16, %v21043_v29  ;;  %vm5967_vm13 = vcmp.eq.s32.totalorder %v14638_v1, %v18400_v6 }
 0x607   : > { %13327 = vmatprep.subr.msk.mxu0 %vm6016_vm14, %v20885_v36  ;;  %12753 = vmatprep.subr.msk.mxu1 %vm5480_vm15, %v20885_v36  ;;  %vm5431_vm14 = vcmp.eq.s32.totalorder %v21012_v16, %v21044_v34  ;;  %vm5952_vm15 = vcmp.eq.s32.totalorder %v14656_v5, %v18392_v14 }
 0x608   : > { %13328 = vmatpush1.msk.msra.mxu0 %vm6015_vm1, %v20885_v36  ;;  %12754 = vmatpush1.msk.msra.mxu1 %vm5479_vm2, %v20885_v36  ;;  %vm5416_vm1 = vcmp.eq.s32.totalorder %v21013_v37, %v21043_v29  ;;  %vm5951_vm2 = vcmp.eq.s32.totalorder %v14656_v5, %v18400_v6 }
 0x609   : > { %13329 = vmatprep.subr.msk.mxu0 %vm6000_vm3, %v20885_v36  ;;  %12755 = vmatprep.subr.msk.mxu1 %vm5464_vm4, %v20885_v36  ;;  %vm5415_vm3 = vcmp.eq.s32.totalorder %v21013_v37, %v21044_v34  ;;  %vm5936_vm4 = vcmp.eq.s32.totalorder %v14674_v7, %v18392_v14 }
 0x60a   : > { %13330 = vmatpush1.msk.msra.mxu0 %vm5999_vm5, %v20885_v36  ;;  %12756 = vmatpush1.msk.msra.mxu1 %vm5463_vm6, %v20885_v36  ;;  %vm5400_vm5 = vcmp.eq.s32.totalorder %v21014_v4, %v21043_v29  ;;  %vm5935_vm6 = vcmp.eq.s32.totalorder %v14674_v7, %v18400_v6 }
 0x60b   : > { %13331 = vmatprep.subr.msk.mxu0 %vm5984_vm7, %v20885_v36  ;;  %12757 = vmatprep.subr.msk.mxu1 %vm5448_vm8, %v20885_v36  ;;  %vm5399_vm7 = vcmp.eq.s32.totalorder %v21014_v4, %v21044_v34  ;;  %vm5920_vm8 = vcmp.eq.s32.totalorder %v20987_v11, %v18392_v14 }
 0x60c   : > { %13332 = vmatpush1.msk.msra.mxu0 %vm5983_vm9, %v20885_v36  ;;  %12758 = vmatpush1.msk.msra.mxu1 %vm5447_vm10, %v20885_v36  ;;  %vm5384_vm9 = vcmp.eq.s32.totalorder %v21015_v12, %v21043_v29  ;;  %vm5919_vm10 = vcmp.eq.s32.totalorder %v20987_v11, %v18400_v6 }
 0x60d   : > { %13333 = vmatprep.subr.msk.mxu0 %vm5968_vm11, %v20885_v36  ;;  %12759 = vmatprep.subr.msk.mxu1 %vm5432_vm12, %v20885_v36  ;;  %vm5383_vm11 = vcmp.eq.s32.totalorder %v21015_v12, %v21044_v34  ;;  %vm5904_vm12 = vcmp.eq.s32.totalorder %v20988_v35, %v18392_v14 }
 0x60e   : > { %13334 = vmatpush1.msk.msra.mxu0 %vm5967_vm13, %v20885_v36  ;;  %12760 = vmatpush1.msk.msra.mxu1 %vm5431_vm14, %v20885_v36  ;;  %vm5368_vm13 = vcmp.eq.s32.totalorder %v21016_v13, %v21043_v29  ;;  %vm5903_vm14 = vcmp.eq.s32.totalorder %v20988_v35, %v18400_v6 }
 0x60f   : > { %13335 = vmatprep.subr.msk.mxu0 %vm5952_vm15, %v20885_v36  ;;  %12761 = vmatprep.subr.msk.mxu1 %vm5416_vm1, %v20885_v36  ;;  %vm5367_vm15 = vcmp.eq.s32.totalorder %v21016_v13, %v21044_v34  ;;  %vm5888_vm1 = vcmp.eq.s32.totalorder %v20989_v44, %v18392_v14 }
 0x610   : > { %13336 = vmatpush1.msk.msra.mxu0 %vm5951_vm2, %v20885_v36  ;;  %12762 = vmatpush1.msk.msra.mxu1 %vm5415_vm3, %v20885_v36  ;;  %vm5864_vm2 = vcmp.eq.s32.totalorder %v21017_v2, %v21043_v29  ;;  %vm5887_vm3 = vcmp.eq.s32.totalorder %v20989_v44, %v18400_v6 }
 0x611   : > { %13337 = vmatprep.subr.msk.mxu0 %vm5936_vm4, %v20885_v36  ;;  %12763 = vmatprep.subr.msk.mxu1 %vm5400_vm5, %v20885_v36  ;;  %vm5863_vm4 = vcmp.eq.s32.totalorder %v21017_v2, %v21044_v34  ;;  %vm6384_vm5 = vcmp.eq.s32.totalorder %v20990_v10, %v18392_v14 }
 0x612   : > { %13338 = vmatpush1.msk.msra.mxu0 %vm5935_vm6, %v20885_v36  ;;  %12764 = vmatpush1.msk.msra.mxu1 %vm5399_vm7, %v20885_v36  ;;  %vm5848_vm6 = vcmp.eq.s32.totalorder %v21018_v23, %v21043_v29  ;;  %vm6383_vm7 = vcmp.eq.s32.totalorder %v20990_v10, %v18400_v6 }
 0x613   : > { %13339 = vmatprep.subr.msk.mxu0 %vm5920_vm8, %v20885_v36  ;;  %12765 = vmatprep.subr.msk.mxu1 %vm5384_vm9, %v20885_v36  ;;  %vm5847_vm8 = vcmp.eq.s32.totalorder %v21018_v23, %v21044_v34  ;;  %vm6368_vm9 = vcmp.eq.s32.totalorder %v14761_v17, %v18392_v14 }
 0x614   : > { %13340 = vmatpush1.msk.msra.mxu0 %vm5919_vm10, %v20885_v36  ;;  %12766 = vmatpush1.msk.msra.mxu1 %vm5383_vm11, %v20885_v36  ;;  %vm5832_vm10 = vcmp.eq.s32.totalorder %v21019_v38, %v21043_v29  ;;  %vm6367_vm11 = vcmp.eq.s32.totalorder %v14761_v17, %v18400_v6 }
 0x615   : > { %13341 = vmatprep.subr.msk.mxu0 %vm5904_vm12, %v20885_v36  ;;  %12767 = vmatprep.subr.msk.mxu1 %vm5368_vm13, %v20885_v36  ;;  %vm5831_vm12 = vcmp.eq.s32.totalorder %v21019_v38, %v21044_v34  ;;  %vm6352_vm13 = vcmp.eq.s32.totalorder %v20991_v32, %v18392_v14 }
 0x616   : > { %13342 = vmatpush1.msk.msra.mxu0 %vm5903_vm14, %v20885_v36  ;;  %12768 = vmatpush1.msk.msra.mxu1 %vm5367_vm15, %v20885_v36  ;;  %vm5816_vm14 = vcmp.eq.s32.totalorder %v21020_v18, %v21043_v29  ;;  %vm6351_vm15 = vcmp.eq.s32.totalorder %v20991_v32, %v18400_v6 }
 0x617   : > { %13343 = vmatprep.subr.msk.mxu0 %vm5888_vm1, %v20885_v36  ;;  %12769 = vmatprep.subr.msk.mxu1 %vm5864_vm2, %v20885_v36  ;;  %vm5815_vm1 = vcmp.eq.s32.totalorder %v21020_v18, %v21044_v34  ;;  %vm6336_vm2 = vcmp.eq.s32.totalorder %v20992_v40, %v18392_v14 }
 0x618   : > { %13344 = vmatpush1.msk.msra.mxu0 %vm5887_vm3, %v20885_v36  ;;  %12770 = vmatpush2.msk.msra.mxu1 %vm5863_vm4, %v20885_v36  ;;  %vm5800_vm3 = vcmp.eq.s32.totalorder %v21021_v20, %v21043_v29  ;;  %vm6335_vm4 = vcmp.eq.s32.totalorder %v20992_v40, %v18400_v6 }
 0x619   : > { %13345 = vmatprep.subr.msk.mxu0 %vm6384_vm5, %v20885_v36  ;;  %12771 = vmatprep.subr.msk.mxu1 %vm5848_vm6, %v20885_v36  ;;  %vm5799_vm5 = vcmp.eq.s32.totalorder %v21021_v20, %v21044_v34  ;;  %vm6320_vm6 = vcmp.eq.s32.totalorder %v20993_v33, %v18392_v14 }
 0x61a   : > { %13346 = vmatpush2.msk.msra.mxu0 %vm6383_vm7, %v20885_v36  ;;  %12772 = vmatpush2.msk.msra.mxu1 %vm5847_vm8, %v20885_v36  ;;  %vm5784_vm7 = vcmp.eq.s32.totalorder %v21022_v43, %v21043_v29  ;;  %vm6319_vm8 = vcmp.eq.s32.totalorder %v20993_v33, %v18400_v6 }
 0x61b   : > { %13347 = vmatprep.subr.msk.mxu0 %vm6368_vm9, %v20885_v36  ;;  %12773 = vmatprep.subr.msk.mxu1 %vm5832_vm10, %v20885_v36  ;;  %vm5783_vm9 = vcmp.eq.s32.totalorder %v21022_v43, %v21044_v34  ;;  %vm6304_vm10 = vcmp.eq.s32.totalorder %v21023_v62, %v18392_v14 }
 0x61c   : > { %13348 = vmatpush2.msk.msra.mxu0 %vm6367_vm11, %v20885_v36  ;;  %12774 = vmatpush2.msk.msra.mxu1 %vm5831_vm12, %v20885_v36  ;;  %vm5768_vm11 = vcmp.eq.s32.totalorder %v21045_v27, %v21043_v29  ;;  %vm6303_vm12 = vcmp.eq.s32.totalorder %v21023_v62, %v18400_v6 }
 0x61d   : > { %13349 = vmatprep.subr.msk.mxu0 %vm6352_vm13, %v20885_v36  ;;  %12775 = vmatprep.subr.msk.mxu1 %vm5816_vm14, %v20885_v36  ;;  %vm5767_vm13 = vcmp.eq.s32.totalorder %v21045_v27, %v21044_v34  ;;  %vm6288_vm14 = vcmp.eq.s32.totalorder %v21046_v3, %v18392_v14 }
 0x61e   : > { %13350 = vmatpush2.msk.msra.mxu0 %vm6351_vm15, %v20885_v36  ;;  %12776 = vmatpush2.msk.msra.mxu1 %vm5815_vm1, %v20885_v36  ;;  %vm5752_vm15 = vcmp.eq.s32.totalorder %v21047_v21, %v21043_v29  ;;  %vm6287_vm1 = vcmp.eq.s32.totalorder %v21046_v3, %v18400_v6 }
 0x61f   : > { %13351 = vmatprep.subr.msk.mxu0 %vm6336_vm2, %v20885_v36  ;;  %12777 = vmatprep.subr.msk.mxu1 %vm5800_vm3, %v20885_v36  ;;  %vm5751_vm2 = vcmp.eq.s32.totalorder %v21047_v21, %v21044_v34  ;;  %vm6272_vm3 = vcmp.eq.s32.totalorder %v21048_v26, %v18392_v14  ;;  %v21050_v21 = vld [vmem:[#allocation64_spill] sm:$0xff] }
 0x620   : > { %13352 = vmatpush2.msk.msra.mxu0 %vm6335_vm4, %v20885_v36  ;;  %12778 = vmatpush2.msk.msra.mxu1 %vm5799_vm5, %v20885_v36  ;;  %vm5736_vm4 = vcmp.eq.s32.totalorder %v21049_v25, %v21043_v29  ;;  %vm6271_vm5 = vcmp.eq.s32.totalorder %v21048_v26, %v18400_v6 }
 0x621   : > { %13353 = vmatprep.subr.msk.mxu0 %vm6320_vm6, %v20885_v36  ;;  %12779 = vmatprep.subr.msk.mxu1 %vm5784_vm7, %v20885_v36  ;;  %vm5735_vm6 = vcmp.eq.s32.totalorder %v21049_v25, %v21044_v34  ;;  %vm6256_vm7 = vcmp.eq.s32.totalorder %v21029_v31, %v18392_v14  ;;  %v21051_v25 = vld [vmem:[#allocation66_spill] sm:$0xff] }
 0x622   : > { %13354 = vmatpush2.msk.msra.mxu0 %vm6319_vm8, %v20885_v36  ;;  %12780 = vmatpush2.msk.msra.mxu1 %vm5783_vm9, %v20885_v36  ;;  %vm5720_vm8 = vcmp.eq.s32.totalorder %v21050_v21, %v21043_v29  ;;  %vm6255_vm9 = vcmp.eq.s32.totalorder %v21029_v31, %v18400_v6  ;;  %v21053_v31 = vld [vmem:[#allocation68_spill] sm:$0xff] }
 0x623   : > { %13355 = vmatprep.subr.msk.mxu0 %vm6304_vm10, %v20885_v36  ;;  %12781 = vmatprep.subr.msk.mxu1 %vm5768_vm11, %v20885_v36  ;;  %vm5719_vm10 = vcmp.eq.s32.totalorder %v21050_v21, %v21044_v34  ;;  %vm6240_vm11 = vcmp.eq.s32.totalorder %v21031_v9, %v18392_v14  ;;  %v21052_v21 = vld [vmem:[#allocation67_spill] sm:$0xff] }
 0x624   : > { %13356 = vmatpush2.msk.msra.mxu0 %vm6303_vm12, %v20885_v36  ;;  %12782 = vmatpush2.msk.msra.mxu1 %vm5767_vm13, %v20885_v36  ;;  %vm5704_vm12 = vcmp.eq.s32.totalorder %v21051_v25, %v21043_v29  ;;  %vm6239_vm13 = vcmp.eq.s32.totalorder %v21031_v9, %v18400_v6  ;;  %v21055_v9 = vld [vmem:[#allocation70_spill] sm:$0xff] }
 0x625   : > { %13357 = vmatprep.subr.msk.mxu0 %vm6288_vm14, %v20885_v36  ;;  %12783 = vmatprep.subr.msk.mxu1 %vm5752_vm15, %v20885_v36  ;;  %vm5703_vm14 = vcmp.eq.s32.totalorder %v21051_v25, %v21044_v34  ;;  %vm6224_vm15 = vcmp.eq.s32.totalorder %v21052_v21, %v18392_v14  ;;  %v21054_v25 = vld [vmem:[#allocation69_spill] sm:$0xff] }
 0x626   : > { %13358 = vmatpush2.msk.msra.mxu0 %vm6287_vm1, %v20885_v36  ;;  %12784 = vmatpush2.msk.msra.mxu1 %vm5751_vm2, %v20885_v36  ;;  %vm5688_vm1 = vcmp.eq.s32.totalorder %v21053_v31, %v21043_v29  ;;  %vm6223_vm2 = vcmp.eq.s32.totalorder %v21052_v21, %v18400_v6 }
 0x627   : > { %13359 = vmatprep.subr.msk.mxu0 %vm6272_vm3, %v20885_v36  ;;  %12785 = vmatprep.subr.msk.mxu1 %vm5736_vm4, %v20885_v36  ;;  %vm5687_vm3 = vcmp.eq.s32.totalorder %v21053_v31, %v21044_v34  ;;  %vm6208_vm4 = vcmp.eq.s32.totalorder %v21054_v25, %v18392_v14  ;;  %v21056_v31 = vld [vmem:[#allocation72_spill] sm:$0xff] }
 0x628   : > { %13360 = vmatpush2.msk.msra.mxu0 %vm6271_vm5, %v20885_v36  ;;  %12786 = vmatpush2.msk.msra.mxu1 %vm5735_vm6, %v20885_v36  ;;  %vm5672_vm5 = vcmp.eq.s32.totalorder %v21055_v9, %v21043_v29  ;;  %vm6207_vm6 = vcmp.eq.s32.totalorder %v21054_v25, %v18400_v6  ;;  %v21058_v25 = vld [vmem:[#allocation74_spill] sm:$0xff] }
 0x629   : > { %13361 = vmatprep.subr.msk.mxu0 %vm6256_vm7, %v20885_v36  ;;  %12787 = vmatprep.subr.msk.mxu1 %vm5720_vm8, %v20885_v36  ;;  %vm5671_vm7 = vcmp.eq.s32.totalorder %v21055_v9, %v21044_v34  ;;  %vm6192_vm8 = vcmp.eq.s32.totalorder %v20996_v24, %v18392_v14  ;;  %v21057_v9 = vld [vmem:[#allocation73_spill] sm:$0xff] }
 0x62a   : > { %13362 = vmatpush2.msk.msra.mxu0 %vm6255_vm9, %v20885_v36  ;;  %12788 = vmatpush2.msk.msra.mxu1 %vm5719_vm10, %v20885_v36  ;;  %vm5656_vm9 = vcmp.eq.s32.totalorder %v21056_v31, %v21043_v29  ;;  %vm6191_vm10 = vcmp.eq.s32.totalorder %v20996_v24, %v18400_v6 }
 0x62b   : > { %13363 = vmatprep.subr.msk.mxu0 %vm6240_vm11, %v20885_v36  ;;  %12789 = vmatprep.subr.msk.mxu1 %vm5704_vm12, %v20885_v36  ;;  %vm5655_vm11 = vcmp.eq.s32.totalorder %v21056_v31, %v21044_v34  ;;  %vm6176_vm12 = vcmp.eq.s32.totalorder %v21057_v9, %v18392_v14 }
 0x62c   : > { %13364 = vmatpush2.msk.msra.mxu0 %vm6239_vm13, %v20885_v36  ;;  %12790 = vmatpush2.msk.msra.mxu1 %vm5703_vm14, %v20885_v36  ;;  %vm5640_vm13 = vcmp.eq.s32.totalorder %v21058_v25, %v21043_v29  ;;  %vm6175_vm14 = vcmp.eq.s32.totalorder %v21057_v9, %v18400_v6  ;;  %v21059_v9 = vld [vmem:[#allocation35_spill] sm:$0xff] }
 0x62d   : > { %13365 = vmatprep.subr.msk.mxu0 %vm6224_vm15, %v20885_v36  ;;  %12791 = vmatprep.subr.msk.mxu1 %vm5688_vm1, %v20885_v36  ;;  %vm5639_vm15 = vcmp.eq.s32.totalorder %v21058_v25, %v21044_v34  ;;  %vm6160_vm1 = vcmp.eq.s32.totalorder %v20977_v28, %v18392_v14  ;;  %v18789_v25 = vld [vmem:[%s14321_s17 + $0x8] sm:$0xff]  ;;  %s13894_s17 = scalar_lea.vmem %s20410_s28, 1024 }
 0x62e   : > { %13366 = vmatpush2.msk.msra.mxu0 %vm6223_vm2, %v20885_v36  ;;  %12792 = vmatpush2.msk.msra.mxu1 %vm5687_vm3, %v20885_v36  ;;  %vm5624_vm2 = vcmp.eq.s32.totalorder %v21038_v42, %v21043_v29  ;;  %vm6159_vm3 = vcmp.eq.s32.totalorder %v20977_v28, %v18400_v6  ;;  %v18793_v31 = vrot.slane %v18789_v25, %v21059_v9  ;;  %v21060_v29 = vld [vmem:[#allocation29_spill] sm:$0xff]  ;;  %v21062_v9 = vld [vmem:[#allocation84_spill] sm:$0xff]  ;;  %p13895_p3 = scmp.ne.s32.totalorder %s20410_s28, %s13894_s17  ;;  %p13902_p11 = scmp.lt.s32.totalorder %s13900_s12, %s13894_s17 }
 0x62f   : > { %13367 = vmatprep.subr.msk.mxu0 %vm6208_vm4, %v20885_v36  ;;  %12793 = vmatprep.subr.msk.mxu1 %vm5672_vm5, %v20885_v36  ;;  %vm5623_vm4 = vcmp.eq.s32.totalorder %v21038_v42, %v21044_v34  ;;  %vm6144_vm5 = vcmp.eq.s32.totalorder %v20978_v50, %v18392_v14  ;;  %v18801_v24 = vrot.slane %v18789_v25, %v21060_v29  ;;  %v21061_v34 = vld [vmem:[#allocation78_spill] sm:$0xff]  ;;  %v21063_v29 = vld [vmem:[#allocation60_spill] sm:$0xff]  ;;  %v21065_v14 = vld [vmem:[#allocation63_spill] sm:$0xff] }
 0x630   : > { %13368 = vmatpush2.msk.msra.mxu0 %vm6207_vm6, %v20885_v36  ;;  %12794 = vmatpush2.msk.msra.mxu1 %vm5671_vm7, %v20885_v36  ;;  %vm5610_vm6 = vcmp.eq.s32.totalorder %v14451_v30, %v21061_v34  ;;  %vm6143_vm7 = vcmp.eq.s32.totalorder %v20978_v50, %v18400_v6  ;;  %v21064_v6 = vld [vmem:[#allocation62_spill] sm:$0xff]  ;;  %p13896_p2 = pnand %p13895_p3, %p21114_p8  ;;  %p13903_p12 = por %p13902_p11, %p13901_p5 }
 0x631   : > { %13369 = vmatprep.subr.msk.mxu0 %vm6192_vm8, %v20885_v36  ;;  %12795 = vmatprep.subr.msk.mxu1 %vm5656_vm9, %v20885_v36  ;;  %vm5609_vm8 = vcmp.eq.s32.totalorder %v14451_v30, %v21062_v9  ;;  %vm6130_vm9 = vcmp.eq.s32.totalorder %v14464_v39, %v18793_v31 }
 0x632   : > { %13370 = vmatpush2.msk.msra.mxu0 %vm6191_vm10, %v20885_v36  ;;  %12796 = vmatpush2.msk.msra.mxu1 %vm5655_vm11, %v20885_v36  ;;  %vm5594_vm10 = vcmp.eq.s32.totalorder %v14469_v41, %v21061_v34  ;;  %vm6129_vm11 = vcmp.eq.s32.totalorder %v14464_v39, %v18801_v24  ;;  %p13897_p4 = pneg %p13896_p2 }
 0x633   : > { %13371 = vmatprep.subr.msk.mxu0 %vm6176_vm12, %v20885_v36  ;;  %12797 = vmatprep.subr.msk.mxu1 %vm5640_vm13, %v20885_v36  ;;  %vm5593_vm12 = vcmp.eq.s32.totalorder %v14469_v41, %v21062_v9  ;;  %vm6114_vm13 = vcmp.eq.s32.totalorder %v14477_v45, %v18793_v31 }
 0x634   : > { %13372 = vmatpush2.msk.msra.mxu0 %vm6175_vm14, %v20885_v36  ;;  %12798 = vmatpush2.msk.msra.mxu1 %vm5639_vm15, %v20885_v36  ;;  %vm5578_vm14 = vcmp.eq.s32.totalorder %v14485_v47, %v21061_v34  ;;  %vm6113_vm15 = vcmp.eq.s32.totalorder %v14477_v45, %v18801_v24  ;;  %p13904_p0 = pnand %p13903_p12, %p13897_p4 }
 0x635   : > { %13373 = vmatprep.subr.msk.mxu0 %vm6160_vm1, %v20885_v36  ;;  %12799 = vmatprep.subr.msk.mxu1 %vm5624_vm2, %v20885_v36  ;;  %vm5577_vm1 = vcmp.eq.s32.totalorder %v14485_v47, %v21062_v9  ;;  %vm6098_vm2 = vcmp.eq.s32.totalorder %v14494_v48, %v18793_v31 }
 0x636   : > { %13374 = vmatpush2.msk.msra.mxu0 %vm6159_vm3, %v20885_v36  ;;  %12800 = vmatpush2.msk.msra.mxu1 %vm5623_vm4, %v20885_v36  ;;  %vm5562_vm3 = vcmp.eq.s32.totalorder %v14503_v49, %v21061_v34  ;;  %vm6097_vm4 = vcmp.eq.s32.totalorder %v14494_v48, %v18801_v24 }
 0x637   : > { %13375 = vmatprep.subr.msk.mxu0 %vm6144_vm5, %v20885_v36  ;;  %8644 = vmatmul.mubr.f32.vlgmr.msra.gmra.mxu1 %v18402_v8  ;;  %vm5561_vm5 = vcmp.eq.s32.totalorder %v14503_v49, %v21062_v9 }
 0x638   : > { %12865 = vmatprep.subr.msk.mxu1 %vm5610_vm6, %v20885_v36  ;;  %13376 = vmatpush2.msk.msra.mxu0 %vm6143_vm7, %v20885_v36  ;;  %vm6082_vm6 = vcmp.eq.s32.totalorder %v14512_v51, %v18793_v31  ;;  %vm5546_vm7 = vcmp.eq.s32.totalorder %v14521_v52, %v21061_v34 }
 0x639   : > { %12866 = vmatpush1.msk.msra.mxu1 %vm5609_vm8, %v20885_v36  ;;  %8785 = vmatprep.mubr.f32.mxu1 %v18038_v19  ;;  %vm6081_vm8 = vcmp.eq.s32.totalorder %v14512_v51, %v18801_v24 }
 0x63a   : > { %9283 = vmatmul.mubr.f32.vlgmr.msra.gmra.mxu0 %v17383_v46  ;;  %13441 = vmatprep.subr.msk.mxu0 %vm6130_vm9, %v20885_v36  ;;  %vm5545_vm9 = vcmp.eq.s32.totalorder %v14521_v52, %v21062_v9 }
 0x63b   : > { %12867 = vmatprep.subr.msk.mxu1 %vm5594_vm10, %v20885_v36  ;;  %13442 = vmatpush1.msk.msra.mxu0 %vm6129_vm11, %v20885_v36  ;;  %vm6066_vm10 = vcmp.eq.s32.totalorder %v14530_v53, %v18793_v31  ;;  %vm5530_vm11 = vcmp.eq.s32.totalorder %v14539_v54, %v21061_v34 }
 0x63c   : > { %9424 = vmatprep.mubr.f32.mxu0 %v17381_v15  ;;  %12868 = vmatpush1.msk.msra.mxu1 %vm5593_vm12, %v20885_v36  ;;  %vm6065_vm12 = vcmp.eq.s32.totalorder %v14530_v53, %v18801_v24 }
 0x63d   : > { %13443 = vmatprep.subr.msk.mxu0 %vm6114_vm13, %v20885_v36  ;;  %12869 = vmatprep.subr.msk.mxu1 %vm5578_vm14, %v20885_v36  ;;  %vm5529_vm13 = vcmp.eq.s32.totalorder %v14539_v54, %v21062_v9  ;;  %vm6050_vm14 = vcmp.eq.s32.totalorder %v14548_v55, %v18793_v31 }
 0x63e   : > { %13444 = vmatpush1.msk.msra.mxu0 %vm6113_vm15, %v20885_v36  ;;  %12870 = vmatpush1.msk.msra.mxu1 %vm5577_vm1, %v20885_v36  ;;  %vm5514_vm15 = vcmp.eq.s32.totalorder %v14557_v56, %v21061_v34  ;;  %vm6049_vm1 = vcmp.eq.s32.totalorder %v14548_v55, %v18801_v24 }
 0x63f   : > { %13445 = vmatprep.subr.msk.mxu0 %vm6098_vm2, %v20885_v36  ;;  %12871 = vmatprep.subr.msk.mxu1 %vm5562_vm3, %v20885_v36  ;;  %vm5513_vm2 = vcmp.eq.s32.totalorder %v14557_v56, %v21062_v9  ;;  %vm6034_vm3 = vcmp.eq.s32.totalorder %v14566_v57, %v18793_v31 }
 0x640   : > { %13446 = vmatpush1.msk.msra.mxu0 %vm6097_vm4, %v20885_v36  ;;  %12872 = vmatpush1.msk.msra.mxu1 %vm5561_vm5, %v20885_v36  ;;  %vm5498_vm4 = vcmp.eq.s32.totalorder %v14575_v58, %v21061_v34  ;;  %vm6033_vm5 = vcmp.eq.s32.totalorder %v14566_v57, %v18801_v24 }
 0x641   : > { %13447 = vmatprep.subr.msk.mxu0 %vm6082_vm6, %v20885_v36  ;;  %12873 = vmatprep.subr.msk.mxu1 %vm5546_vm7, %v20885_v36  ;;  %vm5497_vm6 = vcmp.eq.s32.totalorder %v14575_v58, %v21062_v9  ;;  %vm6018_vm7 = vcmp.eq.s32.totalorder %v14584_v59, %v18793_v31 }
 0x642   : > { %13448 = vmatpush1.msk.msra.mxu0 %vm6081_vm8, %v20885_v36  ;;  %12874 = vmatpush1.msk.msra.mxu1 %vm5545_vm9, %v20885_v36  ;;  %vm5482_vm8 = vcmp.eq.s32.totalorder %v14593_v60, %v21061_v34  ;;  %vm6017_vm9 = vcmp.eq.s32.totalorder %v14584_v59, %v18801_v24 }
 0x643   : > { %13449 = vmatprep.subr.msk.mxu0 %vm6066_vm10, %v20885_v36  ;;  %12875 = vmatprep.subr.msk.mxu1 %vm5530_vm11, %v20885_v36  ;;  %vm5481_vm10 = vcmp.eq.s32.totalorder %v14593_v60, %v21062_v9  ;;  %vm6002_vm11 = vcmp.eq.s32.totalorder %v14602_v61, %v18793_v31 }
 0x644   : > { %13450 = vmatpush1.msk.msra.mxu0 %vm6065_vm12, %v20885_v36  ;;  %12876 = vmatpush1.msk.msra.mxu1 %vm5529_vm13, %v20885_v36  ;;  %vm5466_vm12 = vcmp.eq.s32.totalorder %v21010_v0, %v21061_v34  ;;  %vm6001_vm13 = vcmp.eq.s32.totalorder %v14602_v61, %v18801_v24 }
 0x645   : > { %13451 = vmatprep.subr.msk.mxu0 %vm6050_vm14, %v20885_v36  ;;  %12877 = vmatprep.subr.msk.mxu1 %vm5514_vm15, %v20885_v36  ;;  %vm5465_vm14 = vcmp.eq.s32.totalorder %v21010_v0, %v21062_v9  ;;  %vm5986_vm15 = vcmp.eq.s32.totalorder %v14620_v63, %v18793_v31 }
 0x646   : > { %13452 = vmatpush1.msk.msra.mxu0 %vm6049_vm1, %v20885_v36  ;;  %12878 = vmatpush1.msk.msra.mxu1 %vm5513_vm2, %v20885_v36  ;;  %vm5450_vm1 = vcmp.eq.s32.totalorder %v21011_v22, %v21061_v34  ;;  %vm5985_vm2 = vcmp.eq.s32.totalorder %v14620_v63, %v18801_v24 }
 0x647   : > { %13453 = vmatprep.subr.msk.mxu0 %vm6034_vm3, %v20885_v36  ;;  %12879 = vmatprep.subr.msk.mxu1 %vm5498_vm4, %v20885_v36  ;;  %vm5449_vm3 = vcmp.eq.s32.totalorder %v21011_v22, %v21062_v9  ;;  %vm5970_vm4 = vcmp.eq.s32.totalorder %v14638_v1, %v18793_v31 }
 0x648   : > { %13454 = vmatpush1.msk.msra.mxu0 %vm6033_vm5, %v20885_v36  ;;  %12880 = vmatpush1.msk.msra.mxu1 %vm5497_vm6, %v20885_v36  ;;  %vm5434_vm5 = vcmp.eq.s32.totalorder %v21012_v16, %v21061_v34  ;;  %vm5969_vm6 = vcmp.eq.s32.totalorder %v14638_v1, %v18801_v24 }
 0x649   : > { %13455 = vmatprep.subr.msk.mxu0 %vm6018_vm7, %v20885_v36  ;;  %12881 = vmatprep.subr.msk.mxu1 %vm5482_vm8, %v20885_v36  ;;  %vm5433_vm7 = vcmp.eq.s32.totalorder %v21012_v16, %v21062_v9  ;;  %vm5954_vm8 = vcmp.eq.s32.totalorder %v14656_v5, %v18793_v31 }
 0x64a   : > { %13456 = vmatpush1.msk.msra.mxu0 %vm6017_vm9, %v20885_v36  ;;  %12882 = vmatpush1.msk.msra.mxu1 %vm5481_vm10, %v20885_v36  ;;  %vm5418_vm9 = vcmp.eq.s32.totalorder %v21013_v37, %v21061_v34  ;;  %vm5953_vm10 = vcmp.eq.s32.totalorder %v14656_v5, %v18801_v24 }
 0x64b   : > { %13457 = vmatprep.subr.msk.mxu0 %vm6002_vm11, %v20885_v36  ;;  %12883 = vmatprep.subr.msk.mxu1 %vm5466_vm12, %v20885_v36  ;;  %vm5417_vm11 = vcmp.eq.s32.totalorder %v21013_v37, %v21062_v9  ;;  %vm5938_vm12 = vcmp.eq.s32.totalorder %v14674_v7, %v18793_v31 }
 0x64c   : > { %13458 = vmatpush1.msk.msra.mxu0 %vm6001_vm13, %v20885_v36  ;;  %12884 = vmatpush1.msk.msra.mxu1 %vm5465_vm14, %v20885_v36  ;;  %vm5402_vm13 = vcmp.eq.s32.totalorder %v21014_v4, %v21061_v34  ;;  %vm5937_vm14 = vcmp.eq.s32.totalorder %v14674_v7, %v18801_v24 }
 0x64d   : > { %13459 = vmatprep.subr.msk.mxu0 %vm5986_vm15, %v20885_v36  ;;  %12885 = vmatprep.subr.msk.mxu1 %vm5450_vm1, %v20885_v36  ;;  %vm5401_vm15 = vcmp.eq.s32.totalorder %v21014_v4, %v21062_v9  ;;  %vm5922_vm1 = vcmp.eq.s32.totalorder %v20987_v11, %v18793_v31 }
 0x64e   : > { %13460 = vmatpush1.msk.msra.mxu0 %vm5985_vm2, %v20885_v36  ;;  %12886 = vmatpush1.msk.msra.mxu1 %vm5449_vm3, %v20885_v36  ;;  %vm5386_vm2 = vcmp.eq.s32.totalorder %v21015_v12, %v21061_v34  ;;  %vm5921_vm3 = vcmp.eq.s32.totalorder %v20987_v11, %v18801_v24 }
 0x64f   : > { %13461 = vmatprep.subr.msk.mxu0 %vm5970_vm4, %v20885_v36  ;;  %12887 = vmatprep.subr.msk.mxu1 %vm5434_vm5, %v20885_v36  ;;  %vm5385_vm4 = vcmp.eq.s32.totalorder %v21015_v12, %v21062_v9  ;;  %vm5906_vm5 = vcmp.eq.s32.totalorder %v20988_v35, %v18793_v31 }
 0x650   : > { %13462 = vmatpush1.msk.msra.mxu0 %vm5969_vm6, %v20885_v36  ;;  %12888 = vmatpush1.msk.msra.mxu1 %vm5433_vm7, %v20885_v36  ;;  %vm5370_vm6 = vcmp.eq.s32.totalorder %v21016_v13, %v21061_v34  ;;  %vm5905_vm7 = vcmp.eq.s32.totalorder %v20988_v35, %v18801_v24 }
 0x651   : > { %13463 = vmatprep.subr.msk.mxu0 %vm5954_vm8, %v20885_v36  ;;  %12889 = vmatprep.subr.msk.mxu1 %vm5418_vm9, %v20885_v36  ;;  %vm5369_vm8 = vcmp.eq.s32.totalorder %v21016_v13, %v21062_v9  ;;  %vm5890_vm9 = vcmp.eq.s32.totalorder %v20989_v44, %v18793_v31 }
 0x652   : > { %13464 = vmatpush1.msk.msra.mxu0 %vm5953_vm10, %v20885_v36  ;;  %12890 = vmatpush1.msk.msra.mxu1 %vm5417_vm11, %v20885_v36  ;;  %vm5866_vm10 = vcmp.eq.s32.totalorder %v21017_v2, %v21061_v34  ;;  %vm5889_vm11 = vcmp.eq.s32.totalorder %v20989_v44, %v18801_v24 }
 0x653   : > { %13465 = vmatprep.subr.msk.mxu0 %vm5938_vm12, %v20885_v36  ;;  %12891 = vmatprep.subr.msk.mxu1 %vm5402_vm13, %v20885_v36  ;;  %vm5865_vm12 = vcmp.eq.s32.totalorder %v21017_v2, %v21062_v9  ;;  %vm6386_vm13 = vcmp.eq.s32.totalorder %v20990_v10, %v18793_v31 }
 0x654   : > { %13466 = vmatpush1.msk.msra.mxu0 %vm5937_vm14, %v20885_v36  ;;  %12892 = vmatpush1.msk.msra.mxu1 %vm5401_vm15, %v20885_v36  ;;  %vm5850_vm14 = vcmp.eq.s32.totalorder %v21018_v23, %v21061_v34  ;;  %vm6385_vm15 = vcmp.eq.s32.totalorder %v20990_v10, %v18801_v24 }
 0x655   : > { %13467 = vmatprep.subr.msk.mxu0 %vm5922_vm1, %v20885_v36  ;;  %12893 = vmatprep.subr.msk.mxu1 %vm5386_vm2, %v20885_v36  ;;  %vm5849_vm1 = vcmp.eq.s32.totalorder %v21018_v23, %v21062_v9  ;;  %vm6370_vm2 = vcmp.eq.s32.totalorder %v14761_v17, %v18793_v31 }
 0x656   : > { %13468 = vmatpush1.msk.msra.mxu0 %vm5921_vm3, %v20885_v36  ;;  %12894 = vmatpush1.msk.msra.mxu1 %vm5385_vm4, %v20885_v36  ;;  %vm5834_vm3 = vcmp.eq.s32.totalorder %v21019_v38, %v21061_v34  ;;  %vm6369_vm4 = vcmp.eq.s32.totalorder %v14761_v17, %v18801_v24 }
 0x657   : > { %13469 = vmatprep.subr.msk.mxu0 %vm5906_vm5, %v20885_v36  ;;  %12895 = vmatprep.subr.msk.mxu1 %vm5370_vm6, %v20885_v36  ;;  %vm5833_vm5 = vcmp.eq.s32.totalorder %v21019_v38, %v21062_v9  ;;  %vm6354_vm6 = vcmp.eq.s32.totalorder %v20991_v32, %v18793_v31 }
 0x658   : > { %13470 = vmatpush1.msk.msra.mxu0 %vm5905_vm7, %v20885_v36  ;;  %12896 = vmatpush1.msk.msra.mxu1 %vm5369_vm8, %v20885_v36  ;;  %vm5818_vm7 = vcmp.eq.s32.totalorder %v21020_v18, %v21061_v34  ;;  %vm6353_vm8 = vcmp.eq.s32.totalorder %v20991_v32, %v18801_v24 }
 0x659   : > { %13471 = vmatprep.subr.msk.mxu0 %vm5890_vm9, %v20885_v36  ;;  %12897 = vmatprep.subr.msk.mxu1 %vm5866_vm10, %v20885_v36  ;;  %vm5817_vm9 = vcmp.eq.s32.totalorder %v21020_v18, %v21062_v9  ;;  %vm6338_vm10 = vcmp.eq.s32.totalorder %v20992_v40, %v18793_v31 }
 0x65a   : > { %13472 = vmatpush1.msk.msra.mxu0 %vm5889_vm11, %v20885_v36  ;;  %12898 = vmatpush2.msk.msra.mxu1 %vm5865_vm12, %v20885_v36  ;;  %vm5802_vm11 = vcmp.eq.s32.totalorder %v21021_v20, %v21061_v34  ;;  %vm6337_vm12 = vcmp.eq.s32.totalorder %v20992_v40, %v18801_v24 }
 0x65b   : > { %13473 = vmatprep.subr.msk.mxu0 %vm6386_vm13, %v20885_v36  ;;  %12899 = vmatprep.subr.msk.mxu1 %vm5850_vm14, %v20885_v36  ;;  %vm5801_vm13 = vcmp.eq.s32.totalorder %v21021_v20, %v21062_v9  ;;  %vm6322_vm14 = vcmp.eq.s32.totalorder %v20993_v33, %v18793_v31 }
 0x65c   : > { %13474 = vmatpush2.msk.msra.mxu0 %vm6385_vm15, %v20885_v36  ;;  %12900 = vmatpush2.msk.msra.mxu1 %vm5849_vm1, %v20885_v36  ;;  %vm5786_vm15 = vcmp.eq.s32.totalorder %v21022_v43, %v21061_v34  ;;  %vm6321_vm1 = vcmp.eq.s32.totalorder %v20993_v33, %v18801_v24 }
 0x65d   : > { %13475 = vmatprep.subr.msk.mxu0 %vm6370_vm2, %v20885_v36  ;;  %12901 = vmatprep.subr.msk.mxu1 %vm5834_vm3, %v20885_v36  ;;  %vm5785_vm2 = vcmp.eq.s32.totalorder %v21022_v43, %v21062_v9  ;;  %vm6306_vm3 = vcmp.eq.s32.totalorder %v21023_v62, %v18793_v31  ;;  %v21078_v43 = vld [vmem:[#allocation73_spill] sm:$0xff] }
 0x65e   : > { %13476 = vmatpush2.msk.msra.mxu0 %vm6369_vm4, %v20885_v36  ;;  %12902 = vmatpush2.msk.msra.mxu1 %vm5833_vm5, %v20885_v36  ;;  %vm5770_vm4 = vcmp.eq.s32.totalorder %v21045_v27, %v21061_v34  ;;  %vm6305_vm5 = vcmp.eq.s32.totalorder %v21023_v62, %v18801_v24 }
 0x65f   : > { %13477 = vmatprep.subr.msk.mxu0 %vm6354_vm6, %v20885_v36  ;;  %12903 = vmatprep.subr.msk.mxu1 %vm5818_vm7, %v20885_v36  ;;  %vm5769_vm6 = vcmp.eq.s32.totalorder %v21045_v27, %v21062_v9  ;;  %vm6290_vm7 = vcmp.eq.s32.totalorder %v21046_v3, %v18793_v31 }
 0x660   : > { %13478 = vmatpush2.msk.msra.mxu0 %vm6353_vm8, %v20885_v36  ;;  %12904 = vmatpush2.msk.msra.mxu1 %vm5817_vm9, %v20885_v36  ;;  %vm5754_vm8 = vcmp.eq.s32.totalorder %v21063_v29, %v21061_v34  ;;  %vm6289_vm9 = vcmp.eq.s32.totalorder %v21046_v3, %v18801_v24  ;;  %v21075_v3 = vld [vmem:[#allocation28_spill] sm:$0xff] }
 0x661   : > { %13479 = vmatprep.subr.msk.mxu0 %vm6338_vm10, %v20885_v36  ;;  %12905 = vmatprep.subr.msk.mxu1 %vm5802_vm11, %v20885_v36  ;;  %vm5753_vm10 = vcmp.eq.s32.totalorder %v21063_v29, %v21062_v9  ;;  %vm6274_vm11 = vcmp.eq.s32.totalorder %v21048_v26, %v18793_v31  ;;  %v21066_v29 = vld [vmem:[#allocation64_spill] sm:$0xff] }
 0x662   : > { %13480 = vmatpush2.msk.msra.mxu0 %vm6337_vm12, %v20885_v36  ;;  %12906 = vmatpush2.msk.msra.mxu1 %vm5801_vm13, %v20885_v36  ;;  %vm5738_vm12 = vcmp.eq.s32.totalorder %v21064_v6, %v21061_v34  ;;  %vm6273_vm13 = vcmp.eq.s32.totalorder %v21048_v26, %v18801_v24  ;;  %v21068_v26 = vld [vmem:[#allocation66_spill] sm:$0xff] }
 0x663   : > { %13481 = vmatprep.subr.msk.mxu0 %vm6322_vm14, %v20885_v36  ;;  %12907 = vmatprep.subr.msk.mxu1 %vm5786_vm15, %v20885_v36  ;;  %vm5737_vm14 = vcmp.eq.s32.totalorder %v21064_v6, %v21062_v9  ;;  %vm6258_vm15 = vcmp.eq.s32.totalorder %v21065_v14, %v18793_v31  ;;  %v21067_v6 = vld [vmem:[#allocation65_spill] sm:$0xff] }
 0x664   : > { %13482 = vmatpush2.msk.msra.mxu0 %vm6321_vm1, %v20885_v36  ;;  %12908 = vmatpush2.msk.msra.mxu1 %vm5785_vm2, %v20885_v36  ;;  %vm5722_vm1 = vcmp.eq.s32.totalorder %v21066_v29, %v21061_v34  ;;  %vm6257_vm2 = vcmp.eq.s32.totalorder %v21065_v14, %v18801_v24  ;;  %v21074_v14 = vld [vmem:[#allocation86_spill] sm:$0xff] }
 0x665   : > { %13483 = vmatprep.subr.msk.mxu0 %vm6306_vm3, %v20885_v36  ;;  %12909 = vmatprep.subr.msk.mxu1 %vm5770_vm4, %v20885_v36  ;;  %vm5721_vm3 = vcmp.eq.s32.totalorder %v21066_v29, %v21062_v9  ;;  %vm6242_vm4 = vcmp.eq.s32.totalorder %v21067_v6, %v18793_v31  ;;  %v21069_v29 = vld [vmem:[#allocation68_spill] sm:$0xff]  ;;  %v2740_v27 = vadd.f32 %v21075_v3, %v21074_v14  ;;  %v21079_v14 = vld [vmem:[#allocation74_spill] sm:$0xff] }
 0x666   : > { %13484 = vmatpush2.msk.msra.mxu0 %vm6305_vm5, %v20885_v36  ;;  %12910 = vmatpush2.msk.msra.mxu1 %vm5769_vm6, %v20885_v36  ;;  %vm5706_vm5 = vcmp.eq.s32.totalorder %v21068_v26, %v21061_v34  ;;  %vm6241_vm6 = vcmp.eq.s32.totalorder %v21067_v6, %v18801_v24  ;;  %v21071_v6 = vld [vmem:[#allocation70_spill] sm:$0xff] }
 0x667   : > { %13485 = vmatprep.subr.msk.mxu0 %vm6290_vm7, %v20885_v36  ;;  %12911 = vmatprep.subr.msk.mxu1 %vm5754_vm8, %v20885_v36  ;;  %vm5705_vm7 = vcmp.eq.s32.totalorder %v21068_v26, %v21062_v9  ;;  %vm6226_vm8 = vcmp.eq.s32.totalorder %v21052_v21, %v18793_v31  ;;  %v21070_v26 = vld [vmem:[#allocation69_spill] sm:$0xff] }
 0x668   : > { %13486 = vmatpush2.msk.msra.mxu0 %vm6289_vm9, %v20885_v36  ;;  %12912 = vmatpush2.msk.msra.mxu1 %vm5753_vm10, %v20885_v36  ;;  %vm5690_vm9 = vcmp.eq.s32.totalorder %v21069_v29, %v21061_v34  ;;  %vm6225_vm10 = vcmp.eq.s32.totalorder %v21052_v21, %v18801_v24  ;;  %v21073_v21 = vld [vmem:[#allocation72_spill] sm:$0xff] }
 0x669   : > { %13487 = vmatprep.subr.msk.mxu0 %vm6274_vm11, %v20885_v36  ;;  %12913 = vmatprep.subr.msk.mxu1 %vm5738_vm12, %v20885_v36  ;;  %vm5689_vm11 = vcmp.eq.s32.totalorder %v21069_v29, %v21062_v9  ;;  %vm6210_vm12 = vcmp.eq.s32.totalorder %v21070_v26, %v18793_v31  ;;  %v21072_v29 = vld [vmem:[#allocation71_spill] sm:$0xff] }
 0x66a   : > { %13488 = vmatpush2.msk.msra.mxu0 %vm6273_vm13, %v20885_v36  ;;  %12914 = vmatpush2.msk.msra.mxu1 %vm5737_vm14, %v20885_v36  ;;  %vm5674_vm13 = vcmp.eq.s32.totalorder %v21071_v6, %v21061_v34  ;;  %vm6209_vm14 = vcmp.eq.s32.totalorder %v21070_v26, %v18801_v24  ;;  %v21077_v26 = vld [vmem:[#allocation81_spill] sm:$0xff] }
 0x66b   : > { %13489 = vmatprep.subr.msk.mxu0 %vm6258_vm15, %v20885_v36  ;;  %12915 = vmatprep.subr.msk.mxu1 %vm5722_vm1, %v20885_v36  ;;  %vm5673_vm15 = vcmp.eq.s32.totalorder %v21071_v6, %v21062_v9  ;;  %vm6194_vm1 = vcmp.eq.s32.totalorder %v21072_v29, %v18793_v31  ;;  %v21076_v6 = vld [vmem:[#allocation87_spill] sm:$0xff] }
 0x66c   : > { %13490 = vmatpush2.msk.msra.mxu0 %vm6257_vm2, %v20885_v36  ;;  %12916 = vmatpush2.msk.msra.mxu1 %vm5721_vm3, %v20885_v36  ;;  %vm5658_vm2 = vcmp.eq.s32.totalorder %v21073_v21, %v21061_v34  ;;  %vm6193_vm3 = vcmp.eq.s32.totalorder %v21072_v29, %v18801_v24  ;;  %v2742_v62 = vadd.f32 %v21077_v26, %v21076_v6 }
 0x66d   : > { %13491 = vmatprep.subr.msk.mxu0 %vm6242_vm4, %v20885_v36  ;;  %12917 = vmatprep.subr.msk.mxu1 %vm5706_vm5, %v20885_v36  ;;  %vm5657_vm4 = vcmp.eq.s32.totalorder %v21073_v21, %v21062_v9  ;;  %vm6178_vm5 = vcmp.eq.s32.totalorder %v21078_v43, %v18793_v31  ;;  %v21084_v21 = vld [vmem:[#allocation79_spill] sm:$0xff] }
 0x66e   : > { %13492 = vmatpush2.msk.msra.mxu0 %vm6241_vm6, %v20885_v36  ;;  %12918 = vmatpush2.msk.msra.mxu1 %vm5705_vm7, %v20885_v36  ;;  %vm5642_vm6 = vcmp.eq.s32.totalorder %v21079_v14, %v21061_v34  ;;  %vm6177_vm7 = vcmp.eq.s32.totalorder %v21078_v43, %v18801_v24  ;;  %v21083_v43 = vld [vmem:[#allocation88_spill] sm:$0xff] }
 0x66f   : > { %13493 = vmatprep.subr.msk.mxu0 %vm6226_vm8, %v20885_v36  ;;  %12919 = vmatprep.subr.msk.mxu1 %vm5690_vm9, %v20885_v36  ;;  %vm5641_vm8 = vcmp.eq.s32.totalorder %v21079_v14, %v21062_v9  ;;  %vm6162_vm9 = vcmp.eq.s32.totalorder %v20977_v28, %v18793_v31 }
 0x670   : > { %13494 = vmatpush2.msk.msra.mxu0 %vm6225_vm10, %v20885_v36  ;;  %12920 = vmatpush2.msk.msra.mxu1 %vm5689_vm11, %v20885_v36  ;;  %vm5626_vm10 = vcmp.eq.s32.totalorder %v21038_v42, %v21061_v34  ;;  %vm6161_vm11 = vcmp.eq.s32.totalorder %v20977_v28, %v18801_v24  ;;  %v21082_v34 = vld [vmem:[#allocation83_spill] sm:$0xff] }
 0x671   : > { %13495 = vmatprep.subr.msk.mxu0 %vm6210_vm12, %v20885_v36  ;;  %12921 = vmatprep.subr.msk.mxu1 %vm5674_vm13, %v20885_v36  ;;  %vm5625_vm12 = vcmp.eq.s32.totalorder %v21038_v42, %v21062_v9  ;;  %vm6146_vm13 = vcmp.eq.s32.totalorder %v20978_v50, %v18793_v31  ;;  %v19205_v14 = vrot.slane %v18789_v25, %v21082_v34 }
 0x672   : > { %13496 = vmatpush2.msk.msra.mxu0 %vm6209_vm14, %v20885_v36  ;;  %12922 = vmatpush2.msk.msra.mxu1 %vm5673_vm15, %v20885_v36  ;;  %v5126_v3 = vpop.f32.mrf.mxu1  ;;  %v2746_v9 = vadd.f32 %v21084_v21, %v21083_v43  ;;  %vm6145_vm15 = vcmp.eq.s32.totalorder %v20978_v50, %v18801_v24  ;;  %v21087_v21 = vld [vmem:[#allocation89_spill] sm:$0xff] }
 0x673   : > { %13497 = vmatprep.subr.msk.mxu0 %vm6194_vm1, %v20885_v36  ;;  %12923 = vmatprep.subr.msk.mxu1 %vm5658_vm2, %v20885_v36  ;;  %v19179_v6 = vadd.f32 %v5126_v3, %v2740_v27  ;;  %v21081_v27 = vld [vmem:[#allocation82_spill] sm:$0xff] }
 0x674   : > { %13498 = vmatpush2.msk.msra.mxu0 %vm6193_vm3, %v20885_v36  ;;  %12924 = vmatpush2.msk.msra.mxu1 %vm5657_vm4, %v20885_v36  ;;  %v5128_v26 = vpop.f32.mrf.mxu1  ;;  %v19195_v3 = vrot.slane %v18789_v25, %v21081_v27  ;;  %v21086_v25 = vld [vmem:[#allocation30_spill] sm:$0xff]  ;;  %vm6131_vm4 = vcmp.eq.s32.totalorder %v14464_v39, %v19205_v14 }
 0x675   : > { %21080 = vst [vmem:[#allocation51_spill] sm:$0xff] %v19179_v6  ;;  %13499 = vmatprep.subr.msk.mxu0 %vm6178_vm5, %v20885_v36  ;;  %12925 = vmatprep.subr.msk.mxu1 %vm5642_vm6, %v20885_v36  ;;  %v19197_v6 = vadd.f32 %v5128_v26, %v2742_v62  ;;  %v21085_v62 = vld [vmem:[#allocation85_spill] sm:$0xff]  ;;  %vm5611_vm1 = vcmp.eq.s32.totalorder %v14451_v30, %v21086_v25  ;;  %v21088_v26 = vld [vmem:[#allocation34_spill] sm:$0xff] }
 0x676   : > { %13500 = vmatpush2.msk.msra.mxu0 %vm6177_vm7, %v20885_v36  ;;  %12926 = vmatpush2.msk.msra.mxu1 %vm5641_vm8, %v20885_v36  ;;  %vm5612_vm14 = vcmp.eq.s32.totalorder %v14451_v30, %v21085_v62  ;;  %v2748_v27 = vadd.f32 %v21088_v26, %v21087_v21  ;;  %vm6132_vm2 = vcmp.eq.s32.totalorder %v14464_v39, %v19195_v3  ;;  %v21089_v39 = vld [vmem:[#allocation56_spill] sm:$0xff] }
 0x677   : > { %13501 = vmatprep.subr.msk.mxu0 %vm6162_vm9, %v20885_v36  ;;  %12927 = vmatprep.subr.msk.mxu1 %vm5626_vm10, %v20885_v36  ;;  %vm5596_vm3 = vcmp.eq.s32.totalorder %v14469_v41, %v21085_v62  ;;  %vm5595_vm5 = vcmp.eq.s32.totalorder %v14469_v41, %v21086_v25  ;;  %vm6116_vm6 = vcmp.eq.s32.totalorder %v14477_v45, %v19195_v3 }
 0x678   : > { %13502 = vmatpush2.msk.msra.mxu0 %vm6161_vm11, %v20885_v36  ;;  %12928 = vmatpush2.msk.msra.mxu1 %vm5625_vm12, %v20885_v36  ;;  %v5132_v43 = vpop.f32.mrf.mxu1  ;;  %vm5580_vm7 = vcmp.eq.s32.totalorder %v14485_v47, %v21085_v62  ;;  %vm6115_vm8 = vcmp.eq.s32.totalorder %v14477_v45, %v19205_v14  ;;  %vm5579_vm9 = vcmp.eq.s32.totalorder %v14485_v47, %v21086_v25  ;;  %v21090_v45 = vld [vmem:[#allocation57_spill] sm:$0xff] }
 0x679   : > { %13503 = vmatprep.subr.msk.mxu0 %vm6146_vm13, %v20885_v36  ;;  %8786 = vmatmul.mubr.f32.vlgmr.msra.gmra.mxu1 %v18402_v8  ;;  %v19228_v34 = vadd.f32 %v5132_v43, %v2746_v9  ;;  %vm6100_vm10 = vcmp.eq.s32.totalorder %v14494_v48, %v19195_v3  ;;  %vm5564_vm11 = vcmp.eq.s32.totalorder %v14503_v49, %v21085_v62 }
 0x67a   : > { %12993 = vmatprep.subr.msk.mxu1 %vm5612_vm14, %v20885_v36  ;;  %13504 = vmatpush2.msk.msra.mxu0 %vm6145_vm15, %v20885_v36  ;;  %v5134_v21 = vpop.f32.mrf.mxu1  ;;  %vm6099_vm12 = vcmp.eq.s32.totalorder %v14494_v48, %v19205_v14  ;;  %vm5563_vm13 = vcmp.eq.s32.totalorder %v14503_v49, %v21086_v25  ;;  %vm6084_vm14 = vcmp.eq.s32.totalorder %v14512_v51, %v19195_v3  ;;  %v21091_v48 = vld [vmem:[#allocation58_spill] sm:$0xff] }
 0x67b   : > { %12994 = vmatpush1.msk.msra.mxu1 %vm5611_vm1, %v20885_v36  ;;  %8927 = vmatprep.mubr.f32.mxu1 %v18038_v19  ;;  %v19240_v9 = vadd.f32 %v5134_v21, %v2748_v27  ;;  %vm5548_vm15 = vcmp.eq.s32.totalorder %v14521_v52, %v21085_v62  ;;  %vm6083_vm1 = vcmp.eq.s32.totalorder %v14512_v51, %v19205_v14  ;;  %v21092_v51 = vld [vmem:[#allocation59_spill] sm:$0xff] }
 0x67c   : > { %9425 = vmatmul.mubr.f32.vlgmr.msra.gmra.mxu0 %v17383_v46  ;;  %13569 = vmatprep.subr.msk.mxu0 %vm6132_vm2, %v20885_v36  ;;  %vm5547_vm2 = vcmp.eq.s32.totalorder %v14521_v52, %v21086_v25 }
 0x67d   : > { %12995 = vmatprep.subr.msk.mxu1 %vm5596_vm3, %v20885_v36  ;;  %13570 = vmatpush1.msk.msra.mxu0 %vm6131_vm4, %v20885_v36  ;;  %vm6068_vm3 = vcmp.eq.s32.totalorder %v14530_v53, %v19195_v3  ;;  %vm5532_vm4 = vcmp.eq.s32.totalorder %v14539_v54, %v21085_v62 }
 0x67e   : > { %9566 = vmatprep.mubr.f32.mxu0 %v17381_v15  ;;  %12996 = vmatpush1.msk.msra.mxu1 %vm5595_vm5, %v20885_v36  ;;  %vm6067_vm5 = vcmp.eq.s32.totalorder %v14530_v53, %v19205_v14  ;;  %v21093_v53 = vld [vmem:[#allocation60_spill] sm:$0xff]  ;;  %v21105_v15 = vld [vmem:[#allocation73_spill] sm:$0xff] }
 0x67f   : > { %13571 = vmatprep.subr.msk.mxu0 %vm6116_vm6, %v20885_v36  ;;  %12997 = vmatprep.subr.msk.mxu1 %vm5580_vm7, %v20885_v36  ;;  %vm5531_vm6 = vcmp.eq.s32.totalorder %v14539_v54, %v21086_v25  ;;  %vm6052_vm7 = vcmp.eq.s32.totalorder %v14548_v55, %v19195_v3 }
 0x680   : > { %13572 = vmatpush1.msk.msra.mxu0 %vm6115_vm8, %v20885_v36  ;;  %12998 = vmatpush1.msk.msra.mxu1 %vm5579_vm9, %v20885_v36  ;;  %vm5516_vm8 = vcmp.eq.s32.totalorder %v14557_v56, %v21085_v62  ;;  %vm6051_vm9 = vcmp.eq.s32.totalorder %v14548_v55, %v19205_v14  ;;  %v21094_v55 = vld [vmem:[#allocation61_spill] sm:$0xff] }
 0x681   : > { %13573 = vmatprep.subr.msk.mxu0 %vm6100_vm10, %v20885_v36  ;;  %12999 = vmatprep.subr.msk.mxu1 %vm5564_vm11, %v20885_v36  ;;  %vm5515_vm10 = vcmp.eq.s32.totalorder %v14557_v56, %v21086_v25  ;;  %vm6036_vm11 = vcmp.eq.s32.totalorder %v14566_v57, %v19195_v3 }
 0x682   : > { %13574 = vmatpush1.msk.msra.mxu0 %vm6099_vm12, %v20885_v36  ;;  %13000 = vmatpush1.msk.msra.mxu1 %vm5563_vm13, %v20885_v36  ;;  %vm5500_vm12 = vcmp.eq.s32.totalorder %v14575_v58, %v21085_v62  ;;  %vm6035_vm13 = vcmp.eq.s32.totalorder %v14566_v57, %v19205_v14  ;;  %v21095_v57 = vld [vmem:[#allocation62_spill] sm:$0xff] }
 0x683   : > { %13575 = vmatprep.subr.msk.mxu0 %vm6084_vm14, %v20885_v36  ;;  %13001 = vmatprep.subr.msk.mxu1 %vm5548_vm15, %v20885_v36  ;;  %vm5499_vm14 = vcmp.eq.s32.totalorder %v14575_v58, %v21086_v25  ;;  %vm6020_vm15 = vcmp.eq.s32.totalorder %v14584_v59, %v19195_v3 }
 0x684   : > { %13576 = vmatpush1.msk.msra.mxu0 %vm6083_vm1, %v20885_v36  ;;  %13002 = vmatpush1.msk.msra.mxu1 %vm5547_vm2, %v20885_v36  ;;  %vm5484_vm1 = vcmp.eq.s32.totalorder %v14593_v60, %v21085_v62  ;;  %vm6019_vm2 = vcmp.eq.s32.totalorder %v14584_v59, %v19205_v14  ;;  %v21096_v59 = vld [vmem:[#allocation63_spill] sm:$0xff] }
 0x685   : > { %13577 = vmatprep.subr.msk.mxu0 %vm6068_vm3, %v20885_v36  ;;  %13003 = vmatprep.subr.msk.mxu1 %vm5532_vm4, %v20885_v36  ;;  %vm5483_vm3 = vcmp.eq.s32.totalorder %v14593_v60, %v21086_v25  ;;  %vm6004_vm4 = vcmp.eq.s32.totalorder %v14602_v61, %v19195_v3 }
 0x686   : > { %13578 = vmatpush1.msk.msra.mxu0 %vm6067_vm5, %v20885_v36  ;;  %13004 = vmatpush1.msk.msra.mxu1 %vm5531_vm6, %v20885_v36  ;;  %vm5468_vm5 = vcmp.eq.s32.totalorder %v21010_v0, %v21085_v62  ;;  %vm6003_vm6 = vcmp.eq.s32.totalorder %v14602_v61, %v19205_v14  ;;  %v21097_v61 = vld [vmem:[#allocation64_spill] sm:$0xff] }
 0x687   : > { %13579 = vmatprep.subr.msk.mxu0 %vm6052_vm7, %v20885_v36  ;;  %13005 = vmatprep.subr.msk.mxu1 %vm5516_vm8, %v20885_v36  ;;  %vm5467_vm7 = vcmp.eq.s32.totalorder %v21010_v0, %v21086_v25  ;;  %vm5988_vm8 = vcmp.eq.s32.totalorder %v14620_v63, %v19195_v3 }
 0x688   : > { %13580 = vmatpush1.msk.msra.mxu0 %vm6051_vm9, %v20885_v36  ;;  %13006 = vmatpush1.msk.msra.mxu1 %vm5515_vm10, %v20885_v36  ;;  %vm5452_vm9 = vcmp.eq.s32.totalorder %v21011_v22, %v21085_v62  ;;  %vm5987_vm10 = vcmp.eq.s32.totalorder %v14620_v63, %v19205_v14  ;;  %v21098_v63 = vld [vmem:[#allocation65_spill] sm:$0xff] }
 0x689   : > { %13581 = vmatprep.subr.msk.mxu0 %vm6036_vm11, %v20885_v36  ;;  %13007 = vmatprep.subr.msk.mxu1 %vm5500_vm12, %v20885_v36  ;;  %vm5451_vm11 = vcmp.eq.s32.totalorder %v21011_v22, %v21086_v25  ;;  %vm5972_vm12 = vcmp.eq.s32.totalorder %v14638_v1, %v19195_v3 }
 0x68a   : > { %13582 = vmatpush1.msk.msra.mxu0 %vm6035_vm13, %v20885_v36  ;;  %13008 = vmatpush1.msk.msra.mxu1 %vm5499_vm14, %v20885_v36  ;;  %vm5436_vm13 = vcmp.eq.s32.totalorder %v21012_v16, %v21085_v62  ;;  %vm5971_vm14 = vcmp.eq.s32.totalorder %v14638_v1, %v19205_v14  ;;  %v21099_v1 = vld [vmem:[#allocation66_spill] sm:$0xff] }
 0x68b   : > { %13583 = vmatprep.subr.msk.mxu0 %vm6020_vm15, %v20885_v36  ;;  %13009 = vmatprep.subr.msk.mxu1 %vm5484_vm1, %v20885_v36  ;;  %vm5435_vm15 = vcmp.eq.s32.totalorder %v21012_v16, %v21086_v25  ;;  %vm5956_vm1 = vcmp.eq.s32.totalorder %v14656_v5, %v19195_v3 }
 0x68c   : > { %13584 = vmatpush1.msk.msra.mxu0 %vm6019_vm2, %v20885_v36  ;;  %13010 = vmatpush1.msk.msra.mxu1 %vm5483_vm3, %v20885_v36  ;;  %vm5420_vm2 = vcmp.eq.s32.totalorder %v21013_v37, %v21085_v62  ;;  %vm5955_vm3 = vcmp.eq.s32.totalorder %v14656_v5, %v19205_v14  ;;  %v21100_v5 = vld [vmem:[#allocation67_spill] sm:$0xff] }
 0x68d   : > { %13585 = vmatprep.subr.msk.mxu0 %vm6004_vm4, %v20885_v36  ;;  %13011 = vmatprep.subr.msk.mxu1 %vm5468_vm5, %v20885_v36  ;;  %vm5419_vm4 = vcmp.eq.s32.totalorder %v21013_v37, %v21086_v25  ;;  %vm5940_vm5 = vcmp.eq.s32.totalorder %v14674_v7, %v19195_v3 }
 0x68e   : > { %13586 = vmatpush1.msk.msra.mxu0 %vm6003_vm6, %v20885_v36  ;;  %13012 = vmatpush1.msk.msra.mxu1 %vm5467_vm7, %v20885_v36  ;;  %vm5404_vm6 = vcmp.eq.s32.totalorder %v21014_v4, %v21085_v62  ;;  %vm5939_vm7 = vcmp.eq.s32.totalorder %v14674_v7, %v19205_v14  ;;  %v21101_v7 = vld [vmem:[#allocation68_spill] sm:$0xff] }
 0x68f   : > { %13587 = vmatprep.subr.msk.mxu0 %vm5988_vm8, %v20885_v36  ;;  %13013 = vmatprep.subr.msk.mxu1 %vm5452_vm9, %v20885_v36  ;;  %vm5403_vm8 = vcmp.eq.s32.totalorder %v21014_v4, %v21086_v25  ;;  %vm5924_vm9 = vcmp.eq.s32.totalorder %v20987_v11, %v19195_v3 }
 0x690   : > { %13588 = vmatpush1.msk.msra.mxu0 %vm5987_vm10, %v20885_v36  ;;  %13014 = vmatpush1.msk.msra.mxu1 %vm5451_vm11, %v20885_v36  ;;  %vm5388_vm10 = vcmp.eq.s32.totalorder %v21015_v12, %v21085_v62  ;;  %vm5923_vm11 = vcmp.eq.s32.totalorder %v20987_v11, %v19205_v14  ;;  %v21106_v11 = vld [vmem:[#allocation74_spill] sm:$0xff] }
 0x691   : > { %13589 = vmatprep.subr.msk.mxu0 %vm5972_vm12, %v20885_v36  ;;  %13015 = vmatprep.subr.msk.mxu1 %vm5436_vm13, %v20885_v36  ;;  %vm5387_vm12 = vcmp.eq.s32.totalorder %v21015_v12, %v21086_v25  ;;  %vm5908_vm13 = vcmp.eq.s32.totalorder %v20988_v35, %v19195_v3 }
 0x692   : > { %13590 = vmatpush1.msk.msra.mxu0 %vm5971_vm14, %v20885_v36  ;;  %13016 = vmatpush1.msk.msra.mxu1 %vm5435_vm15, %v20885_v36  ;;  %vm5372_vm14 = vcmp.eq.s32.totalorder %v21016_v13, %v21085_v62  ;;  %vm5907_vm15 = vcmp.eq.s32.totalorder %v20988_v35, %v19205_v14  ;;  %v21107_v35 = vld [vmem:[#allocation43_spill] sm:$0xff] }
 0x693   : > { %13591 = vmatprep.subr.msk.mxu0 %vm5956_vm1, %v20885_v36  ;;  %13017 = vmatprep.subr.msk.mxu1 %vm5420_vm2, %v20885_v36  ;;  %vm5371_vm1 = vcmp.eq.s32.totalorder %v21016_v13, %v21086_v25  ;;  %vm5892_vm2 = vcmp.eq.s32.totalorder %v20989_v44, %v19195_v3 }
 0x694   : > { %13592 = vmatpush1.msk.msra.mxu0 %vm5955_vm3, %v20885_v36  ;;  %13018 = vmatpush1.msk.msra.mxu1 %vm5419_vm4, %v20885_v36  ;;  %vm5868_vm3 = vcmp.eq.s32.totalorder %v21017_v2, %v21085_v62  ;;  %vm5891_vm4 = vcmp.eq.s32.totalorder %v20989_v44, %v19205_v14 }
 0x695   : > { %13593 = vmatprep.subr.msk.mxu0 %vm5940_vm5, %v20885_v36  ;;  %13019 = vmatprep.subr.msk.mxu1 %vm5404_vm6, %v20885_v36  ;;  %vm5867_vm5 = vcmp.eq.s32.totalorder %v21017_v2, %v21086_v25  ;;  %vm6388_vm6 = vcmp.eq.s32.totalorder %v20990_v10, %v19195_v3 }
 0x696   : > { %13594 = vmatpush1.msk.msra.mxu0 %vm5939_vm7, %v20885_v36  ;;  %13020 = vmatpush1.msk.msra.mxu1 %vm5403_vm8, %v20885_v36  ;;  %vm5852_vm7 = vcmp.eq.s32.totalorder %v21018_v23, %v21085_v62  ;;  %vm6387_vm8 = vcmp.eq.s32.totalorder %v20990_v10, %v19205_v14 }
 0x697   : > { %13595 = vmatprep.subr.msk.mxu0 %vm5924_vm9, %v20885_v36  ;;  %13021 = vmatprep.subr.msk.mxu1 %vm5388_vm10, %v20885_v36  ;;  %vm5851_vm9 = vcmp.eq.s32.totalorder %v21018_v23, %v21086_v25  ;;  %vm6372_vm10 = vcmp.eq.s32.totalorder %v14761_v17, %v19195_v3 }
 0x698   : > { %13596 = vmatpush1.msk.msra.mxu0 %vm5923_vm11, %v20885_v36  ;;  %13022 = vmatpush1.msk.msra.mxu1 %vm5387_vm12, %v20885_v36  ;;  %vm5836_vm11 = vcmp.eq.s32.totalorder %v21019_v38, %v21085_v62  ;;  %vm6371_vm12 = vcmp.eq.s32.totalorder %v14761_v17, %v19205_v14  ;;  %v21102_v17 = vld [vmem:[#allocation69_spill] sm:$0xff] }
 0x699   : > { %13597 = vmatprep.subr.msk.mxu0 %vm5908_vm13, %v20885_v36  ;;  %13023 = vmatprep.subr.msk.mxu1 %vm5372_vm14, %v20885_v36  ;;  %vm5835_vm13 = vcmp.eq.s32.totalorder %v21019_v38, %v21086_v25  ;;  %vm6356_vm14 = vcmp.eq.s32.totalorder %v20991_v32, %v19195_v3 }
 0x69a   : > { %13598 = vmatpush1.msk.msra.mxu0 %vm5907_vm15, %v20885_v36  ;;  %13024 = vmatpush1.msk.msra.mxu1 %vm5371_vm1, %v20885_v36  ;;  %vm5820_vm15 = vcmp.eq.s32.totalorder %v21020_v18, %v21085_v62  ;;  %vm6355_vm1 = vcmp.eq.s32.totalorder %v20991_v32, %v19205_v14 }
 0x69b   : > { %13599 = vmatprep.subr.msk.mxu0 %vm5892_vm2, %v20885_v36  ;;  %13025 = vmatprep.subr.msk.mxu1 %vm5868_vm3, %v20885_v36  ;;  %vm5819_vm2 = vcmp.eq.s32.totalorder %v21020_v18, %v21086_v25  ;;  %vm6340_vm3 = vcmp.eq.s32.totalorder %v20992_v40, %v19195_v3 }
 0x69c   : > { %13600 = vmatpush1.msk.msra.mxu0 %vm5891_vm4, %v20885_v36  ;;  %13026 = vmatpush2.msk.msra.mxu1 %vm5867_vm5, %v20885_v36  ;;  %vm5804_vm4 = vcmp.eq.s32.totalorder %v21021_v20, %v21085_v62  ;;  %vm6339_vm5 = vcmp.eq.s32.totalorder %v20992_v40, %v19205_v14  ;;  %v21103_v40 = vld [vmem:[#allocation70_spill] sm:$0xff] }
 0x69d   : > { %13601 = vmatprep.subr.msk.mxu0 %vm6388_vm6, %v20885_v36  ;;  %13027 = vmatprep.subr.msk.mxu1 %vm5852_vm7, %v20885_v36  ;;  %vm5803_vm6 = vcmp.eq.s32.totalorder %v21021_v20, %v21086_v25  ;;  %vm6324_vm7 = vcmp.eq.s32.totalorder %v20993_v33, %v19195_v3 }
 0x69e   : > { %13602 = vmatpush2.msk.msra.mxu0 %vm6387_vm8, %v20885_v36  ;;  %13028 = vmatpush2.msk.msra.mxu1 %vm5851_vm9, %v20885_v36  ;;  %vm5788_vm8 = vcmp.eq.s32.totalorder %v21089_v39, %v21085_v62  ;;  %vm6323_vm9 = vcmp.eq.s32.totalorder %v20993_v33, %v19205_v14  ;;  %v21104_v33 = vld [vmem:[#allocation72_spill] sm:$0xff] }
 0x69f   : > { %13603 = vmatprep.subr.msk.mxu0 %vm6372_vm10, %v20885_v36  ;;  %13029 = vmatprep.subr.msk.mxu1 %vm5836_vm11, %v20885_v36  ;;  %vm5787_vm10 = vcmp.eq.s32.totalorder %v21089_v39, %v21086_v25  ;;  %vm6308_vm11 = vcmp.eq.s32.totalorder %v21090_v45, %v19195_v3 }
 0x6a0   : > { %13604 = vmatpush2.msk.msra.mxu0 %vm6371_vm12, %v20885_v36  ;;  %13030 = vmatpush2.msk.msra.mxu1 %vm5835_vm13, %v20885_v36  ;;  %vm5772_vm12 = vcmp.eq.s32.totalorder %v21091_v48, %v21085_v62  ;;  %vm6307_vm13 = vcmp.eq.s32.totalorder %v21090_v45, %v19205_v14 }
 0x6a1   : > { %13605 = vmatprep.subr.msk.mxu0 %vm6356_vm14, %v20885_v36  ;;  %13031 = vmatprep.subr.msk.mxu1 %vm5820_vm15, %v20885_v36  ;;  %vm5771_vm14 = vcmp.eq.s32.totalorder %v21091_v48, %v21086_v25  ;;  %vm6292_vm15 = vcmp.eq.s32.totalorder %v21092_v51, %v19195_v3 }
 0x6a2   : > { %13606 = vmatpush2.msk.msra.mxu0 %vm6355_vm1, %v20885_v36  ;;  %13032 = vmatpush2.msk.msra.mxu1 %vm5819_vm2, %v20885_v36  ;;  %vm5756_vm1 = vcmp.eq.s32.totalorder %v21093_v53, %v21085_v62  ;;  %vm6291_vm2 = vcmp.eq.s32.totalorder %v21092_v51, %v19205_v14 }
 0x6a3   : > { %13607 = vmatprep.subr.msk.mxu0 %vm6340_vm3, %v20885_v36  ;;  %13033 = vmatprep.subr.msk.mxu1 %vm5804_vm4, %v20885_v36  ;;  %vm5755_vm3 = vcmp.eq.s32.totalorder %v21093_v53, %v21086_v25  ;;  %vm6276_vm4 = vcmp.eq.s32.totalorder %v21094_v55, %v19195_v3 }
 0x6a4   : > { %13608 = vmatpush2.msk.msra.mxu0 %vm6339_vm5, %v20885_v36  ;;  %13034 = vmatpush2.msk.msra.mxu1 %vm5803_vm6, %v20885_v36  ;;  %vm5740_vm5 = vcmp.eq.s32.totalorder %v21095_v57, %v21085_v62  ;;  %vm6275_vm6 = vcmp.eq.s32.totalorder %v21094_v55, %v19205_v14 }
 0x6a5   : > { %13609 = vmatprep.subr.msk.mxu0 %vm6324_vm7, %v20885_v36  ;;  %13035 = vmatprep.subr.msk.mxu1 %vm5788_vm8, %v20885_v36  ;;  %vm5739_vm7 = vcmp.eq.s32.totalorder %v21095_v57, %v21086_v25  ;;  %vm6260_vm8 = vcmp.eq.s32.totalorder %v21096_v59, %v19195_v3 }
 0x6a6   : > { %13610 = vmatpush2.msk.msra.mxu0 %vm6323_vm9, %v20885_v36  ;;  %13036 = vmatpush2.msk.msra.mxu1 %vm5787_vm10, %v20885_v36  ;;  %vm5724_vm9 = vcmp.eq.s32.totalorder %v21097_v61, %v21085_v62  ;;  %vm6259_vm10 = vcmp.eq.s32.totalorder %v21096_v59, %v19205_v14 }
 0x6a7   : > { %13611 = vmatprep.subr.msk.mxu0 %vm6308_vm11, %v20885_v36  ;;  %13037 = vmatprep.subr.msk.mxu1 %vm5772_vm12, %v20885_v36  ;;  %vm5723_vm11 = vcmp.eq.s32.totalorder %v21097_v61, %v21086_v25  ;;  %vm6244_vm12 = vcmp.eq.s32.totalorder %v21098_v63, %v19195_v3 }
 0x6a8   : > { %13612 = vmatpush2.msk.msra.mxu0 %vm6307_vm13, %v20885_v36  ;;  %13038 = vmatpush2.msk.msra.mxu1 %vm5771_vm14, %v20885_v36  ;;  %vm5708_vm13 = vcmp.eq.s32.totalorder %v21099_v1, %v21085_v62  ;;  %vm6243_vm14 = vcmp.eq.s32.totalorder %v21098_v63, %v19205_v14 }
 0x6a9   : > { %13613 = vmatprep.subr.msk.mxu0 %vm6292_vm15, %v20885_v36  ;;  %13039 = vmatprep.subr.msk.mxu1 %vm5756_vm1, %v20885_v36  ;;  %vm5707_vm15 = vcmp.eq.s32.totalorder %v21099_v1, %v21086_v25  ;;  %vm6228_vm1 = vcmp.eq.s32.totalorder %v21100_v5, %v19195_v3 }
 0x6aa   : > { %13614 = vmatpush2.msk.msra.mxu0 %vm6291_vm2, %v20885_v36  ;;  %13040 = vmatpush2.msk.msra.mxu1 %vm5755_vm3, %v20885_v36  ;;  %vm5692_vm2 = vcmp.eq.s32.totalorder %v21101_v7, %v21085_v62  ;;  %vm6227_vm3 = vcmp.eq.s32.totalorder %v21100_v5, %v19205_v14 }
 0x6ab   : > { %13615 = vmatprep.subr.msk.mxu0 %vm6276_vm4, %v20885_v36  ;;  %13041 = vmatprep.subr.msk.mxu1 %vm5740_vm5, %v20885_v36  ;;  %vm5691_vm4 = vcmp.eq.s32.totalorder %v21101_v7, %v21086_v25  ;;  %vm6212_vm5 = vcmp.eq.s32.totalorder %v21102_v17, %v19195_v3 }
 0x6ac   : > { %13616 = vmatpush2.msk.msra.mxu0 %vm6275_vm6, %v20885_v36  ;;  %13042 = vmatpush2.msk.msra.mxu1 %vm5739_vm7, %v20885_v36  ;;  %vm5676_vm6 = vcmp.eq.s32.totalorder %v21103_v40, %v21085_v62  ;;  %vm6211_vm7 = vcmp.eq.s32.totalorder %v21102_v17, %v19205_v14 }
 0x6ad   : > { %13617 = vmatprep.subr.msk.mxu0 %vm6260_vm8, %v20885_v36  ;;  %13043 = vmatprep.subr.msk.mxu1 %vm5724_vm9, %v20885_v36  ;;  %vm5675_vm8 = vcmp.eq.s32.totalorder %v21103_v40, %v21086_v25  ;;  %vm6196_vm9 = vcmp.eq.s32.totalorder %v21072_v29, %v19195_v3 }
 0x6ae   : > { %13618 = vmatpush2.msk.msra.mxu0 %vm6259_vm10, %v20885_v36  ;;  %13044 = vmatpush2.msk.msra.mxu1 %vm5723_vm11, %v20885_v36  ;;  %vm5660_vm10 = vcmp.eq.s32.totalorder %v21104_v33, %v21085_v62  ;;  %vm6195_vm11 = vcmp.eq.s32.totalorder %v21072_v29, %v19205_v14 }
 0x6af   : > { %13619 = vmatprep.subr.msk.mxu0 %vm6244_vm12, %v20885_v36  ;;  %13045 = vmatprep.subr.msk.mxu1 %vm5708_vm13, %v20885_v36  ;;  %vm5659_vm12 = vcmp.eq.s32.totalorder %v21104_v33, %v21086_v25  ;;  %vm6180_vm13 = vcmp.eq.s32.totalorder %v21105_v15, %v19195_v3 }
 0x6b0   : > { %13620 = vmatpush2.msk.msra.mxu0 %vm6243_vm14, %v20885_v36  ;;  %13046 = vmatpush2.msk.msra.mxu1 %vm5707_vm15, %v20885_v36  ;;  %vm5644_vm14 = vcmp.eq.s32.totalorder %v21106_v11, %v21085_v62  ;;  %vm6179_vm15 = vcmp.eq.s32.totalorder %v21105_v15, %v19205_v14 }
 0x6b1   : > { %13621 = vmatprep.subr.msk.mxu0 %vm6228_vm1, %v20885_v36  ;;  %13047 = vmatprep.subr.msk.mxu1 %vm5692_vm2, %v20885_v36  ;;  %vm5643_vm1 = vcmp.eq.s32.totalorder %v21106_v11, %v21086_v25  ;;  %vm6164_vm2 = vcmp.eq.s32.totalorder %v20977_v28, %v19195_v3 }
 0x6b2   : > { %13622 = vmatpush2.msk.msra.mxu0 %vm6227_vm3, %v20885_v36  ;;  %13048 = vmatpush2.msk.msra.mxu1 %vm5691_vm4, %v20885_v36  ;;  %vm5628_vm3 = vcmp.eq.s32.totalorder %v21038_v42, %v21085_v62  ;;  %vm6163_vm4 = vcmp.eq.s32.totalorder %v20977_v28, %v19205_v14  ;;  %v21108_v28 = vld [vmem:[#allocation45_spill] sm:$0xff] }
 0x6b3   : > { %13623 = vmatprep.subr.msk.mxu0 %vm6212_vm5, %v20885_v36  ;;  %13049 = vmatprep.subr.msk.mxu1 %vm5676_vm6, %v20885_v36  ;;  %vm5627_vm5 = vcmp.eq.s32.totalorder %v21038_v42, %v21086_v25  ;;  %vm6148_vm6 = vcmp.eq.s32.totalorder %v20978_v50, %v19195_v3 }
 0x6b4   : > { %13624 = vmatpush2.msk.msra.mxu0 %vm6211_vm7, %v20885_v36  ;;  %13050 = vmatpush2.msk.msra.mxu1 %vm5675_vm8, %v20885_v36  ;;  %vm5614_vm7 = vcmp.eq.s32.totalorder %v14451_v30, %v21107_v35  ;;  %vm6147_vm8 = vcmp.eq.s32.totalorder %v20978_v50, %v19205_v14  ;;  %v21110_v50 = vld [vmem:[#allocation48_spill] sm:$0xff] }
 0x6b5   : > { %13625 = vmatprep.subr.msk.mxu0 %vm6196_vm9, %v20885_v36  ;;  %13051 = vmatprep.subr.msk.mxu1 %vm5660_vm10, %v20885_v36  ;;  %vm5613_vm9 = vcmp.eq.s32.totalorder %v14451_v30, %v21108_v28  ;;  %vm5598_vm10 = vcmp.eq.s32.totalorder %v14469_v41, %v21107_v35 }
 0x6b6   : > { %13626 = vmatpush2.msk.msra.mxu0 %vm6195_vm11, %v20885_v36  ;;  %13052 = vmatpush2.msk.msra.mxu1 %vm5659_vm12, %v20885_v36  ;;  %vm5597_vm11 = vcmp.eq.s32.totalorder %v14469_v41, %v21108_v28  ;;  %vm5582_vm12 = vcmp.eq.s32.totalorder %v14485_v47, %v21107_v35 }
 0x6b7   : > { %13627 = vmatprep.subr.msk.mxu0 %vm6180_vm13, %v20885_v36  ;;  %13053 = vmatprep.subr.msk.mxu1 %vm5644_vm14, %v20885_v36  ;;  %vm5581_vm13 = vcmp.eq.s32.totalorder %v14485_v47, %v21108_v28  ;;  %vm5566_vm14 = vcmp.eq.s32.totalorder %v14503_v49, %v21107_v35 }
 0x6b8   : > { %13628 = vmatpush2.msk.msra.mxu0 %vm6179_vm15, %v20885_v36  ;;  %13054 = vmatpush2.msk.msra.mxu1 %vm5643_vm1, %v20885_v36  ;;  %vm5565_vm15 = vcmp.eq.s32.totalorder %v14503_v49, %v21108_v28  ;;  %vm5550_vm1 = vcmp.eq.s32.totalorder %v14521_v52, %v21107_v35 }
 0x6b9   : > { %13629 = vmatprep.subr.msk.mxu0 %vm6164_vm2, %v20885_v36  ;;  %13055 = vmatprep.subr.msk.mxu1 %vm5628_vm3, %v20885_v36  ;;  %vm5549_vm2 = vcmp.eq.s32.totalorder %v14521_v52, %v21108_v28  ;;  %vm5534_vm3 = vcmp.eq.s32.totalorder %v14539_v54, %v21107_v35 }
 0x6ba   : > { %13630 = vmatpush2.msk.msra.mxu0 %vm6163_vm4, %v20885_v36  ;;  %13056 = vmatpush2.msk.msra.mxu1 %vm5627_vm5, %v20885_v36  ;;  %vm5533_vm4 = vcmp.eq.s32.totalorder %v14539_v54, %v21108_v28  ;;  %vm5518_vm5 = vcmp.eq.s32.totalorder %v14557_v56, %v21107_v35 }
 0x6bb   : > { %13631 = vmatprep.subr.msk.mxu0 %vm6148_vm6, %v20885_v36  ;;  %8928 = vmatmul.mubr.f32.vlgmr.msra.gmra.mxu1 %v18402_v8  ;;  %vm5517_vm6 = vcmp.eq.s32.totalorder %v14557_v56, %v21108_v28 }
 0x6bc   : > { %13121 = vmatprep.subr.msk.mxu1 %vm5614_vm7, %v20885_v36  ;;  %13632 = vmatpush2.msk.msra.mxu0 %vm6147_vm8, %v20885_v36  ;;  %vm5502_vm7 = vcmp.eq.s32.totalorder %v14575_v58, %v21107_v35  ;;  %vm5501_vm8 = vcmp.eq.s32.totalorder %v14575_v58, %v21108_v28 }
 0x6bd   : > { %13122 = vmatpush1.msk.msra.mxu1 %vm5613_vm9, %v20885_v36  ;;  %9069 = vmatprep.mubr.f32.mxu1 %v18038_v19  ;;  %vm5486_vm9 = vcmp.eq.s32.totalorder %v14593_v60, %v21107_v35 }
 0x6be   : > { %9567 = vmatmul.mubr.f32.vlgmr.msra.gmra.mxu0 %v17383_v46  ;;  %13123 = vmatprep.subr.msk.mxu1 %vm5598_vm10, %v20885_v36  ;;  %vm5485_vm10 = vcmp.eq.s32.totalorder %v14593_v60, %v21108_v28  ;;  %v21109_v46 = vld [vmem:[#allocation46_spill] sm:$0xff] }
 0x6bf   : > { %13124 = vmatpush1.msk.msra.mxu1 %vm5597_vm11, %v20885_v36  ;;  %vm5470_vm11 = vcmp.eq.s32.totalorder %v21010_v0, %v21107_v35 }
 0x6c0   : > { %13125 = vmatprep.subr.msk.mxu1 %vm5582_vm12, %v20885_v36  ;;  %vm5469_vm12 = vcmp.eq.s32.totalorder %v21010_v0, %v21108_v28 }
 0x6c1   : > { %13126 = vmatpush1.msk.msra.mxu1 %vm5581_vm13, %v20885_v36  ;;  %vm5454_vm13 = vcmp.eq.s32.totalorder %v21011_v22, %v21107_v35 }
 0x6c2   : > { %13127 = vmatprep.subr.msk.mxu1 %vm5566_vm14, %v20885_v36  ;;  %vm5453_vm14 = vcmp.eq.s32.totalorder %v21011_v22, %v21108_v28 }
 0x6c3   : > { %13128 = vmatpush1.msk.msra.mxu1 %vm5565_vm15, %v20885_v36  ;;  %vm5438_vm15 = vcmp.eq.s32.totalorder %v21012_v16, %v21107_v35 }
 0x6c4   : > { %13129 = vmatprep.subr.msk.mxu1 %vm5550_vm1, %v20885_v36  ;;  %vm5437_vm1 = vcmp.eq.s32.totalorder %v21012_v16, %v21108_v28 }
 0x6c5   : > { %13130 = vmatpush1.msk.msra.mxu1 %vm5549_vm2, %v20885_v36  ;;  %vm5422_vm2 = vcmp.eq.s32.totalorder %v21013_v37, %v21107_v35 }
 0x6c6   : > { %13131 = vmatprep.subr.msk.mxu1 %vm5534_vm3, %v20885_v36  ;;  %vm5421_vm3 = vcmp.eq.s32.totalorder %v21013_v37, %v21108_v28 }
 0x6c7   : > { %13132 = vmatpush1.msk.msra.mxu1 %vm5533_vm4, %v20885_v36  ;;  %vm5406_vm4 = vcmp.eq.s32.totalorder %v21014_v4, %v21107_v35 }
 0x6c8   : > { %13133 = vmatprep.subr.msk.mxu1 %vm5518_vm5, %v20885_v36  ;;  %vm5405_vm5 = vcmp.eq.s32.totalorder %v21014_v4, %v21108_v28 }
 0x6c9   : > { %13134 = vmatpush1.msk.msra.mxu1 %vm5517_vm6, %v20885_v36  ;;  %vm5390_vm6 = vcmp.eq.s32.totalorder %v21015_v12, %v21107_v35 }
 0x6ca   : > { %13135 = vmatprep.subr.msk.mxu1 %vm5502_vm7, %v20885_v36  ;;  %vm5389_vm7 = vcmp.eq.s32.totalorder %v21015_v12, %v21108_v28 }
 0x6cb   : > { %13136 = vmatpush1.msk.msra.mxu1 %vm5501_vm8, %v20885_v36  ;;  %vm5374_vm8 = vcmp.eq.s32.totalorder %v21016_v13, %v21107_v35 }
 0x6cc   : > { %13137 = vmatprep.subr.msk.mxu1 %vm5486_vm9, %v20885_v36  ;;  %vm5373_vm9 = vcmp.eq.s32.totalorder %v21016_v13, %v21108_v28 }
 0x6cd   : > { %13138 = vmatpush1.msk.msra.mxu1 %vm5485_vm10, %v20885_v36  ;;  %vm5870_vm10 = vcmp.eq.s32.totalorder %v21017_v2, %v21107_v35 }
 0x6ce   : > { %13139 = vmatprep.subr.msk.mxu1 %vm5470_vm11, %v20885_v36  ;;  %vm5869_vm11 = vcmp.eq.s32.totalorder %v21017_v2, %v21108_v28 }
 0x6cf   : > { %13140 = vmatpush1.msk.msra.mxu1 %vm5469_vm12, %v20885_v36  ;;  %vm5854_vm12 = vcmp.eq.s32.totalorder %v21018_v23, %v21107_v35 }
 0x6d0   : > { %13141 = vmatprep.subr.msk.mxu1 %vm5454_vm13, %v20885_v36  ;;  %vm5853_vm13 = vcmp.eq.s32.totalorder %v21018_v23, %v21108_v28 }
 0x6d1   : > { %13142 = vmatpush1.msk.msra.mxu1 %vm5453_vm14, %v20885_v36  ;;  %vm5838_vm14 = vcmp.eq.s32.totalorder %v21019_v38, %v21107_v35 }
 0x6d2   : > { %13143 = vmatprep.subr.msk.mxu1 %vm5438_vm15, %v20885_v36  ;;  %vm5837_vm15 = vcmp.eq.s32.totalorder %v21019_v38, %v21108_v28 }
 0x6d3   : > { %13144 = vmatpush1.msk.msra.mxu1 %vm5437_vm1, %v20885_v36  ;;  %vm5822_vm1 = vcmp.eq.s32.totalorder %v21020_v18, %v21107_v35 }
 0x6d4   : > { %13145 = vmatprep.subr.msk.mxu1 %vm5422_vm2, %v20885_v36  ;;  %vm5821_vm2 = vcmp.eq.s32.totalorder %v21020_v18, %v21108_v28 }
 0x6d5   : > { %13146 = vmatpush1.msk.msra.mxu1 %vm5421_vm3, %v20885_v36  ;;  %vm5806_vm3 = vcmp.eq.s32.totalorder %v21021_v20, %v21107_v35 }
 0x6d6   : > { %13147 = vmatprep.subr.msk.mxu1 %vm5406_vm4, %v20885_v36  ;;  %vm5805_vm4 = vcmp.eq.s32.totalorder %v21021_v20, %v21108_v28 }
 0x6d7   : > { %13148 = vmatpush1.msk.msra.mxu1 %vm5405_vm5, %v20885_v36  ;;  %vm5790_vm5 = vcmp.eq.s32.totalorder %v21089_v39, %v21107_v35 }
 0x6d8   : > { %13149 = vmatprep.subr.msk.mxu1 %vm5390_vm6, %v20885_v36  ;;  %vm5789_vm6 = vcmp.eq.s32.totalorder %v21089_v39, %v21108_v28 }
 0x6d9   : > { %13150 = vmatpush1.msk.msra.mxu1 %vm5389_vm7, %v20885_v36  ;;  %vm5774_vm7 = vcmp.eq.s32.totalorder %v21091_v48, %v21107_v35 }
 0x6da   : > { %13151 = vmatprep.subr.msk.mxu1 %vm5374_vm8, %v20885_v36  ;;  %vm5773_vm8 = vcmp.eq.s32.totalorder %v21091_v48, %v21108_v28 }
 0x6db   : > { %13152 = vmatpush1.msk.msra.mxu1 %vm5373_vm9, %v20885_v36  ;;  %vm5758_vm9 = vcmp.eq.s32.totalorder %v21093_v53, %v21107_v35 }
 0x6dc   : > { %13153 = vmatprep.subr.msk.mxu1 %vm5870_vm10, %v20885_v36  ;;  %vm5757_vm10 = vcmp.eq.s32.totalorder %v21093_v53, %v21108_v28 }
 0x6dd   : > { %13154 = vmatpush2.msk.msra.mxu1 %vm5869_vm11, %v20885_v36  ;;  %vm5742_vm11 = vcmp.eq.s32.totalorder %v21095_v57, %v21107_v35 }
 0x6de   : > { %13155 = vmatprep.subr.msk.mxu1 %vm5854_vm12, %v20885_v36  ;;  %vm5741_vm12 = vcmp.eq.s32.totalorder %v21095_v57, %v21108_v28 }
 0x6df   : > { %13156 = vmatpush2.msk.msra.mxu1 %vm5853_vm13, %v20885_v36  ;;  %vm5726_vm13 = vcmp.eq.s32.totalorder %v21097_v61, %v21107_v35 }
 0x6e0   : > { %13157 = vmatprep.subr.msk.mxu1 %vm5838_vm14, %v20885_v36  ;;  %vm5725_vm14 = vcmp.eq.s32.totalorder %v21097_v61, %v21108_v28 }
 0x6e1   : > { %13158 = vmatpush2.msk.msra.mxu1 %vm5837_vm15, %v20885_v36  ;;  %vm5710_vm15 = vcmp.eq.s32.totalorder %v21099_v1, %v21107_v35 }
 0x6e2   : > { %13159 = vmatprep.subr.msk.mxu1 %vm5822_vm1, %v20885_v36  ;;  %vm5709_vm1 = vcmp.eq.s32.totalorder %v21099_v1, %v21108_v28 }
 0x6e3   : > { %13160 = vmatpush2.msk.msra.mxu1 %vm5821_vm2, %v20885_v36  ;;  %vm5694_vm2 = vcmp.eq.s32.totalorder %v21101_v7, %v21107_v35 }
 0x6e4   : > { %13161 = vmatprep.subr.msk.mxu1 %vm5806_vm3, %v20885_v36  ;;  %vm5693_vm3 = vcmp.eq.s32.totalorder %v21101_v7, %v21108_v28 }
 0x6e5   : > { %13162 = vmatpush2.msk.msra.mxu1 %vm5805_vm4, %v20885_v36  ;;  %vm5678_vm4 = vcmp.eq.s32.totalorder %v21103_v40, %v21107_v35 }
 0x6e6   : > { %13163 = vmatprep.subr.msk.mxu1 %vm5790_vm5, %v20885_v36  ;;  %vm5677_vm5 = vcmp.eq.s32.totalorder %v21103_v40, %v21108_v28 }
 0x6e7   : > { %13164 = vmatpush2.msk.msra.mxu1 %vm5789_vm6, %v20885_v36  ;;  %vm5662_vm6 = vcmp.eq.s32.totalorder %v21104_v33, %v21107_v35 }
 0x6e8   : > { %13165 = vmatprep.subr.msk.mxu1 %vm5774_vm7, %v20885_v36  ;;  %vm5661_vm7 = vcmp.eq.s32.totalorder %v21104_v33, %v21108_v28 }
 0x6e9   : > { %13166 = vmatpush2.msk.msra.mxu1 %vm5773_vm8, %v20885_v36  ;;  %vm5646_vm8 = vcmp.eq.s32.totalorder %v21106_v11, %v21107_v35 }
 0x6ea   : > { %13167 = vmatprep.subr.msk.mxu1 %vm5758_vm9, %v20885_v36  ;;  %vm5645_vm9 = vcmp.eq.s32.totalorder %v21106_v11, %v21108_v28 }
 0x6eb   : > { %13168 = vmatpush2.msk.msra.mxu1 %vm5757_vm10, %v20885_v36  ;;  %vm5630_vm10 = vcmp.eq.s32.totalorder %v21038_v42, %v21107_v35 }
 0x6ec   : > { %13169 = vmatprep.subr.msk.mxu1 %vm5742_vm11, %v20885_v36  ;;  %vm5629_vm11 = vcmp.eq.s32.totalorder %v21038_v42, %v21108_v28 }
 0x6ed   : > { %13170 = vmatpush2.msk.msra.mxu1 %vm5741_vm12, %v20885_v36  ;;  %vm5616_vm12 = vcmp.eq.s32.totalorder %v14451_v30, %v21109_v46 }
 0x6ee   : > { %13171 = vmatprep.subr.msk.mxu1 %vm5726_vm13, %v20885_v36  ;;  %vm5615_vm13 = vcmp.eq.s32.totalorder %v14451_v30, %v21110_v50 }
 0x6ef   : > { %13172 = vmatpush2.msk.msra.mxu1 %vm5725_vm14, %v20885_v36  ;;  %vm5600_vm14 = vcmp.eq.s32.totalorder %v14469_v41, %v21109_v46 }
 0x6f0   : > { %13173 = vmatprep.subr.msk.mxu1 %vm5710_vm15, %v20885_v36  ;;  %vm5599_vm15 = vcmp.eq.s32.totalorder %v14469_v41, %v21110_v50 }
 0x6f1   : > { %13174 = vmatpush2.msk.msra.mxu1 %vm5709_vm1, %v20885_v36  ;;  %vm5584_vm1 = vcmp.eq.s32.totalorder %v14485_v47, %v21109_v46 }
 0x6f2   : > { %13175 = vmatprep.subr.msk.mxu1 %vm5694_vm2, %v20885_v36  ;;  %vm5583_vm2 = vcmp.eq.s32.totalorder %v14485_v47, %v21110_v50 }
 0x6f3   : > { %13176 = vmatpush2.msk.msra.mxu1 %vm5693_vm3, %v20885_v36  ;;  %vm5568_vm3 = vcmp.eq.s32.totalorder %v14503_v49, %v21109_v46 }
 0x6f4   : > { %13177 = vmatprep.subr.msk.mxu1 %vm5678_vm4, %v20885_v36  ;;  %vm5567_vm4 = vcmp.eq.s32.totalorder %v14503_v49, %v21110_v50 }
 0x6f5   : > { %13178 = vmatpush2.msk.msra.mxu1 %vm5677_vm5, %v20885_v36  ;;  %vm5552_vm5 = vcmp.eq.s32.totalorder %v14521_v52, %v21109_v46 }
 0x6f6   : > { %13179 = vmatprep.subr.msk.mxu1 %vm5662_vm6, %v20885_v36  ;;  %vm5551_vm6 = vcmp.eq.s32.totalorder %v14521_v52, %v21110_v50 }
 0x6f7   : > { %13180 = vmatpush2.msk.msra.mxu1 %vm5661_vm7, %v20885_v36  ;;  %vm5536_vm7 = vcmp.eq.s32.totalorder %v14539_v54, %v21109_v46 }
 0x6f8   : > { %13181 = vmatprep.subr.msk.mxu1 %vm5646_vm8, %v20885_v36  ;;  %vm5535_vm8 = vcmp.eq.s32.totalorder %v14539_v54, %v21110_v50 }
 0x6f9   : > { %13182 = vmatpush2.msk.msra.mxu1 %vm5645_vm9, %v20885_v36  ;;  %vm5520_vm9 = vcmp.eq.s32.totalorder %v14557_v56, %v21109_v46 }
 0x6fa   : > { %13183 = vmatprep.subr.msk.mxu1 %vm5630_vm10, %v20885_v36  ;;  %vm5519_vm10 = vcmp.eq.s32.totalorder %v14557_v56, %v21110_v50 }
 0x6fb   : > { %13184 = vmatpush2.msk.msra.mxu1 %vm5629_vm11, %v20885_v36  ;;  %vm5504_vm11 = vcmp.eq.s32.totalorder %v14575_v58, %v21109_v46 }
 0x6fc   : > { %9070 = vmatmul.mubr.f32.vlgmr.msra.gmra.mxu1 %v18402_v8  ;;  %13249 = vmatprep.subr.msk.mxu1 %vm5616_vm12, %v20885_v36  ;;  %vm5503_vm12 = vcmp.eq.s32.totalorder %v14575_v58, %v21110_v50 }
 0x6fd   : > { %13250 = vmatpush1.msk.msra.mxu1 %vm5615_vm13, %v20885_v36  ;;  %9211 = vmatprep.mubr.f32.mxu1 %v18038_v19  ;;  %vm5488_vm13 = vcmp.eq.s32.totalorder %v14593_v60, %v21109_v46 }
 0x6fe   : > { %13251 = vmatprep.subr.msk.mxu1 %vm5600_vm14, %v20885_v36  ;;  %vm5487_vm14 = vcmp.eq.s32.totalorder %v14593_v60, %v21110_v50 }
 0x6ff   : > { %13252 = vmatpush1.msk.msra.mxu1 %vm5599_vm15, %v20885_v36  ;;  %vm5472_vm15 = vcmp.eq.s32.totalorder %v21010_v0, %v21109_v46 }
 0x700   : > { %13253 = vmatprep.subr.msk.mxu1 %vm5584_vm1, %v20885_v36  ;;  %vm5471_vm1 = vcmp.eq.s32.totalorder %v21010_v0, %v21110_v50 }
 0x701   : > { %13254 = vmatpush1.msk.msra.mxu1 %vm5583_vm2, %v20885_v36  ;;  %vm5456_vm2 = vcmp.eq.s32.totalorder %v21011_v22, %v21109_v46 }
 0x702   : > { %13255 = vmatprep.subr.msk.mxu1 %vm5568_vm3, %v20885_v36  ;;  %vm5455_vm3 = vcmp.eq.s32.totalorder %v21011_v22, %v21110_v50 }
 0x703   : > { %13256 = vmatpush1.msk.msra.mxu1 %vm5567_vm4, %v20885_v36  ;;  %vm5440_vm4 = vcmp.eq.s32.totalorder %v21012_v16, %v21109_v46 }
 0x704   : > { %13257 = vmatprep.subr.msk.mxu1 %vm5552_vm5, %v20885_v36  ;;  %vm5439_vm5 = vcmp.eq.s32.totalorder %v21012_v16, %v21110_v50 }
 0x705   : > { %13258 = vmatpush1.msk.msra.mxu1 %vm5551_vm6, %v20885_v36  ;;  %vm5424_vm6 = vcmp.eq.s32.totalorder %v21013_v37, %v21109_v46 }
 0x706   : > { %13259 = vmatprep.subr.msk.mxu1 %vm5536_vm7, %v20885_v36  ;;  %vm5423_vm7 = vcmp.eq.s32.totalorder %v21013_v37, %v21110_v50 }
 0x707   : > { %13260 = vmatpush1.msk.msra.mxu1 %vm5535_vm8, %v20885_v36  ;;  %vm5408_vm8 = vcmp.eq.s32.totalorder %v21014_v4, %v21109_v46 }
 0x708   : > { %13261 = vmatprep.subr.msk.mxu1 %vm5520_vm9, %v20885_v36  ;;  %vm5407_vm9 = vcmp.eq.s32.totalorder %v21014_v4, %v21110_v50 }
 0x709   : > { %13262 = vmatpush1.msk.msra.mxu1 %vm5519_vm10, %v20885_v36  ;;  %vm5392_vm10 = vcmp.eq.s32.totalorder %v21015_v12, %v21109_v46 }
 0x70a   : > { %13263 = vmatprep.subr.msk.mxu1 %vm5504_vm11, %v20885_v36  ;;  %vm5391_vm11 = vcmp.eq.s32.totalorder %v21015_v12, %v21110_v50 }
 0x70b   : > { %13264 = vmatpush1.msk.msra.mxu1 %vm5503_vm12, %v20885_v36  ;;  %vm5376_vm12 = vcmp.eq.s32.totalorder %v21016_v13, %v21109_v46 }
 0x70c   : > { %13265 = vmatprep.subr.msk.mxu1 %vm5488_vm13, %v20885_v36  ;;  %vm5375_vm13 = vcmp.eq.s32.totalorder %v21016_v13, %v21110_v50 }
 0x70d   : > { %13266 = vmatpush1.msk.msra.mxu1 %vm5487_vm14, %v20885_v36  ;;  %vm5872_vm14 = vcmp.eq.s32.totalorder %v21017_v2, %v21109_v46 }
 0x70e   : > { %13267 = vmatprep.subr.msk.mxu1 %vm5472_vm15, %v20885_v36  ;;  %vm5871_vm15 = vcmp.eq.s32.totalorder %v21017_v2, %v21110_v50 }
 0x70f   : > { %13268 = vmatpush1.msk.msra.mxu1 %vm5471_vm1, %v20885_v36  ;;  %vm5856_vm1 = vcmp.eq.s32.totalorder %v21018_v23, %v21109_v46 }
 0x710   : > { %13269 = vmatprep.subr.msk.mxu1 %vm5456_vm2, %v20885_v36  ;;  %vm5855_vm2 = vcmp.eq.s32.totalorder %v21018_v23, %v21110_v50 }
 0x711   : > { %13270 = vmatpush1.msk.msra.mxu1 %vm5455_vm3, %v20885_v36  ;;  %vm5840_vm3 = vcmp.eq.s32.totalorder %v21019_v38, %v21109_v46 }
 0x712   : > { %13271 = vmatprep.subr.msk.mxu1 %vm5440_vm4, %v20885_v36  ;;  %vm5839_vm4 = vcmp.eq.s32.totalorder %v21019_v38, %v21110_v50 }
 0x713   : > { %13272 = vmatpush1.msk.msra.mxu1 %vm5439_vm5, %v20885_v36  ;;  %vm5824_vm5 = vcmp.eq.s32.totalorder %v21020_v18, %v21109_v46 }
 0x714   : > { %13273 = vmatprep.subr.msk.mxu1 %vm5424_vm6, %v20885_v36  ;;  %vm5823_vm6 = vcmp.eq.s32.totalorder %v21020_v18, %v21110_v50 }
 0x715   : > { %13274 = vmatpush1.msk.msra.mxu1 %vm5423_vm7, %v20885_v36  ;;  %vm5808_vm7 = vcmp.eq.s32.totalorder %v21021_v20, %v21109_v46 }
 0x716   : > { %13275 = vmatprep.subr.msk.mxu1 %vm5408_vm8, %v20885_v36  ;;  %vm5807_vm8 = vcmp.eq.s32.totalorder %v21021_v20, %v21110_v50 }
 0x717   : > { %13276 = vmatpush1.msk.msra.mxu1 %vm5407_vm9, %v20885_v36  ;;  %vm5792_vm9 = vcmp.eq.s32.totalorder %v21089_v39, %v21109_v46 }
 0x718   : > { %13277 = vmatprep.subr.msk.mxu1 %vm5392_vm10, %v20885_v36  ;;  %vm5791_vm10 = vcmp.eq.s32.totalorder %v21089_v39, %v21110_v50 }
 0x719   : > { %13278 = vmatpush1.msk.msra.mxu1 %vm5391_vm11, %v20885_v36  ;;  %vm5776_vm11 = vcmp.eq.s32.totalorder %v21091_v48, %v21109_v46 }
 0x71a   : > { %13279 = vmatprep.subr.msk.mxu1 %vm5376_vm12, %v20885_v36  ;;  %vm5775_vm12 = vcmp.eq.s32.totalorder %v21091_v48, %v21110_v50 }
 0x71b   : > { %13280 = vmatpush1.msk.msra.mxu1 %vm5375_vm13, %v20885_v36  ;;  %vm5760_vm13 = vcmp.eq.s32.totalorder %v21093_v53, %v21109_v46 }
 0x71c   : > { %13281 = vmatprep.subr.msk.mxu1 %vm5872_vm14, %v20885_v36  ;;  %vm5759_vm14 = vcmp.eq.s32.totalorder %v21093_v53, %v21110_v50 }
 0x71d   : > { %13282 = vmatpush2.msk.msra.mxu1 %vm5871_vm15, %v20885_v36  ;;  %vm5744_vm15 = vcmp.eq.s32.totalorder %v21095_v57, %v21109_v46 }
 0x71e   : > { %13283 = vmatprep.subr.msk.mxu1 %vm5856_vm1, %v20885_v36  ;;  %vm5743_vm1 = vcmp.eq.s32.totalorder %v21095_v57, %v21110_v50 }
 0x71f   : > { %13284 = vmatpush2.msk.msra.mxu1 %vm5855_vm2, %v20885_v36  ;;  %vm5728_vm2 = vcmp.eq.s32.totalorder %v21097_v61, %v21109_v46 }
 0x720   : > { %13285 = vmatprep.subr.msk.mxu1 %vm5840_vm3, %v20885_v36  ;;  %vm5727_vm3 = vcmp.eq.s32.totalorder %v21097_v61, %v21110_v50 }
 0x721   : > { %13286 = vmatpush2.msk.msra.mxu1 %vm5839_vm4, %v20885_v36  ;;  %vm5712_vm4 = vcmp.eq.s32.totalorder %v21099_v1, %v21109_v46 }
 0x722   : > { %13287 = vmatprep.subr.msk.mxu1 %vm5824_vm5, %v20885_v36  ;;  %vm5711_vm5 = vcmp.eq.s32.totalorder %v21099_v1, %v21110_v50 }
 0x723   : > { %13288 = vmatpush2.msk.msra.mxu1 %vm5823_vm6, %v20885_v36  ;;  %vm5696_vm6 = vcmp.eq.s32.totalorder %v21101_v7, %v21109_v46 }
 0x724   : > { %13289 = vmatprep.subr.msk.mxu1 %vm5808_vm7, %v20885_v36  ;;  %vm5695_vm7 = vcmp.eq.s32.totalorder %v21101_v7, %v21110_v50 }
 0x725   : > { %13290 = vmatpush2.msk.msra.mxu1 %vm5807_vm8, %v20885_v36  ;;  %vm5680_vm8 = vcmp.eq.s32.totalorder %v21103_v40, %v21109_v46 }
 0x726   : > { %13291 = vmatprep.subr.msk.mxu1 %vm5792_vm9, %v20885_v36  ;;  %vm5679_vm9 = vcmp.eq.s32.totalorder %v21103_v40, %v21110_v50 }
 0x727   : > { %13292 = vmatpush2.msk.msra.mxu1 %vm5791_vm10, %v20885_v36  ;;  %vm5664_vm10 = vcmp.eq.s32.totalorder %v21104_v33, %v21109_v46 }
 0x728   : > { %13293 = vmatprep.subr.msk.mxu1 %vm5776_vm11, %v20885_v36  ;;  %vm5663_vm11 = vcmp.eq.s32.totalorder %v21104_v33, %v21110_v50 }
 0x729   : > { %13294 = vmatpush2.msk.msra.mxu1 %vm5775_vm12, %v20885_v36  ;;  %vm5648_vm12 = vcmp.eq.s32.totalorder %v21106_v11, %v21109_v46 }
 0x72a   : > { %13295 = vmatprep.subr.msk.mxu1 %vm5760_vm13, %v20885_v36  ;;  %vm5647_vm13 = vcmp.eq.s32.totalorder %v21106_v11, %v21110_v50 }
 0x72b   : > { %13296 = vmatpush2.msk.msra.mxu1 %vm5759_vm14, %v20885_v36  ;;  %vm5632_vm14 = vcmp.eq.s32.totalorder %v21038_v42, %v21109_v46 }
 0x72c   : > { %13297 = vmatprep.subr.msk.mxu1 %vm5744_vm15, %v20885_v36  ;;  %vm5631_vm15 = vcmp.eq.s32.totalorder %v21038_v42, %v21110_v50 }
 0x72d   : > { %13298 = vmatpush2.msk.msra.mxu1 %vm5743_vm1, %v20885_v36  ;;  %vm5618_vm1 = vcmp.eq.s32.totalorder %v14451_v30, %v18793_v31 }
 0x72e   : > { %13299 = vmatprep.subr.msk.mxu1 %vm5728_vm2, %v20885_v36  ;;  %vm5617_vm2 = vcmp.eq.s32.totalorder %v14451_v30, %v18801_v24 }
 0x72f   : > { %13300 = vmatpush2.msk.msra.mxu1 %vm5727_vm3, %v20885_v36  ;;  %vm5602_vm3 = vcmp.eq.s32.totalorder %v14469_v41, %v18793_v31 }
 0x730   : > { %13301 = vmatprep.subr.msk.mxu1 %vm5712_vm4, %v20885_v36  ;;  %vm5601_vm4 = vcmp.eq.s32.totalorder %v14469_v41, %v18801_v24 }
 0x731   : > { %13302 = vmatpush2.msk.msra.mxu1 %vm5711_vm5, %v20885_v36  ;;  %vm5586_vm5 = vcmp.eq.s32.totalorder %v14485_v47, %v18793_v31 }
 0x732   : > { %13303 = vmatprep.subr.msk.mxu1 %vm5696_vm6, %v20885_v36  ;;  %vm5585_vm6 = vcmp.eq.s32.totalorder %v14485_v47, %v18801_v24 }
 0x733   : > { %13304 = vmatpush2.msk.msra.mxu1 %vm5695_vm7, %v20885_v36  ;;  %vm5570_vm7 = vcmp.eq.s32.totalorder %v14503_v49, %v18793_v31 }
 0x734   : > { %13305 = vmatprep.subr.msk.mxu1 %vm5680_vm8, %v20885_v36  ;;  %vm5569_vm8 = vcmp.eq.s32.totalorder %v14503_v49, %v18801_v24 }
 0x735   : > { %13306 = vmatpush2.msk.msra.mxu1 %vm5679_vm9, %v20885_v36  ;;  %vm5554_vm9 = vcmp.eq.s32.totalorder %v14521_v52, %v18793_v31 }
 0x736   : > { %13307 = vmatprep.subr.msk.mxu1 %vm5664_vm10, %v20885_v36  ;;  %vm5553_vm10 = vcmp.eq.s32.totalorder %v14521_v52, %v18801_v24 }
 0x737   : > { %13308 = vmatpush2.msk.msra.mxu1 %vm5663_vm11, %v20885_v36  ;;  %vm5538_vm11 = vcmp.eq.s32.totalorder %v14539_v54, %v18793_v31 }
 0x738   : > { %13309 = vmatprep.subr.msk.mxu1 %vm5648_vm12, %v20885_v36  ;;  %vm5537_vm12 = vcmp.eq.s32.totalorder %v14539_v54, %v18801_v24 }
 0x739   : > { %13310 = vmatpush2.msk.msra.mxu1 %vm5647_vm13, %v20885_v36  ;;  %vm5522_vm13 = vcmp.eq.s32.totalorder %v14557_v56, %v18793_v31 }
 0x73a   : > { %13311 = vmatprep.subr.msk.mxu1 %vm5632_vm14, %v20885_v36  ;;  %vm5521_vm14 = vcmp.eq.s32.totalorder %v14557_v56, %v18801_v24 }
 0x73b   : > { %13312 = vmatpush2.msk.msra.mxu1 %vm5631_vm15, %v20885_v36  ;;  %vm5506_vm15 = vcmp.eq.s32.totalorder %v14575_v58, %v18793_v31 }
 0x73c   : > { %9212 = vmatmul.mubr.f32.vlgmr.msra.gmra.mxu1 %v18402_v8  ;;  %13377 = vmatprep.subr.msk.mxu1 %vm5618_vm1, %v20885_v36  ;;  %vm5505_vm1 = vcmp.eq.s32.totalorder %v14575_v58, %v18801_v24 }
 0x73d   : > { %13378 = vmatpush1.msk.msra.mxu1 %vm5617_vm2, %v20885_v36  ;;  %9353 = vmatprep.mubr.f32.mxu1 %v18038_v19  ;;  %vm5490_vm2 = vcmp.eq.s32.totalorder %v14593_v60, %v18793_v31 }
 0x73e   : > { %13379 = vmatprep.subr.msk.mxu1 %vm5602_vm3, %v20885_v36  ;;  %vm5489_vm3 = vcmp.eq.s32.totalorder %v14593_v60, %v18801_v24 }
 0x73f   : > { %13380 = vmatpush1.msk.msra.mxu1 %vm5601_vm4, %v20885_v36  ;;  %vm5474_vm4 = vcmp.eq.s32.totalorder %v21010_v0, %v18793_v31 }
 0x740   : > { %13381 = vmatprep.subr.msk.mxu1 %vm5586_vm5, %v20885_v36  ;;  %vm5473_vm5 = vcmp.eq.s32.totalorder %v21010_v0, %v18801_v24 }
 0x741   : > { %13382 = vmatpush1.msk.msra.mxu1 %vm5585_vm6, %v20885_v36  ;;  %vm5458_vm6 = vcmp.eq.s32.totalorder %v21011_v22, %v18793_v31 }
 0x742   : > { %13383 = vmatprep.subr.msk.mxu1 %vm5570_vm7, %v20885_v36  ;;  %vm5457_vm7 = vcmp.eq.s32.totalorder %v21011_v22, %v18801_v24 }
 0x743   : > { %13384 = vmatpush1.msk.msra.mxu1 %vm5569_vm8, %v20885_v36  ;;  %vm5442_vm8 = vcmp.eq.s32.totalorder %v21012_v16, %v18793_v31 }
 0x744   : > { %13385 = vmatprep.subr.msk.mxu1 %vm5554_vm9, %v20885_v36  ;;  %vm5441_vm9 = vcmp.eq.s32.totalorder %v21012_v16, %v18801_v24 }
 0x745   : > { %13386 = vmatpush1.msk.msra.mxu1 %vm5553_vm10, %v20885_v36  ;;  %vm5426_vm10 = vcmp.eq.s32.totalorder %v21013_v37, %v18793_v31 }
 0x746   : > { %13387 = vmatprep.subr.msk.mxu1 %vm5538_vm11, %v20885_v36  ;;  %vm5425_vm11 = vcmp.eq.s32.totalorder %v21013_v37, %v18801_v24 }
 0x747   : > { %13388 = vmatpush1.msk.msra.mxu1 %vm5537_vm12, %v20885_v36  ;;  %vm5410_vm12 = vcmp.eq.s32.totalorder %v21014_v4, %v18793_v31 }
 0x748   : > { %13389 = vmatprep.subr.msk.mxu1 %vm5522_vm13, %v20885_v36  ;;  %vm5409_vm13 = vcmp.eq.s32.totalorder %v21014_v4, %v18801_v24 }
 0x749   : > { %13390 = vmatpush1.msk.msra.mxu1 %vm5521_vm14, %v20885_v36  ;;  %vm5394_vm14 = vcmp.eq.s32.totalorder %v21015_v12, %v18793_v31 }
 0x74a   : > { %13391 = vmatprep.subr.msk.mxu1 %vm5506_vm15, %v20885_v36  ;;  %vm5393_vm15 = vcmp.eq.s32.totalorder %v21015_v12, %v18801_v24 }
 0x74b   : > { %13392 = vmatpush1.msk.msra.mxu1 %vm5505_vm1, %v20885_v36  ;;  %vm5378_vm1 = vcmp.eq.s32.totalorder %v21016_v13, %v18793_v31 }
 0x74c   : > { %13393 = vmatprep.subr.msk.mxu1 %vm5490_vm2, %v20885_v36  ;;  %vm5377_vm2 = vcmp.eq.s32.totalorder %v21016_v13, %v18801_v24 }
 0x74d   : > { %13394 = vmatpush1.msk.msra.mxu1 %vm5489_vm3, %v20885_v36  ;;  %vm5874_vm3 = vcmp.eq.s32.totalorder %v21017_v2, %v18793_v31 }
 0x74e   : > { %13395 = vmatprep.subr.msk.mxu1 %vm5474_vm4, %v20885_v36  ;;  %vm5873_vm4 = vcmp.eq.s32.totalorder %v21017_v2, %v18801_v24 }
 0x74f   : > { %13396 = vmatpush1.msk.msra.mxu1 %vm5473_vm5, %v20885_v36  ;;  %vm5858_vm5 = vcmp.eq.s32.totalorder %v21018_v23, %v18793_v31 }
 0x750   : > { %13397 = vmatprep.subr.msk.mxu1 %vm5458_vm6, %v20885_v36  ;;  %vm5857_vm6 = vcmp.eq.s32.totalorder %v21018_v23, %v18801_v24 }
 0x751   : > { %13398 = vmatpush1.msk.msra.mxu1 %vm5457_vm7, %v20885_v36  ;;  %vm5842_vm7 = vcmp.eq.s32.totalorder %v21019_v38, %v18793_v31 }
 0x752   : > { %13399 = vmatprep.subr.msk.mxu1 %vm5442_vm8, %v20885_v36  ;;  %vm5841_vm8 = vcmp.eq.s32.totalorder %v21019_v38, %v18801_v24 }
 0x753   : > { %13400 = vmatpush1.msk.msra.mxu1 %vm5441_vm9, %v20885_v36  ;;  %vm5826_vm9 = vcmp.eq.s32.totalorder %v21020_v18, %v18793_v31 }
 0x754   : > { %13401 = vmatprep.subr.msk.mxu1 %vm5426_vm10, %v20885_v36  ;;  %vm5825_vm10 = vcmp.eq.s32.totalorder %v21020_v18, %v18801_v24 }
 0x755   : > { %13402 = vmatpush1.msk.msra.mxu1 %vm5425_vm11, %v20885_v36  ;;  %vm5810_vm11 = vcmp.eq.s32.totalorder %v21021_v20, %v18793_v31 }
 0x756   : > { %13403 = vmatprep.subr.msk.mxu1 %vm5410_vm12, %v20885_v36  ;;  %vm5809_vm12 = vcmp.eq.s32.totalorder %v21021_v20, %v18801_v24 }
 0x757   : > { %13404 = vmatpush1.msk.msra.mxu1 %vm5409_vm13, %v20885_v36  ;;  %vm5794_vm13 = vcmp.eq.s32.totalorder %v21089_v39, %v18793_v31 }
 0x758   : > { %13405 = vmatprep.subr.msk.mxu1 %vm5394_vm14, %v20885_v36  ;;  %vm5793_vm14 = vcmp.eq.s32.totalorder %v21089_v39, %v18801_v24 }
 0x759   : > { %13406 = vmatpush1.msk.msra.mxu1 %vm5393_vm15, %v20885_v36  ;;  %vm5778_vm15 = vcmp.eq.s32.totalorder %v21091_v48, %v18793_v31 }
 0x75a   : > { %13407 = vmatprep.subr.msk.mxu1 %vm5378_vm1, %v20885_v36  ;;  %vm5777_vm1 = vcmp.eq.s32.totalorder %v21091_v48, %v18801_v24 }
 0x75b   : > { %13408 = vmatpush1.msk.msra.mxu1 %vm5377_vm2, %v20885_v36  ;;  %vm5762_vm2 = vcmp.eq.s32.totalorder %v21093_v53, %v18793_v31 }
 0x75c   : > { %13409 = vmatprep.subr.msk.mxu1 %vm5874_vm3, %v20885_v36  ;;  %vm5761_vm3 = vcmp.eq.s32.totalorder %v21093_v53, %v18801_v24 }
 0x75d   : > { %13410 = vmatpush2.msk.msra.mxu1 %vm5873_vm4, %v20885_v36  ;;  %vm5746_vm4 = vcmp.eq.s32.totalorder %v21095_v57, %v18793_v31 }
 0x75e   : > { %13411 = vmatprep.subr.msk.mxu1 %vm5858_vm5, %v20885_v36  ;;  %vm5745_vm5 = vcmp.eq.s32.totalorder %v21095_v57, %v18801_v24 }
 0x75f   : > { %13412 = vmatpush2.msk.msra.mxu1 %vm5857_vm6, %v20885_v36  ;;  %vm5730_vm6 = vcmp.eq.s32.totalorder %v21097_v61, %v18793_v31 }
 0x760   : > { %13413 = vmatprep.subr.msk.mxu1 %vm5842_vm7, %v20885_v36  ;;  %vm5729_vm7 = vcmp.eq.s32.totalorder %v21097_v61, %v18801_v24 }
 0x761   : > { %13414 = vmatpush2.msk.msra.mxu1 %vm5841_vm8, %v20885_v36  ;;  %vm5714_vm8 = vcmp.eq.s32.totalorder %v21099_v1, %v18793_v31 }
 0x762   : > { %13415 = vmatprep.subr.msk.mxu1 %vm5826_vm9, %v20885_v36  ;;  %vm5713_vm9 = vcmp.eq.s32.totalorder %v21099_v1, %v18801_v24 }
 0x763   : > { %13416 = vmatpush2.msk.msra.mxu1 %vm5825_vm10, %v20885_v36  ;;  %vm5698_vm10 = vcmp.eq.s32.totalorder %v21101_v7, %v18793_v31 }
 0x764   : > { %13417 = vmatprep.subr.msk.mxu1 %vm5810_vm11, %v20885_v36  ;;  %vm5697_vm11 = vcmp.eq.s32.totalorder %v21101_v7, %v18801_v24 }
 0x765   : > { %13418 = vmatpush2.msk.msra.mxu1 %vm5809_vm12, %v20885_v36  ;;  %vm5682_vm12 = vcmp.eq.s32.totalorder %v21103_v40, %v18793_v31 }
 0x766   : > { %13419 = vmatprep.subr.msk.mxu1 %vm5794_vm13, %v20885_v36  ;;  %vm5681_vm13 = vcmp.eq.s32.totalorder %v21103_v40, %v18801_v24 }
 0x767   : > { %13420 = vmatpush2.msk.msra.mxu1 %vm5793_vm14, %v20885_v36  ;;  %vm5666_vm14 = vcmp.eq.s32.totalorder %v21104_v33, %v18793_v31 }
 0x768   : > { %13421 = vmatprep.subr.msk.mxu1 %vm5778_vm15, %v20885_v36  ;;  %vm5665_vm15 = vcmp.eq.s32.totalorder %v21104_v33, %v18801_v24 }
 0x769   : > { %13422 = vmatpush2.msk.msra.mxu1 %vm5777_vm1, %v20885_v36  ;;  %vm5650_vm1 = vcmp.eq.s32.totalorder %v21106_v11, %v18793_v31 }
 0x76a   : > { %13423 = vmatprep.subr.msk.mxu1 %vm5762_vm2, %v20885_v36  ;;  %vm5649_vm2 = vcmp.eq.s32.totalorder %v21106_v11, %v18801_v24 }
 0x76b   : > { %13424 = vmatpush2.msk.msra.mxu1 %vm5761_vm3, %v20885_v36  ;;  %vm5634_vm3 = vcmp.eq.s32.totalorder %v21038_v42, %v18793_v31 }
 0x76c   : > { %13425 = vmatprep.subr.msk.mxu1 %vm5746_vm4, %v20885_v36  ;;  %vm5633_vm4 = vcmp.eq.s32.totalorder %v21038_v42, %v18801_v24 }
 0x76d   : > { %13426 = vmatpush2.msk.msra.mxu1 %vm5745_vm5, %v20885_v36  ;;  %vm5620_vm5 = vcmp.eq.s32.totalorder %v14451_v30, %v19195_v3 }
 0x76e   : > { %13427 = vmatprep.subr.msk.mxu1 %vm5730_vm6, %v20885_v36  ;;  %vm5619_vm6 = vcmp.eq.s32.totalorder %v14451_v30, %v19205_v14  ;;  %v21111_v30 = vmov 0.0  }
 0x76f   : > { %13428 = vmatpush2.msk.msra.mxu1 %vm5729_vm7, %v20885_v36  ;;  %vm5604_vm7 = vcmp.eq.s32.totalorder %v14469_v41, %v19195_v3 }
 0x770   : > { %13429 = vmatprep.subr.msk.mxu1 %vm5714_vm8, %v20885_v36  ;;  %vm5603_vm8 = vcmp.eq.s32.totalorder %v14469_v41, %v19205_v14  ;;  %v8574_v41 = vpop.f32.mrf.mxu0 }
 0x771   : > { %13430 = vmatpush2.msk.msra.mxu1 %vm5713_vm9, %v20885_v36  ;;  %vm5588_vm9 = vcmp.eq.s32.totalorder %v14485_v47, %v19195_v3 }
 0x772   : > { %13431 = vmatprep.subr.msk.mxu1 %vm5698_vm10, %v20885_v36  ;;  %vm5587_vm10 = vcmp.eq.s32.totalorder %v14485_v47, %v19205_v14  ;;  %v8503_v47 = vpop.f32.mrf.mxu1 }
 0x773   : > { %13432 = vmatpush2.msk.msra.mxu1 %vm5697_vm11, %v20885_v36  ;;  %vm5572_vm11 = vcmp.eq.s32.totalorder %v14503_v49, %v19195_v3 }
 0x774   : > { %13433 = vmatprep.subr.msk.mxu1 %vm5682_vm12, %v20885_v36  ;;  %vm5571_vm12 = vcmp.eq.s32.totalorder %v14503_v49, %v19205_v14  ;;  %v8576_v49 = vpop.f32.mrf.mxu0 }
 0x775   : > { %13434 = vmatpush2.msk.msra.mxu1 %vm5681_vm13, %v20885_v36  ;;  %vm5556_vm13 = vcmp.eq.s32.totalorder %v14521_v52, %v19195_v3 }
 0x776   : > { %13435 = vmatprep.subr.msk.mxu1 %vm5666_vm14, %v20885_v36  ;;  %vm5555_vm14 = vcmp.eq.s32.totalorder %v14521_v52, %v19205_v14  ;;  %v8505_v52 = vpop.f32.mrf.mxu1 }
 0x777   : > { %13436 = vmatpush2.msk.msra.mxu1 %vm5665_vm15, %v20885_v36  ;;  %vm5540_vm15 = vcmp.eq.s32.totalorder %v14539_v54, %v19195_v3 }
 0x778   : > { %13437 = vmatprep.subr.msk.mxu1 %vm5650_vm1, %v20885_v36  ;;  %vm5539_vm1 = vcmp.eq.s32.totalorder %v14539_v54, %v19205_v14  ;;  %v8716_v54 = vpop.f32.mrf.mxu0 }
 0x779   : > { %13438 = vmatpush2.msk.msra.mxu1 %vm5649_vm2, %v20885_v36  ;;  %vm5524_vm2 = vcmp.eq.s32.totalorder %v14557_v56, %v19195_v3 }
 0x77a   : > { %13439 = vmatprep.subr.msk.mxu1 %vm5634_vm3, %v20885_v36  ;;  %vm5523_vm3 = vcmp.eq.s32.totalorder %v14557_v56, %v19205_v14  ;;  %v8645_v56 = vpop.f32.mrf.mxu1 }
 0x77b   : > { %13440 = vmatpush2.msk.msra.mxu1 %vm5633_vm4, %v20885_v36  ;;  %vm5508_vm4 = vcmp.eq.s32.totalorder %v14575_v58, %v19195_v3 }
 0x77c   : > { %9354 = vmatmul.mubr.f32.vlgmr.msra.gmra.mxu1 %v18402_v8  ;;  %13505 = vmatprep.subr.msk.mxu1 %vm5620_vm5, %v20885_v36  ;;  %vm5507_vm5 = vcmp.eq.s32.totalorder %v14575_v58, %v19205_v14  ;;  %v8718_v58 = vpop.f32.mrf.mxu0 }
 0x77d   : > { %13506 = vmatpush1.msk.msra.mxu1 %vm5619_vm6, %v20885_v36  ;;  %9495 = vmatprep.mubr.f32.mxu1 %v18038_v19  ;;  %vm5492_vm6 = vcmp.eq.s32.totalorder %v14593_v60, %v19195_v3 }
 0x77e   : > { %13507 = vmatprep.subr.msk.mxu1 %vm5604_vm7, %v20885_v36  ;;  %vm5491_vm7 = vcmp.eq.s32.totalorder %v14593_v60, %v19205_v14  ;;  %v8647_v60 = vpop.f32.mrf.mxu1  ;;  %v8858_v31 = vpop.f32.mrf.mxu0 }
 0x77f   : > { %13508 = vmatpush1.msk.msra.mxu1 %vm5603_vm8, %v20885_v36  ;;  %vm5476_vm8 = vcmp.eq.s32.totalorder %v21010_v0, %v19195_v3 }
 0x780   : > { %13509 = vmatprep.subr.msk.mxu1 %vm5588_vm9, %v20885_v36  ;;  %vm5475_vm9 = vcmp.eq.s32.totalorder %v21010_v0, %v19205_v14  ;;  %v8860_v24 = vpop.f32.mrf.mxu0 }
 0x781   : > { %13510 = vmatpush1.msk.msra.mxu1 %vm5587_vm10, %v20885_v36  ;;  %vm5460_vm10 = vcmp.eq.s32.totalorder %v21011_v22, %v19195_v3 }
 0x782   : > { %13511 = vmatprep.subr.msk.mxu1 %vm5572_vm11, %v20885_v36  ;;  %vm5459_vm11 = vcmp.eq.s32.totalorder %v21011_v22, %v19205_v14  ;;  %v9000_v10 = vpop.f32.mrf.mxu0 }
 0x783   : > { %13512 = vmatpush1.msk.msra.mxu1 %vm5571_vm12, %v20885_v36  ;;  %vm5444_vm12 = vcmp.eq.s32.totalorder %v21012_v16, %v19195_v3 }
 0x784   : > { %13513 = vmatprep.subr.msk.mxu1 %vm5556_vm13, %v20885_v36  ;;  %vm5443_vm13 = vcmp.eq.s32.totalorder %v21012_v16, %v19205_v14  ;;  %v9002_v19 = vpop.f32.mrf.mxu0 }
 0x785   : > { %13514 = vmatpush1.msk.msra.mxu1 %vm5555_vm14, %v20885_v36  ;;  %vm5428_vm14 = vcmp.eq.s32.totalorder %v21013_v37, %v19195_v3 }
 0x786   : > { %13515 = vmatprep.subr.msk.mxu1 %vm5540_vm15, %v20885_v36  ;;  %vm5427_vm15 = vcmp.eq.s32.totalorder %v21013_v37, %v19205_v14  ;;  %v9142_v0 = vpop.f32.mrf.mxu0 }
 0x787   : > { %13516 = vmatpush1.msk.msra.mxu1 %vm5539_vm1, %v20885_v36  ;;  %vm5412_vm1 = vcmp.eq.s32.totalorder %v21014_v4, %v19195_v3 }
 0x788   : > { %13517 = vmatprep.subr.msk.mxu1 %vm5524_vm2, %v20885_v36  ;;  %vm5411_vm2 = vcmp.eq.s32.totalorder %v21014_v4, %v19205_v14  ;;  %v9144_v22 = vpop.f32.mrf.mxu0 }
 0x789   : > { %13518 = vmatpush1.msk.msra.mxu1 %vm5523_vm3, %v20885_v36  ;;  %vm5396_vm3 = vcmp.eq.s32.totalorder %v21015_v12, %v19195_v3 }
 0x78a   : > { %13519 = vmatprep.subr.msk.mxu1 %vm5508_vm4, %v20885_v36  ;;  %vm5395_vm4 = vcmp.eq.s32.totalorder %v21015_v12, %v19205_v14  ;;  %v9284_v37 = vpop.f32.mrf.mxu0  ;;  %v8719_v12 = vadd.f32 %v8718_v58, %v8647_v60 }
 0x78b   : > { %13520 = vmatpush1.msk.msra.mxu1 %vm5507_vm5, %v20885_v36  ;;  %vm5380_vm5 = vcmp.eq.s32.totalorder %v21016_v13, %v19195_v3 }
 0x78c   : > { %13521 = vmatprep.subr.msk.mxu1 %vm5492_vm6, %v20885_v36  ;;  %vm5379_vm6 = vcmp.eq.s32.totalorder %v21016_v13, %v19205_v14  ;;  %v8717_v13 = vadd.f32 %v8716_v54, %v8645_v56 }
 0x78d   : > { %13522 = vmatpush1.msk.msra.mxu1 %vm5491_vm7, %v20885_v36  ;;  %vm5876_vm7 = vcmp.eq.s32.totalorder %v21017_v2, %v19195_v3 }
 0x78e   : > { %13523 = vmatprep.subr.msk.mxu1 %vm5476_vm8, %v20885_v36  ;;  %vm5875_vm8 = vcmp.eq.s32.totalorder %v21017_v2, %v19205_v14  ;;  %v9286_v2 = vpop.f32.mrf.mxu0 }
 0x78f   : > { %13524 = vmatpush1.msk.msra.mxu1 %vm5475_vm9, %v20885_v36  ;;  %vm5860_vm9 = vcmp.eq.s32.totalorder %v21018_v23, %v19195_v3 }
 0x790   : > { %13525 = vmatprep.subr.msk.mxu1 %vm5460_vm10, %v20885_v36  ;;  %vm5859_vm10 = vcmp.eq.s32.totalorder %v21018_v23, %v19205_v14 }
 0x791   : > { %13526 = vmatpush1.msk.msra.mxu1 %vm5459_vm11, %v20885_v36  ;;  %vm5844_vm11 = vcmp.eq.s32.totalorder %v21019_v38, %v19195_v3 }
 0x792   : > { %13527 = vmatprep.subr.msk.mxu1 %vm5444_vm12, %v20885_v36  ;;  %vm5843_vm12 = vcmp.eq.s32.totalorder %v21019_v38, %v19205_v14  ;;  %v8577_v38 = vadd.f32 %v8576_v49, %v8505_v52  ;;  %v13633_v49 = vld [vmem:[%s20908_s18 + $0x30] sm:$0xff]  ;;  %v13634_v52 = vld [vmem:[%s20908_s18 + $0x38] sm:$0xff] }
 0x793   : > { %13528 = vmatpush1.msk.msra.mxu1 %vm5443_vm13, %v20885_v36  ;;  %vm5828_vm13 = vcmp.eq.s32.totalorder %v21020_v18, %v19195_v3 }
 0x794   : > { %13529 = vmatprep.subr.msk.mxu1 %vm5428_vm14, %v20885_v36  ;;  %vm5827_vm14 = vcmp.eq.s32.totalorder %v21020_v18, %v19205_v14  ;;  %v9574_v62 = vmax.f32 %v8577_v38, %v8719_v12 }
 0x795   : > { %13530 = vmatpush1.msk.msra.mxu1 %vm5427_vm15, %v20885_v36  ;;  %vm5812_vm15 = vcmp.eq.s32.totalorder %v21021_v20, %v19195_v3 }
 0x796   : > { %13531 = vmatprep.subr.msk.mxu1 %vm5412_vm1, %v20885_v36  ;;  %vm5811_vm1 = vcmp.eq.s32.totalorder %v21021_v20, %v19205_v14  ;;  %v8575_v20 = vadd.f32 %v8574_v41, %v8503_v47 }
 0x797   : > { %13532 = vmatpush1.msk.msra.mxu1 %vm5411_vm2, %v20885_v36  ;;  %vm5796_vm2 = vcmp.eq.s32.totalorder %v21089_v39, %v19195_v3 }
 0x798   : > { %13533 = vmatprep.subr.msk.mxu1 %vm5396_vm3, %v20885_v36  ;;  %vm5795_vm3 = vcmp.eq.s32.totalorder %v21089_v39, %v19205_v14  ;;  %v9573_v43 = vmax.f32 %v8575_v20, %v8717_v13 }
 0x799   : > { %13534 = vmatpush1.msk.msra.mxu1 %vm5395_vm4, %v20885_v36  ;;  %vm5780_vm4 = vcmp.eq.s32.totalorder %v21091_v48, %v19195_v3 }
 0x79a   : > { %13535 = vmatprep.subr.msk.mxu1 %vm5380_vm5, %v20885_v36  ;;  %vm5779_vm5 = vcmp.eq.s32.totalorder %v21091_v48, %v19205_v14 }
 0x79b   : > { %13536 = vmatpush1.msk.msra.mxu1 %vm5379_vm6, %v20885_v36  ;;  %vm5764_vm6 = vcmp.eq.s32.totalorder %v21093_v53, %v19195_v3 }
 0x79c   : > { %13537 = vmatprep.subr.msk.mxu1 %vm5876_vm7, %v20885_v36  ;;  %vm5763_vm7 = vcmp.eq.s32.totalorder %v21093_v53, %v19205_v14 }
 0x79d   : > { %13538 = vmatpush2.msk.msra.mxu1 %vm5875_vm8, %v20885_v36  ;;  %vm5748_vm8 = vcmp.eq.s32.totalorder %v21095_v57, %v19195_v3 }
 0x79e   : > { %13539 = vmatprep.subr.msk.mxu1 %vm5860_vm9, %v20885_v36  ;;  %vm5747_vm9 = vcmp.eq.s32.totalorder %v21095_v57, %v19205_v14 }
 0x79f   : > { %13540 = vmatpush2.msk.msra.mxu1 %vm5859_vm10, %v20885_v36  ;;  %vm5732_vm10 = vcmp.eq.s32.totalorder %v21097_v61, %v19195_v3 }
 0x7a0   : > { %13541 = vmatprep.subr.msk.mxu1 %vm5844_vm11, %v20885_v36  ;;  %vm5731_vm11 = vcmp.eq.s32.totalorder %v21097_v61, %v19205_v14 }
 0x7a1   : > { %13542 = vmatpush2.msk.msra.mxu1 %vm5843_vm12, %v20885_v36  ;;  %vm5716_vm12 = vcmp.eq.s32.totalorder %v21099_v1, %v19195_v3 }
 0x7a2   : > { %13543 = vmatprep.subr.msk.mxu1 %vm5828_vm13, %v20885_v36  ;;  %vm5715_vm13 = vcmp.eq.s32.totalorder %v21099_v1, %v19205_v14 }
 0x7a3   : > { %13544 = vmatpush2.msk.msra.mxu1 %vm5827_vm14, %v20885_v36  ;;  %vm5700_vm14 = vcmp.eq.s32.totalorder %v21101_v7, %v19195_v3 }
 0x7a4   : > { %13545 = vmatprep.subr.msk.mxu1 %vm5812_vm15, %v20885_v36  ;;  %vm5699_vm15 = vcmp.eq.s32.totalorder %v21101_v7, %v19205_v14 }
 0x7a5   : > { %13546 = vmatpush2.msk.msra.mxu1 %vm5811_vm1, %v20885_v36  ;;  %vm5684_vm1 = vcmp.eq.s32.totalorder %v21103_v40, %v19195_v3 }
 0x7a6   : > { %13547 = vmatprep.subr.msk.mxu1 %vm5796_vm2, %v20885_v36  ;;  %vm5683_vm2 = vcmp.eq.s32.totalorder %v21103_v40, %v19205_v14 }
 0x7a7   : > { %13548 = vmatpush2.msk.msra.mxu1 %vm5795_vm3, %v20885_v36  ;;  %vm5668_vm3 = vcmp.eq.s32.totalorder %v21104_v33, %v19195_v3 }
 0x7a8   : > { %13549 = vmatprep.subr.msk.mxu1 %vm5780_vm4, %v20885_v36  ;;  %vm5667_vm4 = vcmp.eq.s32.totalorder %v21104_v33, %v19205_v14 }
 0x7a9   : > { %13550 = vmatpush2.msk.msra.mxu1 %vm5779_vm5, %v20885_v36  ;;  %vm5652_vm5 = vcmp.eq.s32.totalorder %v21106_v11, %v19195_v3 }
 0x7aa   : > { %13551 = vmatprep.subr.msk.mxu1 %vm5764_vm6, %v20885_v36  ;;  %vm5651_vm6 = vcmp.eq.s32.totalorder %v21106_v11, %v19205_v14 }
 0x7ab   : > { %13552 = vmatpush2.msk.msra.mxu1 %vm5763_vm7, %v20885_v36  ;;  %vm5636_vm7 = vcmp.eq.s32.totalorder %v21038_v42, %v19195_v3 }
 0x7ac   : > { %13553 = vmatprep.subr.msk.mxu1 %vm5748_vm8, %v20885_v36  ;;  %vm5635_vm8 = vcmp.eq.s32.totalorder %v21038_v42, %v19205_v14  ;;  %v8787_v42 = vpop.f32.mrf.mxu1  ;;  %v9426_v14 = vpop.f32.mrf.mxu0 }
 0x7ad   : > { %13554 = vmatpush2.msk.msra.mxu1 %vm5747_vm9, %v20885_v36  ;;  %v8859_v29 = vadd.f32 %v8858_v31, %v8787_v42 }
 0x7ae   : > { %13555 = vmatprep.subr.msk.mxu1 %vm5732_vm10, %v20885_v36  ;;  %v8789_v44 = vpop.f32.mrf.mxu1  ;;  %v9428_v45 = vpop.f32.mrf.mxu0 }
 0x7af   : > { %13556 = vmatpush2.msk.msra.mxu1 %vm5731_vm11, %v20885_v36  ;;  %v8861_v18 = vadd.f32 %v8860_v24, %v8789_v44  ;;  %v9575_v39 = vmax.f32 %v9573_v43, %v8859_v29 }
 0x7b0   : > { %13557 = vmatprep.subr.msk.mxu1 %vm5716_vm12, %v20885_v36  ;;  %v8929_v32 = vpop.f32.mrf.mxu1  ;;  %v9568_v59 = vpop.f32.mrf.mxu0 }
 0x7b1   : > { %13558 = vmatpush2.msk.msra.mxu1 %vm5715_vm13, %v20885_v36  ;;  %v9001_v26 = vadd.f32 %v9000_v10, %v8929_v32  ;;  %v9576_v27 = vmax.f32 %v9574_v62, %v8861_v18 }
 0x7b2   : > { %13559 = vmatprep.subr.msk.mxu1 %vm5700_vm14, %v20885_v36  ;;  %v9570_v33 = vpop.f32.mrf.mxu0 }
 0x7b3   : > { %13560 = vmatpush2.msk.msra.mxu1 %vm5699_vm15, %v20885_v36  ;;  %v9577_v57 = vmax.f32 %v9575_v39, %v9001_v26 }
 0x7b4   : > { %13561 = vmatprep.subr.msk.mxu1 %vm5684_vm1, %v20885_v36 }
 0x7b5   : > { %13562 = vmatpush2.msk.msra.mxu1 %vm5683_vm2, %v20885_v36 }
 0x7b6   : > { %13563 = vmatprep.subr.msk.mxu1 %vm5668_vm3, %v20885_v36 }
 0x7b7   : > { %13564 = vmatpush2.msk.msra.mxu1 %vm5667_vm4, %v20885_v36 }
 0x7b8   : > { %13565 = vmatprep.subr.msk.mxu1 %vm5652_vm5, %v20885_v36 }
 0x7b9   : > { %13566 = vmatpush2.msk.msra.mxu1 %vm5651_vm6, %v20885_v36 }
 0x7ba   : > { %13567 = vmatprep.subr.msk.mxu1 %vm5636_vm7, %v20885_v36 }
 0x7bb   : > { %13568 = vmatpush2.msk.msra.mxu1 %vm5635_vm8, %v20885_v36  ;;  %v8931_v36 = vpop.f32.mrf.mxu1 }
 0x7bc   : > { %9496 = vmatmul.mubr.f32.vlgmr.msra.gmra.mxu1 %v18402_v8  ;;  %v9003_v25 = vadd.f32 %v9002_v19, %v8931_v36 }
 0x7bd   : > { %9660 = vmatprep.mubr.f32.mxu1 %v21111_v30  ;;  %v9071_v8 = vpop.f32.mrf.mxu1 }
 0x7be   : > { %v9143_v48 = vadd.f32 %v9142_v0, %v9071_v8  ;;  %v9578_v53 = vmax.f32 %v9576_v27, %v9003_v25 }
 0x7bf   : > { %v9073_v16 = vpop.f32.mrf.mxu1 }
 0x7c0   : > { %v9145_v21 = vadd.f32 %v9144_v22, %v9073_v16  ;;  %v9579_v5 = vmax.f32 %v9577_v57, %v9143_v48 }
 0x7c2   : > { %v9580_v63 = vmax.f32 %v9578_v53, %v9145_v21 }
 0x7fc   : > { %v9213_v4 = vpop.f32.mrf.mxu1 }
 0x7fd   : > { %v9285_v61 = vadd.f32 %v9284_v37, %v9213_v4 }
 0x7fe   : > { %v9215_v23 = vpop.f32.mrf.mxu1 }
 0x7ff   : > { %v9287_v55 = vadd.f32 %v9286_v2, %v9215_v23  ;;  %v9581_v15 = vmax.f32 %v9579_v5, %v9285_v61 }
 0x801   : > { %v9582_v40 = vmax.f32 %v9580_v63, %v9287_v55 }
 0x83c   : > { %v9355_v3 = vpop.f32.mrf.mxu1 }
 0x83d   : > { %v9427_v7 = vadd.f32 %v9426_v14, %v9355_v3 }
 0x83e   : > { %v9357_v51 = vpop.f32.mrf.mxu1 }
 0x83f   : > { %v9429_v1 = vadd.f32 %v9428_v45, %v9357_v51  ;;  %v9583_v50 = vmax.f32 %v9581_v15, %v9427_v7 }
 0x841   : > { %v9584_v28 = vmax.f32 %v9582_v40, %v9429_v1 }
 0x87c   : > { %v9497_v17 = vpop.f32.mrf.mxu1 }
 0x87d   : > { %v9569_v11 = vadd.f32 %v9568_v59, %v9497_v17 }
 0x87e   : > { %v9499_v35 = vpop.f32.mrf.mxu1 }
 0x87f   : > { %v9571_v46 = vadd.f32 %v9570_v33, %v9499_v35  ;;  %v9585_v47 = vmax.f32 %v9583_v50, %v9569_v11 }
 0x881   : > { %v9586_v41 = vmax.f32 %v9584_v28, %v9571_v46 }
 0x883   : > { %9626 = vmatprep.subr.mxu1 %v9586_v41 }
 0x884   : > { %9627 = vmatpush1.msra.mxu1 %v9585_v47 }
 0x885   : > { %13635 = vmatmul.mubr.msk.f32.vlgmr.msra.gmra.mxu1 %vm800_vm0, %v13633_v49 }
 0x886   : > { %9666 = vmatprep.mubr.f32.mxu1 %v21111_v30 }
 0x889   : > { %13636 = vmatmul.mubr.msk.f32.gmra.mxu1 %vm800_vm0, %v13634_v52 }
 0x88a   : > { %13907 = shalt.err (!%p13904_p0)
}
 0x88b   : > { %s13908_s21 = scalar_lea.hbm %s20408_s24, 1024  ;;  %s13912_s4 = scalar_lea.hbm %s21113_s16, 4096 }
 0x88c   : > { %p13909_p1 = scmp.ne.s32.totalorder %s20408_s24, %s13908_s21  ;;  %p13913_p10 = scmp.lt.s32.totalorder %s20408_s24, %s21113_s16 }
 0x88d   : > { %p13914_p9 = scmp.lt.s32.totalorder %s13912_s4, %s13908_s21 }
 0x88e   : > { %p13910_p6 = pnand %p13909_p1, %p21114_p8 }
 0x88f   : > { %p13915_p13 = por %p13914_p9, %p13913_p10 }
 0x890   : > { %p13911_p7 = pneg %p13910_p6 }
 0x892   : > { %p13916_p3 = pnand %p13915_p13, %p13911_p7 }
 0x894   : > { %13919 = shalt.err (!%p13916_p3)
}
 0x895   : > { %s14041_s17 = smov 256   ;;  %s14042_s6 = smov 512   ;;  %v21115_v54 = vld [vmem:[#allocation51_spill] sm:$0xff]  ;;  %v9682_v58 = vpop.permute.xlu0 %9681  ;;  %v9687_v19 = vpop.permute.xlu1 %9686 }
 0x896   : > { %s14043_s8 = smov 16   ;;  %s13643_s12 = sshll.u32 %s14016_s25, 3 }
 0x897   : > { %13662 = dma.vmem_to_hbm [thread:$0]  (%p21114_p8), %s20410_s28, 1024, %s20408_s24, %s9702_s9, %s14041_s17, %s14042_s6, %s14043_s8  }
 0x898   : > { %s9737_s21 = sadd.s32 %s13643_s12, %s14329_s0  ;;  %s767_s24 = scalar_lea.vmem [#allocation13], %s10007_s19 }
 0x899   : > { %s13644_s28 = sshll.u32 %s9737_s21, 7  ;;  %s9740_s25 = sshll.u32 %s767_s24, 4  ;;  %s20451_s25 = int_to_ptr.vmem [resolvable:$true] %s9740_s25 }
 0x89a   : > { %s21116_s10 = sld [smem:[#allocation102_spill]]  ;;  %s9707_s19 = scalar_lea.sflag [#allocation14], %s14297_s11 }
 0x89b   : > { %s13920_s4 = scalar_lea.vmem %s20451_s25, 512  ;;  %s14044_s13 = smov [#allocation13]  }
 0x89c   : > { %p13921_p2 = scmp.ne.s32.totalorder %s20451_s25, %s13920_s4  ;;  %s13924_s1 = sshll.u32 %s14044_s13, 4  ;;  %s13925_s1 = int_to_ptr.vmem [resolvable:$false] %s13924_s1 }
 0x89d   : > { %s13926_s12 = scalar_lea.vmem %s13925_s1, 1024  ;;  %p13927_p11 = scmp.lt.s32.totalorder %s20451_s25, %s13925_s1 }
 0x89e   : > { %p13922_p4 = pnand %p13921_p2, %p21114_p8  ;;  %p13928_p12 = scmp.lt.s32.totalorder %s13926_s12, %s13920_s4 }
 0x8a0   : > { %s20449_s29 = scalar_lea.hbm %s21116_s10, %s13644_s28  ;;  %p13923_p5 = pneg %p13922_p4 }
 0x8a1   : > { %p13929_p0 = por %p13928_p12, %p13927_p11 }
 0x8a3   : > { %p13930_p1 = pnand %p13929_p0, %p13923_p5 }
 0x945   : > { %v9662_v30 = vpop.f32.mrf.mxu1 }
 0x946   : > { %v9673_v56 = vadd.f32 %v9662_v30, %v21115_v54 }
 0x947   : > { %v9664_v60 = vpop.f32.mrf.mxu1 }
 0x948   : > { %v9689_v31 = vadd.f32 %v9682_v58, %v9673_v56  ;;  %v9674_v42 = vadd.f32 %v9664_v60, %v19197_v6 }
 0x949   : > { %v9668_v24 = vpop.f32.mrf.mxu1 }
 0x94a   : > { %v9693_v44 = vmax.f32 %v9689_v31, 0.0  ;;  %v9690_v10 = vadd.f32 %v9682_v58, %v9674_v42  ;;  %v9675_v32 = vadd.f32 %v9668_v24, %v19228_v34 }
 0x94b   : > { %v9670_v36 = vpop.f32.mrf.mxu1 }
 0x94c   : > { %9697 = vst [vmem:[%s767_s24] sm:$0xff] %v9693_v44  ;;  %v9694_v0 = vmax.f32 %v9690_v10, 0.0  ;;  %v9691_v8 = vadd.f32 %v9687_v19, %v9675_v32  ;;  %v9676_v22 = vadd.f32 %v9670_v36, %v19240_v9 }
 0x94e   : > { %9698 = vst [vmem:[%s767_s24 + $0x8] sm:$0xff] %v9694_v0  ;;  %v9695_v6 = vmax.f32 %v9691_v8, 0.0  ;;  %v9692_v16 = vadd.f32 %v9687_v19, %v9676_v22 }
 0x950   : > { %9699 = vst [vmem:[%s767_s24 + $0x10] sm:$0xff] %v9695_v6  ;;  %v9696_v34 = vmax.f32 %v9692_v16, 0.0 }
 0x952   : > { %9700 = vst [vmem:[%s767_s24 + $0x18] sm:$0xff] %v9696_v34 }
 0x953   : > { %13933 = shalt.err (!%p13930_p1)
}
 0x954   : > { %s13934_s21 = scalar_lea.hbm %s20449_s29, 512  ;;  %s13938_s24 = scalar_lea.hbm %s21116_s10, 2048 }
 0x955   : > { %p13935_p6 = scmp.ne.s32.totalorder %s20449_s29, %s13934_s21  ;;  %p13939_p9 = scmp.lt.s32.totalorder %s20449_s29, %s21116_s10 }
 0x956   : > { %p13940_p13 = scmp.lt.s32.totalorder %s13938_s24, %s13934_s21 }
 0x957   : > { %p13936_p7 = pnand %p13935_p6, %p21114_p8 }
 0x958   : > { %p13941_p3 = por %p13940_p13, %p13939_p9 }
 0x959   : > { %p13937_p10 = pneg %p13936_p7 }
 0x95b   : > { %p13942_p2 = pnand %p13941_p3, %p13937_p10 }
 0x95d   : > { %13945 = shalt.err (!%p13942_p2)
}
 0x95e   : > { %13663 = dma.vmem_to_hbm [thread:$0]  (%p21114_p8), %s20451_s25, 512, %s20449_s29, %s9707_s19, %s14041_s17, %s14042_s6, %s14043_s8  }
 0x95f PF: > { %s21117_s4 = sld [smem:[#allocation22_spill]] }
 0x960   : > { %s21118_s13 = sld [smem:[#allocation20_spill]] }
 0x961   : > { %s21119_s1 = sld [smem:[#allocation26_spill]] }
 0x965   : > { %p13684_p4 = scmp.ge.s32.totalorder %s21117_s4, 2 }
 0x966   : > { %s9755_s12 = sand.u32 1, %s21118_s13  }
 0x967   : > { %p21120_p5 = scmp.ne.s32.totalorder %s21119_s1, 0  ;;  %s9756_s21 = scalar_lea.sflag [#allocation5], %s9755_s12 }
 0x969   : > { %p13674_p11 = pnand %p13684_p4, %p21120_p5 }
 0x96b   : > { %p13675_p12 = pneg %p13674_p11 }
 0x96d   : > { %13991 = dma.done.wait (%p13675_p12), %s9756_s21, 1024  }
 0x96e   : > { %13993 = vsyncadd (%p13675_p12), %s9756_s21, 4294966272  ;;  %s9765_s11 = scalar_lea.sflag [#allocation14], %s9755_s12 }
 0x96f   : > { %13995 = dma.done.wait (%p13675_p12), %s9765_s11, 512  }
 0x970   : > { %13997 = vsyncadd (%p13675_p12), %s9765_s11, 4294966784  ;;  %s40_s28 = sadd.s32 1, %s21117_s4   ;;  %s21121_s23 = sld [smem:[#allocation21_spill]] }
 0x971   : > { %p37_p0 = scmp.ge.s32.totalorder %s40_s28, 6   ;;  %s21122_s17 = sld [smem:[#allocation27_spill]] }
 0x972   : > { %s21123_s6 = sld [smem:[#allocation23_spill]]  ;;  %s21125_s21 = smov %s14004_s22 }
 0x973   : > { %s21124_s8 = sld [smem:[#allocation24_spill]]  ;;  %s21128_s24 = smov %s14020_s26 }
 0x974   : > { %s21129_s25 = smov %s14024_s27 }
 0x975   :  { %39 = sbr.rel (!%p37_p0) target bundleno = 26 (0x1a), region = 218 }
 0x976   : > { %s21126_s22 = smov %s21121_s23 }
 0x977   : > { %s21127_s23 = smov %s21122_s17 }
 0x978   : > { %s21130_s26 = smov %s21123_s6 }
 0x979   : > { %s21131_s27 = smov %s21124_s8 }
 0x97a   :  { %9770 = vsyncpa [#allocation4], 1 }
 0x97b   :  { %9772 = vsyncpa [#allocation4 + $0x1], 1 }
 0x97c   :  { %9773 = vsyncpa [#allocation7], 1 }
 0x97d   :  { %9775 = vsyncpa [#allocation7 + $0x1], 1 }
 0x97e   :  { %9776 = vsyncpa [#allocation10], 1 }
 0x97f   :  { %9777 = vsyncpa [#allocation5], 1 }
 0x980   :  { %9779 = vsyncpa [#allocation5 + $0x1], 1 }
 0x981   :  { %9780 = vsyncpa [#allocation14], 1 }
 0x982   :  { %9782 = vsyncpa [#allocation14 + $0x1], 1 }

</bundles_post_ra>
